<compile_context>
chip_gen: v6e
topology: v6e:2x2x1
jax: 0.10.0
libtpu: 0.0.40
codegen_flags: <defaults>
</compile_context>

<pallas_src>
import math
import functools

import jax
import jax.numpy as jnp
from jax.experimental import pallas as pl
from jax.experimental.pallas import tpu as pltpu


def _parallel():
    return pltpu.CompilerParams(dimension_semantics=("parallel",))


# ------------------------------ Pallas kernels ------------------------------

def _bn_relu(acc, s, b):
    return jnp.maximum(acc * s + b, 0.0)


def _argmax_onehot(fc):
    """First-argmax one-hot over axis 1 of a (1, n) f32 value (no lax.argmax)."""
    n = fc.shape[1]
    idx = jax.lax.broadcasted_iota(jnp.int32, fc.shape, 1)
    mx = jnp.max(fc, axis=1, keepdims=True)
    first = jnp.min(jnp.where(fc >= mx, idx, n), axis=1, keepdims=True)
    return (idx == first).astype(jnp.float32)


def _gemm_act_kernel(cols_ref, w_ref, s_ref, b_ref, act_ref):
    """conv GEMM -> ReLU(BN(out))."""
    acc = jnp.dot(cols_ref[...], w_ref[...], preferred_element_type=jnp.float32)
    act_ref[...] = _bn_relu(acc, s_ref[...], b_ref[...]).astype(act_ref.dtype)


def _gemm_raw_act_kernel(cols_ref, w_ref, s_ref, b_ref, raw_ref, act_ref):
    """conv GEMM -> (raw pre-BN out, ReLU(BN(out)))."""
    acc = jnp.dot(cols_ref[...], w_ref[...], preferred_element_type=jnp.float32)
    raw_ref[...] = acc.astype(raw_ref.dtype)
    act_ref[...] = _bn_relu(acc, s_ref[...], b_ref[...]).astype(act_ref.dtype)


def _gemm_act_scale_kernel(cols_ref, scale_ref, w_ref, s_ref, b_ref, act_ref):
    """per-image channel-masked conv GEMM -> ReLU(BN(out)) (equal-in/out ASE block)."""
    acc = jnp.dot(cols_ref[...] * scale_ref[0], w_ref[...],
                  preferred_element_type=jnp.float32)
    act_ref[...] = _bn_relu(acc, s_ref[...], b_ref[...]).astype(act_ref.dtype)


def _gemm_dual_kernel(cols_ref, w_ref, ws_ref, s_ref, b_ref, act_ref, skip_ref):
    """conv GEMM + fused 1x1 shortcut (center-tap weight), one cols load."""
    cols = cols_ref[...]
    acc = jnp.dot(cols, w_ref[...], preferred_element_type=jnp.float32)
    sk = jnp.dot(cols, ws_ref[...], preferred_element_type=jnp.float32)
    act_ref[...] = _bn_relu(acc, s_ref[...], b_ref[...]).astype(act_ref.dtype)
    skip_ref[...] = sk.astype(skip_ref.dtype)


def _gemm_dual_scale_kernel(cols_ref, scale_ref, w_ref, ws_ref, s_ref, b_ref,
                            act_ref, skip_ref):
    """non-equal ASE block: masked conv GEMM + (unmasked) fused 1x1 shortcut."""
    cols = cols_ref[...]
    acc = jnp.dot(cols * scale_ref[0], w_ref[...], preferred_element_type=jnp.float32)
    sk = jnp.dot(cols, ws_ref[...], preferred_element_type=jnp.float32)
    act_ref[...] = _bn_relu(acc, s_ref[...], b_ref[...]).astype(act_ref.dtype)
    skip_ref[...] = sk.astype(skip_ref.dtype)


def _gemm_add_act_kernel(cols_ref, w_ref, skip_ref, s_ref, b_ref, act_ref):
    """conv GEMM + residual skip -> ReLU(BN_next(sum)); raw not needed downstream."""
    acc = jnp.dot(cols_ref[...], w_ref[...], preferred_element_type=jnp.float32)
    acc = acc + skip_ref[...].astype(jnp.float32)
    act_ref[...] = _bn_relu(acc, s_ref[...], b_ref[...]).astype(act_ref.dtype)


def _gemm_add_raw_act_kernel(cols_ref, w_ref, skip_ref, s_ref, b_ref,
                             raw_ref, act_ref):
    """conv GEMM + residual skip -> (raw sum, ReLU(BN_next(sum)))."""
    acc = jnp.dot(cols_ref[...], w_ref[...], preferred_element_type=jnp.float32)
    acc = acc + skip_ref[...].astype(jnp.float32)
    raw_ref[...] = acc.astype(raw_ref.dtype)
    act_ref[...] = _bn_relu(acc, s_ref[...], b_ref[...]).astype(act_ref.dtype)


def _gemm_add_ase_kernel(cols_ref, w_ref, skip_ref, s_ref, b_ref,
                         fcwT_ref, fcw_ref, fcb_ref,
                         raw_ref, act_ref, fc_ref, mask_ref):
    """conv2 + skip + next(ASE) BN1/ReLU, fused with the ASE head
    (spatial-mean -> fc -> argmax -> fc.weight[pred] mask) for one image."""
    acc = jnp.dot(cols_ref[...], w_ref[...], preferred_element_type=jnp.float32)
    acc = acc + skip_ref[...].astype(jnp.float32)
    raw_ref[...] = acc.astype(raw_ref.dtype)
    act = _bn_relu(acc, s_ref[...], b_ref[...])
    act_ref[...] = act.astype(act_ref.dtype)
    m = jnp.mean(act, axis=0, keepdims=True)                     # (1, C)
    fc = jnp.dot(m, fcwT_ref[...], preferred_element_type=jnp.float32) + fcb_ref[...]
    onehot = _argmax_onehot(fc)                                  # eval: predicted label
    mask = jnp.dot(onehot, fcw_ref[...], preferred_element_type=jnp.float32)
    fc_ref[0] = fc
    mask_ref[0] = mask


def _gemm_add_final_kernel(cols_ref, w_ref, skip_ref, s_ref, b_ref,
                           ewT_ref, ew_ref, eb_ref, fwT_ref, fb_ref,
                           logit_ref, fc_ref):
    """last block's conv2 + skip + final BN/ReLU, fused with the network head:
    mean -> extra_fc -> argmax mask -> (mask*mean == avg_pool(out*mask,8)) -> fc."""
    acc = jnp.dot(cols_ref[...], w_ref[...], preferred_element_type=jnp.float32)
    acc = acc + skip_ref[...].astype(jnp.float32)
    act = _bn_relu(acc, s_ref[...], b_ref[...])
    m = jnp.mean(act, axis=0, keepdims=True)                     # (1, C)
    fc = jnp.dot(m, ewT_ref[...], preferred_element_type=jnp.float32) + eb_ref[...]
    onehot = _argmax_onehot(fc)
    mask = jnp.dot(onehot, ew_ref[...], preferred_element_type=jnp.float32)
    pooled = m * mask     # mask is constant over space and final spatial is 8x8
    logit_ref[0] = jnp.dot(pooled, fwT_ref[...],
                           preferred_element_type=jnp.float32) + fb_ref[...]
    fc_ref[0] = fc


# ---------------------------- pallas_call wrappers ----------------------------

def _row(mi, c):
    return pl.BlockSpec((mi, c), lambda i: (i, 0))


def _bcast(arr):  # 2-D broadcast (weights / folded BN vectors / linear params)
    return pl.BlockSpec(arr.shape, lambda i: (0, 0))


def _scale_spec(K):
    return pl.BlockSpec((1, 1, K), lambda i: (i, 0, 0))


def _head_spec(n):
    return pl.BlockSpec((1, 1, n), lambda i: (i, 0, 0))


def _conv_act(cols, w, sb, n_img, mi):
    s, b = sb
    K, C = w.shape
    return pl.pallas_call(
        _gemm_act_kernel, grid=(n_img,),
        in_specs=[_row(mi, K), _bcast(w), _bcast(s), _bcast(b)],
        out_specs=_row(mi, C),
        out_shape=jax.ShapeDtypeStruct((n_img * mi, C), jnp.bfloat16),
        compiler_params=_parallel(),
    )(cols, w, s, b)


def _conv_raw_act(cols, w, sb, n_img, mi):
    s, b = sb
    K, C = w.shape
    out_sd = jax.ShapeDtypeStruct((n_img * mi, C), jnp.bfloat16)
    return pl.pallas_call(
        _gemm_raw_act_kernel, grid=(n_img,),
        in_specs=[_row(mi, K), _bcast(w), _bcast(s), _bcast(b)],
        out_specs=[_row(mi, C), _row(mi, C)],
        out_shape=[out_sd, out_sd],
        compiler_params=_parallel(),
    )(cols, w, s, b)


def _conv_act_scale(cols, scale, w, sb, n_img, mi):
    s, b = sb
    K, C = w.shape
    return pl.pallas_call(
        _gemm_act_scale_kernel, grid=(n_img,),
        in_specs=[_row(mi, K), _scale_spec(K), _bcast(w), _bcast(s), _bcast(b)],
        out_specs=_row(mi, C),
        out_shape=jax.ShapeDtypeStruct((n_img * mi, C), jnp.bfloat16),
        compiler_params=_parallel(),
    )(cols, scale, w, s, b)


def _conv_dual(cols, w, ws, sb, n_img, mi):
    s, b = sb
    K, C = w.shape
    out_sd = jax.ShapeDtypeStruct((n_img * mi, C), jnp.bfloat16)
    return pl.pallas_call(
        _gemm_dual_kernel, grid=(n_img,),
        in_specs=[_row(mi, K), _bcast(w), _bcast(ws), _bcast(s), _bcast(b)],
        out_specs=[_row(mi, C), _row(mi, C)],
        out_shape=[out_sd, out_sd],
        compiler_params=_parallel(),
    )(cols, w, ws, s, b)


def _conv_dual_scale(cols, scale, w, ws, sb, n_img, mi):
    s, b = sb
    K, C = w.shape
    out_sd = jax.ShapeDtypeStruct((n_img * mi, C), jnp.bfloat16)
    return pl.pallas_call(
        _gemm_dual_scale_kernel, grid=(n_img,),
        in_specs=[_row(mi, K), _scale_spec(K), _bcast(w), _bcast(ws),
                  _bcast(s), _bcast(b)],
        out_specs=[_row(mi, C), _row(mi, C)],
        out_shape=[out_sd, out_sd],
        compiler_params=_parallel(),
    )(cols, scale, w, ws, s, b)


def _conv_add_act(cols, w, skip, sb, n_img, mi):
    s, b = sb
    K, C = w.shape
    return pl.pallas_call(
        _gemm_add_act_kernel, grid=(n_img,),
        in_specs=[_row(mi, K), _bcast(w), _row(mi, C), _bcast(s), _bcast(b)],
        out_specs=_row(mi, C),
        out_shape=jax.ShapeDtypeStruct((n_img * mi, C), jnp.bfloat16),
        compiler_params=_parallel(),
    )(cols, w, skip, s, b)


def _conv_add_raw_act(cols, w, skip, sb, n_img, mi):
    s, b = sb
    K, C = w.shape
    out_sd = jax.ShapeDtypeStruct((n_img * mi, C), jnp.bfloat16)
    return pl.pallas_call(
        _gemm_add_raw_act_kernel, grid=(n_img,),
        in_specs=[_row(mi, K), _bcast(w), _row(mi, C), _bcast(s), _bcast(b)],
        out_specs=[_row(mi, C), _row(mi, C)],
        out_shape=[out_sd, out_sd],
        compiler_params=_parallel(),
    )(cols, w, skip, s, b)


def _conv_add_ase(cols, w, skip, sb, fc_wT, fc_w, fc_b, n_img, mi):
    s, b = sb
    K, C = w.shape
    ncls = fc_w.shape[0]
    out_sd = jax.ShapeDtypeStruct((n_img * mi, C), jnp.bfloat16)
    raw, act, fc, mask = pl.pallas_call(
        _gemm_add_ase_kernel, grid=(n_img,),
        in_specs=[_row(mi, K), _bcast(w), _row(mi, C), _bcast(s), _bcast(b),
                  _bcast(fc_wT), _bcast(fc_w), _bcast(fc_b)],
        out_specs=[_row(mi, C), _row(mi, C), _head_spec(ncls), _head_spec(C)],
        out_shape=[out_sd, out_sd,
                   jax.ShapeDtypeStruct((n_img, 1, ncls), jnp.float32),
                   jax.ShapeDtypeStruct((n_img, 1, C), jnp.float32)],
        compiler_params=_parallel(),
    )(cols, w, skip, s, b, fc_wT, fc_w, fc_b)
    return raw, act, fc, mask


def _conv_add_final(cols, w, skip, sb, ewT, ew, eb, fwT, fb, n_img, mi):
    s, b = sb
    K, C = w.shape
    ncls_e = ew.shape[0]
    ncls = fwT.shape[1]
    logits, fc = pl.pallas_call(
        _gemm_add_final_kernel, grid=(n_img,),
        in_specs=[_row(mi, K), _bcast(w), _row(mi, C), _bcast(s), _bcast(b),
                  _bcast(ewT), _bcast(ew), _bcast(eb), _bcast(fwT), _bcast(fb)],
        out_specs=[_head_spec(ncls), _head_spec(ncls_e)],
        out_shape=[jax.ShapeDtypeStruct((n_img, 1, ncls), jnp.float32),
                   jax.ShapeDtypeStruct((n_img, 1, ncls_e), jnp.float32)],
        compiler_params=_parallel(),
    )(cols, w, skip, s, b, ewT, ew, eb, fwT, fb)
    return logits.reshape(n_img, ncls), fc.reshape(n_img, ncls_e)


# ------------------------------- XLA-side glue -------------------------------

def _im2col(x_nhwc, stride):
    """3x3 / pad-1 im2col (bf16, XLA glue): (N,H,W,C) -> (N*Ho*Wo, 9*C)."""
    N, H, W, C = x_nhwc.shape
    Ho = (H - 1) // stride + 1
    Wo = (W - 1) // stride + 1
    xp = jnp.pad(x_nhwc, ((0, 0), (1, 1), (1, 1), (0, 0)))
    taps = []
    for kh in range(3):
        for kw in range(3):
            taps.append(xp[:, kh:kh + stride * (Ho - 1) + 1:stride,
                              kw:kw + stride * (Wo - 1) + 1:stride, :])
    cols = jnp.concatenate(taps, axis=-1)                # (N, Ho, Wo, 9*C)
    return cols.reshape(N * Ho * Wo, 9 * C), Ho, Wo


# ------------------------------ parameter init ------------------------------

def _fold_bn(c, eps=1e-5):
    """Eval-mode BN folded to (scale, shift); PyTorch init: gamma=1, beta=0, mean=0, var=1."""
    gamma = jnp.ones((c,), jnp.float32)
    beta = jnp.zeros((c,), jnp.float32)
    mean = jnp.zeros((c,), jnp.float32)
    var = jnp.ones((c,), jnp.float32)
    scale = gamma / jnp.sqrt(var + eps)
    shift = beta - mean * scale
    return scale.reshape(1, c), shift.reshape(1, c)


def _conv_gemm(key, cout, cin, k=3):
    """PyTorch conv init (normal, std=sqrt(2/(k*k*cout))) pre-reshaped to GEMM (k*k*cin, cout)."""
    fan = k * k * cout
    w = jax.random.normal(key, (cout, cin, k, k), jnp.float32) * math.sqrt(2.0 / fan)
    return jnp.transpose(w, (2, 3, 1, 0)).reshape(k * k * cin, cout)


def _linear_init(key, out_f, in_f):
    lim = 1.0 / math.sqrt(in_f)
    w = jax.random.uniform(key, (out_f, in_f), jnp.float32, -lim, lim)
    b = jnp.zeros((1, out_f), jnp.float32)   # module zeroes Linear biases
    return w, b


def init_wideresnet(key, depth=10, num_classes=10, widen_factor=1):
    assert (depth - 4) % 6 == 0
    n = (depth - 4) // 6
    nch = [16, 16 * widen_factor, 32 * widen_factor, 64 * widen_factor]
    keys = iter(jax.random.split(key, 8 * depth + 16))

    params = {"conv1_w": _conv_gemm(next(keys), nch[0], 3).astype(jnp.bfloat16)}

    def make_block(cin, cout, stride, ase):
        p = dict(cin=cin, cout=cout, stride=stride, equal=(cin == cout), ase=ase,
                 bn1=_fold_bn(cin), bn2=_fold_bn(cout),
                 w1=_conv_gemm(next(keys), cout, cin).astype(jnp.bfloat16),
                 w2=_conv_gemm(next(keys), cout, cout).astype(jnp.bfloat16))
        if cin != cout:
            wsk = _conv_gemm(next(keys), cout, cin, k=1)          # (cin, cout)
            # 1x1/stride-s shortcut expressed as a 3x3 GEMM weight that only uses
            # the center tap -> fused into the same kernel as the block's conv1.
            ws = jnp.zeros((9 * cin, cout), jnp.float32).at[4 * cin:5 * cin, :].set(wsk)
            p["ws"] = ws.astype(jnp.bfloat16)
        if ase:
            fw, fb = _linear_init(next(keys), 10, cin)
            p["fc_w"], p["fc_wT"], p["fc_b"] = fw, fw.T, fb
        return p

    blocks = []
    cfg = [(nch[0], nch[1], 1), (nch[1], nch[2], 2), (nch[2], nch[3], 2)]
    for gi, (ci, co, st) in enumerate(cfg):
        for li in range(n):
            cin = ci if li == 0 else co
            stride = st if li == 0 else 1
            ase = (gi == 2 and li == n - 1)    # NetworkBlock_ASE: last layer of block3
            blocks.append(make_block(cin, co, stride, ase))
    params["blocks"] = blocks
    params["bn_final"] = _fold_bn(nch[3])
    fw, fb = _linear_init(next(keys), num_classes, nch[3])
    params["fc_wT"], params["fc_b"] = fw.T, fb
    efw, efb = _linear_init(next(keys), 10, nch[3])
    params["extra_fc_w"], params["extra_fc_wT"], params["extra_fc_b"] = efw, efw.T, efb
    # NOTE: self.sub_block1 in the PyTorch module is never used in forward(); omitted.
    return params


# -------------------------------- forward pass --------------------------------

def wideresnet_forward(params, x_nchw):
    blocks = params["blocks"]
    x = jnp.transpose(x_nchw, (0, 2, 3, 1)).astype(jnp.bfloat16)   # NCHW -> NHWC
    n_img = x.shape[0]
    extra = []

    # conv1 (3x3, no bias) fused with block[0].bn1 + ReLU epilogue.  The pre-BN
    # "raw" output is only materialized if block[0] needs it as identity skip.
    cols, H, W = _im2col(x, 1)
    if blocks[0]["equal"]:
        raw, act = _conv_raw_act(cols, params["conv1_w"], blocks[0]["bn1"],
                                 n_img, H * W)
    else:
        act = _conv_act(cols, params["conv1_w"], blocks[0]["bn1"], n_img, H * W)
        raw = None

    ase_fc = ase_mask = None
    logits = None
    for bi, p in enumerate(blocks):
        cin, cout, stride = p["cin"], p["cout"], p["stride"]
        act4 = act.reshape(n_img, H, W, cin)
        Ho = (H - 1) // stride + 1
        Wo = (W - 1) // stride + 1
        mi = Ho * Wo

        scale = None
        if p["ase"]:
            # fc/mask were produced by the predecessor's fused conv2+ASE kernel.
            extra.append(ase_fc.reshape(n_img, -1))
            # per-image channel mask applied to every im2col tap of conv1's input
            scale = jnp.tile(ase_mask, (1, 1, 9)).astype(jnp.bfloat16)  # (N,1,9*cin)

        cols, _, _ = _im2col(act4, stride)
        if p["equal"]:
            skip = raw                        # identity shortcut (pre-BN block input)
            if p["ase"]:
                h = _conv_act_scale(cols, scale, p["w1"], p["bn2"], n_img, mi)
            else:
                h = _conv_act(cols, p["w1"], p["bn2"], n_img, mi)
        else:
            if p["ase"]:
                h, skip = _conv_dual_scale(cols, scale, p["w1"], p["ws"], p["bn2"],
                                           n_img, mi)
            else:
                h, skip = _conv_dual(cols, p["w1"], p["ws"], p["bn2"], n_img, mi)

        # conv2 (stride 1) + residual add, fused with the *next* BN + ReLU
        # (next block's bn1, or the final BN + full network head after the
        # last block; the predecessor of the ASE block also fuses its head).
        cols, _, _ = _im2col(h.reshape(n_img, Ho, Wo, cout), 1)
        last = (bi + 1 == len(blocks))
        if last:
            # F.avg_pool2d(out*mask, 8).view(-1,C) == mask * spatial_mean(out)
            # exactly, since the mask is constant over space and final spatial is 8x8.
            assert Ho == 8 and Wo == 8
            logits, fc_out = _conv_add_final(
                cols, p["w2"], skip, params["bn_final"],
                params["extra_fc_wT"], params["extra_fc_w"], params["extra_fc_b"],
                params["fc_wT"], params["fc_b"], n_img, mi)
            extra.append(fc_out)
        else:
            nxt = blocks[bi + 1]
            if nxt["ase"]:
                raw, act, ase_fc, ase_mask = _conv_add_ase(
                    cols, p["w2"], skip, nxt["bn1"],
                    nxt["fc_wT"], nxt["fc_w"], nxt["fc_b"], n_img, mi)
            elif nxt["equal"]:
                raw, act = _conv_add_raw_act(cols, p["w2"], skip, nxt["bn1"],
                                             n_img, mi)
            else:
                act = _conv_add_act(cols, p["w2"], skip, nxt["bn1"], n_img, mi)
                raw = None
        H, W = Ho, Wo

    return logits, extra


if __name__ == "__main__":
    key = jax.random.PRNGKey(0)
    pkey, xkey = jax.random.split(key)
    # Small config consistent with the module: depth=10 ((10-4)%6==0), widen_factor=1
    params = init_wideresnet(pkey, depth=10, num_classes=10, widen_factor=1)
    x = jax.random.normal(xkey, (2, 3, 32, 32), jnp.float32)   # PyTorch-style NCHW input
    fwd = jax.jit(functools.partial(wideresnet_forward, params))
    logits, extra = fwd(x)
    jax.block_until_ready(logits)
    for e in extra:
        jax.block_until_ready(e)
    assert logits.shape == (2, 10)
    assert len(extra) == 2 and all(e.shape == (2, 10) for e in extra)
    assert bool(jnp.all(jnp.isfinite(logits)))
    print("KERNEL_OK")
</pallas_src>

<mosaic_0001>
module attributes {stable_mosaic.version = 11 : i64} {
  func.func @_gemm_raw_act_kernel(%arg0: i32, %arg1: memref<1024x27xbf16, #tpu.memory_space<vmem>>, %arg2: memref<27x16xbf16, #tpu.memory_space<vmem>>, %arg3: memref<1x16xf32, #tpu.memory_space<vmem>>, %arg4: memref<1x16xf32, #tpu.memory_space<vmem>>, %arg5: memref<1024x16xbf16, #tpu.memory_space<vmem>>, %arg6: memref<1024x16xbf16, #tpu.memory_space<vmem>>) attributes {dimension_semantics = [#tpu.dimension_semantics<parallel>], iteration_bounds = array<i64: 2>, scalar_prefetch = 0 : i64, scratch_operands = 0 : i64, tpu.core_type = #tpu.core_type<tc>, window_params = [{transform_indices = @transform_0, window_bounds = array<i64: 1024, 27>}, {pipeline_mode = #tpu.pipeline_mode<synchronous>, transform_indices = @transform_1, window_bounds = array<i64: 27, 16>}, {pipeline_mode = #tpu.pipeline_mode<synchronous>, transform_indices = @transform_2, window_bounds = array<i64: 1, 16>}, {pipeline_mode = #tpu.pipeline_mode<synchronous>, transform_indices = @transform_3, window_bounds = array<i64: 1, 16>}, {transform_indices = @transform_4, window_bounds = array<i64: 1024, 16>}, {transform_indices = @transform_5, window_bounds = array<i64: 1024, 16>}]} {
    %c0 = arith.constant 0 : index
    %c0_0 = arith.constant 0 : index
    %0 = vector.load %arg1[%c0, %c0_0] : memref<1024x27xbf16, #tpu.memory_space<vmem>>, vector<1024x27xbf16>
    %c0_1 = arith.constant 0 : index
    %c0_2 = arith.constant 0 : index
    %1 = vector.load %arg2[%c0_1, %c0_2] : memref<27x16xbf16, #tpu.memory_space<vmem>>, vector<27x16xbf16>
    %cst = arith.constant dense<0.000000e+00> : vector<1024x16xf32>
    %2 = tpu.matmul %0, %1, %cst {dimension_numbers = #tpu.dot_dimension_numbers<[1], [0], [0], [1], [0, 0, 1, 1], [], []>} : vector<1024x27xbf16>, vector<27x16xbf16>, vector<1024x16xf32> -> vector<1024x16xf32>
    %3 = arith.truncf %2 : vector<1024x16xf32> to vector<1024x16xbf16>
    %c0_3 = arith.constant 0 : index
    %c0_4 = arith.constant 0 : index
    %4 = vector.load %arg5[%c0_3, %c0_4] : memref<1024x16xbf16, #tpu.memory_space<vmem>>, vector<1024x16xbf16>
    tpu.vector_store %arg5[%c0_3, %c0_4], %3 {strides = array<i32>} : memref<1024x16xbf16, #tpu.memory_space<vmem>>, vector<1024x16xbf16>,
    %c0_5 = arith.constant 0 : index
    %c0_6 = arith.constant 0 : index
    %5 = vector.load %arg3[%c0_5, %c0_6] : memref<1x16xf32, #tpu.memory_space<vmem>>, vector<1x16xf32>
    %c0_7 = arith.constant 0 : index
    %c0_8 = arith.constant 0 : index
    %6 = vector.load %arg4[%c0_7, %c0_8] : memref<1x16xf32, #tpu.memory_space<vmem>>, vector<1x16xf32>
    %7 = vector.broadcast %5 : vector<1x16xf32> to vector<1024x16xf32>
    %8 = arith.mulf %2, %7 : vector<1024x16xf32>
    %9 = vector.broadcast %6 : vector<1x16xf32> to vector<1024x16xf32>
    %10 = arith.addf %8, %9 : vector<1024x16xf32>
    %cst_9 = arith.constant 0.000000e+00 : f32
    %11 = vector.broadcast %cst_9 : f32 to vector<1024x16xf32>
    %12 = arith.maximumf %10, %11 : vector<1024x16xf32>
    %13 = arith.truncf %12 : vector<1024x16xf32> to vector<1024x16xbf16>
    %c0_10 = arith.constant 0 : index
    %c0_11 = arith.constant 0 : index
    %14 = vector.load %arg6[%c0_10, %c0_11] : memref<1024x16xbf16, #tpu.memory_space<vmem>>, vector<1024x16xbf16>
    tpu.vector_store %arg6[%c0_10, %c0_11], %13 {strides = array<i32>} : memref<1024x16xbf16, #tpu.memory_space<vmem>>, vector<1024x16xbf16>,
    return
  }
  func.func @transform_0(%arg0: i32) -> (i32, i32) {
    %c0_i32 = arith.constant 0 : i32
    %c0_i32_0 = arith.constant 0 : i32
    return %arg0, %c0_i32 : i32, i32
  }
  func.func @transform_1(%arg0: i32) -> (i32, i32) {
    %c0_i32 = arith.constant 0 : i32
    %c0_i32_0 = arith.constant 0 : i32
    %c0_i32_1 = arith.constant 0 : i32
    return %c0_i32, %c0_i32_0 : i32, i32
  }
  func.func @transform_2(%arg0: i32) -> (i32, i32) {
    %c0_i32 = arith.constant 0 : i32
    %c0_i32_0 = arith.constant 0 : i32
    %c0_i32_1 = arith.constant 0 : i32
    return %c0_i32, %c0_i32_0 : i32, i32
  }
  func.func @transform_3(%arg0: i32) -> (i32, i32) {
    %c0_i32 = arith.constant 0 : i32
    %c0_i32_0 = arith.constant 0 : i32
    %c0_i32_1 = arith.constant 0 : i32
    return %c0_i32, %c0_i32_0 : i32, i32
  }
  func.func @transform_4(%arg0: i32) -> (i32, i32) {
    %c0_i32 = arith.constant 0 : i32
    %c0_i32_0 = arith.constant 0 : i32
    return %arg0, %c0_i32 : i32, i32
  }
  func.func @transform_5(%arg0: i32) -> (i32, i32) {
    %c0_i32 = arith.constant 0 : i32
    %c0_i32_0 = arith.constant 0 : i32
    return %arg0, %c0_i32 : i32, i32
  }
}

module attributes {stable_mosaic.version = 11 : i64} {
  func.func @_gemm_act_kernel(%arg0: i32, %arg1: memref<1024x144xbf16, #tpu.memory_space<vmem>>, %arg2: memref<144x16xbf16, #tpu.memory_space<vmem>>, %arg3: memref<1x16xf32, #tpu.memory_space<vmem>>, %arg4: memref<1x16xf32, #tpu.memory_space<vmem>>, %arg5: memref<1024x16xbf16, #tpu.memory_space<vmem>>) attributes {dimension_semantics = [#tpu.dimension_semantics<parallel>], iteration_bounds = array<i64: 2>, scalar_prefetch = 0 : i64, scratch_operands = 0 : i64, tpu.core_type = #tpu.core_type<tc>, window_params = [{transform_indices = @transform_0, window_bounds = array<i64: 1024, 144>}, {pipeline_mode = #tpu.pipeline_mode<synchronous>, transform_indices = @transform_1, window_bounds = array<i64: 144, 16>}, {pipeline_mode = #tpu.pipeline_mode<synchronous>, transform_indices = @transform_2, window_bounds = array<i64: 1, 16>}, {pipeline_mode = #tpu.pipeline_mode<synchronous>, transform_indices = @transform_3, window_bounds = array<i64: 1, 16>}, {transform_indices = @transform_4, window_bounds = array<i64: 1024, 16>}]} {
    %c0 = arith.constant 0 : index
    %c0_0 = arith.constant 0 : index
    %0 = vector.load %arg1[%c0, %c0_0] : memref<1024x144xbf16, #tpu.memory_space<vmem>>, vector<1024x144xbf16>
    %c0_1 = arith.constant 0 : index
    %c0_2 = arith.constant 0 : index
    %1 = vector.load %arg2[%c0_1, %c0_2] : memref<144x16xbf16, #tpu.memory_space<vmem>>, vector<144x16xbf16>
    %cst = arith.constant dense<0.000000e+00> : vector<1024x16xf32>
    %2 = tpu.matmul %0, %1, %cst {dimension_numbers = #tpu.dot_dimension_numbers<[1], [0], [0], [1], [0, 0, 1, 1], [], []>} : vector<1024x144xbf16>, vector<144x16xbf16>, vector<1024x16xf32> -> vector<1024x16xf32>
    %c0_3 = arith.constant 0 : index
    %c0_4 = arith.constant 0 : index
    %3 = vector.load %arg3[%c0_3, %c0_4] : memref<1x16xf32, #tpu.memory_space<vmem>>, vector<1x16xf32>
    %c0_5 = arith.constant 0 : index
    %c0_6 = arith.constant 0 : index
    %4 = vector.load %arg4[%c0_5, %c0_6] : memref<1x16xf32, #tpu.memory_space<vmem>>, vector<1x16xf32>
    %5 = vector.broadcast %3 : vector<1x16xf32> to vector<1024x16xf32>
    %6 = arith.mulf %2, %5 : vector<1024x16xf32>
    %7 = vector.broadcast %4 : vector<1x16xf32> to vector<1024x16xf32>
    %8 = arith.addf %6, %7 : vector<1024x16xf32>
    %cst_7 = arith.constant 0.000000e+00 : f32
    %9 = vector.broadcast %cst_7 : f32 to vector<1024x16xf32>
    %10 = arith.maximumf %8, %9 : vector<1024x16xf32>
    %11 = arith.truncf %10 : vector<1024x16xf32> to vector<1024x16xbf16>
    %c0_8 = arith.constant 0 : index
    %c0_9 = arith.constant 0 : index
    %12 = vector.load %arg5[%c0_8, %c0_9] : memref<1024x16xbf16, #tpu.memory_space<vmem>>, vector<1024x16xbf16>
    tpu.vector_store %arg5[%c0_8, %c0_9], %11 {strides = array<i32>} : memref<1024x16xbf16, #tpu.memory_space<vmem>>, vector<1024x16xbf16>,
    return
  }
  func.func @transform_0(%arg0: i32) -> (i32, i32) {
    %c0_i32 = arith.constant 0 : i32
    %c0_i32_0 = arith.constant 0 : i32
    return %arg0, %c0_i32 : i32, i32
  }
  func.func @transform_1(%arg0: i32) -> (i32, i32) {
    %c0_i32 = arith.constant 0 : i32
    %c0_i32_0 = arith.constant 0 : i32
    %c0_i32_1 = arith.constant 0 : i32
    return %c0_i32, %c0_i32_0 : i32, i32
  }
  func.func @transform_2(%arg0: i32) -> (i32, i32) {
    %c0_i32 = arith.constant 0 : i32
    %c0_i32_0 = arith.constant 0 : i32
    %c0_i32_1 = arith.constant 0 : i32
    return %c0_i32, %c0_i32_0 : i32, i32
  }
  func.func @transform_3(%arg0: i32) -> (i32, i32) {
    %c0_i32 = arith.constant 0 : i32
    %c0_i32_0 = arith.constant 0 : i32
    %c0_i32_1 = arith.constant 0 : i32
    return %c0_i32, %c0_i32_0 : i32, i32
  }
  func.func @transform_4(%arg0: i32) -> (i32, i32) {
    %c0_i32 = arith.constant 0 : i32
    %c0_i32_0 = arith.constant 0 : i32
    return %arg0, %c0_i32 : i32, i32
  }
}

module attributes {stable_mosaic.version = 11 : i64} {
  func.func @_gemm_add_act_kernel(%arg0: i32, %arg1: memref<1024x144xbf16, #tpu.memory_space<vmem>>, %arg2: memref<144x16xbf16, #tpu.memory_space<vmem>>, %arg3: memref<1024x16xbf16, #tpu.memory_space<vmem>>, %arg4: memref<1x16xf32, #tpu.memory_space<vmem>>, %arg5: memref<1x16xf32, #tpu.memory_space<vmem>>, %arg6: memref<1024x16xbf16, #tpu.memory_space<vmem>>) attributes {dimension_semantics = [#tpu.dimension_semantics<parallel>], iteration_bounds = array<i64: 2>, scalar_prefetch = 0 : i64, scratch_operands = 0 : i64, tpu.core_type = #tpu.core_type<tc>, window_params = [{transform_indices = @transform_0, window_bounds = array<i64: 1024, 144>}, {pipeline_mode = #tpu.pipeline_mode<synchronous>, transform_indices = @transform_1, window_bounds = array<i64: 144, 16>}, {transform_indices = @transform_2, window_bounds = array<i64: 1024, 16>}, {pipeline_mode = #tpu.pipeline_mode<synchronous>, transform_indices = @transform_3, window_bounds = array<i64: 1, 16>}, {pipeline_mode = #tpu.pipeline_mode<synchronous>, transform_indices = @transform_4, window_bounds = array<i64: 1, 16>}, {transform_indices = @transform_5, window_bounds = array<i64: 1024, 16>}]} {
    %c0 = arith.constant 0 : index
    %c0_0 = arith.constant 0 : index
    %0 = vector.load %arg1[%c0, %c0_0] : memref<1024x144xbf16, #tpu.memory_space<vmem>>, vector<1024x144xbf16>
    %c0_1 = arith.constant 0 : index
    %c0_2 = arith.constant 0 : index
    %1 = vector.load %arg2[%c0_1, %c0_2] : memref<144x16xbf16, #tpu.memory_space<vmem>>, vector<144x16xbf16>
    %cst = arith.constant dense<0.000000e+00> : vector<1024x16xf32>
    %2 = tpu.matmul %0, %1, %cst {dimension_numbers = #tpu.dot_dimension_numbers<[1], [0], [0], [1], [0, 0, 1, 1], [], []>} : vector<1024x144xbf16>, vector<144x16xbf16>, vector<1024x16xf32> -> vector<1024x16xf32>
    %c0_3 = arith.constant 0 : index
    %c0_4 = arith.constant 0 : index
    %3 = vector.load %arg3[%c0_3, %c0_4] : memref<1024x16xbf16, #tpu.memory_space<vmem>>, vector<1024x16xbf16>
    %4 = arith.extf %3 : vector<1024x16xbf16> to vector<1024x16xf32>
    %5 = arith.addf %2, %4 : vector<1024x16xf32>
    %c0_5 = arith.constant 0 : index
    %c0_6 = arith.constant 0 : index
    %6 = vector.load %arg4[%c0_5, %c0_6] : memref<1x16xf32, #tpu.memory_space<vmem>>, vector<1x16xf32>
    %c0_7 = arith.constant 0 : index
    %c0_8 = arith.constant 0 : index
    %7 = vector.load %arg5[%c0_7, %c0_8] : memref<1x16xf32, #tpu.memory_space<vmem>>, vector<1x16xf32>
    %8 = vector.broadcast %6 : vector<1x16xf32> to vector<1024x16xf32>
    %9 = arith.mulf %5, %8 : vector<1024x16xf32>
    %10 = vector.broadcast %7 : vector<1x16xf32> to vector<1024x16xf32>
    %11 = arith.addf %9, %10 : vector<1024x16xf32>
    %cst_9 = arith.constant 0.000000e+00 : f32
    %12 = vector.broadcast %cst_9 : f32 to vector<1024x16xf32>
    %13 = arith.maximumf %11, %12 : vector<1024x16xf32>
    %14 = arith.truncf %13 : vector<1024x16xf32> to vector<1024x16xbf16>
    %c0_10 = arith.constant 0 : index
    %c0_11 = arith.constant 0 : index
    %15 = vector.load %arg6[%c0_10, %c0_11] : memref<1024x16xbf16, #tpu.memory_space<vmem>>, vector<1024x16xbf16>
    tpu.vector_store %arg6[%c0_10, %c0_11], %14 {strides = array<i32>} : memref<1024x16xbf16, #tpu.memory_space<vmem>>, vector<1024x16xbf16>,
    return
  }
  func.func @transform_0(%arg0: i32) -> (i32, i32) {
    %c0_i32 = arith.constant 0 : i32
    %c0_i32_0 = arith.constant 0 : i32
    return %arg0, %c0_i32 : i32, i32
  }
  func.func @transform_1(%arg0: i32) -> (i32, i32) {
    %c0_i32 = arith.constant 0 : i32
    %c0_i32_0 = arith.constant 0 : i32
    %c0_i32_1 = arith.constant 0 : i32
    return %c0_i32, %c0_i32_0 : i32, i32
  }
  func.func @transform_2(%arg0: i32) -> (i32, i32) {
    %c0_i32 = arith.constant 0 : i32
    %c0_i32_0 = arith.constant 0 : i32
    return %arg0, %c0_i32 : i32, i32
  }
  func.func @transform_3(%arg0: i32) -> (i32, i32) {
    %c0_i32 = arith.constant 0 : i32
    %c0_i32_0 = arith.constant 0 : i32
    %c0_i32_1 = arith.constant 0 : i32
    return %c0_i32, %c0_i32_0 : i32, i32
  }
  func.func @transform_4(%arg0: i32) -> (i32, i32) {
    %c0_i32 = arith.constant 0 : i32
    %c0_i32_0 = arith.constant 0 : i32
    %c0_i32_1 = arith.constant 0 : i32
    return %c0_i32, %c0_i32_0 : i32, i32
  }
  func.func @transform_5(%arg0: i32) -> (i32, i32) {
    %c0_i32 = arith.constant 0 : i32
    %c0_i32_0 = arith.constant 0 : i32
    return %arg0, %c0_i32 : i32, i32
  }
}

module attributes {stable_mosaic.version = 11 : i64} {
  func.func @_gemm_dual_kernel(%arg0: i32, %arg1: memref<256x144xbf16, #tpu.memory_space<vmem>>, %arg2: memref<144x32xbf16, #tpu.memory_space<vmem>>, %arg3: memref<144x32xbf16, #tpu.memory_space<vmem>>, %arg4: memref<1x32xf32, #tpu.memory_space<vmem>>, %arg5: memref<1x32xf32, #tpu.memory_space<vmem>>, %arg6: memref<256x32xbf16, #tpu.memory_space<vmem>>, %arg7: memref<256x32xbf16, #tpu.memory_space<vmem>>) attributes {dimension_semantics = [#tpu.dimension_semantics<parallel>], iteration_bounds = array<i64: 2>, scalar_prefetch = 0 : i64, scratch_operands = 0 : i64, tpu.core_type = #tpu.core_type<tc>, window_params = [{transform_indices = @transform_0, window_bounds = array<i64: 256, 144>}, {pipeline_mode = #tpu.pipeline_mode<synchronous>, transform_indices = @transform_1, window_bounds = array<i64: 144, 32>}, {pipeline_mode = #tpu.pipeline_mode<synchronous>, transform_indices = @transform_2, window_bounds = array<i64: 144, 32>}, {pipeline_mode = #tpu.pipeline_mode<synchronous>, transform_indices = @transform_3, window_bounds = array<i64: 1, 32>}, {pipeline_mode = #tpu.pipeline_mode<synchronous>, transform_indices = @transform_4, window_bounds = array<i64: 1, 32>}, {transform_indices = @transform_5, window_bounds = array<i64: 256, 32>}, {transform_indices = @transform_6, window_bounds = array<i64: 256, 32>}]} {
    %c0 = arith.constant 0 : index
    %c0_0 = arith.constant 0 : index
    %0 = vector.load %arg1[%c0, %c0_0] : memref<256x144xbf16, #tpu.memory_space<vmem>>, vector<256x144xbf16>
    %c0_1 = arith.constant 0 : index
    %c0_2 = arith.constant 0 : index
    %1 = vector.load %arg2[%c0_1, %c0_2] : memref<144x32xbf16, #tpu.memory_space<vmem>>, vector<144x32xbf16>
    %cst = arith.constant dense<0.000000e+00> : vector<256x32xf32>
    %2 = tpu.matmul %0, %1, %cst {dimension_numbers = #tpu.dot_dimension_numbers<[1], [0], [0], [1], [0, 0, 1, 1], [], []>} : vector<256x144xbf16>, vector<144x32xbf16>, vector<256x32xf32> -> vector<256x32xf32>
    %c0_3 = arith.constant 0 : index
    %c0_4 = arith.constant 0 : index
    %3 = vector.load %arg3[%c0_3, %c0_4] : memref<144x32xbf16, #tpu.memory_space<vmem>>, vector<144x32xbf16>
    %cst_5 = arith.constant dense<0.000000e+00> : vector<256x32xf32>
    %4 = tpu.matmul %0, %3, %cst_5 {dimension_numbers = #tpu.dot_dimension_numbers<[1], [0], [0], [1], [0, 0, 1, 1], [], []>} : vector<256x144xbf16>, vector<144x32xbf16>, vector<256x32xf32> -> vector<256x32xf32>
    %c0_6 = arith.constant 0 : index
    %c0_7 = arith.constant 0 : index
    %5 = vector.load %arg4[%c0_6, %c0_7] : memref<1x32xf32, #tpu.memory_space<vmem>>, vector<1x32xf32>
    %c0_8 = arith.constant 0 : index
    %c0_9 = arith.constant 0 : index
    %6 = vector.load %arg5[%c0_8, %c0_9] : memref<1x32xf32, #tpu.memory_space<vmem>>, vector<1x32xf32>
    %7 = vector.broadcast %5 : vector<1x32xf32> to vector<256x32xf32>
    %8 = arith.mulf %2, %7 : vector<256x32xf32>
    %9 = vector.broadcast %6 : vector<1x32xf32> to vector<256x32xf32>
    %10 = arith.addf %8, %9 : vector<256x32xf32>
    %cst_10 = arith.constant 0.000000e+00 : f32
    %11 = vector.broadcast %cst_10 : f32 to vector<256x32xf32>
    %12 = arith.maximumf %10, %11 : vector<256x32xf32>
    %13 = arith.truncf %12 : vector<256x32xf32> to vector<256x32xbf16>
    %c0_11 = arith.constant 0 : index
    %c0_12 = arith.constant 0 : index
    %14 = vector.load %arg6[%c0_11, %c0_12] : memref<256x32xbf16, #tpu.memory_space<vmem>>, vector<256x32xbf16>
    tpu.vector_store %arg6[%c0_11, %c0_12], %13 {strides = array<i32>} : memref<256x32xbf16, #tpu.memory_space<vmem>>, vector<256x32xbf16>,
    %15 = arith.truncf %4 : vector<256x32xf32> to vector<256x32xbf16>
    %c0_13 = arith.constant 0 : index
    %c0_14 = arith.constant 0 : index
    %16 = vector.load %arg7[%c0_13, %c0_14] : memref<256x32xbf16, #tpu.memory_space<vmem>>, vector<256x32xbf16>
    tpu.vector_store %arg7[%c0_13, %c0_14], %15 {strides = array<i32>} : memref<256x32xbf16, #tpu.memory_space<vmem>>, vector<256x32xbf16>,
    return
  }
  func.func @transform_0(%arg0: i32) -> (i32, i32) {
    %c0_i32 = arith.constant 0 : i32
    %c0_i32_0 = arith.constant 0 : i32
    return %arg0, %c0_i32 : i32, i32
  }
  func.func @transform_1(%arg0: i32) -> (i32, i32) {
    %c0_i32 = arith.constant 0 : i32
    %c0_i32_0 = arith.constant 0 : i32
    %c0_i32_1 = arith.constant 0 : i32
    return %c0_i32, %c0_i32_0 : i32, i32
  }
  func.func @transform_2(%arg0: i32) -> (i32, i32) {
    %c0_i32 = arith.constant 0 : i32
    %c0_i32_0 = arith.constant 0 : i32
    %c0_i32_1 = arith.constant 0 : i32
    return %c0_i32, %c0_i32_0 : i32, i32
  }
  func.func @transform_3(%arg0: i32) -> (i32, i32) {
    %c0_i32 = arith.constant 0 : i32
    %c0_i32_0 = arith.constant 0 : i32
    %c0_i32_1 = arith.constant 0 : i32
    return %c0_i32, %c0_i32_0 : i32, i32
  }
  func.func @transform_4(%arg0: i32) -> (i32, i32) {
    %c0_i32 = arith.constant 0 : i32
    %c0_i32_0 = arith.constant 0 : i32
    %c0_i32_1 = arith.constant 0 : i32
    return %c0_i32, %c0_i32_0 : i32, i32
  }
  func.func @transform_5(%arg0: i32) -> (i32, i32) {
    %c0_i32 = arith.constant 0 : i32
    %c0_i32_0 = arith.constant 0 : i32
    return %arg0, %c0_i32 : i32, i32
  }
  func.func @transform_6(%arg0: i32) -> (i32, i32) {
    %c0_i32 = arith.constant 0 : i32
    %c0_i32_0 = arith.constant 0 : i32
    return %arg0, %c0_i32 : i32, i32
  }
}

module attributes {stable_mosaic.version = 11 : i64} {
  func.func @_gemm_add_ase_kernel(%arg0: i32, %arg1: memref<256x288xbf16, #tpu.memory_space<vmem>>, %arg2: memref<288x32xbf16, #tpu.memory_space<vmem>>, %arg3: memref<256x32xbf16, #tpu.memory_space<vmem>>, %arg4: memref<1x32xf32, #tpu.memory_space<vmem>>, %arg5: memref<1x32xf32, #tpu.memory_space<vmem>>, %arg6: memref<32x10xf32, #tpu.memory_space<vmem>>, %arg7: memref<10x32xf32, #tpu.memory_space<vmem>>, %arg8: memref<1x10xf32, #tpu.memory_space<vmem>>, %arg9: memref<256x32xbf16, #tpu.memory_space<vmem>>, %arg10: memref<256x32xbf16, #tpu.memory_space<vmem>>, %arg11: memref<1x1x10xf32, #tpu.memory_space<vmem>>, %arg12: memref<1x1x32xf32, #tpu.memory_space<vmem>>) attributes {dimension_semantics = [#tpu.dimension_semantics<parallel>], iteration_bounds = array<i64: 2>, scalar_prefetch = 0 : i64, scratch_operands = 0 : i64, tpu.core_type = #tpu.core_type<tc>, window_params = [{transform_indices = @transform_0, window_bounds = array<i64: 256, 288>}, {pipeline_mode = #tpu.pipeline_mode<synchronous>, transform_indices = @transform_1, window_bounds = array<i64: 288, 32>}, {transform_indices = @transform_2, window_bounds = array<i64: 256, 32>}, {pipeline_mode = #tpu.pipeline_mode<synchronous>, transform_indices = @transform_3, window_bounds = array<i64: 1, 32>}, {pipeline_mode = #tpu.pipeline_mode<synchronous>, transform_indices = @transform_4, window_bounds = array<i64: 1, 32>}, {pipeline_mode = #tpu.pipeline_mode<synchronous>, transform_indices = @transform_5, window_bounds = array<i64: 32, 10>}, {pipeline_mode = #tpu.pipeline_mode<synchronous>, transform_indices = @transform_6, window_bounds = array<i64: 10, 32>}, {pipeline_mode = #tpu.pipeline_mode<synchronous>, transform_indices = @transform_7, window_bounds = array<i64: 1, 10>}, {transform_indices = @transform_8, window_bounds = array<i64: 256, 32>}, {transform_indices = @transform_9, window_bounds = array<i64: 256, 32>}, {transform_indices = @transform_10, window_bounds = array<i64: 1, 1, 10>}, {transform_indices = @transform_11, window_bounds = array<i64: 1, 1, 32>}]} {
    %c0 = arith.constant 0 : index
    %c0_0 = arith.constant 0 : index
    %0 = vector.load %arg1[%c0, %c0_0] : memref<256x288xbf16, #tpu.memory_space<vmem>>, vector<256x288xbf16>
    %c0_1 = arith.constant 0 : index
    %c0_2 = arith.constant 0 : index
    %1 = vector.load %arg2[%c0_1, %c0_2] : memref<288x32xbf16, #tpu.memory_space<vmem>>, vector<288x32xbf16>
    %cst = arith.constant dense<0.000000e+00> : vector<256x32xf32>
    %2 = tpu.matmul %0, %1, %cst {dimension_numbers = #tpu.dot_dimension_numbers<[1], [0], [0], [1], [0, 0, 1, 1], [], []>} : vector<256x288xbf16>, vector<288x32xbf16>, vector<256x32xf32> -> vector<256x32xf32>
    %c0_3 = arith.constant 0 : index
    %c0_4 = arith.constant 0 : index
    %3 = vector.load %arg3[%c0_3, %c0_4] : memref<256x32xbf16, #tpu.memory_space<vmem>>, vector<256x32xbf16>
    %4 = arith.extf %3 : vector<256x32xbf16> to vector<256x32xf32>
    %5 = arith.addf %2, %4 : vector<256x32xf32>
    %6 = arith.truncf %5 : vector<256x32xf32> to vector<256x32xbf16>
    %c0_5 = arith.constant 0 : index
    %c0_6 = arith.constant 0 : index
    %7 = vector.load %arg9[%c0_5, %c0_6] : memref<256x32xbf16, #tpu.memory_space<vmem>>, vector<256x32xbf16>
    tpu.vector_store %arg9[%c0_5, %c0_6], %6 {strides = array<i32>} : memref<256x32xbf16, #tpu.memory_space<vmem>>, vector<256x32xbf16>,
    %c0_7 = arith.constant 0 : index
    %c0_8 = arith.constant 0 : index
    %8 = vector.load %arg4[%c0_7, %c0_8] : memref<1x32xf32, #tpu.memory_space<vmem>>, vector<1x32xf32>
    %c0_9 = arith.constant 0 : index
    %c0_10 = arith.constant 0 : index
    %9 = vector.load %arg5[%c0_9, %c0_10] : memref<1x32xf32, #tpu.memory_space<vmem>>, vector<1x32xf32>
    %10 = vector.broadcast %8 : vector<1x32xf32> to vector<256x32xf32>
    %11 = arith.mulf %5, %10 : vector<256x32xf32>
    %12 = vector.broadcast %9 : vector<1x32xf32> to vector<256x32xf32>
    %13 = arith.addf %11, %12 : vector<256x32xf32>
    %cst_11 = arith.constant 0.000000e+00 : f32
    %14 = vector.broadcast %cst_11 : f32 to vector<256x32xf32>
    %15 = arith.maximumf %13, %14 : vector<256x32xf32>
    %16 = arith.truncf %15 : vector<256x32xf32> to vector<256x32xbf16>
    %c0_12 = arith.constant 0 : index
    %c0_13 = arith.constant 0 : index
    %17 = vector.load %arg10[%c0_12, %c0_13] : memref<256x32xbf16, #tpu.memory_space<vmem>>, vector<256x32xbf16>
    tpu.vector_store %arg10[%c0_12, %c0_13], %16 {strides = array<i32>} : memref<256x32xbf16, #tpu.memory_space<vmem>>, vector<256x32xbf16>,
    %cst_14 = arith.constant dense<0.000000e+00> : vector<32xf32>
    %18 = vector.multi_reduction <add>, %15, %cst_14 [0] : vector<256x32xf32> to vector<32xf32>
    %19 = vector.shape_cast %18 : vector<32xf32> to vector<1x32xf32>
    %cst_15 = arith.constant 2.560000e+02 : f32
    %20 = vector.broadcast %cst_15 : f32 to vector<1x32xf32>
    %21 = arith.divf %19, %20 : vector<1x32xf32>
    %c0_16 = arith.constant 0 : index
    %c0_17 = arith.constant 0 : index
    %22 = vector.load %arg6[%c0_16, %c0_17] : memref<32x10xf32, #tpu.memory_space<vmem>>, vector<32x10xf32>
    %cst_18 = arith.constant dense<0.000000e+00> : vector<1x10xf32>
    %23 = tpu.matmul %21, %22, %cst_18 {dimension_numbers = #tpu.dot_dimension_numbers<[1], [0], [0], [1], [0, 0, 1, 1], [], []>} : vector<1x32xf32>, vector<32x10xf32>, vector<1x10xf32> -> vector<1x10xf32>
    %c0_19 = arith.constant 0 : index
    %c0_20 = arith.constant 0 : index
    %24 = vector.load %arg8[%c0_19, %c0_20] : memref<1x10xf32, #tpu.memory_space<vmem>>, vector<1x10xf32>
    %25 = arith.addf %23, %24 : vector<1x10xf32>
    %26 = tpu.iota {dimensions = array<i32: 1>} : vector<1x10xi32>
    %cst_21 = arith.constant dense<0xFF800000> : vector<1xf32>
    %27 = vector.multi_reduction <maximumf>, %25, %cst_21 [1] : vector<1x10xf32> to vector<1xf32>
    %28 = vector.shape_cast %27 : vector<1xf32> to vector<1x1xf32>
    %29 = vector.broadcast %28 : vector<1x1xf32> to vector<1x10xf32>
    %30 = arith.cmpf oge, %25, %29 : vector<1x10xf32>
    %c10_i32 = arith.constant 10 : i32
    %31 = vector.broadcast %c10_i32 : i32 to vector<1x10xi32>
    %32 = arith.select %30, %26, %31 : vector<1x10xi1>, vector<1x10xi32>
    %cst_22 = arith.constant dense<2147483647> : vector<1xi32>
    %33 = vector.multi_reduction <minsi>, %32, %cst_22 [1] : vector<1x10xi32> to vector<1xi32>
    %34 = vector.shape_cast %33 : vector<1xi32> to vector<1x1xi32>
    %35 = vector.broadcast %34 : vector<1x1xi32> to vector<1x10xi32>
    %36 = arith.cmpi eq, %26, %35 : vector<1x10xi32>
    %37 = arith.extui %36 : vector<1x10xi1> to vector<1x10xi32>
    %38 = arith.sitofp %37 : vector<1x10xi32> to vector<1x10xf32>
    %c0_23 = arith.constant 0 : index
    %c0_24 = arith.constant 0 : index
    %39 = vector.load %arg7[%c0_23, %c0_24] : memref<10x32xf32, #tpu.memory_space<vmem>>, vector<10x32xf32>
    %cst_25 = arith.constant dense<0.000000e+00> : vector<1x32xf32>
    %40 = tpu.matmul %38, %39, %cst_25 {dimension_numbers = #tpu.dot_dimension_numbers<[1], [0], [0], [1], [0, 0, 1, 1], [], []>} : vector<1x10xf32>, vector<10x32xf32>, vector<1x32xf32> -> vector<1x32xf32>
    %c0_26 = arith.constant 0 : index
    %c0_27 = arith.constant 0 : index
    %c0_28 = arith.constant 0 : index
    %41 = vector.load %arg11[%c0_26, %c0_27, %c0_28] : memref<1x1x10xf32, #tpu.memory_space<vmem>>, vector<1x1x10xf32>
    %42 = vector.shape_cast %41 : vector<1x1x10xf32> to vector<1x10xf32>
    %43 = vector.shape_cast %25 : vector<1x10xf32> to vector<1x1x10xf32>
    tpu.vector_store %arg11[%c0_26, %c0_27, %c0_28], %43 {strides = array<i32>} : memref<1x1x10xf32, #tpu.memory_space<vmem>>, vector<1x1x10xf32>,
    %c0_29 = arith.constant 0 : index
    %c0_30 = arith.constant 0 : index
    %c0_31 = arith.constant 0 : index
    %44 = vector.load %arg12[%c0_29, %c0_30, %c0_31] : memref<1x1x32xf32, #tpu.memory_space<vmem>>, vector<1x1x32xf32>
    %45 = vector.shape_cast %44 : vector<1x1x32xf32> to vector<1x32xf32>
    %46 = vector.shape_cast %40 : vector<1x32xf32> to vector<1x1x32xf32>
    tpu.vector_store %arg12[%c0_29, %c0_30, %c0_31], %46 {strides = array<i32>} : memref<1x1x32xf32, #tpu.memory_space<vmem>>, vector<1x1x32xf32>,
    return
  }
  func.func @transform_0(%arg0: i32) -> (i32, i32) {
    %c0_i32 = arith.constant 0 : i32
    %c0_i32_0 = arith.constant 0 : i32
    return %arg0, %c0_i32 : i32, i32
  }
  func.func @transform_1(%arg0: i32) -> (i32, i32) {
    %c0_i32 = arith.constant 0 : i32
    %c0_i32_0 = arith.constant 0 : i32
    %c0_i32_1 = arith.constant 0 : i32
    return %c0_i32, %c0_i32_0 : i32, i32
  }
  func.func @transform_2(%arg0: i32) -> (i32, i32) {
    %c0_i32 = arith.constant 0 : i32
    %c0_i32_0 = arith.constant 0 : i32
    return %arg0, %c0_i32 : i32, i32
  }
  func.func @transform_3(%arg0: i32) -> (i32, i32) {
    %c0_i32 = arith.constant 0 : i32
    %c0_i32_0 = arith.constant 0 : i32
    %c0_i32_1 = arith.constant 0 : i32
    return %c0_i32, %c0_i32_0 : i32, i32
  }
  func.func @transform_4(%arg0: i32) -> (i32, i32) {
    %c0_i32 = arith.constant 0 : i32
    %c0_i32_0 = arith.constant 0 : i32
    %c0_i32_1 = arith.constant 0 : i32
    return %c0_i32, %c0_i32_0 : i32, i32
  }
  func.func @transform_5(%arg0: i32) -> (i32, i32) {
    %c0_i32 = arith.constant 0 : i32
    %c0_i32_0 = arith.constant 0 : i32
    %c0_i32_1 = arith.constant 0 : i32
    return %c0_i32, %c0_i32_0 : i32, i32
  }
  func.func @transform_6(%arg0: i32) -> (i32, i32) {
    %c0_i32 = arith.constant 0 : i32
    %c0_i32_0 = arith.constant 0 : i32
    %c0_i32_1 = arith.constant 0 : i32
    return %c0_i32, %c0_i32_0 : i32, i32
  }
  func.func @transform_7(%arg0: i32) -> (i32, i32) {
    %c0_i32 = arith.constant 0 : i32
    %c0_i32_0 = arith.constant 0 : i32
    %c0_i32_1 = arith.constant 0 : i32
    return %c0_i32, %c0_i32_0 : i32, i32
  }
  func.func @transform_8(%arg0: i32) -> (i32, i32) {
    %c0_i32 = arith.constant 0 : i32
    %c0_i32_0 = arith.constant 0 : i32
    return %arg0, %c0_i32 : i32, i32
  }
  func.func @transform_9(%arg0: i32) -> (i32, i32) {
    %c0_i32 = arith.constant 0 : i32
    %c0_i32_0 = arith.constant 0 : i32
    return %arg0, %c0_i32 : i32, i32
  }
  func.func @transform_10(%arg0: i32) -> (i32, i32, i32) {
    %c0_i32 = arith.constant 0 : i32
    %c0_i32_0 = arith.constant 0 : i32
    %c0_i32_1 = arith.constant 0 : i32
    return %arg0, %c0_i32, %c0_i32_0 : i32, i32, i32
  }
  func.func @transform_11(%arg0: i32) -> (i32, i32, i32) {
    %c0_i32 = arith.constant 0 : i32
    %c0_i32_0 = arith.constant 0 : i32
    %c0_i32_1 = arith.constant 0 : i32
    return %arg0, %c0_i32, %c0_i32_0 : i32, i32, i32
  }
}

module attributes {stable_mosaic.version = 11 : i64} {
  func.func @_gemm_dual_scale_kernel(%arg0: i32, %arg1: memref<64x288xbf16, #tpu.memory_space<vmem>>, %arg2: memref<1x1x288xbf16, #tpu.memory_space<vmem>>, %arg3: memref<288x64xbf16, #tpu.memory_space<vmem>>, %arg4: memref<288x64xbf16, #tpu.memory_space<vmem>>, %arg5: memref<1x64xf32, #tpu.memory_space<vmem>>, %arg6: memref<1x64xf32, #tpu.memory_space<vmem>>, %arg7: memref<64x64xbf16, #tpu.memory_space<vmem>>, %arg8: memref<64x64xbf16, #tpu.memory_space<vmem>>) attributes {dimension_semantics = [#tpu.dimension_semantics<parallel>], iteration_bounds = array<i64: 2>, scalar_prefetch = 0 : i64, scratch_operands = 0 : i64, tpu.core_type = #tpu.core_type<tc>, window_params = [{transform_indices = @transform_0, window_bounds = array<i64: 64, 288>}, {transform_indices = @transform_1, window_bounds = array<i64: 1, 1, 288>}, {pipeline_mode = #tpu.pipeline_mode<synchronous>, transform_indices = @transform_2, window_bounds = array<i64: 288, 64>}, {pipeline_mode = #tpu.pipeline_mode<synchronous>, transform_indices = @transform_3, window_bounds = array<i64: 288, 64>}, {pipeline_mode = #tpu.pipeline_mode<synchronous>, transform_indices = @transform_4, window_bounds = array<i64: 1, 64>}, {pipeline_mode = #tpu.pipeline_mode<synchronous>, transform_indices = @transform_5, window_bounds = array<i64: 1, 64>}, {transform_indices = @transform_6, window_bounds = array<i64: 64, 64>}, {transform_indices = @transform_7, window_bounds = array<i64: 64, 64>}]} {
    %c0 = arith.constant 0 : index
    %c0_0 = arith.constant 0 : index
    %0 = vector.load %arg1[%c0, %c0_0] : memref<64x288xbf16, #tpu.memory_space<vmem>>, vector<64x288xbf16>
    %c0_1 = arith.constant 0 : index
    %c0_2 = arith.constant 0 : index
    %c0_3 = arith.constant 0 : index
    %1 = vector.load %arg2[%c0_1, %c0_2, %c0_3] : memref<1x1x288xbf16, #tpu.memory_space<vmem>>, vector<1x1x288xbf16>
    %2 = vector.shape_cast %1 : vector<1x1x288xbf16> to vector<1x288xbf16>
    %3 = vector.broadcast %2 : vector<1x288xbf16> to vector<64x288xbf16>
    %4 = arith.mulf %0, %3 : vector<64x288xbf16>
    %c0_4 = arith.constant 0 : index
    %c0_5 = arith.constant 0 : index
    %5 = vector.load %arg3[%c0_4, %c0_5] : memref<288x64xbf16, #tpu.memory_space<vmem>>, vector<288x64xbf16>
    %cst = arith.constant dense<0.000000e+00> : vector<64x64xf32>
    %6 = tpu.matmul %4, %5, %cst {dimension_numbers = #tpu.dot_dimension_numbers<[1], [0], [0], [1], [0, 0, 1, 1], [], []>} : vector<64x288xbf16>, vector<288x64xbf16>, vector<64x64xf32> -> vector<64x64xf32>
    %c0_6 = arith.constant 0 : index
    %c0_7 = arith.constant 0 : index
    %7 = vector.load %arg4[%c0_6, %c0_7] : memref<288x64xbf16, #tpu.memory_space<vmem>>, vector<288x64xbf16>
    %cst_8 = arith.constant dense<0.000000e+00> : vector<64x64xf32>
    %8 = tpu.matmul %0, %7, %cst_8 {dimension_numbers = #tpu.dot_dimension_numbers<[1], [0], [0], [1], [0, 0, 1, 1], [], []>} : vector<64x288xbf16>, vector<288x64xbf16>, vector<64x64xf32> -> vector<64x64xf32>
    %c0_9 = arith.constant 0 : index
    %c0_10 = arith.constant 0 : index
    %9 = vector.load %arg5[%c0_9, %c0_10] : memref<1x64xf32, #tpu.memory_space<vmem>>, vector<1x64xf32>
    %c0_11 = arith.constant 0 : index
    %c0_12 = arith.constant 0 : index
    %10 = vector.load %arg6[%c0_11, %c0_12] : memref<1x64xf32, #tpu.memory_space<vmem>>, vector<1x64xf32>
    %11 = vector.broadcast %9 : vector<1x64xf32> to vector<64x64xf32>
    %12 = arith.mulf %6, %11 : vector<64x64xf32>
    %13 = vector.broadcast %10 : vector<1x64xf32> to vector<64x64xf32>
    %14 = arith.addf %12, %13 : vector<64x64xf32>
    %cst_13 = arith.constant 0.000000e+00 : f32
    %15 = vector.broadcast %cst_13 : f32 to vector<64x64xf32>
    %16 = arith.maximumf %14, %15 : vector<64x64xf32>
    %17 = arith.truncf %16 : vector<64x64xf32> to vector<64x64xbf16>
    %c0_14 = arith.constant 0 : index
    %c0_15 = arith.constant 0 : index
    %18 = vector.load %arg7[%c0_14, %c0_15] : memref<64x64xbf16, #tpu.memory_space<vmem>>, vector<64x64xbf16>
    tpu.vector_store %arg7[%c0_14, %c0_15], %17 {strides = array<i32>} : memref<64x64xbf16, #tpu.memory_space<vmem>>, vector<64x64xbf16>,
    %19 = arith.truncf %8 : vector<64x64xf32> to vector<64x64xbf16>
    %c0_16 = arith.constant 0 : index
    %c0_17 = arith.constant 0 : index
    %20 = vector.load %arg8[%c0_16, %c0_17] : memref<64x64xbf16, #tpu.memory_space<vmem>>, vector<64x64xbf16>
    tpu.vector_store %arg8[%c0_16, %c0_17], %19 {strides = array<i32>} : memref<64x64xbf16, #tpu.memory_space<vmem>>, vector<64x64xbf16>,
    return
  }
  func.func @transform_0(%arg0: i32) -> (i32, i32) {
    %c0_i32 = arith.constant 0 : i32
    %c0_i32_0 = arith.constant 0 : i32
    return %arg0, %c0_i32 : i32, i32
  }
  func.func @transform_1(%arg0: i32) -> (i32, i32, i32) {
    %c0_i32 = arith.constant 0 : i32
    %c0_i32_0 = arith.constant 0 : i32
    %c0_i32_1 = arith.constant 0 : i32
    return %arg0, %c0_i32, %c0_i32_0 : i32, i32, i32
  }
  func.func @transform_2(%arg0: i32) -> (i32, i32) {
    %c0_i32 = arith.constant 0 : i32
    %c0_i32_0 = arith.constant 0 : i32
    %c0_i32_1 = arith.constant 0 : i32
    return %c0_i32, %c0_i32_0 : i32, i32
  }
  func.func @transform_3(%arg0: i32) -> (i32, i32) {
    %c0_i32 = arith.constant 0 : i32
    %c0_i32_0 = arith.constant 0 : i32
    %c0_i32_1 = arith.constant 0 : i32
    return %c0_i32, %c0_i32_0 : i32, i32
  }
  func.func @transform_4(%arg0: i32) -> (i32, i32) {
    %c0_i32 = arith.constant 0 : i32
    %c0_i32_0 = arith.constant 0 : i32
    %c0_i32_1 = arith.constant 0 : i32
    return %c0_i32, %c0_i32_0 : i32, i32
  }
  func.func @transform_5(%arg0: i32) -> (i32, i32) {
    %c0_i32 = arith.constant 0 : i32
    %c0_i32_0 = arith.constant 0 : i32
    %c0_i32_1 = arith.constant 0 : i32
    return %c0_i32, %c0_i32_0 : i32, i32
  }
  func.func @transform_6(%arg0: i32) -> (i32, i32) {
    %c0_i32 = arith.constant 0 : i32
    %c0_i32_0 = arith.constant 0 : i32
    return %arg0, %c0_i32 : i32, i32
  }
  func.func @transform_7(%arg0: i32) -> (i32, i32) {
    %c0_i32 = arith.constant 0 : i32
    %c0_i32_0 = arith.constant 0 : i32
    return %arg0, %c0_i32 : i32, i32
  }
}

module attributes {stable_mosaic.version = 11 : i64} {
  func.func @_gemm_add_final_kernel(%arg0: i32, %arg1: memref<64x576xbf16, #tpu.memory_space<vmem>>, %arg2: memref<576x64xbf16, #tpu.memory_space<vmem>>, %arg3: memref<64x64xbf16, #tpu.memory_space<vmem>>, %arg4: memref<1x64xf32, #tpu.memory_space<vmem>>, %arg5: memref<1x64xf32, #tpu.memory_space<vmem>>, %arg6: memref<64x10xf32, #tpu.memory_space<vmem>>, %arg7: memref<10x64xf32, #tpu.memory_space<vmem>>, %arg8: memref<1x10xf32, #tpu.memory_space<vmem>>, %arg9: memref<64x10xf32, #tpu.memory_space<vmem>>, %arg10: memref<1x10xf32, #tpu.memory_space<vmem>>, %arg11: memref<1x1x10xf32, #tpu.memory_space<vmem>>, %arg12: memref<1x1x10xf32, #tpu.memory_space<vmem>>) attributes {dimension_semantics = [#tpu.dimension_semantics<parallel>], iteration_bounds = array<i64: 2>, scalar_prefetch = 0 : i64, scratch_operands = 0 : i64, tpu.core_type = #tpu.core_type<tc>, window_params = [{transform_indices = @transform_0, window_bounds = array<i64: 64, 576>}, {pipeline_mode = #tpu.pipeline_mode<synchronous>, transform_indices = @transform_1, window_bounds = array<i64: 576, 64>}, {transform_indices = @transform_2, window_bounds = array<i64: 64, 64>}, {pipeline_mode = #tpu.pipeline_mode<synchronous>, transform_indices = @transform_3, window_bounds = array<i64: 1, 64>}, {pipeline_mode = #tpu.pipeline_mode<synchronous>, transform_indices = @transform_4, window_bounds = array<i64: 1, 64>}, {pipeline_mode = #tpu.pipeline_mode<synchronous>, transform_indices = @transform_5, window_bounds = array<i64: 64, 10>}, {pipeline_mode = #tpu.pipeline_mode<synchronous>, transform_indices = @transform_6, window_bounds = array<i64: 10, 64>}, {pipeline_mode = #tpu.pipeline_mode<synchronous>, transform_indices = @transform_7, window_bounds = array<i64: 1, 10>}, {pipeline_mode = #tpu.pipeline_mode<synchronous>, transform_indices = @transform_8, window_bounds = array<i64: 64, 10>}, {pipeline_mode = #tpu.pipeline_mode<synchronous>, transform_indices = @transform_9, window_bounds = array<i64: 1, 10>}, {transform_indices = @transform_10, window_bounds = array<i64: 1, 1, 10>}, {transform_indices = @transform_11, window_bounds = array<i64: 1, 1, 10>}]} {
    %c0 = arith.constant 0 : index
    %c0_0 = arith.constant 0 : index
    %0 = vector.load %arg1[%c0, %c0_0] : memref<64x576xbf16, #tpu.memory_space<vmem>>, vector<64x576xbf16>
    %c0_1 = arith.constant 0 : index
    %c0_2 = arith.constant 0 : index
    %1 = vector.load %arg2[%c0_1, %c0_2] : memref<576x64xbf16, #tpu.memory_space<vmem>>, vector<576x64xbf16>
    %cst = arith.constant dense<0.000000e+00> : vector<64x64xf32>
    %2 = tpu.matmul %0, %1, %cst {dimension_numbers = #tpu.dot_dimension_numbers<[1], [0], [0], [1], [0, 0, 1, 1], [], []>} : vector<64x576xbf16>, vector<576x64xbf16>, vector<64x64xf32> -> vector<64x64xf32>
    %c0_3 = arith.constant 0 : index
    %c0_4 = arith.constant 0 : index
    %3 = vector.load %arg3[%c0_3, %c0_4] : memref<64x64xbf16, #tpu.memory_space<vmem>>, vector<64x64xbf16>
    %4 = arith.extf %3 : vector<64x64xbf16> to vector<64x64xf32>
    %5 = arith.addf %2, %4 : vector<64x64xf32>
    %c0_5 = arith.constant 0 : index
    %c0_6 = arith.constant 0 : index
    %6 = vector.load %arg4[%c0_5, %c0_6] : memref<1x64xf32, #tpu.memory_space<vmem>>, vector<1x64xf32>
    %c0_7 = arith.constant 0 : index
    %c0_8 = arith.constant 0 : index
    %7 = vector.load %arg5[%c0_7, %c0_8] : memref<1x64xf32, #tpu.memory_space<vmem>>, vector<1x64xf32>
    %8 = vector.broadcast %6 : vector<1x64xf32> to vector<64x64xf32>
    %9 = arith.mulf %5, %8 : vector<64x64xf32>
    %10 = vector.broadcast %7 : vector<1x64xf32> to vector<64x64xf32>
    %11 = arith.addf %9, %10 : vector<64x64xf32>
    %cst_9 = arith.constant 0.000000e+00 : f32
    %12 = vector.broadcast %cst_9 : f32 to vector<64x64xf32>
    %13 = arith.maximumf %11, %12 : vector<64x64xf32>
    %cst_10 = arith.constant dense<0.000000e+00> : vector<64xf32>
    %14 = vector.multi_reduction <add>, %13, %cst_10 [0] : vector<64x64xf32> to vector<64xf32>
    %15 = vector.shape_cast %14 : vector<64xf32> to vector<1x64xf32>
    %cst_11 = arith.constant 6.400000e+01 : f32
    %16 = vector.broadcast %cst_11 : f32 to vector<1x64xf32>
    %17 = arith.divf %15, %16 : vector<1x64xf32>
    %c0_12 = arith.constant 0 : index
    %c0_13 = arith.constant 0 : index
    %18 = vector.load %arg6[%c0_12, %c0_13] : memref<64x10xf32, #tpu.memory_space<vmem>>, vector<64x10xf32>
    %cst_14 = arith.constant dense<0.000000e+00> : vector<1x10xf32>
    %19 = tpu.matmul %17, %18, %cst_14 {dimension_numbers = #tpu.dot_dimension_numbers<[1], [0], [0], [1], [0, 0, 1, 1], [], []>} : vector<1x64xf32>, vector<64x10xf32>, vector<1x10xf32> -> vector<1x10xf32>
    %c0_15 = arith.constant 0 : index
    %c0_16 = arith.constant 0 : index
    %20 = vector.load %arg8[%c0_15, %c0_16] : memref<1x10xf32, #tpu.memory_space<vmem>>, vector<1x10xf32>
    %21 = arith.addf %19, %20 : vector<1x10xf32>
    %22 = tpu.iota {dimensions = array<i32: 1>} : vector<1x10xi32>
    %cst_17 = arith.constant dense<0xFF800000> : vector<1xf32>
    %23 = vector.multi_reduction <maximumf>, %21, %cst_17 [1] : vector<1x10xf32> to vector<1xf32>
    %24 = vector.shape_cast %23 : vector<1xf32> to vector<1x1xf32>
    %25 = vector.broadcast %24 : vector<1x1xf32> to vector<1x10xf32>
    %26 = arith.cmpf oge, %21, %25 : vector<1x10xf32>
    %c10_i32 = arith.constant 10 : i32
    %27 = vector.broadcast %c10_i32 : i32 to vector<1x10xi32>
    %28 = arith.select %26, %22, %27 : vector<1x10xi1>, vector<1x10xi32>
    %cst_18 = arith.constant dense<2147483647> : vector<1xi32>
    %29 = vector.multi_reduction <minsi>, %28, %cst_18 [1] : vector<1x10xi32> to vector<1xi32>
    %30 = vector.shape_cast %29 : vector<1xi32> to vector<1x1xi32>
    %31 = vector.broadcast %30 : vector<1x1xi32> to vector<1x10xi32>
    %32 = arith.cmpi eq, %22, %31 : vector<1x10xi32>
    %33 = arith.extui %32 : vector<1x10xi1> to vector<1x10xi32>
    %34 = arith.sitofp %33 : vector<1x10xi32> to vector<1x10xf32>
    %c0_19 = arith.constant 0 : index
    %c0_20 = arith.constant 0 : index
    %35 = vector.load %arg7[%c0_19, %c0_20] : memref<10x64xf32, #tpu.memory_space<vmem>>, vector<10x64xf32>
    %cst_21 = arith.constant dense<0.000000e+00> : vector<1x64xf32>
    %36 = tpu.matmul %34, %35, %cst_21 {dimension_numbers = #tpu.dot_dimension_numbers<[1], [0], [0], [1], [0, 0, 1, 1], [], []>} : vector<1x10xf32>, vector<10x64xf32>, vector<1x64xf32> -> vector<1x64xf32>
    %37 = arith.mulf %17, %36 : vector<1x64xf32>
    %c0_22 = arith.constant 0 : index
    %c0_23 = arith.constant 0 : index
    %38 = vector.load %arg9[%c0_22, %c0_23] : memref<64x10xf32, #tpu.memory_space<vmem>>, vector<64x10xf32>
    %cst_24 = arith.constant dense<0.000000e+00> : vector<1x10xf32>
    %39 = tpu.matmul %37, %38, %cst_24 {dimension_numbers = #tpu.dot_dimension_numbers<[1], [0], [0], [1], [0, 0, 1, 1], [], []>} : vector<1x64xf32>, vector<64x10xf32>, vector<1x10xf32> -> vector<1x10xf32>
    %c0_25 = arith.constant 0 : index
    %c0_26 = arith.constant 0 : index
    %40 = vector.load %arg10[%c0_25, %c0_26] : memref<1x10xf32, #tpu.memory_space<vmem>>, vector<1x10xf32>
    %41 = arith.addf %39, %40 : vector<1x10xf32>
    %c0_27 = arith.constant 0 : index
    %c0_28 = arith.constant 0 : index
    %c0_29 = arith.constant 0 : index
    %42 = vector.load %arg11[%c0_27, %c0_28, %c0_29] : memref<1x1x10xf32, #tpu.memory_space<vmem>>, vector<1x1x10xf32>
    %43 = vector.shape_cast %42 : vector<1x1x10xf32> to vector<1x10xf32>
    %44 = vector.shape_cast %41 : vector<1x10xf32> to vector<1x1x10xf32>
    tpu.vector_store %arg11[%c0_27, %c0_28, %c0_29], %44 {strides = array<i32>} : memref<1x1x10xf32, #tpu.memory_space<vmem>>, vector<1x1x10xf32>,
    %c0_30 = arith.constant 0 : index
    %c0_31 = arith.constant 0 : index
    %c0_32 = arith.constant 0 : index
    %45 = vector.load %arg12[%c0_30, %c0_31, %c0_32] : memref<1x1x10xf32, #tpu.memory_space<vmem>>, vector<1x1x10xf32>
    %46 = vector.shape_cast %45 : vector<1x1x10xf32> to vector<1x10xf32>
    %47 = vector.shape_cast %21 : vector<1x10xf32> to vector<1x1x10xf32>
    tpu.vector_store %arg12[%c0_30, %c0_31, %c0_32], %47 {strides = array<i32>} : memref<1x1x10xf32, #tpu.memory_space<vmem>>, vector<1x1x10xf32>,
    return
  }
  func.func @transform_0(%arg0: i32) -> (i32, i32) {
    %c0_i32 = arith.constant 0 : i32
    %c0_i32_0 = arith.constant 0 : i32
    return %arg0, %c0_i32 : i32, i32
  }
  func.func @transform_1(%arg0: i32) -> (i32, i32) {
    %c0_i32 = arith.constant 0 : i32
    %c0_i32_0 = arith.constant 0 : i32
    %c0_i32_1 = arith.constant 0 : i32
    return %c0_i32, %c0_i32_0 : i32, i32
  }
  func.func @transform_2(%arg0: i32) -> (i32, i32) {
    %c0_i32 = arith.constant 0 : i32
    %c0_i32_0 = arith.constant 0 : i32
    return %arg0, %c0_i32 : i32, i32
  }
  func.func @transform_3(%arg0: i32) -> (i32, i32) {
    %c0_i32 = arith.constant 0 : i32
    %c0_i32_0 = arith.constant 0 : i32
    %c0_i32_1 = arith.constant 0 : i32
    return %c0_i32, %c0_i32_0 : i32, i32
  }
  func.func @transform_4(%arg0: i32) -> (i32, i32) {
    %c0_i32 = arith.constant 0 : i32
    %c0_i32_0 = arith.constant 0 : i32
    %c0_i32_1 = arith.constant 0 : i32
    return %c0_i32, %c0_i32_0 : i32, i32
  }
  func.func @transform_5(%arg0: i32) -> (i32, i32) {
    %c0_i32 = arith.constant 0 : i32
    %c0_i32_0 = arith.constant 0 : i32
    %c0_i32_1 = arith.constant 0 : i32
    return %c0_i32, %c0_i32_0 : i32, i32
  }
  func.func @transform_6(%arg0: i32) -> (i32, i32) {
    %c0_i32 = arith.constant 0 : i32
    %c0_i32_0 = arith.constant 0 : i32
    %c0_i32_1 = arith.constant 0 : i32
    return %c0_i32, %c0_i32_0 : i32, i32
  }
  func.func @transform_7(%arg0: i32) -> (i32, i32) {
    %c0_i32 = arith.constant 0 : i32
    %c0_i32_0 = arith.constant 0 : i32
    %c0_i32_1 = arith.constant 0 : i32
    return %c0_i32, %c0_i32_0 : i32, i32
  }
  func.func @transform_8(%arg0: i32) -> (i32, i32) {
    %c0_i32 = arith.constant 0 : i32
    %c0_i32_0 = arith.constant 0 : i32
    %c0_i32_1 = arith.constant 0 : i32
    return %c0_i32, %c0_i32_0 : i32, i32
  }
  func.func @transform_9(%arg0: i32) -> (i32, i32) {
    %c0_i32 = arith.constant 0 : i32
    %c0_i32_0 = arith.constant 0 : i32
    %c0_i32_1 = arith.constant 0 : i32
    return %c0_i32, %c0_i32_0 : i32, i32
  }
  func.func @transform_10(%arg0: i32) -> (i32, i32, i32) {
    %c0_i32 = arith.constant 0 : i32
    %c0_i32_0 = arith.constant 0 : i32
    %c0_i32_1 = arith.constant 0 : i32
    return %arg0, %c0_i32, %c0_i32_0 : i32, i32, i32
  }
  func.func @transform_11(%arg0: i32) -> (i32, i32, i32) {
    %c0_i32 = arith.constant 0 : i32
    %c0_i32_0 = arith.constant 0 : i32
    %c0_i32_1 = arith.constant 0 : i32
    return %arg0, %c0_i32, %c0_i32_0 : i32, i32, i32
  }
}

</mosaic_0001>

<bundles_post_ra>
// kernel: wideresnet_forward.7
= control target key start
LH: loop header
LB: loop body
LE: loop exit
PB: predicated region body
PF: predicated region fallthrough
CT: control target
= control target key end

     0   :  { %s4195_s18 = smov 0   ;;  %s5593_s0 = inlined_call_operand.vmem [shape: bf16[2048,27], index: 0, kind: input, shape index: {}]   ;;  %s5594_s1 = inlined_call_operand.vmem [shape: bf16[27,16], index: 1, kind: input, shape index: {}]   ;;  %s5595_s2 = inlined_call_operand.vmem [shape: f32[1,16], index: 2, kind: input, shape index: {}]   ;;  %s5596_s3 = inlined_call_operand.vmem [shape: f32[1,16], index: 3, kind: input, shape index: {}]   ;;  %s5597_s4 = inlined_call_operand.vmem [shape: bf16[2048,16], index: 4, kind: output, shape index: {0}]   ;;  %s5598_s5 = inlined_call_operand.vmem [shape: bf16[2048,16], index: 5, kind: output, shape index: {1}]  }
   0x1 LB: > { %s3220_s19 = sadd.s32 4294967295, %s4162_s18   ;;  %p3224_p0 = scmp.ge.s32.totalorder %s4162_s18, 1  ;;  %s4162_s18 = sphi %s4195_s18, %s16_s18  }
   0x2   : > { %p191_p1 = scmp.lt.s32.totalorder %s4162_s18, 3 }
   0x4   : > { %p192_p2 = pnand %p3224_p0, %p191_p1 }
   0x5   : > { %s3225_s22 = sshll.u32 (!%p192_p2), %s3220_s19, 7 }
   0x6   : > { %195 = sbr.rel (%p192_p2) target bundleno = 412 (0x19c), region = 36  ;;  %p225_p3 = scmp.lt.s32.totalorder (!%p192_p2), %s3225_s22, 255 }
   0xb   : > { %v4088_v0 = vld [vmem:[%s5594_s1 + $0x8] sm:$0x3f]   ;;  %vm899_vm0 = vcmask 1044480   ;;  %vm900_vm1 = vcmask 1045504   ;;  %v4164_v1 = vmov 65535   ;;  %v4089_v5 = vld [vmem:[%s5594_s1] sm:$0xff]  }
   0xc   : > { %v901_v2 = vsel %vm899_vm0, 4294967295, %v4164_v1  ;;  %s5600_s22 = smov (!%p225_p3, %s3225_s22), 255  ;;  %vm706_vm2 = vcmask 220160   ;;  %vm1963_vm3 = vcmask 125952  }
   0xd   : > { %v902_v3 = vsel %vm900_vm1, %v901_v2, 0  ;;  %s4209_s25 = sshll.u32 %s5600_s22, 2 }
   0xe   : > { %v904_v4 = vand.u32 %v4088_v0, %v902_v3  ;;  %s4215_s28 = scalar_lea.vmem %s5593_s0, %s4209_s25  ;;  %s4354_s8 = scalar_lea.vmem %s5597_s4, %s4209_s25 }
   0xf   : > { %v4090_v6 = vld [vmem:[%s4215_s28] sm:$0xff]   ;;  %v4092_v8 = vld [vmem:[%s4215_s28 + $0x8] sm:$0xff]   ;;  %v4094_v10 = vld [vmem:[%s4215_s28 + $0x10] sm:$0xff]   ;;  %s4378_s13 = scalar_lea.vmem %s5598_s5, %s4209_s25 }
  0x10   : > { %3943 = vmatprep.subr.bf16.mxu0 %v904_v4  ;;  %4075 = vmatprep.subr.bf16.mxu1 %v904_v4  ;;  %v4091_v7 = vld [vmem:[%s4215_s28 + $0x100] sm:$0xff]   ;;  %v4093_v9 = vld [vmem:[%s4215_s28 + $0x108] sm:$0xff]   ;;  %v4095_v11 = vld [vmem:[%s4215_s28 + $0x110] sm:$0xff]  }
  0x11   : > { %3944 = vmatpush3.bf16.msra.mxu0 %v904_v4  ;;  %4077 = vmatpush3.bf16.msra.mxu1 %v904_v4  ;;  %v4096_v12 = vld [vmem:[%s4215_s28 + $0x18] sm:$0xff]   ;;  %v4098_v14 = vld [vmem:[%s4215_s28 + $0x20] sm:$0xff]   ;;  %v4100_v16 = vld [vmem:[%s4215_s28 + $0x28] sm:$0xff]  }
  0x12   : > { %3945 = vmatprep.subr.bf16.mxu0 %v4089_v5  ;;  %4076 = vmatprep.subr.bf16.mxu1 %v4089_v5  ;;  %v4097_v13 = vld [vmem:[%s4215_s28 + $0x118] sm:$0xff]   ;;  %v4099_v15 = vld [vmem:[%s4215_s28 + $0x120] sm:$0xff]   ;;  %v4101_v17 = vld [vmem:[%s4215_s28 + $0x128] sm:$0xff]  }
  0x13   : > { %3947 = vmatprep.mubr.msk.bf16.mxu0 %vm706_vm2, %v4090_v6  ;;  %4011 = vmatprep.mubr.msk.bf16.mxu1 %vm706_vm2, %v4091_v7  ;;  %v4102_v18 = vld [vmem:[%s4215_s28 + $0x30] sm:$0xff]   ;;  %v4104_v20 = vld [vmem:[%s4215_s28 + $0x38] sm:$0xff]   ;;  %v4106_v22 = vld [vmem:[%s4215_s28 + $0x40] sm:$0xff]  }
  0x14   : > { %v4103_v19 = vld [vmem:[%s4215_s28 + $0x130] sm:$0xff]   ;;  %v4105_v21 = vld [vmem:[%s4215_s28 + $0x138] sm:$0xff]   ;;  %v4107_v23 = vld [vmem:[%s4215_s28 + $0x140] sm:$0xff]  }
  0x15   : > { %3946 = vmatpush3.bf16.msra.mxu0 %v4089_v5  ;;  %4078 = vmatpush3.bf16.msra.mxu1 %v4089_v5  ;;  %v4108_v24 = vld [vmem:[%s4215_s28 + $0x48] sm:$0xff]   ;;  %v4110_v26 = vld [vmem:[%s4215_s28 + $0x50] sm:$0xff]   ;;  %v4112_v28 = vld [vmem:[%s4215_s28 + $0x58] sm:$0xff]  }
  0x16   : > { %v4109_v25 = vld [vmem:[%s4215_s28 + $0x148] sm:$0xff]   ;;  %v4111_v27 = vld [vmem:[%s4215_s28 + $0x150] sm:$0xff]   ;;  %v4113_v29 = vld [vmem:[%s4215_s28 + $0x158] sm:$0xff]  }
  0x17   : > { %v4114_v30 = vld [vmem:[%s4215_s28 + $0x60] sm:$0xff]   ;;  %v4116_v32 = vld [vmem:[%s4215_s28 + $0x68] sm:$0xff]   ;;  %v4118_v34 = vld [vmem:[%s4215_s28 + $0x70] sm:$0xff]  }
  0x18   : > { %3948 = vmatmul.mubr.msk.bf16.vlgmr.msra.gmra.mxu0 %vm706_vm2, %v4092_v8  ;;  %4012 = vmatmul.mubr.msk.bf16.vlgmr.msra.gmra.mxu1 %vm706_vm2, %v4093_v9  ;;  %v4115_v31 = vld [vmem:[%s4215_s28 + $0x160] sm:$0xff]   ;;  %v4117_v33 = vld [vmem:[%s4215_s28 + $0x168] sm:$0xff]   ;;  %v4119_v35 = vld [vmem:[%s4215_s28 + $0x170] sm:$0xff]  }
  0x19   : > { %3951 = vmatprep.mubr.msk.bf16.mxu0 %vm706_vm2, %v4094_v10  ;;  %4015 = vmatprep.mubr.msk.bf16.mxu1 %vm706_vm2, %v4095_v11  ;;  %v4120_v36 = vld [vmem:[%s4215_s28 + $0x78] sm:$0xff]   ;;  %v4122_v38 = vld [vmem:[%s4215_s28 + $0x80] sm:$0xff]   ;;  %v4124_v40 = vld [vmem:[%s4215_s28 + $0x88] sm:$0xff]  }
  0x1a   : > { %v4121_v37 = vld [vmem:[%s4215_s28 + $0x178] sm:$0xff]   ;;  %v4123_v39 = vld [vmem:[%s4215_s28 + $0x180] sm:$0xff]   ;;  %v4125_v41 = vld [vmem:[%s4215_s28 + $0x188] sm:$0xff]  }
  0x1b   : > { %v4126_v42 = vld [vmem:[%s4215_s28 + $0x90] sm:$0xff]   ;;  %v4128_v44 = vld [vmem:[%s4215_s28 + $0x98] sm:$0xff]   ;;  %v4130_v46 = vld [vmem:[%s4215_s28 + $0xa0] sm:$0xff]  }
  0x1c   : > { %v4127_v43 = vld [vmem:[%s4215_s28 + $0x190] sm:$0xff]   ;;  %v4129_v45 = vld [vmem:[%s4215_s28 + $0x198] sm:$0xff]   ;;  %v4131_v47 = vld [vmem:[%s4215_s28 + $0x1a0] sm:$0xff]  }
  0x1d   : > { %v4132_v48 = vld [vmem:[%s4215_s28 + $0xa8] sm:$0xff]   ;;  %v4134_v50 = vld [vmem:[%s4215_s28 + $0xb0] sm:$0xff]   ;;  %v4136_v52 = vld [vmem:[%s4215_s28 + $0xb8] sm:$0xff]  }
  0x1e   : > { %v4133_v49 = vld [vmem:[%s4215_s28 + $0x1a8] sm:$0xff]   ;;  %v4135_v51 = vld [vmem:[%s4215_s28 + $0x1b0] sm:$0xff]   ;;  %v4137_v53 = vld [vmem:[%s4215_s28 + $0x1b8] sm:$0xff]  }
  0x1f   : > { %v4138_v54 = vld [vmem:[%s4215_s28 + $0xc0] sm:$0xff]   ;;  %v4140_v56 = vld [vmem:[%s4215_s28 + $0xc8] sm:$0xff]   ;;  %v4142_v58 = vld [vmem:[%s4215_s28 + $0xd0] sm:$0xff]  }
  0x20   : > { %3952 = vmatmul.mubr.msk.bf16.gmra.mxu0 %vm706_vm2, %v4096_v12  ;;  %4016 = vmatmul.mubr.msk.bf16.gmra.mxu1 %vm706_vm2, %v4097_v13  ;;  %v4139_v55 = vld [vmem:[%s4215_s28 + $0x1c0] sm:$0xff]   ;;  %v4141_v57 = vld [vmem:[%s4215_s28 + $0x1c8] sm:$0xff]   ;;  %v4143_v59 = vld [vmem:[%s4215_s28 + $0x1d0] sm:$0xff]  }
  0x21   : > { %3955 = vmatprep.mubr.msk.bf16.mxu0 %vm706_vm2, %v4098_v14  ;;  %4019 = vmatprep.mubr.msk.bf16.mxu1 %vm706_vm2, %v4099_v15  ;;  %v4144_v60 = vld [vmem:[%s4215_s28 + $0xd8] sm:$0xff]   ;;  %v4146_v62 = vld [vmem:[%s4215_s28 + $0xe0] sm:$0xff]   ;;  %v4148_v0 = vld [vmem:[%s4215_s28 + $0xe8] sm:$0xff]  }
  0x22   : > { %v4145_v61 = vld [vmem:[%s4215_s28 + $0x1d8] sm:$0xff]   ;;  %v4147_v63 = vld [vmem:[%s4215_s28 + $0x1e0] sm:$0xff]   ;;  %v4149_v1 = vld [vmem:[%s4215_s28 + $0x1e8] sm:$0xff]  }
  0x23   : > { %v4150_v2 = vld [vmem:[%s4215_s28 + $0xf0] sm:$0xff]   ;;  %v4152_v4 = vld [vmem:[%s4215_s28 + $0xf8] sm:$0xff]   ;;  %v4348_v6 = vld [vmem:[%s5595_s2] ss:$0 sm:$0xff] }
  0x24   : > { %v4151_v3 = vld [vmem:[%s4215_s28 + $0x1f0] sm:$0xff]   ;;  %v4153_v5 = vld [vmem:[%s4215_s28 + $0x1f8] sm:$0xff]   ;;  %v4359_v8 = vld [vmem:[%s5596_s3] ss:$0 sm:$0xff] }
  0x28   : > { %3956 = vmatmul.mubr.msk.bf16.gmra.mxu0 %vm706_vm2, %v4100_v16  ;;  %4020 = vmatmul.mubr.msk.bf16.gmra.mxu1 %vm706_vm2, %v4101_v17 }
  0x29   : > { %3959 = vmatprep.mubr.msk.bf16.mxu0 %vm706_vm2, %v4102_v18  ;;  %4023 = vmatprep.mubr.msk.bf16.mxu1 %vm706_vm2, %v4103_v19 }
  0x30   : > { %3960 = vmatmul.mubr.msk.bf16.gmra.mxu0 %vm706_vm2, %v4104_v20  ;;  %4024 = vmatmul.mubr.msk.bf16.gmra.mxu1 %vm706_vm2, %v4105_v21 }
  0x31   : > { %3963 = vmatprep.mubr.msk.bf16.mxu0 %vm706_vm2, %v4106_v22  ;;  %4027 = vmatprep.mubr.msk.bf16.mxu1 %vm706_vm2, %v4107_v23 }
  0x38   : > { %3964 = vmatmul.mubr.msk.bf16.gmra.mxu0 %vm706_vm2, %v4108_v24  ;;  %4028 = vmatmul.mubr.msk.bf16.gmra.mxu1 %vm706_vm2, %v4109_v25 }
  0x39   : > { %3967 = vmatprep.mubr.msk.bf16.mxu0 %vm706_vm2, %v4110_v26  ;;  %4031 = vmatprep.mubr.msk.bf16.mxu1 %vm706_vm2, %v4111_v27 }
  0x40   : > { %3968 = vmatmul.mubr.msk.bf16.gmra.mxu0 %vm706_vm2, %v4112_v28  ;;  %4032 = vmatmul.mubr.msk.bf16.gmra.mxu1 %vm706_vm2, %v4113_v29 }
  0x41   : > { %3971 = vmatprep.mubr.msk.bf16.mxu0 %vm706_vm2, %v4114_v30  ;;  %4035 = vmatprep.mubr.msk.bf16.mxu1 %vm706_vm2, %v4115_v31 }
  0x48   : > { %3972 = vmatmul.mubr.msk.bf16.gmra.mxu0 %vm706_vm2, %v4116_v32  ;;  %4036 = vmatmul.mubr.msk.bf16.gmra.mxu1 %vm706_vm2, %v4117_v33 }
  0x49   : > { %3975 = vmatprep.mubr.msk.bf16.mxu0 %vm706_vm2, %v4118_v34  ;;  %4039 = vmatprep.mubr.msk.bf16.mxu1 %vm706_vm2, %v4119_v35 }
  0x50   : > { %3976 = vmatmul.mubr.msk.bf16.gmra.mxu0 %vm706_vm2, %v4120_v36  ;;  %4040 = vmatmul.mubr.msk.bf16.gmra.mxu1 %vm706_vm2, %v4121_v37 }
  0x51   : > { %3979 = vmatprep.mubr.msk.bf16.mxu0 %vm706_vm2, %v4122_v38  ;;  %4043 = vmatprep.mubr.msk.bf16.mxu1 %vm706_vm2, %v4123_v39 }
  0x58   : > { %3980 = vmatmul.mubr.msk.bf16.gmra.mxu0 %vm706_vm2, %v4124_v40  ;;  %4044 = vmatmul.mubr.msk.bf16.gmra.mxu1 %vm706_vm2, %v4125_v41 }
  0x59   : > { %3983 = vmatprep.mubr.msk.bf16.mxu0 %vm706_vm2, %v4126_v42  ;;  %4047 = vmatprep.mubr.msk.bf16.mxu1 %vm706_vm2, %v4127_v43 }
  0x60   : > { %3984 = vmatmul.mubr.msk.bf16.gmra.mxu0 %vm706_vm2, %v4128_v44  ;;  %4048 = vmatmul.mubr.msk.bf16.gmra.mxu1 %vm706_vm2, %v4129_v45 }
  0x61   : > { %3987 = vmatprep.mubr.msk.bf16.mxu0 %vm706_vm2, %v4130_v46  ;;  %4051 = vmatprep.mubr.msk.bf16.mxu1 %vm706_vm2, %v4131_v47 }
  0x68   : > { %3988 = vmatmul.mubr.msk.bf16.gmra.mxu0 %vm706_vm2, %v4132_v48  ;;  %4052 = vmatmul.mubr.msk.bf16.gmra.mxu1 %vm706_vm2, %v4133_v49 }
  0x69   : > { %3991 = vmatprep.mubr.msk.bf16.mxu0 %vm706_vm2, %v4134_v50  ;;  %4055 = vmatprep.mubr.msk.bf16.mxu1 %vm706_vm2, %v4135_v51 }
  0x70   : > { %3992 = vmatmul.mubr.msk.bf16.gmra.mxu0 %vm706_vm2, %v4136_v52  ;;  %4056 = vmatmul.mubr.msk.bf16.gmra.mxu1 %vm706_vm2, %v4137_v53 }
  0x71   : > { %3995 = vmatprep.mubr.msk.bf16.mxu0 %vm706_vm2, %v4138_v54  ;;  %4059 = vmatprep.mubr.msk.bf16.mxu1 %vm706_vm2, %v4139_v55 }
  0x78   : > { %3996 = vmatmul.mubr.msk.bf16.gmra.mxu0 %vm706_vm2, %v4140_v56  ;;  %4060 = vmatmul.mubr.msk.bf16.gmra.mxu1 %vm706_vm2, %v4141_v57 }
  0x79   : > { %3999 = vmatprep.mubr.msk.bf16.mxu0 %vm706_vm2, %v4142_v58  ;;  %4063 = vmatprep.mubr.msk.bf16.mxu1 %vm706_vm2, %v4143_v59 }
  0x80   : > { %4000 = vmatmul.mubr.msk.bf16.gmra.mxu0 %vm706_vm2, %v4144_v60  ;;  %4064 = vmatmul.mubr.msk.bf16.gmra.mxu1 %vm706_vm2, %v4145_v61 }
  0x81   : > { %4003 = vmatprep.mubr.msk.bf16.mxu0 %vm706_vm2, %v4146_v62  ;;  %4067 = vmatprep.mubr.msk.bf16.mxu1 %vm706_vm2, %v4147_v63 }
  0x88   : > { %4004 = vmatmul.mubr.msk.bf16.gmra.mxu0 %vm706_vm2, %v4148_v0  ;;  %4068 = vmatmul.mubr.msk.bf16.gmra.mxu1 %vm706_vm2, %v4149_v1 }
  0x89   : > { %4007 = vmatprep.mubr.msk.bf16.mxu0 %vm706_vm2, %v4150_v2  ;;  %4071 = vmatprep.mubr.msk.bf16.mxu1 %vm706_vm2, %v4151_v3 }
  0x90   : > { %4008 = vmatmul.mubr.msk.bf16.gmra.mxu0 %vm706_vm2, %v4152_v4  ;;  %4072 = vmatmul.mubr.msk.bf16.gmra.mxu1 %vm706_vm2, %v4153_v5 }
  0xd8   : > { %v3949_v7 = vpop.f32.mrf.mxu0  ;;  %v4013_v9 = vpop.f32.mrf.mxu1 }
  0xd9   : > { %v3623_v10 = vpack.c.bf16 %v3949_v7, %v3949_v7  ;;  %v2102_v11 = vmul.f32 %v3949_v7, %v4348_v6  ;;  %v3687_v12 = vpack.c.bf16 %v4013_v9, %v4013_v9  ;;  %v2166_v13 = vmul.f32 %v4013_v9, %v4348_v6 }
  0xda   : > { %v940_v14 = vpop.f32.mrf.mxu0  ;;  %v1196_v15 = vpop.f32.mrf.mxu1 }
  0xdb   : > { %1966 = vst.msk [vmem:[%s4354_s8 + $0x8] sm:$0xf] %vm1963_vm3, %v3623_v10  ;;  %v2236_v16 = vadd.f32 %v4359_v8, %v2102_v11  ;;  %2030 = vst.msk [vmem:[%s4354_s8 + $0x108] sm:$0xf] %vm1963_vm3, %v3687_v12  ;;  %v2300_v17 = vadd.f32 %v4359_v8, %v2166_v13  ;;  %v3621_v18 = vpack.c.bf16 %v940_v14, %v940_v14 }
  0xdc   : > { %v2100_v19 = vmul.f32 %v4348_v6, %v940_v14  ;;  %v3685_v20 = vpack.c.bf16 %v1196_v15, %v1196_v15  ;;  %v2164_v21 = vmul.f32 %v4348_v6, %v1196_v15  ;;  %v3950_v22 = vpop.f32.mrf.mxu0  ;;  %v4014_v23 = vpop.f32.mrf.mxu1 }
  0xdd   : > { %v2364_v24 = vmax.f32 %v2236_v16, 0.0  ;;  %v2428_v25 = vmax.f32 %v2300_v17, 0.0  ;;  %1964 = vst.msk [vmem:[%s4354_s8] sm:$0xf] %vm1963_vm3, %v3621_v18  ;;  %v3624_v27 = vpack.c.bf16 %v3950_v22, %v3950_v22  ;;  %v2103_v29 = vmul.f32 %v3950_v22, %v4348_v6 }
  0xde   : > { %v2234_v26 = vadd.f32 %v4359_v8, %v2100_v19  ;;  %2028 = vst.msk [vmem:[%s4354_s8 + $0x100] sm:$0xf] %vm1963_vm3, %v3685_v20  ;;  %v2298_v28 = vadd.f32 %v4359_v8, %v2164_v21  ;;  %v3688_v30 = vpack.c.bf16 %v4014_v23, %v4014_v23  ;;  %v2167_v31 = vmul.f32 %v4014_v23, %v4348_v6  ;;  %v943_v32 = vpop.f32.mrf.mxu0  ;;  %v1199_v33 = vpop.f32.mrf.mxu1 }
  0xdf   : > { %v3751_v34 = vpack.c.bf16 %v2364_v24, %v2364_v24  ;;  %v3815_v35 = vpack.c.bf16 %v2428_v25, %v2428_v25  ;;  %1967 = vst.msk [vmem:[%s4354_s8 + $0xc] sm:$0xf] %vm1963_vm3, %v3624_v27  ;;  %v3622_v37 = vpack.c.bf16 %v943_v32, %v943_v32  ;;  %v2237_v39 = vadd.f32 %v4359_v8, %v2103_v29 }
  0xe0   : > { %v2362_v36 = vmax.f32 %v2234_v26, 0.0  ;;  %v2426_v38 = vmax.f32 %v2298_v28, 0.0  ;;  %2031 = vst.msk [vmem:[%s4354_s8 + $0x10c] sm:$0xf] %vm1963_vm3, %v3688_v30  ;;  %v2301_v40 = vadd.f32 %v4359_v8, %v2167_v31  ;;  %v2101_v41 = vmul.f32 %v4348_v6, %v943_v32  ;;  %v3953_v42 = vpop.f32.mrf.mxu0  ;;  %v4017_v43 = vpop.f32.mrf.mxu1 }
  0xe1   : > { %3004 = vst.msk [vmem:[%s4378_s13 + $0x8] sm:$0xf] %vm1963_vm3, %v3751_v34  ;;  %3068 = vst.msk [vmem:[%s4378_s13 + $0x108] sm:$0xf] %vm1963_vm3, %v3815_v35  ;;  %v3686_v45 = vpack.c.bf16 %v1199_v33, %v1199_v33  ;;  %v2165_v46 = vmul.f32 %v4348_v6, %v1199_v33  ;;  %v3627_v47 = vpack.c.bf16 %v3953_v42, %v3953_v42  ;;  %v2365_v49 = vmax.f32 %v2237_v39, 0.0 }
  0xe2   : > { %v3749_v44 = vpack.c.bf16 %v2362_v36, %v2362_v36  ;;  %1965 = vst.msk [vmem:[%s4354_s8 + $0x4] sm:$0xf] %vm1963_vm3, %v3622_v37  ;;  %v3813_v48 = vpack.c.bf16 %v2426_v38, %v2426_v38  ;;  %v2429_v50 = vmax.f32 %v2301_v40, 0.0  ;;  %v2235_v51 = vadd.f32 %v4359_v8, %v2101_v41  ;;  %v956_v52 = vpop.f32.mrf.mxu0  ;;  %v1212_v53 = vpop.f32.mrf.mxu1 }
  0xe3   : > { %2029 = vst.msk [vmem:[%s4354_s8 + $0x104] sm:$0xf] %vm1963_vm3, %v3686_v45  ;;  %v2299_v54 = vadd.f32 %v4359_v8, %v2165_v46  ;;  %1970 = vst.msk [vmem:[%s4354_s8 + $0x18] sm:$0xf] %vm1963_vm3, %v3627_v47  ;;  %v2106_v55 = vmul.f32 %v3953_v42, %v4348_v6  ;;  %v3691_v56 = vpack.c.bf16 %v4017_v43, %v4017_v43 }
  0xe4   : > { %3002 = vst.msk [vmem:[%s4378_s13] sm:$0xf] %vm1963_vm3, %v3749_v44  ;;  %v2170_v57 = vmul.f32 %v4017_v43, %v4348_v6  ;;  %3066 = vst.msk [vmem:[%s4378_s13 + $0x100] sm:$0xf] %vm1963_vm3, %v3813_v48  ;;  %v3752_v58 = vpack.c.bf16 %v2365_v49, %v2365_v49  ;;  %v3816_v59 = vpack.c.bf16 %v2429_v50, %v2429_v50  ;;  %v2363_v60 = vmax.f32 %v2235_v51, 0.0  ;;  %v3954_v62 = vpop.f32.mrf.mxu0  ;;  %v4018_v63 = vpop.f32.mrf.mxu1 }
  0xe5   : > { %v3625_v61 = vpack.c.bf16 %v956_v52, %v956_v52  ;;  %v2427_v0 = vmax.f32 %v2299_v54, 0.0  ;;  %v2240_v1 = vadd.f32 %v4359_v8, %v2106_v55  ;;  %2034 = vst.msk [vmem:[%s4354_s8 + $0x118] sm:$0xf] %vm1963_vm3, %v3691_v56  ;;  %v2104_v3 = vmul.f32 %v4348_v6, %v956_v52 }
  0xe6   : > { %v2304_v2 = vadd.f32 %v4359_v8, %v2170_v57  ;;  %3005 = vst.msk [vmem:[%s4378_s13 + $0xc] sm:$0xf] %vm1963_vm3, %v3752_v58  ;;  %3069 = vst.msk [vmem:[%s4378_s13 + $0x10c] sm:$0xf] %vm1963_vm3, %v3816_v59  ;;  %v3750_v4 = vpack.c.bf16 %v2363_v60, %v2363_v60  ;;  %v3689_v5 = vpack.c.bf16 %v1212_v53, %v1212_v53  ;;  %v959_v10 = vpop.f32.mrf.mxu0  ;;  %v1215_v11 = vpop.f32.mrf.mxu1 }
  0xe7   : > { %1968 = vst.msk [vmem:[%s4354_s8 + $0x10] sm:$0xf] %vm1963_vm3, %v3625_v61  ;;  %v2168_v7 = vmul.f32 %v4348_v6, %v1212_v53  ;;  %v3628_v9 = vpack.c.bf16 %v3954_v62, %v3954_v62  ;;  %v3814_v12 = vpack.c.bf16 %v2427_v0, %v2427_v0  ;;  %v2368_v13 = vmax.f32 %v2240_v1, 0.0 }
  0xe8   : > { %v2432_v14 = vmax.f32 %v2304_v2, 0.0  ;;  %v2238_v15 = vadd.f32 %v4359_v8, %v2104_v3  ;;  %3003 = vst.msk [vmem:[%s4378_s13 + $0x4] sm:$0xf] %vm1963_vm3, %v3750_v4  ;;  %2032 = vst.msk [vmem:[%s4354_s8 + $0x110] sm:$0xf] %vm1963_vm3, %v3689_v5  ;;  %v2107_v17 = vmul.f32 %v3954_v62, %v4348_v6  ;;  %v3692_v18 = vpack.c.bf16 %v4018_v63, %v4018_v63  ;;  %v3957_v20 = vpop.f32.mrf.mxu0  ;;  %v4021_v21 = vpop.f32.mrf.mxu1 }
  0xe9   : > { %v2302_v16 = vadd.f32 %v4359_v8, %v2168_v7  ;;  %1971 = vst.msk [vmem:[%s4354_s8 + $0x1c] sm:$0xf] %vm1963_vm3, %v3628_v9  ;;  %v2171_v19 = vmul.f32 %v4018_v63, %v4348_v6  ;;  %3067 = vst.msk [vmem:[%s4378_s13 + $0x104] sm:$0xf] %vm1963_vm3, %v3814_v12  ;;  %v3755_v22 = vpack.c.bf16 %v2368_v13, %v2368_v13 }
  0xea   : > { %v3819_v23 = vpack.c.bf16 %v2432_v14, %v2432_v14  ;;  %v2366_v24 = vmax.f32 %v2238_v15, 0.0  ;;  %v3626_v25 = vpack.c.bf16 %v959_v10, %v959_v10  ;;  %v2241_v27 = vadd.f32 %v4359_v8, %v2107_v17  ;;  %2035 = vst.msk [vmem:[%s4354_s8 + $0x11c] sm:$0xf] %vm1963_vm3, %v3692_v18  ;;  %v972_v30 = vpop.f32.mrf.mxu0  ;;  %v1228_v31 = vpop.f32.mrf.mxu1 }
  0xeb   : > { %v2430_v26 = vmax.f32 %v2302_v16, 0.0  ;;  %v2305_v28 = vadd.f32 %v4359_v8, %v2171_v19  ;;  %v2105_v29 = vmul.f32 %v4348_v6, %v959_v10  ;;  %3008 = vst.msk [vmem:[%s4378_s13 + $0x18] sm:$0xf] %vm1963_vm3, %v3755_v22  ;;  %v3690_v33 = vpack.c.bf16 %v1215_v11, %v1215_v11 }
  0xec   : > { %3072 = vst.msk [vmem:[%s4378_s13 + $0x118] sm:$0xf] %vm1963_vm3, %v3819_v23  ;;  %v3753_v32 = vpack.c.bf16 %v2366_v24, %v2366_v24  ;;  %1969 = vst.msk [vmem:[%s4354_s8 + $0x14] sm:$0xf] %vm1963_vm3, %v3626_v25  ;;  %v2169_v34 = vmul.f32 %v4348_v6, %v1215_v11  ;;  %v3631_v35 = vpack.c.bf16 %v3957_v20, %v3957_v20  ;;  %v2369_v37 = vmax.f32 %v2241_v27, 0.0  ;;  %v3958_v40 = vpop.f32.mrf.mxu0  ;;  %v4022_v41 = vpop.f32.mrf.mxu1 }
  0xed   : > { %v3817_v36 = vpack.c.bf16 %v2430_v26, %v2430_v26  ;;  %v2433_v38 = vmax.f32 %v2305_v28, 0.0  ;;  %v2239_v39 = vadd.f32 %v4359_v8, %v2105_v29  ;;  %2033 = vst.msk [vmem:[%s4354_s8 + $0x114] sm:$0xf] %vm1963_vm3, %v3690_v33  ;;  %v2110_v43 = vmul.f32 %v3957_v20, %v4348_v6 }
  0xee   : > { %3006 = vst.msk [vmem:[%s4378_s13 + $0x10] sm:$0xf] %vm1963_vm3, %v3753_v32  ;;  %v2303_v42 = vadd.f32 %v4359_v8, %v2169_v34  ;;  %1974 = vst.msk [vmem:[%s4354_s8 + $0x28] sm:$0xf] %vm1963_vm3, %v3631_v35  ;;  %v3695_v44 = vpack.c.bf16 %v4021_v21, %v4021_v21  ;;  %v2174_v45 = vmul.f32 %v4021_v21, %v4348_v6  ;;  %v975_v50 = vpop.f32.mrf.mxu0  ;;  %v1231_v51 = vpop.f32.mrf.mxu1 }
  0xef   : > { %3070 = vst.msk [vmem:[%s4378_s13 + $0x110] sm:$0xf] %vm1963_vm3, %v3817_v36  ;;  %v3756_v46 = vpack.c.bf16 %v2369_v37, %v2369_v37  ;;  %v3820_v47 = vpack.c.bf16 %v2433_v38, %v2433_v38  ;;  %v2367_v48 = vmax.f32 %v2239_v39, 0.0  ;;  %v3629_v49 = vpack.c.bf16 %v972_v30, %v972_v30 }
  0xf0   : > { %v2431_v52 = vmax.f32 %v2303_v42, 0.0  ;;  %v2244_v53 = vadd.f32 %v4359_v8, %v2110_v43  ;;  %2038 = vst.msk [vmem:[%s4354_s8 + $0x128] sm:$0xf] %vm1963_vm3, %v3695_v44  ;;  %v2308_v54 = vadd.f32 %v4359_v8, %v2174_v45  ;;  %v2108_v55 = vmul.f32 %v4348_v6, %v972_v30  ;;  %v3961_v60 = vpop.f32.mrf.mxu0  ;;  %v4025_v61 = vpop.f32.mrf.mxu1 }
  0xf1   : > { %3009 = vst.msk [vmem:[%s4378_s13 + $0x1c] sm:$0xf] %vm1963_vm3, %v3756_v46  ;;  %3073 = vst.msk [vmem:[%s4378_s13 + $0x11c] sm:$0xf] %vm1963_vm3, %v3820_v47  ;;  %v3754_v56 = vpack.c.bf16 %v2367_v48, %v2367_v48  ;;  %v3693_v57 = vpack.c.bf16 %v1228_v31, %v1228_v31  ;;  %v2172_v58 = vmul.f32 %v4348_v6, %v1228_v31 }
  0xf2   : > { %1972 = vst.msk [vmem:[%s4354_s8 + $0x20] sm:$0xf] %vm1963_vm3, %v3629_v49  ;;  %v3632_v59 = vpack.c.bf16 %v3958_v40, %v3958_v40  ;;  %v3818_v62 = vpack.c.bf16 %v2431_v52, %v2431_v52  ;;  %v2372_v63 = vmax.f32 %v2244_v53, 0.0  ;;  %v2436_v0 = vmax.f32 %v2308_v54, 0.0  ;;  %v988_v7 = vpop.f32.mrf.mxu0  ;;  %v1244_v9 = vpop.f32.mrf.mxu1 }
  0xf3   : > { %v2242_v1 = vadd.f32 %v4359_v8, %v2108_v55  ;;  %3007 = vst.msk [vmem:[%s4378_s13 + $0x14] sm:$0xf] %vm1963_vm3, %v3754_v56  ;;  %2036 = vst.msk [vmem:[%s4354_s8 + $0x120] sm:$0xf] %vm1963_vm3, %v3693_v57  ;;  %v2306_v2 = vadd.f32 %v4359_v8, %v2172_v58  ;;  %v2111_v3 = vmul.f32 %v3958_v40, %v4348_v6 }
  0xf4   : > { %1975 = vst.msk [vmem:[%s4354_s8 + $0x2c] sm:$0xf] %vm1963_vm3, %v3632_v59  ;;  %v3696_v4 = vpack.c.bf16 %v4022_v41, %v4022_v41  ;;  %v2175_v5 = vmul.f32 %v4022_v41, %v4348_v6  ;;  %3071 = vst.msk [vmem:[%s4378_s13 + $0x114] sm:$0xf] %vm1963_vm3, %v3818_v62  ;;  %v3759_v10 = vpack.c.bf16 %v2372_v63, %v2372_v63  ;;  %v3962_v18 = vpop.f32.mrf.mxu0  ;;  %v4488_v19 = vpop.f32.mrf.mxu1 }
  0xf5   : > { %v3823_v11 = vpack.c.bf16 %v2436_v0, %v2436_v0  ;;  %v2370_v12 = vmax.f32 %v2242_v1, 0.0  ;;  %v3630_v13 = vpack.c.bf16 %v975_v50, %v975_v50  ;;  %v2434_v14 = vmax.f32 %v2306_v2, 0.0 }
  0xf6   : > { %v2245_v15 = vadd.f32 %v4359_v8, %v2111_v3  ;;  %2039 = vst.msk [vmem:[%s4354_s8 + $0x12c] sm:$0xf] %vm1963_vm3, %v3696_v4  ;;  %v2309_v16 = vadd.f32 %v4359_v8, %v2175_v5  ;;  %v2109_v17 = vmul.f32 %v4348_v6, %v975_v50  ;;  %3012 = vst.msk [vmem:[%s4378_s13 + $0x28] sm:$0xf] %vm1963_vm3, %v3759_v10  ;;  %v991_v28 = vpop.f32.mrf.mxu0  ;;  %v4498_v29 = vpop.f32.mrf.mxu1 }
  0xf7   : > { %3076 = vst.msk [vmem:[%s4378_s13 + $0x128] sm:$0xf] %vm1963_vm3, %v3823_v11  ;;  %v3757_v20 = vpack.c.bf16 %v2370_v12, %v2370_v12  ;;  %1973 = vst.msk [vmem:[%s4354_s8 + $0x24] sm:$0xf] %vm1963_vm3, %v3630_v13  ;;  %v3694_v21 = vpack.c.bf16 %v1231_v51, %v1231_v51  ;;  %v2173_v22 = vmul.f32 %v4348_v6, %v1231_v51 }
  0xf8   : > { %v3635_v23 = vpack.c.bf16 %v3961_v60, %v3961_v60  ;;  %v3821_v24 = vpack.c.bf16 %v2434_v14, %v2434_v14  ;;  %v2373_v25 = vmax.f32 %v2245_v15, 0.0  ;;  %v2437_v26 = vmax.f32 %v2309_v16, 0.0  ;;  %v3965_v38 = vpop.f32.mrf.mxu0  ;;  %v4511_v39 = vpop.f32.mrf.mxu1 }
  0xf9   : > { %v2243_v27 = vadd.f32 %v4359_v8, %v2109_v17  ;;  %3010 = vst.msk [vmem:[%s4378_s13 + $0x20] sm:$0xf] %vm1963_vm3, %v3757_v20  ;;  %2037 = vst.msk [vmem:[%s4354_s8 + $0x124] sm:$0xf] %vm1963_vm3, %v3694_v21  ;;  %v2307_v30 = vadd.f32 %v4359_v8, %v2173_v22  ;;  %v2114_v31 = vmul.f32 %v3961_v60, %v4348_v6 }
  0xfa   : > { %1978 = vst.msk [vmem:[%s4354_s8 + $0x38] sm:$0xf] %vm1963_vm3, %v3635_v23  ;;  %v3699_v32 = vpack.c.bf16 %v4025_v61, %v4025_v61  ;;  %v2178_v33 = vmul.f32 %v4025_v61, %v4348_v6  ;;  %3074 = vst.msk [vmem:[%s4378_s13 + $0x120] sm:$0xf] %vm1963_vm3, %v3821_v24  ;;  %v3760_v34 = vpack.c.bf16 %v2373_v25, %v2373_v25  ;;  %v4525_v48 = vpop.f32.mrf.mxu0  ;;  %v4527_v49 = vpop.f32.mrf.mxu1 }
  0xfb   : > { %v3824_v35 = vpack.c.bf16 %v2437_v26, %v2437_v26  ;;  %v2371_v36 = vmax.f32 %v2243_v27, 0.0  ;;  %v3633_v37 = vpack.c.bf16 %v988_v7, %v988_v7  ;;  %v2435_v40 = vmax.f32 %v2307_v30, 0.0 }
  0xfc   : > { %v2248_v41 = vadd.f32 %v4359_v8, %v2114_v31  ;;  %2042 = vst.msk [vmem:[%s4354_s8 + $0x138] sm:$0xf] %vm1963_vm3, %v3699_v32  ;;  %v2312_v42 = vadd.f32 %v4359_v8, %v2178_v33  ;;  %v2112_v43 = vmul.f32 %v4348_v6, %v988_v7  ;;  %3013 = vst.msk [vmem:[%s4378_s13 + $0x2c] sm:$0xf] %vm1963_vm3, %v3760_v34  ;;  %v4542_v58 = vpop.f32.mrf.mxu0  ;;  %v4544_v59 = vpop.f32.mrf.mxu1 }
  0xfd   : > { %3077 = vst.msk [vmem:[%s4378_s13 + $0x12c] sm:$0xf] %vm1963_vm3, %v3824_v35  ;;  %v3758_v44 = vpack.c.bf16 %v2371_v36, %v2371_v36  ;;  %1976 = vst.msk [vmem:[%s4354_s8 + $0x30] sm:$0xf] %vm1963_vm3, %v3633_v37  ;;  %v3697_v45 = vpack.c.bf16 %v1244_v9, %v1244_v9  ;;  %v2176_v46 = vmul.f32 %v4348_v6, %v1244_v9 }
  0xfe   : > { %v3636_v47 = vpack.c.bf16 %v3962_v18, %v3962_v18  ;;  %v3822_v50 = vpack.c.bf16 %v2435_v40, %v2435_v40  ;;  %v2376_v51 = vmax.f32 %v2248_v41, 0.0  ;;  %v2440_v52 = vmax.f32 %v2312_v42, 0.0  ;;  %v4553_v4 = vpop.f32.mrf.mxu0  ;;  %v4555_v5 = vpop.f32.mrf.mxu1 }
  0xff   : > { %v2246_v53 = vadd.f32 %v4359_v8, %v2112_v43  ;;  %3011 = vst.msk [vmem:[%s4378_s13 + $0x24] sm:$0xf] %vm1963_vm3, %v3758_v44  ;;  %2040 = vst.msk [vmem:[%s4354_s8 + $0x130] sm:$0xf] %vm1963_vm3, %v3697_v45  ;;  %v2310_v54 = vadd.f32 %v4359_v8, %v2176_v46  ;;  %v2115_v55 = vmul.f32 %v3962_v18, %v4348_v6 }
 0x100   : > { %1979 = vst.msk [vmem:[%s4354_s8 + $0x3c] sm:$0xf] %vm1963_vm3, %v3636_v47  ;;  %v3700_v56 = vpack.c.bf16 %v4488_v19, %v4488_v19  ;;  %v2179_v57 = vmul.f32 %v4488_v19, %v4348_v6  ;;  %3075 = vst.msk [vmem:[%s4378_s13 + $0x124] sm:$0xf] %vm1963_vm3, %v3822_v50  ;;  %v3763_v60 = vpack.c.bf16 %v2376_v51, %v2376_v51  ;;  %v4568_v16 = vpop.f32.mrf.mxu0  ;;  %v4570_v17 = vpop.f32.mrf.mxu1 }
 0x101   : > { %v3827_v61 = vpack.c.bf16 %v2440_v52, %v2440_v52  ;;  %v2374_v62 = vmax.f32 %v2246_v53, 0.0  ;;  %v3634_v63 = vpack.c.bf16 %v991_v28, %v991_v28  ;;  %v2438_v0 = vmax.f32 %v2310_v54, 0.0 }
 0x102   : > { %v2249_v1 = vadd.f32 %v4359_v8, %v2115_v55  ;;  %2043 = vst.msk [vmem:[%s4354_s8 + $0x13c] sm:$0xf] %vm1963_vm3, %v3700_v56  ;;  %v2313_v2 = vadd.f32 %v4359_v8, %v2179_v57  ;;  %v2113_v3 = vmul.f32 %v4348_v6, %v991_v28  ;;  %3016 = vst.msk [vmem:[%s4378_s13 + $0x38] sm:$0xf] %vm1963_vm3, %v3763_v60  ;;  %v4588_v26 = vpop.f32.mrf.mxu0  ;;  %v4590_v27 = vpop.f32.mrf.mxu1 }
 0x103   : > { %3080 = vst.msk [vmem:[%s4378_s13 + $0x138] sm:$0xf] %vm1963_vm3, %v3827_v61  ;;  %v3761_v7 = vpack.c.bf16 %v2374_v62, %v2374_v62  ;;  %1977 = vst.msk [vmem:[%s4354_s8 + $0x34] sm:$0xf] %vm1963_vm3, %v3634_v63  ;;  %v3698_v9 = vpack.c.bf16 %v4498_v29, %v4498_v29  ;;  %v2177_v10 = vmul.f32 %v4348_v6, %v4498_v29 }
 0x104   : > { %v3639_v11 = vpack.c.bf16 %v3965_v38, %v3965_v38  ;;  %v3825_v12 = vpack.c.bf16 %v2438_v0, %v2438_v0  ;;  %v2377_v13 = vmax.f32 %v2249_v1, 0.0  ;;  %v2441_v14 = vmax.f32 %v2313_v2, 0.0  ;;  %v4610_v36 = vpop.f32.mrf.mxu0  ;;  %v4612_v37 = vpop.f32.mrf.mxu1 }
 0x105   : > { %v2247_v15 = vadd.f32 %v4359_v8, %v2113_v3  ;;  %3014 = vst.msk [vmem:[%s4378_s13 + $0x30] sm:$0xf] %vm1963_vm3, %v3761_v7  ;;  %2041 = vst.msk [vmem:[%s4354_s8 + $0x134] sm:$0xf] %vm1963_vm3, %v3698_v9  ;;  %v2311_v18 = vadd.f32 %v4359_v8, %v2177_v10  ;;  %v2118_v19 = vmul.f32 %v3965_v38, %v4348_v6 }
 0x106   : > { %1982 = vst.msk [vmem:[%s4354_s8 + $0x48] sm:$0xf] %vm1963_vm3, %v3639_v11  ;;  %v3703_v20 = vpack.c.bf16 %v4511_v39, %v4511_v39  ;;  %v2182_v21 = vmul.f32 %v4511_v39, %v4348_v6  ;;  %3078 = vst.msk [vmem:[%s4378_s13 + $0x130] sm:$0xf] %vm1963_vm3, %v3825_v12  ;;  %v3764_v22 = vpack.c.bf16 %v2377_v13, %v2377_v13  ;;  %v4628_v46 = vpop.f32.mrf.mxu0  ;;  %v4630_v47 = vpop.f32.mrf.mxu1 }
 0x107   : > { %v3828_v23 = vpack.c.bf16 %v2441_v14, %v2441_v14  ;;  %v2375_v24 = vmax.f32 %v2247_v15, 0.0  ;;  %v3637_v25 = vpack.c.bf16 %v4525_v48, %v4525_v48  ;;  %v2439_v28 = vmax.f32 %v2311_v18, 0.0 }
 0x108   : > { %v2252_v29 = vadd.f32 %v4359_v8, %v2118_v19  ;;  %2046 = vst.msk [vmem:[%s4354_s8 + $0x148] sm:$0xf] %vm1963_vm3, %v3703_v20  ;;  %v2316_v30 = vadd.f32 %v4359_v8, %v2182_v21  ;;  %v2116_v31 = vmul.f32 %v4348_v6, %v4525_v48  ;;  %3017 = vst.msk [vmem:[%s4378_s13 + $0x3c] sm:$0xf] %vm1963_vm3, %v3764_v22  ;;  %v4642_v56 = vpop.f32.mrf.mxu0  ;;  %v4644_v57 = vpop.f32.mrf.mxu1 }
 0x109   : > { %3081 = vst.msk [vmem:[%s4378_s13 + $0x13c] sm:$0xf] %vm1963_vm3, %v3828_v23  ;;  %v3762_v32 = vpack.c.bf16 %v2375_v24, %v2375_v24  ;;  %1980 = vst.msk [vmem:[%s4354_s8 + $0x40] sm:$0xf] %vm1963_vm3, %v3637_v25  ;;  %v3701_v33 = vpack.c.bf16 %v4527_v49, %v4527_v49  ;;  %v2180_v34 = vmul.f32 %v4348_v6, %v4527_v49 }
 0x10a   : > { %v3640_v35 = vpack.c.bf16 %v4542_v58, %v4542_v58  ;;  %v3826_v38 = vpack.c.bf16 %v2439_v28, %v2439_v28  ;;  %v2380_v39 = vmax.f32 %v2252_v29, 0.0  ;;  %v2444_v40 = vmax.f32 %v2316_v30, 0.0  ;;  %v4659_v2 = vpop.f32.mrf.mxu0  ;;  %v4661_v3 = vpop.f32.mrf.mxu1 }
 0x10b   : > { %v2250_v41 = vadd.f32 %v4359_v8, %v2116_v31  ;;  %3015 = vst.msk [vmem:[%s4378_s13 + $0x34] sm:$0xf] %vm1963_vm3, %v3762_v32  ;;  %2044 = vst.msk [vmem:[%s4354_s8 + $0x140] sm:$0xf] %vm1963_vm3, %v3701_v33  ;;  %v2314_v42 = vadd.f32 %v4359_v8, %v2180_v34  ;;  %v2119_v43 = vmul.f32 %v4542_v58, %v4348_v6 }
 0x10c   : > { %1983 = vst.msk [vmem:[%s4354_s8 + $0x4c] sm:$0xf] %vm1963_vm3, %v3640_v35  ;;  %v3704_v44 = vpack.c.bf16 %v4544_v59, %v4544_v59  ;;  %v2183_v45 = vmul.f32 %v4544_v59, %v4348_v6  ;;  %3079 = vst.msk [vmem:[%s4378_s13 + $0x134] sm:$0xf] %vm1963_vm3, %v3826_v38  ;;  %v3767_v48 = vpack.c.bf16 %v2380_v39, %v2380_v39  ;;  %v4680_v14 = vpop.f32.mrf.mxu0  ;;  %v4682_v15 = vpop.f32.mrf.mxu1 }
 0x10d   : > { %v3831_v49 = vpack.c.bf16 %v2444_v40, %v2444_v40  ;;  %v2378_v50 = vmax.f32 %v2250_v41, 0.0  ;;  %v3638_v51 = vpack.c.bf16 %v4553_v4, %v4553_v4  ;;  %v2442_v52 = vmax.f32 %v2314_v42, 0.0 }
 0x10e   : > { %v2253_v53 = vadd.f32 %v4359_v8, %v2119_v43  ;;  %2047 = vst.msk [vmem:[%s4354_s8 + $0x14c] sm:$0xf] %vm1963_vm3, %v3704_v44  ;;  %v2317_v54 = vadd.f32 %v4359_v8, %v2183_v45  ;;  %v2117_v55 = vmul.f32 %v4348_v6, %v4553_v4  ;;  %3020 = vst.msk [vmem:[%s4378_s13 + $0x48] sm:$0xf] %vm1963_vm3, %v3767_v48  ;;  %v4702_v24 = vpop.f32.mrf.mxu0  ;;  %v4704_v25 = vpop.f32.mrf.mxu1 }
 0x10f   : > { %3084 = vst.msk [vmem:[%s4378_s13 + $0x148] sm:$0xf] %vm1963_vm3, %v3831_v49  ;;  %v3765_v58 = vpack.c.bf16 %v2378_v50, %v2378_v50  ;;  %1981 = vst.msk [vmem:[%s4354_s8 + $0x44] sm:$0xf] %vm1963_vm3, %v3638_v51  ;;  %v3702_v59 = vpack.c.bf16 %v4555_v5, %v4555_v5  ;;  %v2181_v60 = vmul.f32 %v4348_v6, %v4555_v5 }
 0x110   : > { %v3643_v61 = vpack.c.bf16 %v4568_v16, %v4568_v16  ;;  %v3829_v62 = vpack.c.bf16 %v2442_v52, %v2442_v52  ;;  %v2381_v63 = vmax.f32 %v2253_v53, 0.0  ;;  %v2445_v0 = vmax.f32 %v2317_v54, 0.0  ;;  %v4720_v34 = vpop.f32.mrf.mxu0  ;;  %v4722_v35 = vpop.f32.mrf.mxu1 }
 0x111   : > { %v2251_v1 = vadd.f32 %v4359_v8, %v2117_v55  ;;  %3018 = vst.msk [vmem:[%s4378_s13 + $0x40] sm:$0xf] %vm1963_vm3, %v3765_v58  ;;  %2045 = vst.msk [vmem:[%s4354_s8 + $0x144] sm:$0xf] %vm1963_vm3, %v3702_v59  ;;  %v2315_v4 = vadd.f32 %v4359_v8, %v2181_v60  ;;  %v2122_v5 = vmul.f32 %v4568_v16, %v4348_v6 }
 0x112   : > { %1986 = vst.msk [vmem:[%s4354_s8 + $0x58] sm:$0xf] %vm1963_vm3, %v3643_v61  ;;  %v3707_v7 = vpack.c.bf16 %v4570_v17, %v4570_v17  ;;  %v2186_v9 = vmul.f32 %v4570_v17, %v4348_v6  ;;  %3082 = vst.msk [vmem:[%s4378_s13 + $0x140] sm:$0xf] %vm1963_vm3, %v3829_v62  ;;  %v3768_v10 = vpack.c.bf16 %v2381_v63, %v2381_v63  ;;  %v4734_v44 = vpop.f32.mrf.mxu0  ;;  %v4736_v45 = vpop.f32.mrf.mxu1 }
 0x113   : > { %v3832_v11 = vpack.c.bf16 %v2445_v0, %v2445_v0  ;;  %v2379_v12 = vmax.f32 %v2251_v1, 0.0  ;;  %v3641_v13 = vpack.c.bf16 %v4588_v26, %v4588_v26  ;;  %v2443_v16 = vmax.f32 %v2315_v4, 0.0 }
 0x114   : > { %v2256_v18 = vadd.f32 %v4359_v8, %v2122_v5  ;;  %2050 = vst.msk [vmem:[%s4354_s8 + $0x158] sm:$0xf] %vm1963_vm3, %v3707_v7  ;;  %v2320_v17 = vadd.f32 %v4359_v8, %v2186_v9  ;;  %v2120_v19 = vmul.f32 %v4348_v6, %v4588_v26  ;;  %3021 = vst.msk [vmem:[%s4378_s13 + $0x4c] sm:$0xf] %vm1963_vm3, %v3768_v10  ;;  %v4751_v55 = vpop.f32.mrf.mxu0  ;;  %v4753_v58 = vpop.f32.mrf.mxu1 }
 0x115   : > { %3085 = vst.msk [vmem:[%s4378_s13 + $0x14c] sm:$0xf] %vm1963_vm3, %v3832_v11  ;;  %v3766_v20 = vpack.c.bf16 %v2379_v12, %v2379_v12  ;;  %1984 = vst.msk [vmem:[%s4354_s8 + $0x50] sm:$0xf] %vm1963_vm3, %v3641_v13  ;;  %v3705_v21 = vpack.c.bf16 %v4590_v27, %v4590_v27  ;;  %v2184_v22 = vmul.f32 %v4348_v6, %v4590_v27 }
 0x116   : > { %v3644_v23 = vpack.c.bf16 %v4610_v36, %v4610_v36  ;;  %v3830_v26 = vpack.c.bf16 %v2443_v16, %v2443_v16  ;;  %v2384_v28 = vmax.f32 %v2256_v18, 0.0  ;;  %v2448_v29 = vmax.f32 %v2320_v17, 0.0  ;;  %v4772_v4 = vpop.f32.mrf.mxu0  ;;  %v4774_v5 = vpop.f32.mrf.mxu1 }
 0x117   : > { %v2254_v30 = vadd.f32 %v4359_v8, %v2120_v19  ;;  %3019 = vst.msk [vmem:[%s4378_s13 + $0x44] sm:$0xf] %vm1963_vm3, %v3766_v20  ;;  %2048 = vst.msk [vmem:[%s4354_s8 + $0x150] sm:$0xf] %vm1963_vm3, %v3705_v21  ;;  %v2318_v27 = vadd.f32 %v4359_v8, %v2184_v22  ;;  %v2123_v31 = vmul.f32 %v4610_v36, %v4348_v6 }
 0x118   : > { %1987 = vst.msk [vmem:[%s4354_s8 + $0x5c] sm:$0xf] %vm1963_vm3, %v3644_v23  ;;  %v3708_v32 = vpack.c.bf16 %v4612_v37, %v4612_v37  ;;  %v2187_v33 = vmul.f32 %v4612_v37, %v4348_v6  ;;  %3083 = vst.msk [vmem:[%s4378_s13 + $0x144] sm:$0xf] %vm1963_vm3, %v3830_v26  ;;  %v3771_v38 = vpack.c.bf16 %v2384_v28, %v2384_v28  ;;  %v4794_v16 = vpop.f32.mrf.mxu0 }
 0x119   : > { %v3835_v39 = vpack.c.bf16 %v2448_v29, %v2448_v29  ;;  %v2382_v40 = vmax.f32 %v2254_v30, 0.0  ;;  %v3642_v36 = vpack.c.bf16 %v4628_v46, %v4628_v46  ;;  %v2446_v41 = vmax.f32 %v2318_v27, 0.0 }
 0x11a   : > { %v2257_v42 = vadd.f32 %v4359_v8, %v2123_v31  ;;  %2051 = vst.msk [vmem:[%s4354_s8 + $0x15c] sm:$0xf] %vm1963_vm3, %v3708_v32  ;;  %v2321_v37 = vadd.f32 %v4359_v8, %v2187_v33  ;;  %v2121_v43 = vmul.f32 %v4348_v6, %v4628_v46  ;;  %3024 = vst.msk [vmem:[%s4378_s13 + $0x58] sm:$0xf] %vm1963_vm3, %v3771_v38  ;;  %v4812_v26 = vpop.f32.mrf.mxu0 }
 0x11b   : > { %3088 = vst.msk [vmem:[%s4378_s13 + $0x158] sm:$0xf] %vm1963_vm3, %v3835_v39  ;;  %v3769_v48 = vpack.c.bf16 %v2382_v40, %v2382_v40  ;;  %1985 = vst.msk [vmem:[%s4354_s8 + $0x54] sm:$0xf] %vm1963_vm3, %v3642_v36  ;;  %v3706_v49 = vpack.c.bf16 %v4630_v47, %v4630_v47  ;;  %v2185_v46 = vmul.f32 %v4348_v6, %v4630_v47 }
 0x11c   : > { %v3647_v50 = vpack.c.bf16 %v4642_v56, %v4642_v56  ;;  %v3833_v51 = vpack.c.bf16 %v2446_v41, %v2446_v41  ;;  %v2385_v52 = vmax.f32 %v2257_v42, 0.0  ;;  %v2449_v53 = vmax.f32 %v2321_v37, 0.0  ;;  %v4826_v38 = vpop.f32.mrf.mxu0 }
 0x11d   : > { %v2255_v54 = vadd.f32 %v4359_v8, %v2121_v43  ;;  %3022 = vst.msk [vmem:[%s4378_s13 + $0x50] sm:$0xf] %vm1963_vm3, %v3769_v48  ;;  %2049 = vst.msk [vmem:[%s4354_s8 + $0x154] sm:$0xf] %vm1963_vm3, %v3706_v49  ;;  %v2319_v59 = vadd.f32 %v4359_v8, %v2185_v46  ;;  %v2126_v47 = vmul.f32 %v4642_v56, %v4348_v6 }
 0x11e   : > { %1990 = vst.msk [vmem:[%s4354_s8 + $0x68] sm:$0xf] %vm1963_vm3, %v3647_v50  ;;  %v3711_v60 = vpack.c.bf16 %v4644_v57, %v4644_v57  ;;  %v2190_v61 = vmul.f32 %v4644_v57, %v4348_v6  ;;  %3086 = vst.msk [vmem:[%s4378_s13 + $0x150] sm:$0xf] %vm1963_vm3, %v3833_v51  ;;  %v3772_v62 = vpack.c.bf16 %v2385_v52, %v2385_v52  ;;  %v4843_v49 = vpop.f32.mrf.mxu0 }
 0x11f   : > { %v3836_v63 = vpack.c.bf16 %v2449_v53, %v2449_v53  ;;  %v2383_v0 = vmax.f32 %v2255_v54, 0.0  ;;  %v3645_v1 = vpack.c.bf16 %v4659_v2, %v4659_v2  ;;  %v2447_v56 = vmax.f32 %v2319_v59, 0.0 }
 0x120   : > { %v2260_v7 = vadd.f32 %v4359_v8, %v2126_v47  ;;  %2054 = vst.msk [vmem:[%s4354_s8 + $0x168] sm:$0xf] %vm1963_vm3, %v3711_v60  ;;  %v2324_v57 = vadd.f32 %v4359_v8, %v2190_v61  ;;  %v2124_v9 = vmul.f32 %v4348_v6, %v4659_v2  ;;  %3025 = vst.msk [vmem:[%s4378_s13 + $0x5c] sm:$0xf] %vm1963_vm3, %v3772_v62  ;;  %v4796_v2 = vpop.f32.mrf.mxu1  ;;  %v4864_v60 = vpop.f32.mrf.mxu0 }
 0x121   : > { %3089 = vst.msk [vmem:[%s4378_s13 + $0x15c] sm:$0xf] %vm1963_vm3, %v3836_v63  ;;  %v3770_v10 = vpack.c.bf16 %v2383_v0, %v2383_v0  ;;  %1988 = vst.msk [vmem:[%s4354_s8 + $0x60] sm:$0xf] %vm1963_vm3, %v3645_v1  ;;  %v3709_v11 = vpack.c.bf16 %v4661_v3, %v4661_v3  ;;  %v2188_v12 = vmul.f32 %v4348_v6, %v4661_v3 }
 0x122   : > { %v3648_v13 = vpack.c.bf16 %v4680_v14, %v4680_v14  ;;  %v3834_v18 = vpack.c.bf16 %v2447_v56, %v2447_v56  ;;  %v2388_v17 = vmax.f32 %v2260_v7, 0.0  ;;  %v2452_v19 = vmax.f32 %v2324_v57, 0.0  ;;  %v4814_v28 = vpop.f32.mrf.mxu1  ;;  %v4886_v57 = vpop.f32.mrf.mxu0 }
 0x123   : > { %v2258_v20 = vadd.f32 %v4359_v8, %v2124_v9  ;;  %3023 = vst.msk [vmem:[%s4378_s13 + $0x54] sm:$0xf] %vm1963_vm3, %v3770_v10  ;;  %2052 = vst.msk [vmem:[%s4354_s8 + $0x160] sm:$0xf] %vm1963_vm3, %v3709_v11  ;;  %v2322_v3 = vadd.f32 %v4359_v8, %v2188_v12  ;;  %v2127_v21 = vmul.f32 %v4680_v14, %v4348_v6 }
 0x124   : > { %1991 = vst.msk [vmem:[%s4354_s8 + $0x6c] sm:$0xf] %vm1963_vm3, %v3648_v13  ;;  %v3712_v22 = vpack.c.bf16 %v4682_v15, %v4682_v15  ;;  %v2191_v23 = vmul.f32 %v4682_v15, %v4348_v6  ;;  %3087 = vst.msk [vmem:[%s4378_s13 + $0x154] sm:$0xf] %vm1963_vm3, %v3834_v18  ;;  %v3775_v29 = vpack.c.bf16 %v2388_v17, %v2388_v17  ;;  %v4828_v39 = vpop.f32.mrf.mxu1 }
 0x125   : > { %v3839_v30 = vpack.c.bf16 %v2452_v19, %v2452_v19  ;;  %v2386_v27 = vmax.f32 %v2258_v20, 0.0  ;;  %v3646_v14 = vpack.c.bf16 %v4702_v24, %v4702_v24  ;;  %v2450_v31 = vmax.f32 %v2322_v3, 0.0  ;;  %v4904_v19 = vpop.f32.mrf.mxu0 }
 0x126   : > { %v2261_v32 = vadd.f32 %v4359_v8, %v2127_v21  ;;  %2055 = vst.msk [vmem:[%s4354_s8 + $0x16c] sm:$0xf] %vm1963_vm3, %v3712_v22  ;;  %v2325_v15 = vadd.f32 %v4359_v8, %v2191_v23  ;;  %v2125_v33 = vmul.f32 %v4348_v6, %v4702_v24  ;;  %3028 = vst.msk [vmem:[%s4378_s13 + $0x68] sm:$0xf] %vm1963_vm3, %v3775_v29  ;;  %v4845_v46 = vpop.f32.mrf.mxu1 }
 0x127   : > { %3092 = vst.msk [vmem:[%s4378_s13 + $0x168] sm:$0xf] %vm1963_vm3, %v3839_v30  ;;  %v3773_v40 = vpack.c.bf16 %v2386_v27, %v2386_v27  ;;  %1989 = vst.msk [vmem:[%s4354_s8 + $0x64] sm:$0xf] %vm1963_vm3, %v3646_v14  ;;  %v3710_v36 = vpack.c.bf16 %v4704_v25, %v4704_v25  ;;  %v2189_v24 = vmul.f32 %v4348_v6, %v4704_v25  ;;  %v4918_v27 = vpop.f32.mrf.mxu0 }
 0x128   : > { %v3651_v41 = vpack.c.bf16 %v4720_v34, %v4720_v34  ;;  %v3837_v42 = vpack.c.bf16 %v2450_v31, %v2450_v31  ;;  %v2389_v37 = vmax.f32 %v2261_v32, 0.0  ;;  %v2453_v43 = vmax.f32 %v2325_v15, 0.0  ;;  %v4866_v61 = vpop.f32.mrf.mxu1 }
 0x129   : > { %v2259_v48 = vadd.f32 %v4359_v8, %v2125_v33  ;;  %3026 = vst.msk [vmem:[%s4378_s13 + $0x60] sm:$0xf] %vm1963_vm3, %v3773_v40  ;;  %2053 = vst.msk [vmem:[%s4354_s8 + $0x164] sm:$0xf] %vm1963_vm3, %v3710_v36  ;;  %v2323_v50 = vadd.f32 %v4359_v8, %v2189_v24  ;;  %v2130_v25 = vmul.f32 %v4720_v34, %v4348_v6  ;;  %v4942_v36 = vld [vmem:[%s5596_s3] ss:$0 sm:$0xff] }
 0x12a   : > { %1994 = vst.msk [vmem:[%s4354_s8 + $0x78] sm:$0xf] %vm1963_vm3, %v3651_v41  ;;  %v3715_v51 = vpack.c.bf16 %v4722_v35, %v4722_v35  ;;  %v2194_v52 = vmul.f32 %v4722_v35, %v4348_v6  ;;  %3090 = vst.msk [vmem:[%s4378_s13 + $0x160] sm:$0xf] %vm1963_vm3, %v3837_v42  ;;  %v3776_v53 = vpack.c.bf16 %v2389_v37, %v2389_v37  ;;  %v4945_v41 = vpop.f32.mrf.mxu0 }
 0x12b   : > { %v3840_v54 = vpack.c.bf16 %v2453_v43, %v2453_v43  ;;  %v2387_v59 = vmax.f32 %v2259_v48, 0.0  ;;  %v3649_v47 = vpack.c.bf16 %v4734_v44, %v4734_v44  ;;  %v2451_v34 = vmax.f32 %v2323_v50, 0.0 }
 0x12c   : > { %v2264_v62 = vadd.f32 %v4359_v8, %v2130_v25  ;;  %2058 = vst.msk [vmem:[%s4354_s8 + $0x178] sm:$0xf] %vm1963_vm3, %v3715_v51  ;;  %v2328_v35 = vadd.f32 %v4359_v8, %v2194_v52  ;;  %v2128_v63 = vmul.f32 %v4348_v6, %v4734_v44  ;;  %3029 = vst.msk [vmem:[%s4378_s13 + $0x6c] sm:$0xf] %vm1963_vm3, %v3776_v53  ;;  %v4888_v44 = vpop.f32.mrf.mxu1  ;;  %v4966_v53 = vpop.f32.mrf.mxu0 }
 0x12d   : > { %3093 = vst.msk [vmem:[%s4378_s13 + $0x16c] sm:$0xf] %vm1963_vm3, %v3840_v54  ;;  %v3774_v0 = vpack.c.bf16 %v2387_v59, %v2387_v59  ;;  %1992 = vst.msk [vmem:[%s4354_s8 + $0x70] sm:$0xf] %vm1963_vm3, %v3649_v47  ;;  %v3713_v1 = vpack.c.bf16 %v4736_v45, %v4736_v45  ;;  %v2192_v56 = vmul.f32 %v4348_v6, %v4736_v45 }
 0x12e   : > { %v3652_v7 = vpack.c.bf16 %v4751_v55, %v4751_v55  ;;  %v3838_v9 = vpack.c.bf16 %v2451_v34, %v2451_v34  ;;  %v2392_v10 = vmax.f32 %v2264_v62, 0.0  ;;  %v2456_v11 = vmax.f32 %v2328_v35, 0.0  ;;  %v4906_v20 = vpop.f32.mrf.mxu1 }
 0x12f   : > { %v2262_v12 = vadd.f32 %v4359_v8, %v2128_v63  ;;  %3027 = vst.msk [vmem:[%s4378_s13 + $0x64] sm:$0xf] %vm1963_vm3, %v3774_v0  ;;  %2056 = vst.msk [vmem:[%s4354_s8 + $0x170] sm:$0xf] %vm1963_vm3, %v3713_v1  ;;  %v2326_v45 = vadd.f32 %v4359_v8, %v2192_v56  ;;  %v2131_v13 = vmul.f32 %v4751_v55, %v4348_v6  ;;  %v4988_v0 = vpop.f32.mrf.mxu0 }
 0x130   : > { %1995 = vst.msk [vmem:[%s4354_s8 + $0x7c] sm:$0xf] %vm1963_vm3, %v3652_v7  ;;  %v3716_v18 = vpack.c.bf16 %v4753_v58, %v4753_v58  ;;  %v2195_v17 = vmul.f32 %v4753_v58, %v4348_v6  ;;  %3091 = vst.msk [vmem:[%s4378_s13 + $0x164] sm:$0xf] %vm1963_vm3, %v3838_v9  ;;  %v3779_v3 = vpack.c.bf16 %v2392_v10, %v2392_v10  ;;  %v4920_v14 = vpop.f32.mrf.mxu1 }
 0x131   : > { %v3843_v21 = vpack.c.bf16 %v2456_v11, %v2456_v11  ;;  %v2390_v22 = vmax.f32 %v2262_v12, 0.0  ;;  %v3650_v55 = vpack.c.bf16 %v4772_v4, %v4772_v4  ;;  %v2454_v23 = vmax.f32 %v2326_v45, 0.0  ;;  %v5006_v45 = vpop.f32.mrf.mxu0 }
 0x132   : > { %v2265_v29 = vadd.f32 %v4359_v8, %v2131_v13  ;;  %2059 = vst.msk [vmem:[%s4354_s8 + $0x17c] sm:$0xf] %vm1963_vm3, %v3716_v18  ;;  %v2329_v58 = vadd.f32 %v4359_v8, %v2195_v17  ;;  %v2129_v30 = vmul.f32 %v4348_v6, %v4772_v4  ;;  %3032 = vst.msk [vmem:[%s4378_s13 + $0x78] sm:$0xf] %vm1963_vm3, %v3779_v3  ;;  %v4933_v6 = vld [vmem:[%s5595_s2] ss:$0 sm:$0xff]  ;;  %v4947_v42 = vpop.f32.mrf.mxu1 }
 0x133   : > { %3096 = vst.msk [vmem:[%s4378_s13 + $0x178] sm:$0xf] %vm1963_vm3, %v3843_v21  ;;  %v3777_v31 = vpack.c.bf16 %v2390_v22, %v2390_v22  ;;  %1993 = vst.msk [vmem:[%s4354_s8 + $0x74] sm:$0xf] %vm1963_vm3, %v3650_v55  ;;  %v3714_v8 = vpack.c.bf16 %v4774_v5, %v4774_v5  ;;  %v2193_v4 = vmul.f32 %v4933_v6, %v4774_v5 }
 0x134   : > { %v3655_v32 = vpack.c.bf16 %v4794_v16, %v4794_v16  ;;  %v3841_v15 = vpack.c.bf16 %v2454_v23, %v2454_v23  ;;  %v2393_v33 = vmax.f32 %v2265_v29, 0.0  ;;  %v2457_v40 = vmax.f32 %v2329_v58, 0.0  ;;  %v4968_v54 = vpop.f32.mrf.mxu1  ;;  %v5020_v23 = vpop.f32.mrf.mxu0 }
 0x135   : > { %v2263_v24 = vadd.f32 %v4942_v36, %v2129_v30  ;;  %3030 = vst.msk [vmem:[%s4378_s13 + $0x70] sm:$0xf] %vm1963_vm3, %v3777_v31  ;;  %2057 = vst.msk [vmem:[%s4354_s8 + $0x174] sm:$0xf] %vm1963_vm3, %v3714_v8  ;;  %v2327_v5 = vadd.f32 %v4942_v36, %v2193_v4  ;;  %v2134_v37 = vmul.f32 %v4933_v6, %v4794_v16 }
 0x136   : > { %1998 = vst.msk [vmem:[%s4354_s8 + $0x88] sm:$0xf] %vm1963_vm3, %v3655_v32  ;;  %v3719_v43 = vpack.c.bf16 %v4796_v2, %v4796_v2  ;;  %v2198_v48 = vmul.f32 %v4933_v6, %v4796_v2  ;;  %3094 = vst.msk [vmem:[%s4378_s13 + $0x170] sm:$0xf] %vm1963_vm3, %v3841_v15  ;;  %v3780_v50 = vpack.c.bf16 %v2393_v33, %v2393_v33  ;;  %v5037_v33 = vpop.f32.mrf.mxu0 }
 0x137   : > { %v3844_v25 = vpack.c.bf16 %v2457_v40, %v2457_v40  ;;  %v2391_v51 = vmax.f32 %v2263_v24, 0.0  ;;  %v3653_v52 = vpack.c.bf16 %v4812_v26, %v4812_v26  ;;  %v2455_v16 = vmax.f32 %v2327_v5, 0.0 }
 0x138   : > { %v2268_v59 = vadd.f32 %v4942_v36, %v2134_v37  ;;  %2062 = vst.msk [vmem:[%s4354_s8 + $0x188] sm:$0xf] %vm1963_vm3, %v3719_v43  ;;  %v2332_v2 = vadd.f32 %v4942_v36, %v2198_v48  ;;  %v2132_v47 = vmul.f32 %v4933_v6, %v4812_v26  ;;  %3033 = vst.msk [vmem:[%s4378_s13 + $0x7c] sm:$0xf] %vm1963_vm3, %v3780_v50  ;;  %v4990_v26 = vpop.f32.mrf.mxu1 }
 0x139   : > { %3097 = vst.msk [vmem:[%s4378_s13 + $0x17c] sm:$0xf] %vm1963_vm3, %v3844_v25  ;;  %v3778_v34 = vpack.c.bf16 %v2391_v51, %v2391_v51  ;;  %1996 = vst.msk [vmem:[%s4354_s8 + $0x80] sm:$0xf] %vm1963_vm3, %v3653_v52  ;;  %v3717_v62 = vpack.c.bf16 %v4814_v28, %v4814_v28  ;;  %v2196_v35 = vmul.f32 %v4933_v6, %v4814_v28  ;;  %v5058_v51 = vpop.f32.mrf.mxu0 }
 0x13a   : > { %v3656_v63 = vpack.c.bf16 %v4826_v38, %v4826_v38  ;;  %v3842_v1 = vpack.c.bf16 %v2455_v16, %v2455_v16  ;;  %v2396_v56 = vmax.f32 %v2268_v59, 0.0  ;;  %v2460_v7 = vmax.f32 %v2332_v2, 0.0  ;;  %v5008_v13 = vpop.f32.mrf.mxu1 }
 0x13b   : > { %v2266_v9 = vadd.f32 %v4942_v36, %v2132_v47  ;;  %3031 = vst.msk [vmem:[%s4378_s13 + $0x74] sm:$0xf] %vm1963_vm3, %v3778_v34  ;;  %2060 = vst.msk [vmem:[%s4354_s8 + $0x180] sm:$0xf] %vm1963_vm3, %v3717_v62  ;;  %v2330_v28 = vadd.f32 %v4942_v36, %v2196_v35  ;;  %v2135_v10 = vmul.f32 %v4933_v6, %v4826_v38  ;;  %v5080_v35 = vpop.f32.mrf.mxu0 }
 0x13c   : > { %1999 = vst.msk [vmem:[%s4354_s8 + $0x8c] sm:$0xf] %vm1963_vm3, %v3656_v63  ;;  %v3720_v11 = vpack.c.bf16 %v4828_v39, %v4828_v39  ;;  %v2199_v12 = vmul.f32 %v4933_v6, %v4828_v39  ;;  %3095 = vst.msk [vmem:[%s4378_s13 + $0x174] sm:$0xf] %vm1963_vm3, %v3842_v1  ;;  %v3783_v18 = vpack.c.bf16 %v2396_v56, %v2396_v56  ;;  %v5022_v29 = vpop.f32.mrf.mxu1 }
 0x13d   : > { %v3847_v17 = vpack.c.bf16 %v2460_v7, %v2460_v7  ;;  %v2394_v3 = vmax.f32 %v2266_v9, 0.0  ;;  %v3654_v38 = vpack.c.bf16 %v4843_v49, %v4843_v49  ;;  %v2458_v21 = vmax.f32 %v2330_v28, 0.0 }
 0x13e   : > { %v2269_v22 = vadd.f32 %v4942_v36, %v2135_v10  ;;  %2063 = vst.msk [vmem:[%s4354_s8 + $0x18c] sm:$0xf] %vm1963_vm3, %v3720_v11  ;;  %v2333_v39 = vadd.f32 %v4942_v36, %v2199_v12  ;;  %v2133_v55 = vmul.f32 %v4933_v6, %v4843_v49  ;;  %3036 = vst.msk [vmem:[%s4378_s13 + $0x88] sm:$0xf] %vm1963_vm3, %v3783_v18  ;;  %v5039_v40 = vpop.f32.mrf.mxu1  ;;  %v5098_v11 = vpop.f32.mrf.mxu0 }
 0x13f   : > { %3100 = vst.msk [vmem:[%s4378_s13 + $0x188] sm:$0xf] %vm1963_vm3, %v3847_v17  ;;  %v3781_v58 = vpack.c.bf16 %v2394_v3, %v2394_v3  ;;  %1997 = vst.msk [vmem:[%s4354_s8 + $0x84] sm:$0xf] %vm1963_vm3, %v3654_v38  ;;  %v3718_v30 = vpack.c.bf16 %v4845_v46, %v4845_v46  ;;  %v2197_v49 = vmul.f32 %v4933_v6, %v4845_v46 }
 0x140   : > { %v3659_v31 = vpack.c.bf16 %v4864_v60, %v4864_v60  ;;  %v3845_v8 = vpack.c.bf16 %v2458_v21, %v2458_v21  ;;  %v2397_v4 = vmax.f32 %v2269_v22, 0.0  ;;  %v2461_v32 = vmax.f32 %v2333_v39, 0.0  ;;  %v5060_v52 = vpop.f32.mrf.mxu1  ;;  %v5112_v39 = vpop.f32.mrf.mxu0 }
 0x141   : > { %v2267_v15 = vadd.f32 %v4942_v36, %v2133_v55  ;;  %3034 = vst.msk [vmem:[%s4378_s13 + $0x80] sm:$0xf] %vm1963_vm3, %v3781_v58  ;;  %2061 = vst.msk [vmem:[%s4354_s8 + $0x184] sm:$0xf] %vm1963_vm3, %v3718_v30  ;;  %v2331_v24 = vadd.f32 %v4942_v36, %v2197_v49  ;;  %v2138_v46 = vmul.f32 %v4933_v6, %v4864_v60 }
 0x142   : > { %2002 = vst.msk [vmem:[%s4354_s8 + $0x98] sm:$0xf] %vm1963_vm3, %v3659_v31  ;;  %v3723_v5 = vpack.c.bf16 %v4866_v61, %v4866_v61  ;;  %v2202_v37 = vmul.f32 %v4933_v6, %v4866_v61  ;;  %3098 = vst.msk [vmem:[%s4378_s13 + $0x180] sm:$0xf] %vm1963_vm3, %v3845_v8  ;;  %v3784_v43 = vpack.c.bf16 %v2397_v4, %v2397_v4 }
 0x143   : > { %v3848_v48 = vpack.c.bf16 %v2461_v32, %v2461_v32  ;;  %v2395_v50 = vmax.f32 %v2267_v15, 0.0  ;;  %v3657_v25 = vpack.c.bf16 %v4886_v57, %v4886_v57  ;;  %v2459_v60 = vmax.f32 %v2331_v24, 0.0 }
 0x144   : > { %v2272_v16 = vadd.f32 %v4942_v36, %v2138_v46  ;;  %2066 = vst.msk [vmem:[%s4354_s8 + $0x198] sm:$0xf] %vm1963_vm3, %v3723_v5  ;;  %v2336_v61 = vadd.f32 %v4942_v36, %v2202_v37  ;;  %v2136_v59 = vmul.f32 %v4933_v6, %v4886_v57  ;;  %3037 = vst.msk [vmem:[%s4378_s13 + $0x8c] sm:$0xf] %vm1963_vm3, %v3784_v43  ;;  %v5082_v57 = vpop.f32.mrf.mxu1 }
 0x145   : > { %3101 = vst.msk [vmem:[%s4378_s13 + $0x18c] sm:$0xf] %vm1963_vm3, %v3848_v48  ;;  %v3782_v2 = vpack.c.bf16 %v2395_v50, %v2395_v50  ;;  %2000 = vst.msk [vmem:[%s4354_s8 + $0x90] sm:$0xf] %vm1963_vm3, %v3657_v25  ;;  %v3721_v47 = vpack.c.bf16 %v4888_v44, %v4888_v44  ;;  %v2200_v34 = vmul.f32 %v4933_v6, %v4888_v44  ;;  %v5146_v50 = vpop.f32.mrf.mxu0 }
 0x146   : > { %v3660_v62 = vpack.c.bf16 %v4904_v19, %v4904_v19  ;;  %v3846_v63 = vpack.c.bf16 %v2459_v60, %v2459_v60  ;;  %v2400_v1 = vmax.f32 %v2272_v16, 0.0  ;;  %v2464_v56 = vmax.f32 %v2336_v61, 0.0  ;;  %v5100_v12 = vpop.f32.mrf.mxu1 }
 0x147   : > { %v2270_v7 = vadd.f32 %v4942_v36, %v2136_v59  ;;  %3035 = vst.msk [vmem:[%s4378_s13 + $0x84] sm:$0xf] %vm1963_vm3, %v3782_v2  ;;  %2064 = vst.msk [vmem:[%s4354_s8 + $0x190] sm:$0xf] %vm1963_vm3, %v3721_v47  ;;  %v2334_v44 = vadd.f32 %v4942_v36, %v2200_v34  ;;  %v2139_v9 = vmul.f32 %v4933_v6, %v4904_v19 }
 0x148   : > { %2003 = vst.msk [vmem:[%s4354_s8 + $0x9c] sm:$0xf] %vm1963_vm3, %v3660_v62  ;;  %v3724_v28 = vpack.c.bf16 %v4906_v20, %v4906_v20  ;;  %v2203_v10 = vmul.f32 %v4933_v6, %v4906_v20  ;;  %3099 = vst.msk [vmem:[%s4378_s13 + $0x184] sm:$0xf] %vm1963_vm3, %v3846_v63  ;;  %v3787_v18 = vpack.c.bf16 %v2400_v1, %v2400_v1  ;;  %v5127_v32 = vpop.f32.mrf.mxu1 }
 0x149   : > { %v3851_v17 = vpack.c.bf16 %v2464_v56, %v2464_v56  ;;  %v2398_v3 = vmax.f32 %v2270_v7, 0.0  ;;  %v3658_v19 = vpack.c.bf16 %v4918_v27, %v4918_v27  ;;  %v2462_v38 = vmax.f32 %v2334_v44, 0.0  ;;  %v5182_v44 = vpop.f32.mrf.mxu0 }
 0x14a   : > { %v2273_v21 = vadd.f32 %v4942_v36, %v2139_v9  ;;  %2067 = vst.msk [vmem:[%s4354_s8 + $0x19c] sm:$0xf] %vm1963_vm3, %v3724_v28  ;;  %v2337_v20 = vadd.f32 %v4942_v36, %v2203_v10  ;;  %v2137_v22 = vmul.f32 %v4933_v6, %v4918_v27  ;;  %3040 = vst.msk [vmem:[%s4378_s13 + $0x98] sm:$0xf] %vm1963_vm3, %v3787_v18  ;;  %v5166_v47 = vpop.f32.mrf.mxu1 }
 0x14b   : > { %3104 = vst.msk [vmem:[%s4378_s13 + $0x198] sm:$0xf] %vm1963_vm3, %v3851_v17  ;;  %v3785_v55 = vpack.c.bf16 %v2398_v3, %v2398_v3  ;;  %2001 = vst.msk [vmem:[%s4354_s8 + $0x94] sm:$0xf] %vm1963_vm3, %v3658_v19  ;;  %v3722_v58 = vpack.c.bf16 %v4920_v14, %v4920_v14  ;;  %v2201_v30 = vmul.f32 %v4933_v6, %v4920_v14 }
 0x14c   : > { %v3663_v27 = vpack.c.bf16 %v4945_v41, %v4945_v41  ;;  %v3849_v49 = vpack.c.bf16 %v2462_v38, %v2462_v38  ;;  %v2401_v31 = vmax.f32 %v2273_v21, 0.0  ;;  %v2465_v8 = vmax.f32 %v2337_v20, 0.0  ;;  %v5194_v19 = vpop.f32.mrf.mxu1 }
 0x14d   : > { %v2271_v4 = vadd.f32 %v4942_v36, %v2137_v22  ;;  %3038 = vst.msk [vmem:[%s4378_s13 + $0x90] sm:$0xf] %vm1963_vm3, %v3785_v55  ;;  %2065 = vst.msk [vmem:[%s4354_s8 + $0x194] sm:$0xf] %vm1963_vm3, %v3722_v58  ;;  %v2335_v15 = vadd.f32 %v4942_v36, %v2201_v30  ;;  %v2142_v14 = vmul.f32 %v4933_v6, %v4945_v41 }
 0x14e   : > { %2006 = vst.msk [vmem:[%s4354_s8 + $0xa8] sm:$0xf] %vm1963_vm3, %v3663_v27  ;;  %v3727_v24 = vpack.c.bf16 %v4947_v42, %v4947_v42  ;;  %v2206_v46 = vmul.f32 %v4933_v6, %v4947_v42  ;;  %3102 = vst.msk [vmem:[%s4378_s13 + $0x190] sm:$0xf] %vm1963_vm3, %v3849_v49  ;;  %v3788_v5 = vpack.c.bf16 %v2401_v31, %v2401_v31  ;;  %v5209_v27 = vpop.f32.mrf.mxu0 }
 0x14f   : > { %v3852_v37 = vpack.c.bf16 %v2465_v8, %v2465_v8  ;;  %v2399_v43 = vmax.f32 %v2271_v4, 0.0  ;;  %v3661_v48 = vpack.c.bf16 %v4966_v53, %v4966_v53  ;;  %v2463_v25 = vmax.f32 %v2335_v15, 0.0 }
 0x150   : > { %v2276_v41 = vadd.f32 %v4942_v36, %v2142_v14  ;;  %2070 = vst.msk [vmem:[%s4354_s8 + $0x1a8] sm:$0xf] %vm1963_vm3, %v3727_v24  ;;  %v2340_v60 = vadd.f32 %v4942_v36, %v2206_v46  ;;  %v2140_v42 = vmul.f32 %v4933_v6, %v4966_v53  ;;  %3041 = vst.msk [vmem:[%s4378_s13 + $0x9c] sm:$0xf] %vm1963_vm3, %v3788_v5  ;;  %v5228_v46 = vpop.f32.mrf.mxu1 }
 0x151   : > { %3105 = vst.msk [vmem:[%s4378_s13 + $0x19c] sm:$0xf] %vm1963_vm3, %v3852_v37  ;;  %v3786_v16 = vpack.c.bf16 %v2399_v43, %v2399_v43  ;;  %2004 = vst.msk [vmem:[%s4354_s8 + $0xa0] sm:$0xf] %vm1963_vm3, %v3661_v48  ;;  %v3725_v61 = vpack.c.bf16 %v4968_v54, %v4968_v54  ;;  %v2204_v59 = vmul.f32 %v4933_v6, %v4968_v54 }
 0x152   : > { %v3664_v2 = vpack.c.bf16 %v4988_v0, %v4988_v0  ;;  %v3850_v53 = vpack.c.bf16 %v2463_v25, %v2463_v25  ;;  %v2404_v34 = vmax.f32 %v2276_v41, 0.0  ;;  %v2468_v62 = vmax.f32 %v2340_v60, 0.0  ;;  %v5248_v60 = vpop.f32.mrf.mxu0 }
 0x153   : > { %v2274_v63 = vadd.f32 %v4942_v36, %v2140_v42  ;;  %3039 = vst.msk [vmem:[%s4378_s13 + $0x94] sm:$0xf] %vm1963_vm3, %v3786_v16  ;;  %2068 = vst.msk [vmem:[%s4354_s8 + $0x1a0] sm:$0xf] %vm1963_vm3, %v3725_v61  ;;  %v2338_v1 = vadd.f32 %v4942_v36, %v2204_v59  ;;  %v2143_v54 = vmul.f32 %v4933_v6, %v4988_v0 }
 0x154   : > { %2007 = vst.msk [vmem:[%s4354_s8 + $0xac] sm:$0xf] %vm1963_vm3, %v3664_v2  ;;  %v3728_v56 = vpack.c.bf16 %v4990_v26, %v4990_v26  ;;  %v2207_v7 = vmul.f32 %v4933_v6, %v4990_v26  ;;  %3103 = vst.msk [vmem:[%s4378_s13 + $0x194] sm:$0xf] %vm1963_vm3, %v3850_v53  ;;  %v3791_v9 = vpack.c.bf16 %v2404_v34, %v2404_v34  ;;  %v5264_v34 = vpop.f32.mrf.mxu1 }
 0x155   : > { %v3855_v28 = vpack.c.bf16 %v2468_v62, %v2468_v62  ;;  %v2402_v10 = vmax.f32 %v2274_v63, 0.0  ;;  %v3662_v18 = vpack.c.bf16 %v5006_v45, %v5006_v45  ;;  %v2466_v17 = vmax.f32 %v2338_v1, 0.0 }
 0x156   : > { %v2277_v0 = vadd.f32 %v4942_v36, %v2143_v54  ;;  %2071 = vst.msk [vmem:[%s4354_s8 + $0x1ac] sm:$0xf] %vm1963_vm3, %v3728_v56  ;;  %v2341_v3 = vadd.f32 %v4942_v36, %v2207_v7  ;;  %v2141_v26 = vmul.f32 %v4933_v6, %v5006_v45  ;;  %3044 = vst.msk [vmem:[%s4378_s13 + $0xa8] sm:$0xf] %vm1963_vm3, %v3791_v9  ;;  %v5276_v9 = vpop.f32.mrf.mxu0 }
 0x157   : > { %3108 = vst.msk [vmem:[%s4378_s13 + $0x1a8] sm:$0xf] %vm1963_vm3, %v3855_v28  ;;  %v3789_v38 = vpack.c.bf16 %v2402_v10, %v2402_v10  ;;  %2005 = vst.msk [vmem:[%s4354_s8 + $0xa4] sm:$0xf] %vm1963_vm3, %v3662_v18  ;;  %v3726_v21 = vpack.c.bf16 %v5008_v13, %v5008_v13  ;;  %v2205_v20 = vmul.f32 %v4933_v6, %v5008_v13 }
 0x158   : > { %v3667_v45 = vpack.c.bf16 %v5020_v23, %v5020_v23  ;;  %v3853_v22 = vpack.c.bf16 %v2466_v17, %v2466_v17  ;;  %v2405_v55 = vmax.f32 %v2277_v0, 0.0  ;;  %v2469_v58 = vmax.f32 %v2341_v3, 0.0 }
 0x159   : > { %v2275_v30 = vadd.f32 %v4942_v36, %v2141_v26  ;;  %3042 = vst.msk [vmem:[%s4378_s13 + $0xa0] sm:$0xf] %vm1963_vm3, %v3789_v38  ;;  %2069 = vst.msk [vmem:[%s4354_s8 + $0x1a4] sm:$0xf] %vm1963_vm3, %v3726_v21  ;;  %v2339_v49 = vadd.f32 %v4942_v36, %v2205_v20  ;;  %v2146_v13 = vmul.f32 %v4933_v6, %v5020_v23  ;;  %v5291_v38 = vpop.f32.mrf.mxu1 }
 0x15a   : > { %2010 = vst.msk [vmem:[%s4354_s8 + $0xb8] sm:$0xf] %vm1963_vm3, %v3667_v45  ;;  %v3731_v31 = vpack.c.bf16 %v5022_v29, %v5022_v29  ;;  %v2210_v8 = vmul.f32 %v4933_v6, %v5022_v29  ;;  %3106 = vst.msk [vmem:[%s4378_s13 + $0x1a0] sm:$0xf] %vm1963_vm3, %v3853_v22  ;;  %v3792_v4 = vpack.c.bf16 %v2405_v55, %v2405_v55 }
 0x15b   : > { %v3856_v15 = vpack.c.bf16 %v2469_v58, %v2469_v58  ;;  %v2403_v14 = vmax.f32 %v2275_v30, 0.0  ;;  %v3665_v24 = vpack.c.bf16 %v5037_v33, %v5037_v33  ;;  %v2467_v5 = vmax.f32 %v2339_v49, 0.0  ;;  %v5310_v49 = vpop.f32.mrf.mxu0 }
 0x15c   : > { %v2280_v23 = vadd.f32 %v4942_v36, %v2146_v13  ;;  %2074 = vst.msk [vmem:[%s4354_s8 + $0x1b8] sm:$0xf] %vm1963_vm3, %v3731_v31  ;;  %v2344_v37 = vadd.f32 %v4942_v36, %v2210_v8  ;;  %v2144_v29 = vmul.f32 %v4933_v6, %v5037_v33  ;;  %3045 = vst.msk [vmem:[%s4378_s13 + $0xac] sm:$0xf] %vm1963_vm3, %v3792_v4 }
 0x15d   : > { %3109 = vst.msk [vmem:[%s4378_s13 + $0x1ac] sm:$0xf] %vm1963_vm3, %v3856_v15  ;;  %v3790_v43 = vpack.c.bf16 %v2403_v14, %v2403_v14  ;;  %2008 = vst.msk [vmem:[%s4354_s8 + $0xb0] sm:$0xf] %vm1963_vm3, %v3665_v24  ;;  %v3729_v48 = vpack.c.bf16 %v5039_v40, %v5039_v40  ;;  %v2208_v25 = vmul.f32 %v4933_v6, %v5039_v40  ;;  %v5330_v24 = vpop.f32.mrf.mxu1 }
 0x15e   : > { %v3668_v41 = vpack.c.bf16 %v5058_v51, %v5058_v51  ;;  %v3854_v33 = vpack.c.bf16 %v2467_v5, %v2467_v5  ;;  %v2408_v42 = vmax.f32 %v2280_v23, 0.0  ;;  %v2472_v16 = vmax.f32 %v2344_v37, 0.0 }
 0x15f   : > { %v2278_v61 = vadd.f32 %v4942_v36, %v2144_v29  ;;  %3043 = vst.msk [vmem:[%s4378_s13 + $0xa4] sm:$0xf] %vm1963_vm3, %v3790_v43  ;;  %2072 = vst.msk [vmem:[%s4354_s8 + $0x1b0] sm:$0xf] %vm1963_vm3, %v3729_v48  ;;  %v2342_v59 = vadd.f32 %v4942_v36, %v2208_v25  ;;  %v2147_v40 = vmul.f32 %v4933_v6, %v5058_v51  ;;  %v5346_v25 = vpop.f32.mrf.mxu0 }
 0x160   : > { %2011 = vst.msk [vmem:[%s4354_s8 + $0xbc] sm:$0xf] %vm1963_vm3, %v3668_v41  ;;  %v3732_v2 = vpack.c.bf16 %v5060_v52, %v5060_v52  ;;  %v2211_v53 = vmul.f32 %v4933_v6, %v5060_v52  ;;  %3107 = vst.msk [vmem:[%s4378_s13 + $0x1a4] sm:$0xf] %vm1963_vm3, %v3854_v33  ;;  %v3795_v62 = vpack.c.bf16 %v2408_v42, %v2408_v42 }
 0x161   : > { %v3859_v63 = vpack.c.bf16 %v2472_v16, %v2472_v16  ;;  %v2406_v1 = vmax.f32 %v2278_v61, 0.0  ;;  %v3666_v54 = vpack.c.bf16 %v5080_v35, %v5080_v35  ;;  %v2470_v56 = vmax.f32 %v2342_v59, 0.0 }
 0x162   : > { %v2281_v51 = vadd.f32 %v4942_v36, %v2147_v40  ;;  %2075 = vst.msk [vmem:[%s4354_s8 + $0x1bc] sm:$0xf] %vm1963_vm3, %v3732_v2  ;;  %v2345_v7 = vadd.f32 %v4942_v36, %v2211_v53  ;;  %v2145_v52 = vmul.f32 %v4933_v6, %v5080_v35  ;;  %3048 = vst.msk [vmem:[%s4378_s13 + $0xb8] sm:$0xf] %vm1963_vm3, %v3795_v62  ;;  %v5358_v40 = vpop.f32.mrf.mxu1 }
 0x163   : > { %3112 = vst.msk [vmem:[%s4378_s13 + $0x1b8] sm:$0xf] %vm1963_vm3, %v3859_v63  ;;  %v3793_v28 = vpack.c.bf16 %v2406_v1, %v2406_v1  ;;  %2009 = vst.msk [vmem:[%s4354_s8 + $0xb4] sm:$0xf] %vm1963_vm3, %v3666_v54  ;;  %v3730_v10 = vpack.c.bf16 %v5082_v57, %v5082_v57  ;;  %v2209_v18 = vmul.f32 %v4933_v6, %v5082_v57 }
 0x164   : > { %v3671_v35 = vpack.c.bf16 %v5098_v11, %v5098_v11  ;;  %v3857_v17 = vpack.c.bf16 %v2470_v56, %v2470_v56  ;;  %v2409_v0 = vmax.f32 %v2281_v51, 0.0  ;;  %v2473_v3 = vmax.f32 %v2345_v7, 0.0  ;;  %v5373_v51 = vpop.f32.mrf.mxu0 }
 0x165   : > { %v2279_v26 = vadd.f32 %v4942_v36, %v2145_v52  ;;  %3046 = vst.msk [vmem:[%s4378_s13 + $0xb0] sm:$0xf] %vm1963_vm3, %v3793_v28  ;;  %2073 = vst.msk [vmem:[%s4354_s8 + $0x1b4] sm:$0xf] %vm1963_vm3, %v3730_v10  ;;  %v2343_v21 = vadd.f32 %v4942_v36, %v2209_v18  ;;  %v2150_v57 = vmul.f32 %v4933_v6, %v5098_v11 }
 0x166   : > { %2014 = vst.msk [vmem:[%s4354_s8 + $0xc8] sm:$0xf] %vm1963_vm3, %v3671_v35  ;;  %v3735_v20 = vpack.c.bf16 %v5100_v12, %v5100_v12  ;;  %v2214_v45 = vmul.f32 %v4933_v6, %v5100_v12  ;;  %3110 = vst.msk [vmem:[%s4378_s13 + $0x1b0] sm:$0xf] %vm1963_vm3, %v3857_v17  ;;  %v3796_v22 = vpack.c.bf16 %v2409_v0, %v2409_v0  ;;  %v5392_v0 = vpop.f32.mrf.mxu1 }
 0x167   : > { %v3860_v55 = vpack.c.bf16 %v2473_v3, %v2473_v3  ;;  %v2407_v58 = vmax.f32 %v2279_v26, 0.0  ;;  %v3669_v30 = vpack.c.bf16 %v5112_v39, %v5112_v39  ;;  %v2471_v13 = vmax.f32 %v2343_v21, 0.0 }
 0x168   : > { %v2284_v11 = vadd.f32 %v4942_v36, %v2150_v57  ;;  %2078 = vst.msk [vmem:[%s4354_s8 + $0x1c8] sm:$0xf] %vm1963_vm3, %v3735_v20  ;;  %v2348_v31 = vadd.f32 %v4942_v36, %v2214_v45  ;;  %v2148_v12 = vmul.f32 %v4933_v6, %v5112_v39  ;;  %3049 = vst.msk [vmem:[%s4378_s13 + $0xbc] sm:$0xf] %vm1963_vm3, %v3796_v22  ;;  %v5412_v22 = vpop.f32.mrf.mxu0 }
 0x169   : > { %3113 = vst.msk [vmem:[%s4378_s13 + $0x1bc] sm:$0xf] %vm1963_vm3, %v3860_v55  ;;  %v3794_v8 = vpack.c.bf16 %v2407_v58, %v2407_v58  ;;  %2012 = vst.msk [vmem:[%s4354_s8 + $0xc0] sm:$0xf] %vm1963_vm3, %v3669_v30  ;;  %v3733_v4 = vpack.c.bf16 %v5127_v32, %v5127_v32  ;;  %v2212_v15 = vmul.f32 %v4933_v6, %v5127_v32 }
 0x16a   : > { %v3672_v14 = vpack.c.bf16 %v5146_v50, %v5146_v50  ;;  %v3858_v39 = vpack.c.bf16 %v2471_v13, %v2471_v13  ;;  %v2412_v5 = vmax.f32 %v2284_v11, 0.0  ;;  %v2476_v23 = vmax.f32 %v2348_v31, 0.0 }
 0x16b   : > { %v2282_v37 = vadd.f32 %v4942_v36, %v2148_v12  ;;  %3047 = vst.msk [vmem:[%s4378_s13 + $0xb4] sm:$0xf] %vm1963_vm3, %v3794_v8  ;;  %2076 = vst.msk [vmem:[%s4354_s8 + $0x1c0] sm:$0xf] %vm1963_vm3, %v3733_v4  ;;  %v2346_v29 = vadd.f32 %v4942_v36, %v2212_v15  ;;  %v2151_v32 = vmul.f32 %v4933_v6, %v5146_v50  ;;  %v5428_v12 = vpop.f32.mrf.mxu1 }
 0x16c   : > { %2015 = vst.msk [vmem:[%s4354_s8 + $0xcc] sm:$0xf] %vm1963_vm3, %v3672_v14  ;;  %v3736_v43 = vpack.c.bf16 %v5166_v47, %v5166_v47  ;;  %v2215_v48 = vmul.f32 %v4933_v6, %v5166_v47  ;;  %3111 = vst.msk [vmem:[%s4378_s13 + $0x1b4] sm:$0xf] %vm1963_vm3, %v3858_v39  ;;  %v3799_v41 = vpack.c.bf16 %v2412_v5, %v2412_v5 }
 0x16d   : > { %v3863_v33 = vpack.c.bf16 %v2476_v23, %v2476_v23  ;;  %v2410_v42 = vmax.f32 %v2282_v37, 0.0  ;;  %v3670_v16 = vpack.c.bf16 %v5182_v44, %v5182_v44  ;;  %v2474_v61 = vmax.f32 %v2346_v29, 0.0  ;;  %v5440_v23 = vpop.f32.mrf.mxu0 }
 0x16e   : > { %v2285_v50 = vadd.f32 %v4942_v36, %v2151_v32  ;;  %2079 = vst.msk [vmem:[%s4354_s8 + $0x1cc] sm:$0xf] %vm1963_vm3, %v3736_v43  ;;  %v2349_v59 = vadd.f32 %v4942_v36, %v2215_v48  ;;  %v2149_v47 = vmul.f32 %v4933_v6, %v5182_v44  ;;  %3052 = vst.msk [vmem:[%s4378_s13 + $0xc8] sm:$0xf] %vm1963_vm3, %v3799_v41 }
 0x16f   : > { %3116 = vst.msk [vmem:[%s4378_s13 + $0x1c8] sm:$0xf] %vm1963_vm3, %v3863_v33  ;;  %v3797_v2 = vpack.c.bf16 %v2410_v42, %v2410_v42  ;;  %2013 = vst.msk [vmem:[%s4354_s8 + $0xc4] sm:$0xf] %vm1963_vm3, %v3670_v16  ;;  %v3734_v53 = vpack.c.bf16 %v5194_v19, %v5194_v19  ;;  %v2213_v62 = vmul.f32 %v4933_v6, %v5194_v19  ;;  %v5455_v42 = vpop.f32.mrf.mxu1 }
 0x170   : > { %v3675_v44 = vpack.c.bf16 %v5209_v27, %v5209_v27  ;;  %v3861_v63 = vpack.c.bf16 %v2474_v61, %v2474_v61  ;;  %v2413_v1 = vmax.f32 %v2285_v50, 0.0  ;;  %v2477_v54 = vmax.f32 %v2349_v59, 0.0 }
 0x171   : > { %v2283_v56 = vadd.f32 %v4942_v36, %v2149_v47  ;;  %3050 = vst.msk [vmem:[%s4378_s13 + $0xc0] sm:$0xf] %vm1963_vm3, %v3797_v2  ;;  %2077 = vst.msk [vmem:[%s4354_s8 + $0x1c4] sm:$0xf] %vm1963_vm3, %v3734_v53  ;;  %v2347_v7 = vadd.f32 %v4942_v36, %v2213_v62  ;;  %v2154_v19 = vmul.f32 %v4933_v6, %v5209_v27  ;;  %v4009_v62 = vpop.f32.mrf.mxu0 }
 0x172   : > { %2018 = vst.msk [vmem:[%s4354_s8 + $0xd8] sm:$0xf] %vm1963_vm3, %v3675_v44  ;;  %v3739_v52 = vpack.c.bf16 %v5228_v46, %v5228_v46  ;;  %v2218_v28 = vmul.f32 %v4933_v6, %v5228_v46  ;;  %3114 = vst.msk [vmem:[%s4378_s13 + $0x1c0] sm:$0xf] %vm1963_vm3, %v3861_v63  ;;  %v3800_v10 = vpack.c.bf16 %v2413_v1, %v2413_v1 }
 0x173   : > { %v3864_v18 = vpack.c.bf16 %v2477_v54, %v2477_v54  ;;  %v2411_v35 = vmax.f32 %v2283_v56, 0.0  ;;  %v3673_v17 = vpack.c.bf16 %v5248_v60, %v5248_v60  ;;  %v2475_v3 = vmax.f32 %v2347_v7, 0.0 }
 0x174   : > { %v2288_v27 = vadd.f32 %v4942_v36, %v2154_v19  ;;  %2082 = vst.msk [vmem:[%s4354_s8 + $0x1d8] sm:$0xf] %vm1963_vm3, %v3739_v52  ;;  %v2352_v26 = vadd.f32 %v4942_v36, %v2218_v28  ;;  %v2152_v46 = vmul.f32 %v4933_v6, %v5248_v60  ;;  %3053 = vst.msk [vmem:[%s4378_s13 + $0xcc] sm:$0xf] %vm1963_vm3, %v3800_v10  ;;  %v4073_v19 = vpop.f32.mrf.mxu1 }
 0x175   : > { %3117 = vst.msk [vmem:[%s4378_s13 + $0x1cc] sm:$0xf] %vm1963_vm3, %v3864_v18  ;;  %v3798_v21 = vpack.c.bf16 %v2411_v35, %v2411_v35  ;;  %2016 = vst.msk [vmem:[%s4354_s8 + $0xd0] sm:$0xf] %vm1963_vm3, %v3673_v17  ;;  %v3737_v57 = vpack.c.bf16 %v5264_v34, %v5264_v34  ;;  %v2216_v20 = vmul.f32 %v4933_v6, %v5264_v34 }
 0x176   : > { %v3676_v45 = vpack.c.bf16 %v5276_v9, %v5276_v9  ;;  %v3862_v60 = vpack.c.bf16 %v2475_v3, %v2475_v3  ;;  %v2416_v55 = vmax.f32 %v2288_v27, 0.0  ;;  %v2480_v58 = vmax.f32 %v2352_v26, 0.0  ;;  %v1180_v3 = vpop.f32.mrf.mxu0 }
 0x177   : > { %v2286_v30 = vadd.f32 %v4942_v36, %v2152_v46  ;;  %3051 = vst.msk [vmem:[%s4378_s13 + $0xc4] sm:$0xf] %vm1963_vm3, %v3798_v21  ;;  %2080 = vst.msk [vmem:[%s4354_s8 + $0x1d0] sm:$0xf] %vm1963_vm3, %v3737_v57  ;;  %v2350_v13 = vadd.f32 %v4942_v36, %v2216_v20  ;;  %v2155_v34 = vmul.f32 %v4933_v6, %v5276_v9 }
 0x178   : > { %2019 = vst.msk [vmem:[%s4354_s8 + $0xdc] sm:$0xf] %vm1963_vm3, %v3676_v45  ;;  %v3740_v11 = vpack.c.bf16 %v5291_v38, %v5291_v38  ;;  %v2219_v31 = vmul.f32 %v4933_v6, %v5291_v38  ;;  %3115 = vst.msk [vmem:[%s4378_s13 + $0x1c4] sm:$0xf] %vm1963_vm3, %v3862_v60  ;;  %v3803_v8 = vpack.c.bf16 %v2416_v55, %v2416_v55  ;;  %v1436_v60 = vpop.f32.mrf.mxu1 }
 0x179   : > { %v3867_v4 = vpack.c.bf16 %v2480_v58, %v2480_v58  ;;  %v2414_v15 = vmax.f32 %v2286_v30, 0.0  ;;  %v3674_v14 = vpack.c.bf16 %v5310_v49, %v5310_v49  ;;  %v2478_v39 = vmax.f32 %v2350_v13, 0.0 }
 0x17a   : > { %v2289_v9 = vadd.f32 %v4942_v36, %v2155_v34  ;;  %2083 = vst.msk [vmem:[%s4354_s8 + $0x1dc] sm:$0xf] %vm1963_vm3, %v3740_v11  ;;  %v2353_v5 = vadd.f32 %v4942_v36, %v2219_v31  ;;  %v2153_v38 = vmul.f32 %v4933_v6, %v5310_v49  ;;  %3056 = vst.msk [vmem:[%s4378_s13 + $0xd8] sm:$0xf] %vm1963_vm3, %v3803_v8  ;;  %v4010_v8 = vpop.f32.mrf.mxu0 }
 0x17b   : > { %3120 = vst.msk [vmem:[%s4378_s13 + $0x1d8] sm:$0xf] %vm1963_vm3, %v3867_v4  ;;  %v3801_v37 = vpack.c.bf16 %v2414_v15, %v2414_v15  ;;  %2017 = vst.msk [vmem:[%s4354_s8 + $0xd4] sm:$0xf] %vm1963_vm3, %v3674_v14  ;;  %v3738_v29 = vpack.c.bf16 %v5330_v24, %v5330_v24  ;;  %v2217_v32 = vmul.f32 %v4933_v6, %v5330_v24 }
 0x17c   : > { %v3679_v49 = vpack.c.bf16 %v5346_v25, %v5346_v25  ;;  %v3865_v43 = vpack.c.bf16 %v2478_v39, %v2478_v39  ;;  %v2417_v48 = vmax.f32 %v2289_v9, 0.0  ;;  %v2481_v41 = vmax.f32 %v2353_v5, 0.0 }
 0x17d   : > { %v2287_v33 = vadd.f32 %v4942_v36, %v2153_v38  ;;  %3054 = vst.msk [vmem:[%s4378_s13 + $0xd0] sm:$0xf] %vm1963_vm3, %v3801_v37  ;;  %2081 = vst.msk [vmem:[%s4354_s8 + $0x1d4] sm:$0xf] %vm1963_vm3, %v3738_v29  ;;  %v2351_v16 = vadd.f32 %v4942_v36, %v2217_v32  ;;  %v2158_v24 = vmul.f32 %v4933_v6, %v5346_v25  ;;  %v4074_v37 = vpop.f32.mrf.mxu1 }
 0x17e   : > { %2022 = vst.msk [vmem:[%s4354_s8 + $0xe8] sm:$0xf] %vm1963_vm3, %v3679_v49  ;;  %v3743_v61 = vpack.c.bf16 %v5358_v40, %v5358_v40  ;;  %v2222_v50 = vmul.f32 %v4933_v6, %v5358_v40  ;;  %3118 = vst.msk [vmem:[%s4378_s13 + $0x1d0] sm:$0xf] %vm1963_vm3, %v3865_v43  ;;  %v3804_v59 = vpack.c.bf16 %v2417_v48, %v2417_v48 }
 0x17f   : > { %v3868_v47 = vpack.c.bf16 %v2481_v41, %v2481_v41  ;;  %v2415_v2 = vmax.f32 %v2287_v33, 0.0  ;;  %v3677_v53 = vpack.c.bf16 %v5373_v51, %v5373_v51  ;;  %v2479_v44 = vmax.f32 %v2351_v16, 0.0  ;;  %v1183_v16 = vpop.f32.mrf.mxu0 }
 0x180   : > { %v2292_v63 = vadd.f32 %v4942_v36, %v2158_v24  ;;  %2086 = vst.msk [vmem:[%s4354_s8 + $0x1e8] sm:$0xf] %vm1963_vm3, %v3743_v61  ;;  %v2356_v25 = vadd.f32 %v4942_v36, %v2222_v50  ;;  %v2156_v40 = vmul.f32 %v4933_v6, %v5373_v51  ;;  %3057 = vst.msk [vmem:[%s4378_s13 + $0xdc] sm:$0xf] %vm1963_vm3, %v3804_v59 }
 0x181   : > { %3121 = vst.msk [vmem:[%s4378_s13 + $0x1dc] sm:$0xf] %vm1963_vm3, %v3868_v47  ;;  %v3802_v1 = vpack.c.bf16 %v2415_v2, %v2415_v2  ;;  %2020 = vst.msk [vmem:[%s4354_s8 + $0xe0] sm:$0xf] %vm1963_vm3, %v3677_v53  ;;  %v3741_v54 = vpack.c.bf16 %v5392_v0, %v5392_v0  ;;  %v2220_v56 = vmul.f32 %v4933_v6, %v5392_v0 }
 0x182   : > { %v3680_v7 = vpack.c.bf16 %v5412_v22, %v5412_v22  ;;  %v3866_v51 = vpack.c.bf16 %v2479_v44, %v2479_v44  ;;  %v2420_v52 = vmax.f32 %v2292_v63, 0.0  ;;  %v2484_v28 = vmax.f32 %v2356_v25, 0.0  ;;  %v1439_v44 = vpop.f32.mrf.mxu1 }
 0x183   : > { %v2290_v10 = vadd.f32 %v4942_v36, %v2156_v40  ;;  %3055 = vst.msk [vmem:[%s4378_s13 + $0xd4] sm:$0xf] %vm1963_vm3, %v3802_v1  ;;  %2084 = vst.msk [vmem:[%s4354_s8 + $0x1e0] sm:$0xf] %vm1963_vm3, %v3741_v54  ;;  %v2354_v18 = vadd.f32 %v4942_v36, %v2220_v56  ;;  %v2159_v35 = vmul.f32 %v4933_v6, %v5412_v22 }
 0x184   : > { %2023 = vst.msk [vmem:[%s4354_s8 + $0xec] sm:$0xf] %vm1963_vm3, %v3680_v7  ;;  %v3744_v17 = vpack.c.bf16 %v5428_v12, %v5428_v12  ;;  %v2223_v0 = vmul.f32 %v4933_v6, %v5428_v12  ;;  %3119 = vst.msk [vmem:[%s4378_s13 + $0x1d4] sm:$0xf] %vm1963_vm3, %v3866_v51  ;;  %v3807_v27 = vpack.c.bf16 %v2420_v52, %v2420_v52 }
 0x185   : > { %v3871_v26 = vpack.c.bf16 %v2484_v28, %v2484_v28  ;;  %v2418_v46 = vmax.f32 %v2290_v10, 0.0  ;;  %v3678_v21 = vpack.c.bf16 %v5440_v23, %v5440_v23  ;;  %v2482_v57 = vmax.f32 %v2354_v18, 0.0 }
 0x186   : > { %v2293_v20 = vadd.f32 %v4942_v36, %v2159_v35  ;;  %2087 = vst.msk [vmem:[%s4354_s8 + $0x1ec] sm:$0xf] %vm1963_vm3, %v3744_v17  ;;  %v2357_v45 = vadd.f32 %v4942_v36, %v2223_v0  ;;  %v2157_v22 = vmul.f32 %v4933_v6, %v5440_v23  ;;  %3060 = vst.msk [vmem:[%s4378_s13 + $0xe8] sm:$0xf] %vm1963_vm3, %v3807_v27 }
 0x187   : > { %3124 = vst.msk [vmem:[%s4378_s13 + $0x1e8] sm:$0xf] %vm1963_vm3, %v3871_v26  ;;  %v3805_v55 = vpack.c.bf16 %v2418_v46, %v2418_v46  ;;  %2021 = vst.msk [vmem:[%s4354_s8 + $0xe4] sm:$0xf] %vm1963_vm3, %v3678_v21  ;;  %v3742_v58 = vpack.c.bf16 %v5455_v42, %v5455_v42  ;;  %v2221_v30 = vmul.f32 %v4933_v6, %v5455_v42 }
 0x188   : > { %v3683_v13 = vpack.c.bf16 %v4009_v62, %v4009_v62  ;;  %v3869_v34 = vpack.c.bf16 %v2482_v57, %v2482_v57  ;;  %v2421_v11 = vmax.f32 %v2293_v20, 0.0  ;;  %v2485_v31 = vmax.f32 %v2357_v45, 0.0 }
 0x189   : > { %v2291_v12 = vadd.f32 %v4942_v36, %v2157_v22  ;;  %3058 = vst.msk [vmem:[%s4378_s13 + $0xe0] sm:$0xf] %vm1963_vm3, %v3805_v55  ;;  %2085 = vst.msk [vmem:[%s4354_s8 + $0x1e4] sm:$0xf] %vm1963_vm3, %v3742_v58  ;;  %v2355_v4 = vadd.f32 %v4942_v36, %v2221_v30  ;;  %v2162_v15 = vmul.f32 %v4933_v6, %v4009_v62 }
 0x18a   : > { %2026 = vst.msk [vmem:[%s4354_s8 + $0xf8] sm:$0xf] %vm1963_vm3, %v3683_v13  ;;  %v3747_v14 = vpack.c.bf16 %v4073_v19, %v4073_v19  ;;  %v2226_v39 = vmul.f32 %v4933_v6, %v4073_v19  ;;  %3122 = vst.msk [vmem:[%s4378_s13 + $0x1e0] sm:$0xf] %vm1963_vm3, %v3869_v34  ;;  %v3808_v9 = vpack.c.bf16 %v2421_v11, %v2421_v11 }
 0x18b   : > { %v3872_v5 = vpack.c.bf16 %v2485_v31, %v2485_v31  ;;  %v2419_v38 = vmax.f32 %v2291_v12, 0.0  ;;  %v3681_v23 = vpack.c.bf16 %v1180_v3, %v1180_v3  ;;  %v2483_v29 = vmax.f32 %v2355_v4, 0.0 }
 0x18c   : > { %v2296_v32 = vadd.f32 %v4942_v36, %v2162_v15  ;;  %2090 = vst.msk [vmem:[%s4354_s8 + $0x1f8] sm:$0xf] %vm1963_vm3, %v3747_v14  ;;  %v2360_v49 = vadd.f32 %v4942_v36, %v2226_v39  ;;  %v2160_v43 = vmul.f32 %v4933_v6, %v1180_v3  ;;  %3061 = vst.msk [vmem:[%s4378_s13 + $0xec] sm:$0xf] %vm1963_vm3, %v3808_v9 }
 0x18d   : > { %3125 = vst.msk [vmem:[%s4378_s13 + $0x1ec] sm:$0xf] %vm1963_vm3, %v3872_v5  ;;  %v3806_v48 = vpack.c.bf16 %v2419_v38, %v2419_v38  ;;  %2024 = vst.msk [vmem:[%s4354_s8 + $0xf0] sm:$0xf] %vm1963_vm3, %v3681_v23  ;;  %v3745_v41 = vpack.c.bf16 %v1436_v60, %v1436_v60  ;;  %v2224_v33 = vmul.f32 %v4933_v6, %v1436_v60 }
 0x18e   : > { %v3684_v42 = vpack.c.bf16 %v4010_v8, %v4010_v8  ;;  %v3870_v24 = vpack.c.bf16 %v2483_v29, %v2483_v29  ;;  %v2424_v61 = vmax.f32 %v2296_v32, 0.0  ;;  %v2488_v50 = vmax.f32 %v2360_v49, 0.0 }
 0x18f   : > { %v2294_v59 = vadd.f32 %v4942_v36, %v2160_v43  ;;  %3059 = vst.msk [vmem:[%s4378_s13 + $0xe4] sm:$0xf] %vm1963_vm3, %v3806_v48  ;;  %2088 = vst.msk [vmem:[%s4354_s8 + $0x1f0] sm:$0xf] %vm1963_vm3, %v3745_v41  ;;  %v2358_v47 = vadd.f32 %v4942_v36, %v2224_v33  ;;  %v2163_v2 = vmul.f32 %v4933_v6, %v4010_v8 }
 0x190   : > { %2027 = vst.msk [vmem:[%s4354_s8 + $0xfc] sm:$0xf] %vm1963_vm3, %v3684_v42  ;;  %v3748_v53 = vpack.c.bf16 %v4074_v37, %v4074_v37  ;;  %v2227_v62 = vmul.f32 %v4933_v6, %v4074_v37  ;;  %3123 = vst.msk [vmem:[%s4378_s13 + $0x1e4] sm:$0xf] %vm1963_vm3, %v3870_v24  ;;  %v3811_v63 = vpack.c.bf16 %v2424_v61, %v2424_v61 }
 0x191   : > { %v3875_v25 = vpack.c.bf16 %v2488_v50, %v2488_v50  ;;  %v2422_v40 = vmax.f32 %v2294_v59, 0.0  ;;  %v3682_v1 = vpack.c.bf16 %v1183_v16, %v1183_v16  ;;  %v2486_v54 = vmax.f32 %v2358_v47, 0.0 }
 0x192   : > { %v2297_v56 = vadd.f32 %v4942_v36, %v2163_v2  ;;  %2091 = vst.msk [vmem:[%s4354_s8 + $0x1fc] sm:$0xf] %vm1963_vm3, %v3748_v53  ;;  %v2361_v7 = vadd.f32 %v4942_v36, %v2227_v62  ;;  %v2161_v19 = vmul.f32 %v4933_v6, %v1183_v16  ;;  %3064 = vst.msk [vmem:[%s4378_s13 + $0xf8] sm:$0xf] %vm1963_vm3, %v3811_v63 }
 0x193   : > { %3128 = vst.msk [vmem:[%s4378_s13 + $0x1f8] sm:$0xf] %vm1963_vm3, %v3875_v25  ;;  %v3809_v51 = vpack.c.bf16 %v2422_v40, %v2422_v40  ;;  %2025 = vst.msk [vmem:[%s4354_s8 + $0xf4] sm:$0xf] %vm1963_vm3, %v3682_v1  ;;  %v3746_v52 = vpack.c.bf16 %v1439_v44, %v1439_v44  ;;  %v2225_v28 = vmul.f32 %v4933_v6, %v1439_v44 }
 0x194   : > { %v3873_v10 = vpack.c.bf16 %v2486_v54, %v2486_v54  ;;  %v2425_v18 = vmax.f32 %v2297_v56, 0.0  ;;  %v2489_v35 = vmax.f32 %v2361_v7, 0.0  ;;  %v2295_v17 = vadd.f32 %v4942_v36, %v2161_v19 }
 0x195   : > { %3062 = vst.msk [vmem:[%s4378_s13 + $0xf0] sm:$0xf] %vm1963_vm3, %v3809_v51  ;;  %2089 = vst.msk [vmem:[%s4354_s8 + $0x1f4] sm:$0xf] %vm1963_vm3, %v3746_v52  ;;  %v2359_v0 = vadd.f32 %v4942_v36, %v2225_v28 }
 0x196   : > { %3126 = vst.msk [vmem:[%s4378_s13 + $0x1f0] sm:$0xf] %vm1963_vm3, %v3873_v10  ;;  %v3812_v3 = vpack.c.bf16 %v2425_v18, %v2425_v18  ;;  %v3876_v27 = vpack.c.bf16 %v2489_v35, %v2489_v35  ;;  %v2423_v26 = vmax.f32 %v2295_v17, 0.0 }
 0x197   : > { %v2487_v46 = vmax.f32 %v2359_v0, 0.0 }
 0x198   : > { %3065 = vst.msk [vmem:[%s4378_s13 + $0xfc] sm:$0xf] %vm1963_vm3, %v3812_v3  ;;  %3129 = vst.msk [vmem:[%s4378_s13 + $0x1fc] sm:$0xf] %vm1963_vm3, %v3876_v27  ;;  %v3810_v6 = vpack.c.bf16 %v2423_v26, %v2423_v26 }
 0x199   : > { %v3874_v21 = vpack.c.bf16 %v2487_v46, %v2487_v46 }
 0x19a   : > { %3063 = vst.msk [vmem:[%s4378_s13 + $0xf4] sm:$0xf] %vm1963_vm3, %v3810_v6 }
 0x19b   : > { %3127 = vst.msk [vmem:[%s4378_s13 + $0x1f4] sm:$0xf] %vm1963_vm3, %v3874_v21 }
 0x19c PF: > { %s16_s18 = sadd.s32 1, %s4162_s18  }
 0x19d   : > { %p13_p4 = scmp.ge.s32.totalorder %s16_s18, 4  }
 0x19f   :  { %15 = sbr.rel (!%p13_p4) target bundleno = 1 (0x1), region = 78 }

// kernel: wideresnet_forward.8
= control target key start
LH: loop header
LB: loop body
LE: loop exit
PB: predicated region body
PF: predicated region fallthrough
CT: control target
= control target key end

     0   :  { %s3534_s15 = smov 0   ;;  %s4326_s0 = inlined_call_operand.vmem [shape: bf16[2048,144], index: 0, kind: input, shape index: {}]   ;;  %s4327_s1 = inlined_call_operand.vmem [shape: bf16[144,16], index: 1, kind: input, shape index: {}]   ;;  %s4328_s2 = inlined_call_operand.vmem [shape: f32[1,16], index: 2, kind: input, shape index: {}]   ;;  %s4329_s3 = inlined_call_operand.vmem [shape: f32[1,16], index: 3, kind: input, shape index: {}]   ;;  %s4330_s4 = inlined_call_operand.vmem [shape: bf16[2048,16], index: 4, kind: output, shape index: {}]  }
   0x1 LB: > { %s2814_s16 = sadd.s32 4294967295, %s3506_s15   ;;  %p2818_p0 = scmp.ge.s32.totalorder %s3506_s15, 1  ;;  %s3506_s15 = sphi %s3534_s15, %s14_s15  }
   0x2   : > { %p164_p1 = scmp.lt.s32.totalorder %s3506_s15, 3 }
   0x4   : > { %p165_p2 = pnand %p2818_p0, %p164_p1 }
   0x5   : > { %s2819_s19 = sshll.u32 (!%p165_p2), %s2814_s16, 7 }
   0x6   : > { %168 = sbr.rel (%p165_p2) target bundleno = 502 (0x1f6), region = 36  ;;  %p192_p3 = scmp.lt.s32.totalorder (!%p165_p2), %s2819_s19, 255 }
   0xb   : > { %v3313_v0 = vld [vmem:[%s4327_s1 + $0x38] sm:$0xff]   ;;  %v3508_v1 = vmov 0   ;;  %v3314_v2 = vld [vmem:[%s4327_s1 + $0x30] sm:$0xff]   ;;  %s4332_s19 = smov (!%p192_p3, %s2819_s19), 255  ;;  %v3315_v3 = vld [vmem:[%s4327_s1 + $0x28] sm:$0xff]   ;;  %vm981_vm0 = vcmask 130048  }
   0xc   : > { %1174 = vmatprep.subr.bf16.mxu0 %v3508_v1  ;;  %3286 = vmatprep.subr.bf16.mxu1 %v3508_v1  ;;  %s3157_s24 = sshll.u32 %s4332_s19, 3  ;;  %v3316_v4 = vld [vmem:[%s4327_s1 + $0x20] sm:$0xff]   ;;  %v3317_v7 = vld [vmem:[%s4327_s1 + $0x18] sm:$0xff]   ;;  %v3318_v8 = vld [vmem:[%s4327_s1 + $0x10] sm:$0xff]   ;;  %s2823_s20 = sshll.u32 %s4332_s19, 2  ;;  %vm2629_vm1 = vcmask 125952  }
   0xd   : > { %1175 = vmatpush1.bf16.msra.mxu0 %v3313_v0  ;;  %3295 = vmatpush1.bf16.msra.mxu1 %v3313_v0  ;;  %s3557_s27 = scalar_lea.vmem %s4326_s0, %s3157_s24  ;;  %v3319_v9 = vld [vmem:[%s4327_s1 + $0x8] sm:$0xff]   ;;  %v3320_v10 = vld [vmem:[%s4327_s1] sm:$0xff]   ;;  %s3759_s19 = scalar_lea.vmem %s4330_s4, %s2823_s20 }
   0xe   : > { %1176 = vmatprep.subr.bf16.mxu0 %v3508_v1  ;;  %3287 = vmatprep.subr.bf16.mxu1 %v3508_v1  ;;  %v3324_v5 = vld [vmem:[%s3557_s27 + $0x4] ss:$8 sps:$4 sm:$0xff]   ;;  %v3322_v12 = vld [vmem:[%s3557_s27] ss:$8 sps:$4 sm:$0xff]   ;;  %v3328_v14 = vld [vmem:[%s3557_s27 + $0x14] ss:$8 sps:$4 sm:$0xff]  }
   0xf   : > { %v3327_v6 = vld [vmem:[%s3557_s27 + $0x204] ss:$8 sps:$4 sm:$0xff]   ;;  %2961 = vmatprep.mubr.msk.bf16.mxu0 %vm981_vm0, %v3324_v5  ;;  %v3325_v13 = vld [vmem:[%s3557_s27 + $0x200] ss:$8 sps:$4 sm:$0xff]   ;;  %v3330_v15 = vld [vmem:[%s3557_s27 + $0x214] ss:$8 sps:$4 sm:$0xff]  }
  0x10   : > { %2993 = vmatprep.mubr.msk.bf16.mxu1 %vm981_vm0, %v3327_v6  ;;  %v3321_v11 = vld [vmem:[%s4327_s1 + $0x40] sm:$0xff]   ;;  %v3332_v16 = vld [vmem:[%s3557_s27 + $0x10] ss:$8 sps:$4 sm:$0xff]   ;;  %v3340_v22 = vld [vmem:[%s3557_s27 + $0x34] ss:$8 sps:$4 sm:$0xff]  }
  0x11   : > { %1177 = vmatpush1.bf16.msra.mxu0 %v3314_v2  ;;  %3296 = vmatpush1.bf16.msra.mxu1 %v3314_v2  ;;  %v3333_v17 = vld [vmem:[%s3557_s27 + $0x210] ss:$8 sps:$4 sm:$0xff]   ;;  %v3334_v18 = vld [vmem:[%s3557_s27 + $0x24] ss:$8 sps:$4 sm:$0xff]   ;;  %v3338_v20 = vld [vmem:[%s3557_s27 + $0x20] ss:$8 sps:$4 sm:$0xff]  }
  0x12   : > { %1178 = vmatprep.subr.bf16.mxu0 %v3508_v1  ;;  %3288 = vmatprep.subr.bf16.mxu1 %v3508_v1  ;;  %v3336_v19 = vld [vmem:[%s3557_s27 + $0x224] ss:$8 sps:$4 sm:$0xff]   ;;  %v3339_v21 = vld [vmem:[%s3557_s27 + $0x220] ss:$8 sps:$4 sm:$0xff]   ;;  %v3342_v23 = vld [vmem:[%s3557_s27 + $0x234] ss:$8 sps:$4 sm:$0xff]  }
  0x13   : > { %v3344_v24 = vld [vmem:[%s3557_s27 + $0x30] ss:$8 sps:$4 sm:$0xff]   ;;  %v3346_v26 = vld [vmem:[%s3557_s27 + $0x44] ss:$8 sps:$4 sm:$0xff]   ;;  %v3350_v28 = vld [vmem:[%s3557_s27 + $0x40] ss:$8 sps:$4 sm:$0xff]  }
  0x14   : > { %v3345_v25 = vld [vmem:[%s3557_s27 + $0x230] ss:$8 sps:$4 sm:$0xff]   ;;  %v3348_v27 = vld [vmem:[%s3557_s27 + $0x244] ss:$8 sps:$4 sm:$0xff]   ;;  %v3351_v29 = vld [vmem:[%s3557_s27 + $0x240] ss:$8 sps:$4 sm:$0xff]  }
  0x15   : > { %1179 = vmatpush1.bf16.msra.mxu0 %v3315_v3  ;;  %3297 = vmatpush1.bf16.msra.mxu1 %v3315_v3  ;;  %v3352_v30 = vld [vmem:[%s3557_s27 + $0x54] ss:$8 sps:$4 sm:$0xff]   ;;  %v3356_v32 = vld [vmem:[%s3557_s27 + $0x50] ss:$8 sps:$4 sm:$0xff]   ;;  %v3358_v34 = vld [vmem:[%s3557_s27 + $0x64] ss:$8 sps:$4 sm:$0xff]  }
  0x16   : > { %1180 = vmatprep.subr.bf16.mxu0 %v3508_v1  ;;  %3289 = vmatprep.subr.bf16.mxu1 %v3508_v1  ;;  %v3354_v31 = vld [vmem:[%s3557_s27 + $0x254] ss:$8 sps:$4 sm:$0xff]   ;;  %v3357_v33 = vld [vmem:[%s3557_s27 + $0x250] ss:$8 sps:$4 sm:$0xff]   ;;  %v3360_v35 = vld [vmem:[%s3557_s27 + $0x264] ss:$8 sps:$4 sm:$0xff]  }
  0x17   : > { %v3362_v36 = vld [vmem:[%s3557_s27 + $0x60] ss:$8 sps:$4 sm:$0xff]   ;;  %v3364_v38 = vld [vmem:[%s3557_s27 + $0x74] ss:$8 sps:$4 sm:$0xff]   ;;  %v3368_v40 = vld [vmem:[%s3557_s27 + $0x70] ss:$8 sps:$4 sm:$0xff]  }
  0x18   : > { %v3363_v37 = vld [vmem:[%s3557_s27 + $0x260] ss:$8 sps:$4 sm:$0xff]   ;;  %v3366_v39 = vld [vmem:[%s3557_s27 + $0x274] ss:$8 sps:$4 sm:$0xff]   ;;  %v3369_v41 = vld [vmem:[%s3557_s27 + $0x270] ss:$8 sps:$4 sm:$0xff]  }
  0x19   : > { %1181 = vmatpush1.bf16.msra.mxu0 %v3316_v4  ;;  %3298 = vmatpush1.bf16.msra.mxu1 %v3316_v4  ;;  %v3370_v42 = vld [vmem:[%s3557_s27 + $0x84] ss:$8 sps:$4 sm:$0xff]   ;;  %v3374_v44 = vld [vmem:[%s3557_s27 + $0x80] ss:$8 sps:$4 sm:$0xff]   ;;  %v3376_v46 = vld [vmem:[%s3557_s27 + $0x94] ss:$8 sps:$4 sm:$0xff]  }
  0x1a   : > { %1182 = vmatprep.subr.bf16.mxu0 %v3508_v1  ;;  %3290 = vmatprep.subr.bf16.mxu1 %v3508_v1  ;;  %v3372_v43 = vld [vmem:[%s3557_s27 + $0x284] ss:$8 sps:$4 sm:$0xff]   ;;  %v3375_v45 = vld [vmem:[%s3557_s27 + $0x280] ss:$8 sps:$4 sm:$0xff]   ;;  %v3378_v47 = vld [vmem:[%s3557_s27 + $0x294] ss:$8 sps:$4 sm:$0xff]  }
  0x1b   : > { %v3380_v48 = vld [vmem:[%s3557_s27 + $0x90] ss:$8 sps:$4 sm:$0xff]   ;;  %v3382_v50 = vld [vmem:[%s3557_s27 + $0xa4] ss:$8 sps:$4 sm:$0xff]   ;;  %v3386_v52 = vld [vmem:[%s3557_s27 + $0xa0] ss:$8 sps:$4 sm:$0xff]  }
  0x1c   : > { %v3381_v49 = vld [vmem:[%s3557_s27 + $0x290] ss:$8 sps:$4 sm:$0xff]   ;;  %v3384_v51 = vld [vmem:[%s3557_s27 + $0x2a4] ss:$8 sps:$4 sm:$0xff]   ;;  %v3387_v53 = vld [vmem:[%s3557_s27 + $0x2a0] ss:$8 sps:$4 sm:$0xff]  }
  0x1d   : > { %1183 = vmatpush1.bf16.msra.mxu0 %v3317_v7  ;;  %3299 = vmatpush1.bf16.msra.mxu1 %v3317_v7  ;;  %v3388_v54 = vld [vmem:[%s3557_s27 + $0xb4] ss:$8 sps:$4 sm:$0xff]   ;;  %v3392_v56 = vld [vmem:[%s3557_s27 + $0xb0] ss:$8 sps:$4 sm:$0xff]   ;;  %v3394_v58 = vld [vmem:[%s3557_s27 + $0xc4] ss:$8 sps:$4 sm:$0xff]  }
  0x1e   : > { %1184 = vmatprep.subr.bf16.mxu0 %v3508_v1  ;;  %3291 = vmatprep.subr.bf16.mxu1 %v3508_v1  ;;  %v3390_v55 = vld [vmem:[%s3557_s27 + $0x2b4] ss:$8 sps:$4 sm:$0xff]   ;;  %v3393_v57 = vld [vmem:[%s3557_s27 + $0x2b0] ss:$8 sps:$4 sm:$0xff]   ;;  %v3396_v59 = vld [vmem:[%s3557_s27 + $0x2c4] ss:$8 sps:$4 sm:$0xff]  }
  0x1f   : > { %v3398_v60 = vld [vmem:[%s3557_s27 + $0xc0] ss:$8 sps:$4 sm:$0xff]   ;;  %v3400_v62 = vld [vmem:[%s3557_s27 + $0xd4] ss:$8 sps:$4 sm:$0xff]   ;;  %v3404_v0 = vld [vmem:[%s3557_s27 + $0xd0] ss:$8 sps:$4 sm:$0xff]  }
  0x20   : > { %v3399_v61 = vld [vmem:[%s3557_s27 + $0x2c0] ss:$8 sps:$4 sm:$0xff]   ;;  %v3402_v63 = vld [vmem:[%s3557_s27 + $0x2d4] ss:$8 sps:$4 sm:$0xff]   ;;  %v3406_v2 = vld [vmem:[%s3557_s27 + $0xe4] ss:$8 sps:$4 sm:$0xff]  }
  0x21   : > { %1185 = vmatpush1.bf16.msra.mxu0 %v3318_v8  ;;  %3300 = vmatpush1.bf16.msra.mxu1 %v3318_v8  ;;  %v3408_v3 = vld [vmem:[%s3557_s27 + $0x2e4] ss:$8 sps:$4 sm:$0xff]   ;;  %v3410_v4 = vld [vmem:[%s3557_s27 + $0xe0] ss:$8 sps:$4 sm:$0xff]   ;;  %v3412_v6 = vld [vmem:[%s3557_s27 + $0xf4] ss:$8 sps:$4 sm:$0xff]  }
  0x22   : > { %1186 = vmatprep.subr.bf16.mxu0 %v3508_v1  ;;  %3292 = vmatprep.subr.bf16.mxu1 %v3508_v1  ;;  %v3411_v5 = vld [vmem:[%s3557_s27 + $0x2e0] ss:$8 sps:$4 sm:$0xff]   ;;  %v3414_v7 = vld [vmem:[%s3557_s27 + $0x2f4] ss:$8 sps:$4 sm:$0xff]   ;;  %v3416_v8 = vld [vmem:[%s3557_s27 + $0xf0] ss:$8 sps:$4 sm:$0xff]  }
  0x25   : > { %1187 = vmatpush1.bf16.msra.mxu0 %v3319_v9  ;;  %3301 = vmatpush1.bf16.msra.mxu1 %v3319_v9  ;;  %v3417_v9 = vld [vmem:[%s3557_s27 + $0x2f0] ss:$8 sps:$4 sm:$0xff]  }
  0x26   : > { %1188 = vmatprep.subr.bf16.mxu0 %v3508_v1  ;;  %3293 = vmatprep.subr.bf16.mxu1 %v3508_v1 }
  0x29   : > { %1189 = vmatpush1.bf16.msra.mxu0 %v3320_v10  ;;  %3302 = vmatpush1.bf16.msra.mxu1 %v3320_v10  ;;  %v3418_v10 = vld [vmem:[%s3557_s27 + $0x104] ss:$8 sps:$4 sm:$0xff]  }
  0x2a   : > { %1204 = vmatprep.subr.bf16.mxu0 %v3508_v1  ;;  %3294 = vmatprep.subr.bf16.mxu1 %v3508_v1  ;;  %v3405_v1 = vld [vmem:[%s3557_s27 + $0x2d0] ss:$8 sps:$4 sm:$0xff]  }
  0x2d   : > { %1205 = vmatpush2.bf16.msra.mxu0 %v3321_v11  ;;  %3303 = vmatpush2.bf16.msra.mxu1 %v3321_v11  ;;  %v3420_v11 = vld [vmem:[%s3557_s27 + $0x304] ss:$8 sps:$4 sm:$0xff]  }
  0x30   : > { %1207 = vmatmul.mubr.bf16.vlgmr.msra.gmra.mxu0 %v3322_v12  ;;  %1463 = vmatmul.mubr.bf16.vlgmr.msra.gmra.mxu1 %v3325_v13  ;;  %v3422_v12 = vld [vmem:[%s3557_s27 + $0x100] ss:$8 sps:$4 sm:$0xff]  }
  0x31   : > { %2962 = vmatprep.mubr.msk.bf16.mxu0 %vm981_vm0, %v3328_v14  ;;  %2994 = vmatprep.mubr.msk.bf16.mxu1 %vm981_vm0, %v3330_v15  ;;  %v3423_v13 = vld [vmem:[%s3557_s27 + $0x300] ss:$8 sps:$4 sm:$0xff]   ;;  %v3424_v14 = vld [vmem:[%s3557_s27 + $0x114] ss:$8 sps:$4 sm:$0xff]  }
  0x32   : > { %v3426_v15 = vld [vmem:[%s3557_s27 + $0x314] ss:$8 sps:$4 sm:$0xff]  }
  0x38   : > { %1215 = vmatmul.mubr.bf16.gmra.mxu0 %v3332_v16  ;;  %1471 = vmatmul.mubr.bf16.gmra.mxu1 %v3333_v17  ;;  %v3428_v16 = vld [vmem:[%s3557_s27 + $0x110] ss:$8 sps:$4 sm:$0xff]  }
  0x39   : > { %2963 = vmatprep.mubr.msk.bf16.mxu0 %vm981_vm0, %v3334_v18  ;;  %2995 = vmatprep.mubr.msk.bf16.mxu1 %vm981_vm0, %v3336_v19  ;;  %v3429_v17 = vld [vmem:[%s3557_s27 + $0x310] ss:$8 sps:$4 sm:$0xff]   ;;  %v3430_v18 = vld [vmem:[%s3557_s27 + $0x124] ss:$8 sps:$4 sm:$0xff]  }
  0x3a   : > { %v3432_v19 = vld [vmem:[%s3557_s27 + $0x324] ss:$8 sps:$4 sm:$0xff]  }
  0x40   : > { %1223 = vmatmul.mubr.bf16.gmra.mxu0 %v3338_v20  ;;  %1479 = vmatmul.mubr.bf16.gmra.mxu1 %v3339_v21  ;;  %v3434_v20 = vld [vmem:[%s3557_s27 + $0x120] ss:$8 sps:$4 sm:$0xff]  }
  0x41   : > { %2964 = vmatprep.mubr.msk.bf16.mxu0 %vm981_vm0, %v3340_v22  ;;  %2996 = vmatprep.mubr.msk.bf16.mxu1 %vm981_vm0, %v3342_v23  ;;  %v3435_v21 = vld [vmem:[%s3557_s27 + $0x320] ss:$8 sps:$4 sm:$0xff]   ;;  %v3436_v22 = vld [vmem:[%s3557_s27 + $0x134] ss:$8 sps:$4 sm:$0xff]  }
  0x42   : > { %v3438_v23 = vld [vmem:[%s3557_s27 + $0x334] ss:$8 sps:$4 sm:$0xff]  }
  0x48   : > { %1231 = vmatmul.mubr.bf16.gmra.mxu0 %v3344_v24  ;;  %1487 = vmatmul.mubr.bf16.gmra.mxu1 %v3345_v25  ;;  %v3440_v24 = vld [vmem:[%s3557_s27 + $0x130] ss:$8 sps:$4 sm:$0xff]  }
  0x49   : > { %2965 = vmatprep.mubr.msk.bf16.mxu0 %vm981_vm0, %v3346_v26  ;;  %2997 = vmatprep.mubr.msk.bf16.mxu1 %vm981_vm0, %v3348_v27  ;;  %v3441_v25 = vld [vmem:[%s3557_s27 + $0x330] ss:$8 sps:$4 sm:$0xff]   ;;  %v3442_v26 = vld [vmem:[%s3557_s27 + $0x144] ss:$8 sps:$4 sm:$0xff]  }
  0x4a   : > { %v3444_v27 = vld [vmem:[%s3557_s27 + $0x344] ss:$8 sps:$4 sm:$0xff]  }
  0x50   : > { %1239 = vmatmul.mubr.bf16.gmra.mxu0 %v3350_v28  ;;  %1495 = vmatmul.mubr.bf16.gmra.mxu1 %v3351_v29  ;;  %v3446_v28 = vld [vmem:[%s3557_s27 + $0x140] ss:$8 sps:$4 sm:$0xff]  }
  0x51   : > { %2966 = vmatprep.mubr.msk.bf16.mxu0 %vm981_vm0, %v3352_v30  ;;  %2998 = vmatprep.mubr.msk.bf16.mxu1 %vm981_vm0, %v3354_v31  ;;  %v3447_v29 = vld [vmem:[%s3557_s27 + $0x340] ss:$8 sps:$4 sm:$0xff]   ;;  %v3448_v30 = vld [vmem:[%s3557_s27 + $0x154] ss:$8 sps:$4 sm:$0xff]  }
  0x52   : > { %v3450_v31 = vld [vmem:[%s3557_s27 + $0x354] ss:$8 sps:$4 sm:$0xff]  }
  0x58   : > { %1247 = vmatmul.mubr.bf16.gmra.mxu0 %v3356_v32  ;;  %1503 = vmatmul.mubr.bf16.gmra.mxu1 %v3357_v33  ;;  %v3452_v32 = vld [vmem:[%s3557_s27 + $0x150] ss:$8 sps:$4 sm:$0xff]  }
  0x59   : > { %2967 = vmatprep.mubr.msk.bf16.mxu0 %vm981_vm0, %v3358_v34  ;;  %2999 = vmatprep.mubr.msk.bf16.mxu1 %vm981_vm0, %v3360_v35  ;;  %v3453_v33 = vld [vmem:[%s3557_s27 + $0x350] ss:$8 sps:$4 sm:$0xff]   ;;  %v3454_v34 = vld [vmem:[%s3557_s27 + $0x164] ss:$8 sps:$4 sm:$0xff]  }
  0x5a   : > { %v3456_v35 = vld [vmem:[%s3557_s27 + $0x364] ss:$8 sps:$4 sm:$0xff]  }
  0x60   : > { %1255 = vmatmul.mubr.bf16.gmra.mxu0 %v3362_v36  ;;  %1511 = vmatmul.mubr.bf16.gmra.mxu1 %v3363_v37  ;;  %v3458_v36 = vld [vmem:[%s3557_s27 + $0x160] ss:$8 sps:$4 sm:$0xff]  }
  0x61   : > { %2968 = vmatprep.mubr.msk.bf16.mxu0 %vm981_vm0, %v3364_v38  ;;  %3000 = vmatprep.mubr.msk.bf16.mxu1 %vm981_vm0, %v3366_v39  ;;  %v3459_v37 = vld [vmem:[%s3557_s27 + $0x360] ss:$8 sps:$4 sm:$0xff]   ;;  %v3460_v38 = vld [vmem:[%s3557_s27 + $0x174] ss:$8 sps:$4 sm:$0xff]  }
  0x62   : > { %v3462_v39 = vld [vmem:[%s3557_s27 + $0x374] ss:$8 sps:$4 sm:$0xff]  }
  0x68   : > { %1263 = vmatmul.mubr.bf16.gmra.mxu0 %v3368_v40  ;;  %1519 = vmatmul.mubr.bf16.gmra.mxu1 %v3369_v41  ;;  %v3464_v40 = vld [vmem:[%s3557_s27 + $0x170] ss:$8 sps:$4 sm:$0xff]  }
  0x69   : > { %2969 = vmatprep.mubr.msk.bf16.mxu0 %vm981_vm0, %v3370_v42  ;;  %3001 = vmatprep.mubr.msk.bf16.mxu1 %vm981_vm0, %v3372_v43  ;;  %v3465_v41 = vld [vmem:[%s3557_s27 + $0x370] ss:$8 sps:$4 sm:$0xff]   ;;  %v3466_v42 = vld [vmem:[%s3557_s27 + $0x184] ss:$8 sps:$4 sm:$0xff]  }
  0x6a   : > { %v3468_v43 = vld [vmem:[%s3557_s27 + $0x384] ss:$8 sps:$4 sm:$0xff]  }
  0x70   : > { %1271 = vmatmul.mubr.bf16.gmra.mxu0 %v3374_v44  ;;  %1527 = vmatmul.mubr.bf16.gmra.mxu1 %v3375_v45  ;;  %v253_v44 = vld [vmem:[%s3557_s27 + $0x180] sm:$0xff]  ;;  %v254_v45 = vld [vmem:[%s3557_s27 + $0x188] sm:$0xff] }
  0x71   : > { %2970 = vmatprep.mubr.msk.bf16.mxu0 %vm981_vm0, %v3376_v46  ;;  %3002 = vmatprep.mubr.msk.bf16.mxu1 %vm981_vm0, %v3378_v47  ;;  %v317_v46 = vld [vmem:[%s3557_s27 + $0x380] sm:$0xff]  ;;  %v318_v47 = vld [vmem:[%s3557_s27 + $0x388] sm:$0xff] }
  0x78   : > { %1279 = vmatmul.mubr.bf16.gmra.mxu0 %v3380_v48  ;;  %1535 = vmatmul.mubr.bf16.gmra.mxu1 %v3381_v49  ;;  %v2872_v48 = vcombine.low %v253_v44, %v254_v45  ;;  %v2936_v49 = vcombine.low %v317_v46, %v318_v47 }
  0x79   : > { %2971 = vmatprep.mubr.msk.bf16.mxu0 %vm981_vm0, %v3382_v50  ;;  %3003 = vmatprep.mubr.msk.bf16.mxu1 %vm981_vm0, %v3384_v51  ;;  %v3470_v50 = vld [vmem:[%s3557_s27 + $0x194] ss:$8 sps:$4 sm:$0xff]  }
  0x7a   : > { %v3472_v51 = vld [vmem:[%s3557_s27 + $0x394] ss:$8 sps:$4 sm:$0xff]  }
  0x80   : > { %1287 = vmatmul.mubr.bf16.gmra.mxu0 %v3386_v52  ;;  %1543 = vmatmul.mubr.bf16.gmra.mxu1 %v3387_v53  ;;  %v3734_v52 = vld [vmem:[%s4328_s2] ss:$0 sm:$0xff] }
  0x81   : > { %2972 = vmatprep.mubr.msk.bf16.mxu0 %vm981_vm0, %v3388_v54  ;;  %3004 = vmatprep.mubr.msk.bf16.mxu1 %vm981_vm0, %v3390_v55  ;;  %v3739_v54 = vld [vmem:[%s4329_s3] ss:$0 sm:$0xff] }
  0x88   : > { %1295 = vmatmul.mubr.bf16.gmra.mxu0 %v3392_v56  ;;  %1551 = vmatmul.mubr.bf16.gmra.mxu1 %v3393_v57  ;;  %v255_v56 = vld [vmem:[%s3557_s27 + $0x190] sm:$0xff] }
  0x89   : > { %2973 = vmatprep.mubr.msk.bf16.mxu0 %vm981_vm0, %v3394_v58  ;;  %3005 = vmatprep.mubr.msk.bf16.mxu1 %vm981_vm0, %v3396_v59  ;;  %v256_v59 = vld [vmem:[%s3557_s27 + $0x198] sm:$0xff] }
  0x90   : > { %1303 = vmatmul.mubr.bf16.gmra.mxu0 %v3398_v60  ;;  %1559 = vmatmul.mubr.bf16.gmra.mxu1 %v3399_v61  ;;  %v319_v60 = vld [vmem:[%s3557_s27 + $0x390] sm:$0xff]  ;;  %v320_v61 = vld [vmem:[%s3557_s27 + $0x398] sm:$0xff] }
  0x91   : > { %2974 = vmatprep.mubr.msk.bf16.mxu0 %vm981_vm0, %v3400_v62  ;;  %3006 = vmatprep.mubr.msk.bf16.mxu1 %vm981_vm0, %v3402_v63 }
  0x98   : > { %1311 = vmatmul.mubr.bf16.gmra.mxu0 %v3404_v0  ;;  %1567 = vmatmul.mubr.bf16.gmra.mxu1 %v3405_v1 }
  0x99   : > { %2975 = vmatprep.mubr.msk.bf16.mxu0 %vm981_vm0, %v3406_v2  ;;  %3007 = vmatprep.mubr.msk.bf16.mxu1 %vm981_vm0, %v3408_v3 }
  0xa0   : > { %1319 = vmatmul.mubr.bf16.gmra.mxu0 %v3410_v4  ;;  %1575 = vmatmul.mubr.bf16.gmra.mxu1 %v3411_v5  ;;  %v2874_v4 = vcombine.low %v255_v56, %v256_v59  ;;  %v2938_v5 = vcombine.low %v319_v60, %v320_v61  ;;  %v260_v59 = vld [vmem:[%s3557_s27 + $0x1b8] sm:$0xff]  ;;  %v323_v60 = vld [vmem:[%s3557_s27 + $0x3b0] sm:$0xff] }
  0xa1   : > { %2976 = vmatprep.mubr.msk.bf16.mxu0 %vm981_vm0, %v3412_v6  ;;  %3008 = vmatprep.mubr.msk.bf16.mxu1 %vm981_vm0, %v3414_v7  ;;  %v324_v61 = vld [vmem:[%s3557_s27 + $0x3b8] sm:$0xff] }
  0xa8   : > { %1327 = vmatmul.mubr.bf16.gmra.mxu0 %v3416_v8  ;;  %1583 = vmatmul.mubr.bf16.gmra.mxu1 %v3417_v9 }
  0xa9   : > { %2977 = vmatprep.mubr.msk.bf16.mxu0 %vm981_vm0, %v3418_v10  ;;  %3009 = vmatprep.mubr.msk.bf16.mxu1 %vm981_vm0, %v3420_v11  ;;  %v3474_v10 = vld [vmem:[%s3557_s27 + $0x1a4] ss:$8 sps:$4 sm:$0xff]  }
  0xaa   : > { %v3476_v11 = vld [vmem:[%s3557_s27 + $0x3a4] ss:$8 sps:$4 sm:$0xff]  }
  0xb0   : > { %1335 = vmatmul.mubr.bf16.gmra.mxu0 %v3422_v12  ;;  %1591 = vmatmul.mubr.bf16.gmra.mxu1 %v3423_v13 }
  0xb1   : > { %2978 = vmatprep.mubr.msk.bf16.mxu0 %vm981_vm0, %v3424_v14  ;;  %3010 = vmatprep.mubr.msk.bf16.mxu1 %vm981_vm0, %v3426_v15 }
  0xb8   : > { %1343 = vmatmul.mubr.bf16.gmra.mxu0 %v3428_v16  ;;  %1599 = vmatmul.mubr.bf16.gmra.mxu1 %v3429_v17 }
  0xb9   : > { %2979 = vmatprep.mubr.msk.bf16.mxu0 %vm981_vm0, %v3430_v18  ;;  %3011 = vmatprep.mubr.msk.bf16.mxu1 %vm981_vm0, %v3432_v19 }
  0xc0   : > { %1351 = vmatmul.mubr.bf16.gmra.mxu0 %v3434_v20  ;;  %1607 = vmatmul.mubr.bf16.gmra.mxu1 %v3435_v21  ;;  %v257_v20 = vld [vmem:[%s3557_s27 + $0x1a0] sm:$0xff] }
  0xc1   : > { %2980 = vmatprep.mubr.msk.bf16.mxu0 %vm981_vm0, %v3436_v22  ;;  %3012 = vmatprep.mubr.msk.bf16.mxu1 %vm981_vm0, %v3438_v23 }
  0xc8   : > { %1359 = vmatmul.mubr.bf16.gmra.mxu0 %v3440_v24  ;;  %1615 = vmatmul.mubr.bf16.gmra.mxu1 %v3441_v25  ;;  %v258_v25 = vld [vmem:[%s3557_s27 + $0x1a8] sm:$0xff] }
  0xc9   : > { %2981 = vmatprep.mubr.msk.bf16.mxu0 %vm981_vm0, %v3442_v26  ;;  %3013 = vmatprep.mubr.msk.bf16.mxu1 %vm981_vm0, %v3444_v27  ;;  %v321_v26 = vld [vmem:[%s3557_s27 + $0x3a0] sm:$0xff]  ;;  %v322_v27 = vld [vmem:[%s3557_s27 + $0x3a8] sm:$0xff] }
  0xd0   : > { %1367 = vmatmul.mubr.bf16.gmra.mxu0 %v3446_v28  ;;  %1623 = vmatmul.mubr.bf16.gmra.mxu1 %v3447_v29 }
  0xd1   : > { %2982 = vmatprep.mubr.msk.bf16.mxu0 %vm981_vm0, %v3448_v30  ;;  %3014 = vmatprep.mubr.msk.bf16.mxu1 %vm981_vm0, %v3450_v31 }
  0xd8   : > { %1375 = vmatmul.mubr.bf16.gmra.mxu0 %v3452_v32  ;;  %1631 = vmatmul.mubr.bf16.gmra.mxu1 %v3453_v33 }
  0xd9   : > { %2983 = vmatprep.mubr.msk.bf16.mxu0 %vm981_vm0, %v3454_v34  ;;  %3015 = vmatprep.mubr.msk.bf16.mxu1 %vm981_vm0, %v3456_v35 }
  0xe0   : > { %1383 = vmatmul.mubr.bf16.gmra.mxu0 %v3458_v36  ;;  %1639 = vmatmul.mubr.bf16.gmra.mxu1 %v3459_v37  ;;  %v2876_v36 = vcombine.low %v257_v20, %v258_v25  ;;  %v2940_v37 = vcombine.low %v321_v26, %v322_v27  ;;  %v262_v27 = vld [vmem:[%s3557_s27 + $0x1c8] sm:$0xff] }
  0xe1   : > { %2984 = vmatprep.mubr.msk.bf16.mxu0 %vm981_vm0, %v3460_v38  ;;  %3016 = vmatprep.mubr.msk.bf16.mxu1 %vm981_vm0, %v3462_v39 }
  0xe8   : > { %1391 = vmatmul.mubr.bf16.gmra.mxu0 %v3464_v40  ;;  %1647 = vmatmul.mubr.bf16.gmra.mxu1 %v3465_v41 }
  0xe9   : > { %2985 = vmatprep.mubr.msk.bf16.mxu0 %vm981_vm0, %v3466_v42  ;;  %3017 = vmatprep.mubr.msk.bf16.mxu1 %vm981_vm0, %v3468_v43  ;;  %v3478_v42 = vld [vmem:[%s3557_s27 + $0x1b4] ss:$8 sps:$4 sm:$0xff]  }
  0xea   : > { %v3480_v43 = vld [vmem:[%s3557_s27 + $0x3b4] ss:$8 sps:$4 sm:$0xff]  }
  0xf0   : > { %v1208_v53 = vpop.f32.mrf.mxu0  ;;  %1399 = vmatmul.mubr.bf16.gmra.mxu0 %v2872_v48  ;;  %v1464_v55 = vpop.f32.mrf.mxu1  ;;  %1655 = vmatmul.mubr.bf16.gmra.mxu1 %v2936_v49 }
  0xf1   : > { %v1727_v57 = vmul.f32 %v3734_v52, %v1208_v53  ;;  %v1791_v58 = vmul.f32 %v3734_v52, %v1464_v55  ;;  %2986 = vmatprep.mubr.msk.bf16.mxu0 %vm981_vm0, %v3470_v50  ;;  %3018 = vmatprep.mubr.msk.bf16.mxu1 %vm981_vm0, %v3472_v51  ;;  %v259_v53 = vld [vmem:[%s3557_s27 + $0x1b0] sm:$0xff] }
  0xf2   : > { %v1210_v62 = vpop.f32.mrf.mxu0  ;;  %v1466_v63 = vpop.f32.mrf.mxu1 }
  0xf3   : > { %v1861_v0 = vadd.f32 %v3739_v54, %v1727_v57  ;;  %v1925_v1 = vadd.f32 %v3739_v54, %v1791_v58 }
  0xf4   : > { %v1211_v2 = vpop.f32.mrf.mxu0  ;;  %v1467_v3 = vpop.f32.mrf.mxu1 }
  0xf5   : > { %v1989_v6 = vmax.f32 %v1861_v0, 0.0  ;;  %v2053_v7 = vmax.f32 %v1925_v1, 0.0  ;;  %v1728_v8 = vmul.f32 %v3734_v52, %v1211_v2  ;;  %v1792_v9 = vmul.f32 %v3734_v52, %v1467_v3 }
  0xf6   : > { %v1213_v12 = vpop.f32.mrf.mxu0  ;;  %v1469_v13 = vpop.f32.mrf.mxu1 }
  0xf7   : > { %v3158_v14 = vpack.c.bf16 %v1989_v6, %v1989_v6  ;;  %v3222_v15 = vpack.c.bf16 %v2053_v7, %v2053_v7  ;;  %v1862_v16 = vadd.f32 %v3739_v54, %v1728_v8  ;;  %v1926_v17 = vadd.f32 %v3739_v54, %v1792_v9  ;;  %v3482_v12 = vld [vmem:[%s3557_s27 + $0x1c4] ss:$8 sps:$4 sm:$0xff]  }
  0xf8   : > { %v1216_v18 = vpop.f32.mrf.mxu0  ;;  %1407 = vmatmul.mubr.bf16.gmra.mxu0 %v2874_v4  ;;  %v1472_v19 = vpop.f32.mrf.mxu1  ;;  %1663 = vmatmul.mubr.bf16.gmra.mxu1 %v2938_v5  ;;  %v2878_v6 = vcombine.low %v259_v53, %v260_v59  ;;  %v2942_v7 = vcombine.low %v323_v60, %v324_v61  ;;  %v3484_v13 = vld [vmem:[%s3557_s27 + $0x3c4] ss:$8 sps:$4 sm:$0xff]   ;;  %v264_v61 = vld [vmem:[%s3557_s27 + $0x1d8] sm:$0xff] }
  0xf9   : > { %2630 = vst.msk [vmem:[%s3759_s19] sm:$0xf] %vm2629_vm1, %v3158_v14  ;;  %2694 = vst.msk [vmem:[%s3759_s19 + $0x100] sm:$0xf] %vm2629_vm1, %v3222_v15  ;;  %v1990_v21 = vmax.f32 %v1862_v16, 0.0  ;;  %v2054_v22 = vmax.f32 %v1926_v17, 0.0  ;;  %v1729_v23 = vmul.f32 %v3734_v52, %v1216_v18  ;;  %v1793_v24 = vmul.f32 %v3734_v52, %v1472_v19  ;;  %2987 = vmatprep.mubr.msk.bf16.mxu0 %vm981_vm0, %v3474_v10 }
  0xfa   : > { %3019 = vmatprep.mubr.msk.bf16.mxu1 %vm981_vm0, %v3476_v11  ;;  %v1218_v28 = vpop.f32.mrf.mxu0  ;;  %v1474_v29 = vpop.f32.mrf.mxu1 }
  0xfb   : > { %v3159_v30 = vpack.c.bf16 %v1990_v21, %v1990_v21  ;;  %v3223_v31 = vpack.c.bf16 %v2054_v22, %v2054_v22  ;;  %v1863_v32 = vadd.f32 %v3739_v54, %v1729_v23  ;;  %v1927_v33 = vadd.f32 %v3739_v54, %v1793_v24  ;;  %v261_v22 = vld [vmem:[%s3557_s27 + $0x1c0] sm:$0xff]  ;;  %v326_v29 = vld [vmem:[%s3557_s27 + $0x3c8] sm:$0xff] }
  0xfc   : > { %v1219_v34 = vpop.f32.mrf.mxu0  ;;  %v1475_v35 = vpop.f32.mrf.mxu1  ;;  %v325_v28 = vld [vmem:[%s3557_s27 + $0x3c0] sm:$0xff] }
  0xfd   : > { %2631 = vst.msk [vmem:[%s3759_s19 + $0x4] sm:$0xf] %vm2629_vm1, %v3159_v30  ;;  %2695 = vst.msk [vmem:[%s3759_s19 + $0x104] sm:$0xf] %vm2629_vm1, %v3223_v31  ;;  %v1991_v38 = vmax.f32 %v1863_v32, 0.0  ;;  %v2055_v39 = vmax.f32 %v1927_v33, 0.0  ;;  %v1730_v40 = vmul.f32 %v3734_v52, %v1219_v34  ;;  %v1794_v41 = vmul.f32 %v3734_v52, %v1475_v35 }
  0xfe   : > { %v1221_v44 = vpop.f32.mrf.mxu0  ;;  %v1477_v45 = vpop.f32.mrf.mxu1 }
  0xff   : > { %v3160_v46 = vpack.c.bf16 %v1991_v38, %v1991_v38  ;;  %v3224_v47 = vpack.c.bf16 %v2055_v39, %v2055_v39  ;;  %v1864_v48 = vadd.f32 %v3739_v54, %v1730_v40  ;;  %v1928_v49 = vadd.f32 %v3739_v54, %v1794_v41  ;;  %v3486_v44 = vld [vmem:[%s3557_s27 + $0x1d4] ss:$8 sps:$4 sm:$0xff]  }
 0x100   : > { %v1224_v50 = vpop.f32.mrf.mxu0  ;;  %1415 = vmatmul.mubr.bf16.gmra.mxu0 %v2876_v36  ;;  %v1480_v51 = vpop.f32.mrf.mxu1  ;;  %1671 = vmatmul.mubr.bf16.gmra.mxu1 %v2940_v37  ;;  %v2880_v38 = vcombine.low %v261_v22, %v262_v27  ;;  %v2944_v39 = vcombine.low %v325_v28, %v326_v29  ;;  %v3488_v45 = vld [vmem:[%s3557_s27 + $0x3d4] ss:$8 sps:$4 sm:$0xff]   ;;  %v266_v29 = vld [vmem:[%s3557_s27 + $0x1e8] sm:$0xff] }
 0x101   : > { %2632 = vst.msk [vmem:[%s3759_s19 + $0x8] sm:$0xf] %vm2629_vm1, %v3160_v46  ;;  %2696 = vst.msk [vmem:[%s3759_s19 + $0x108] sm:$0xf] %vm2629_vm1, %v3224_v47  ;;  %v1992_v55 = vmax.f32 %v1864_v48, 0.0  ;;  %v2056_v56 = vmax.f32 %v1928_v49, 0.0  ;;  %v1731_v57 = vmul.f32 %v3734_v52, %v1224_v50  ;;  %v1795_v58 = vmul.f32 %v3734_v52, %v1480_v51  ;;  %2988 = vmatprep.mubr.msk.bf16.mxu0 %vm981_vm0, %v3478_v42 }
 0x102   : > { %3020 = vmatprep.mubr.msk.bf16.mxu1 %vm981_vm0, %v3480_v43  ;;  %v1226_v62 = vpop.f32.mrf.mxu0  ;;  %v1482_v63 = vpop.f32.mrf.mxu1 }
 0x103   : > { %v3161_v0 = vpack.c.bf16 %v1992_v55, %v1992_v55  ;;  %v3225_v1 = vpack.c.bf16 %v2056_v56, %v2056_v56  ;;  %v1865_v2 = vadd.f32 %v3739_v54, %v1731_v57  ;;  %v1929_v3 = vadd.f32 %v3739_v54, %v1795_v58  ;;  %v263_v56 = vld [vmem:[%s3557_s27 + $0x1d0] sm:$0xff]  ;;  %v328_v63 = vld [vmem:[%s3557_s27 + $0x3d8] sm:$0xff] }
 0x104   : > { %v1227_v4 = vpop.f32.mrf.mxu0  ;;  %v1483_v5 = vpop.f32.mrf.mxu1  ;;  %v327_v62 = vld [vmem:[%s3557_s27 + $0x3d0] sm:$0xff] }
 0x105   : > { %2633 = vst.msk [vmem:[%s3759_s19 + $0xc] sm:$0xf] %vm2629_vm1, %v3161_v0  ;;  %2697 = vst.msk [vmem:[%s3759_s19 + $0x10c] sm:$0xf] %vm2629_vm1, %v3225_v1  ;;  %v1993_v8 = vmax.f32 %v1865_v2, 0.0  ;;  %v2057_v9 = vmax.f32 %v1929_v3, 0.0  ;;  %v1732_v10 = vmul.f32 %v3734_v52, %v1227_v4  ;;  %v1796_v11 = vmul.f32 %v3734_v52, %v1483_v5 }
 0x106   : > { %v1229_v14 = vpop.f32.mrf.mxu0  ;;  %v1485_v15 = vpop.f32.mrf.mxu1 }
 0x107   : > { %v3162_v16 = vpack.c.bf16 %v1993_v8, %v1993_v8  ;;  %v3226_v17 = vpack.c.bf16 %v2057_v9, %v2057_v9  ;;  %v1866_v18 = vadd.f32 %v3739_v54, %v1732_v10  ;;  %v1930_v19 = vadd.f32 %v3739_v54, %v1796_v11  ;;  %v3490_v14 = vld [vmem:[%s3557_s27 + $0x1e4] ss:$8 sps:$4 sm:$0xff]  }
 0x108   : > { %v1232_v20 = vpop.f32.mrf.mxu0  ;;  %1423 = vmatmul.mubr.bf16.gmra.mxu0 %v2878_v6  ;;  %v1488_v21 = vpop.f32.mrf.mxu1  ;;  %1679 = vmatmul.mubr.bf16.gmra.mxu1 %v2942_v7  ;;  %v2882_v8 = vcombine.low %v263_v56, %v264_v61  ;;  %v2946_v9 = vcombine.low %v327_v62, %v328_v63  ;;  %v3492_v15 = vld [vmem:[%s3557_s27 + $0x3e4] ss:$8 sps:$4 sm:$0xff]   ;;  %v268_v63 = vld [vmem:[%s3557_s27 + $0x1f8] sm:$0xff] }
 0x109   : > { %2634 = vst.msk [vmem:[%s3759_s19 + $0x10] sm:$0xf] %vm2629_vm1, %v3162_v16  ;;  %2698 = vst.msk [vmem:[%s3759_s19 + $0x110] sm:$0xf] %vm2629_vm1, %v3226_v17  ;;  %v1994_v23 = vmax.f32 %v1866_v18, 0.0  ;;  %v2058_v24 = vmax.f32 %v1930_v19, 0.0  ;;  %v1733_v25 = vmul.f32 %v3734_v52, %v1232_v20  ;;  %v1797_v26 = vmul.f32 %v3734_v52, %v1488_v21  ;;  %2989 = vmatprep.mubr.msk.bf16.mxu0 %vm981_vm0, %v3482_v12 }
 0x10a   : > { %3021 = vmatprep.mubr.msk.bf16.mxu1 %vm981_vm0, %v3484_v13  ;;  %v1234_v30 = vpop.f32.mrf.mxu0  ;;  %v1490_v31 = vpop.f32.mrf.mxu1 }
 0x10b   : > { %v3163_v32 = vpack.c.bf16 %v1994_v23, %v1994_v23  ;;  %v3227_v33 = vpack.c.bf16 %v2058_v24, %v2058_v24  ;;  %v1867_v34 = vadd.f32 %v3739_v54, %v1733_v25  ;;  %v1931_v35 = vadd.f32 %v3739_v54, %v1797_v26  ;;  %v265_v24 = vld [vmem:[%s3557_s27 + $0x1e0] sm:$0xff]  ;;  %v330_v31 = vld [vmem:[%s3557_s27 + $0x3e8] sm:$0xff] }
 0x10c   : > { %v1235_v36 = vpop.f32.mrf.mxu0  ;;  %v1491_v37 = vpop.f32.mrf.mxu1  ;;  %v329_v30 = vld [vmem:[%s3557_s27 + $0x3e0] sm:$0xff] }
 0x10d   : > { %2635 = vst.msk [vmem:[%s3759_s19 + $0x14] sm:$0xf] %vm2629_vm1, %v3163_v32  ;;  %2699 = vst.msk [vmem:[%s3759_s19 + $0x114] sm:$0xf] %vm2629_vm1, %v3227_v33  ;;  %v1995_v40 = vmax.f32 %v1867_v34, 0.0  ;;  %v2059_v41 = vmax.f32 %v1931_v35, 0.0  ;;  %v1734_v42 = vmul.f32 %v3734_v52, %v1235_v36  ;;  %v1798_v43 = vmul.f32 %v3734_v52, %v1491_v37 }
 0x10e   : > { %v1237_v46 = vpop.f32.mrf.mxu0  ;;  %v1493_v47 = vpop.f32.mrf.mxu1 }
 0x10f   : > { %v3164_v48 = vpack.c.bf16 %v1995_v40, %v1995_v40  ;;  %v3228_v49 = vpack.c.bf16 %v2059_v41, %v2059_v41  ;;  %v1868_v50 = vadd.f32 %v3739_v54, %v1734_v42  ;;  %v1932_v51 = vadd.f32 %v3739_v54, %v1798_v43  ;;  %v3494_v46 = vld [vmem:[%s3557_s27 + $0x1f4] ss:$8 sps:$4 sm:$0xff]  }
 0x110   : > { %v1240_v53 = vpop.f32.mrf.mxu0  ;;  %1431 = vmatmul.mubr.bf16.gmra.mxu0 %v2880_v38  ;;  %v1496_v55 = vpop.f32.mrf.mxu1  ;;  %1687 = vmatmul.mubr.bf16.gmra.mxu1 %v2944_v39  ;;  %v2884_v40 = vcombine.low %v265_v24, %v266_v29  ;;  %v2948_v41 = vcombine.low %v329_v30, %v330_v31  ;;  %v3496_v47 = vld [vmem:[%s3557_s27 + $0x3f4] ss:$8 sps:$4 sm:$0xff]  }
 0x111   : > { %2636 = vst.msk [vmem:[%s3759_s19 + $0x18] sm:$0xf] %vm2629_vm1, %v3164_v48  ;;  %2700 = vst.msk [vmem:[%s3759_s19 + $0x118] sm:$0xf] %vm2629_vm1, %v3228_v49  ;;  %v1996_v57 = vmax.f32 %v1868_v50, 0.0  ;;  %v2060_v58 = vmax.f32 %v1932_v51, 0.0  ;;  %v1735_v59 = vmul.f32 %v3734_v52, %v1240_v53  ;;  %v1799_v60 = vmul.f32 %v3734_v52, %v1496_v55  ;;  %2990 = vmatprep.mubr.msk.bf16.mxu0 %vm981_vm0, %v3486_v44 }
 0x112   : > { %3022 = vmatprep.mubr.msk.bf16.mxu1 %vm981_vm0, %v3488_v45  ;;  %v1242_v0 = vpop.f32.mrf.mxu0  ;;  %v1498_v1 = vpop.f32.mrf.mxu1 }
 0x113   : > { %v3165_v2 = vpack.c.bf16 %v1996_v57, %v1996_v57  ;;  %v3229_v3 = vpack.c.bf16 %v2060_v58, %v2060_v58  ;;  %v1869_v4 = vadd.f32 %v3739_v54, %v1735_v59  ;;  %v1933_v5 = vadd.f32 %v3739_v54, %v1799_v60  ;;  %v267_v58 = vld [vmem:[%s3557_s27 + $0x1f0] sm:$0xff]  ;;  %v332_v1 = vld [vmem:[%s3557_s27 + $0x3f8] sm:$0xff] }
 0x114   : > { %v1243_v6 = vpop.f32.mrf.mxu0  ;;  %v1499_v7 = vpop.f32.mrf.mxu1  ;;  %v331_v0 = vld [vmem:[%s3557_s27 + $0x3f0] sm:$0xff] }
 0x115   : > { %2637 = vst.msk [vmem:[%s3759_s19 + $0x1c] sm:$0xf] %vm2629_vm1, %v3165_v2  ;;  %2701 = vst.msk [vmem:[%s3759_s19 + $0x11c] sm:$0xf] %vm2629_vm1, %v3229_v3  ;;  %v1997_v10 = vmax.f32 %v1869_v4, 0.0  ;;  %v2061_v11 = vmax.f32 %v1933_v5, 0.0  ;;  %v1736_v12 = vmul.f32 %v3734_v52, %v1243_v6  ;;  %v1800_v13 = vmul.f32 %v3734_v52, %v1499_v7 }
 0x116   : > { %v1245_v16 = vpop.f32.mrf.mxu0  ;;  %v1501_v17 = vpop.f32.mrf.mxu1 }
 0x117   : > { %v3166_v18 = vpack.c.bf16 %v1997_v10, %v1997_v10  ;;  %v3230_v19 = vpack.c.bf16 %v2061_v11, %v2061_v11  ;;  %v1870_v20 = vadd.f32 %v3739_v54, %v1736_v12  ;;  %v1934_v21 = vadd.f32 %v3739_v54, %v1800_v13 }
 0x118   : > { %v1248_v22 = vpop.f32.mrf.mxu0  ;;  %1439 = vmatmul.mubr.bf16.gmra.mxu0 %v2882_v8  ;;  %v1504_v23 = vpop.f32.mrf.mxu1  ;;  %1695 = vmatmul.mubr.bf16.gmra.mxu1 %v2946_v9  ;;  %v2886_v10 = vcombine.low %v267_v58, %v268_v63  ;;  %v2950_v11 = vcombine.low %v331_v0, %v332_v1 }
 0x119   : > { %2638 = vst.msk [vmem:[%s3759_s19 + $0x20] sm:$0xf] %vm2629_vm1, %v3166_v18  ;;  %2702 = vst.msk [vmem:[%s3759_s19 + $0x120] sm:$0xf] %vm2629_vm1, %v3230_v19  ;;  %v1998_v25 = vmax.f32 %v1870_v20, 0.0  ;;  %v2062_v26 = vmax.f32 %v1934_v21, 0.0  ;;  %v1737_v27 = vmul.f32 %v3734_v52, %v1248_v22  ;;  %v1801_v28 = vmul.f32 %v3734_v52, %v1504_v23  ;;  %2991 = vmatprep.mubr.msk.bf16.mxu0 %vm981_vm0, %v3490_v14 }
 0x11a   : > { %3023 = vmatprep.mubr.msk.bf16.mxu1 %vm981_vm0, %v3492_v15  ;;  %v1250_v32 = vpop.f32.mrf.mxu0  ;;  %v1506_v33 = vpop.f32.mrf.mxu1 }
 0x11b   : > { %v3167_v34 = vpack.c.bf16 %v1998_v25, %v1998_v25  ;;  %v3231_v35 = vpack.c.bf16 %v2062_v26, %v2062_v26  ;;  %v1871_v36 = vadd.f32 %v3739_v54, %v1737_v27  ;;  %v1935_v37 = vadd.f32 %v3739_v54, %v1801_v28 }
 0x11c   : > { %v1251_v38 = vpop.f32.mrf.mxu0  ;;  %v1507_v39 = vpop.f32.mrf.mxu1 }
 0x11d   : > { %2639 = vst.msk [vmem:[%s3759_s19 + $0x24] sm:$0xf] %vm2629_vm1, %v3167_v34  ;;  %2703 = vst.msk [vmem:[%s3759_s19 + $0x124] sm:$0xf] %vm2629_vm1, %v3231_v35  ;;  %v1999_v42 = vmax.f32 %v1871_v36, 0.0  ;;  %v2063_v43 = vmax.f32 %v1935_v37, 0.0  ;;  %v1738_v44 = vmul.f32 %v3734_v52, %v1251_v38  ;;  %v1802_v45 = vmul.f32 %v3734_v52, %v1507_v39 }
 0x11e   : > { %v1253_v48 = vpop.f32.mrf.mxu0  ;;  %v1509_v49 = vpop.f32.mrf.mxu1 }
 0x11f   : > { %v3168_v50 = vpack.c.bf16 %v1999_v42, %v1999_v42  ;;  %v3232_v51 = vpack.c.bf16 %v2063_v43, %v2063_v43  ;;  %v1872_v53 = vadd.f32 %v3739_v54, %v1738_v44  ;;  %v1936_v55 = vadd.f32 %v3739_v54, %v1802_v45 }
 0x120   : > { %v1256_v56 = vpop.f32.mrf.mxu0  ;;  %1447 = vmatmul.mubr.bf16.gmra.mxu0 %v2884_v40  ;;  %v1512_v57 = vpop.f32.mrf.mxu1  ;;  %1703 = vmatmul.mubr.bf16.gmra.mxu1 %v2948_v41 }
 0x121   : > { %2640 = vst.msk [vmem:[%s3759_s19 + $0x28] sm:$0xf] %vm2629_vm1, %v3168_v50  ;;  %2704 = vst.msk [vmem:[%s3759_s19 + $0x128] sm:$0xf] %vm2629_vm1, %v3232_v51  ;;  %v2000_v59 = vmax.f32 %v1872_v53, 0.0  ;;  %v2064_v60 = vmax.f32 %v1936_v55, 0.0  ;;  %v1739_v61 = vmul.f32 %v3734_v52, %v1256_v56  ;;  %v1803_v62 = vmul.f32 %v3734_v52, %v1512_v57  ;;  %2992 = vmatprep.mubr.msk.bf16.mxu0 %vm981_vm0, %v3494_v46 }
 0x122   : > { %3024 = vmatprep.mubr.msk.bf16.mxu1 %vm981_vm0, %v3496_v47  ;;  %v1258_v2 = vpop.f32.mrf.mxu0  ;;  %v1514_v3 = vpop.f32.mrf.mxu1 }
 0x123   : > { %v3169_v4 = vpack.c.bf16 %v2000_v59, %v2000_v59  ;;  %v3233_v5 = vpack.c.bf16 %v2064_v60, %v2064_v60  ;;  %v1873_v6 = vadd.f32 %v3739_v54, %v1739_v61  ;;  %v1937_v7 = vadd.f32 %v3739_v54, %v1803_v62 }
 0x124   : > { %v1259_v8 = vpop.f32.mrf.mxu0  ;;  %v1515_v9 = vpop.f32.mrf.mxu1 }
 0x125   : > { %2641 = vst.msk [vmem:[%s3759_s19 + $0x2c] sm:$0xf] %vm2629_vm1, %v3169_v4  ;;  %2705 = vst.msk [vmem:[%s3759_s19 + $0x12c] sm:$0xf] %vm2629_vm1, %v3233_v5  ;;  %v2001_v12 = vmax.f32 %v1873_v6, 0.0  ;;  %v2065_v13 = vmax.f32 %v1937_v7, 0.0  ;;  %v1740_v14 = vmul.f32 %v3734_v52, %v1259_v8  ;;  %v1804_v15 = vmul.f32 %v3734_v52, %v1515_v9 }
 0x126   : > { %v1261_v16 = vpop.f32.mrf.mxu0  ;;  %v1517_v17 = vpop.f32.mrf.mxu1 }
 0x127   : > { %v3170_v18 = vpack.c.bf16 %v2001_v12, %v2001_v12  ;;  %v3234_v19 = vpack.c.bf16 %v2065_v13, %v2065_v13  ;;  %v1874_v20 = vadd.f32 %v3739_v54, %v1740_v14  ;;  %v1938_v21 = vadd.f32 %v3739_v54, %v1804_v15 }
 0x128   : > { %v1264_v22 = vpop.f32.mrf.mxu0  ;;  %1455 = vmatmul.mubr.bf16.gmra.mxu0 %v2886_v10  ;;  %v1520_v23 = vpop.f32.mrf.mxu1  ;;  %1711 = vmatmul.mubr.bf16.gmra.mxu1 %v2950_v11 }
 0x129   : > { %2642 = vst.msk [vmem:[%s3759_s19 + $0x30] sm:$0xf] %vm2629_vm1, %v3170_v18  ;;  %2706 = vst.msk [vmem:[%s3759_s19 + $0x130] sm:$0xf] %vm2629_vm1, %v3234_v19  ;;  %v2002_v24 = vmax.f32 %v1874_v20, 0.0  ;;  %v2066_v25 = vmax.f32 %v1938_v21, 0.0  ;;  %v1741_v26 = vmul.f32 %v3734_v52, %v1264_v22  ;;  %v1805_v27 = vmul.f32 %v3734_v52, %v1520_v23 }
 0x12a   : > { %v1266_v28 = vpop.f32.mrf.mxu0  ;;  %v1522_v29 = vpop.f32.mrf.mxu1 }
 0x12b   : > { %v3171_v30 = vpack.c.bf16 %v2002_v24, %v2002_v24  ;;  %v3235_v31 = vpack.c.bf16 %v2066_v25, %v2066_v25  ;;  %v1875_v32 = vadd.f32 %v3739_v54, %v1741_v26  ;;  %v1939_v33 = vadd.f32 %v3739_v54, %v1805_v27 }
 0x12c   : > { %v1267_v34 = vpop.f32.mrf.mxu0  ;;  %v1523_v35 = vpop.f32.mrf.mxu1 }
 0x12d   : > { %2643 = vst.msk [vmem:[%s3759_s19 + $0x34] sm:$0xf] %vm2629_vm1, %v3171_v30  ;;  %2707 = vst.msk [vmem:[%s3759_s19 + $0x134] sm:$0xf] %vm2629_vm1, %v3235_v31  ;;  %v2003_v36 = vmax.f32 %v1875_v32, 0.0  ;;  %v2067_v37 = vmax.f32 %v1939_v33, 0.0  ;;  %v1742_v38 = vmul.f32 %v3734_v52, %v1267_v34  ;;  %v1806_v39 = vmul.f32 %v3734_v52, %v1523_v35 }
 0x12e   : > { %v1269_v40 = vpop.f32.mrf.mxu0  ;;  %v1525_v41 = vpop.f32.mrf.mxu1 }
 0x12f   : > { %v3172_v42 = vpack.c.bf16 %v2003_v36, %v2003_v36  ;;  %v3236_v43 = vpack.c.bf16 %v2067_v37, %v2067_v37  ;;  %v1876_v44 = vadd.f32 %v3739_v54, %v1742_v38  ;;  %v1940_v45 = vadd.f32 %v3739_v54, %v1806_v39 }
 0x130   : > { %v1272_v46 = vpop.f32.mrf.mxu0  ;;  %v1528_v47 = vpop.f32.mrf.mxu1 }
 0x131   : > { %2644 = vst.msk [vmem:[%s3759_s19 + $0x38] sm:$0xf] %vm2629_vm1, %v3172_v42  ;;  %2708 = vst.msk [vmem:[%s3759_s19 + $0x138] sm:$0xf] %vm2629_vm1, %v3236_v43  ;;  %v2004_v48 = vmax.f32 %v1876_v44, 0.0  ;;  %v2068_v49 = vmax.f32 %v1940_v45, 0.0  ;;  %v1743_v50 = vmul.f32 %v3734_v52, %v1272_v46  ;;  %v1807_v51 = vmul.f32 %v3734_v52, %v1528_v47 }
 0x132   : > { %v1274_v53 = vpop.f32.mrf.mxu0  ;;  %v1530_v55 = vpop.f32.mrf.mxu1 }
 0x133   : > { %v3173_v56 = vpack.c.bf16 %v2004_v48, %v2004_v48  ;;  %v3237_v57 = vpack.c.bf16 %v2068_v49, %v2068_v49  ;;  %v1877_v58 = vadd.f32 %v3739_v54, %v1743_v50  ;;  %v1941_v59 = vadd.f32 %v3739_v54, %v1807_v51 }
 0x134   : > { %v1275_v60 = vpop.f32.mrf.mxu0  ;;  %v1531_v61 = vpop.f32.mrf.mxu1 }
 0x135   : > { %2645 = vst.msk [vmem:[%s3759_s19 + $0x3c] sm:$0xf] %vm2629_vm1, %v3173_v56  ;;  %2709 = vst.msk [vmem:[%s3759_s19 + $0x13c] sm:$0xf] %vm2629_vm1, %v3237_v57  ;;  %v2005_v62 = vmax.f32 %v1877_v58, 0.0  ;;  %v2069_v63 = vmax.f32 %v1941_v59, 0.0  ;;  %v1744_v0 = vmul.f32 %v3734_v52, %v1275_v60  ;;  %v1808_v1 = vmul.f32 %v3734_v52, %v1531_v61 }
 0x136   : > { %v1277_v2 = vpop.f32.mrf.mxu0  ;;  %v1533_v3 = vpop.f32.mrf.mxu1 }
 0x137   : > { %v3174_v4 = vpack.c.bf16 %v2005_v62, %v2005_v62  ;;  %v3238_v5 = vpack.c.bf16 %v2069_v63, %v2069_v63  ;;  %v1878_v6 = vadd.f32 %v3739_v54, %v1744_v0  ;;  %v1942_v7 = vadd.f32 %v3739_v54, %v1808_v1 }
 0x138   : > { %v1280_v8 = vpop.f32.mrf.mxu0  ;;  %v1536_v9 = vpop.f32.mrf.mxu1 }
 0x139   : > { %2646 = vst.msk [vmem:[%s3759_s19 + $0x40] sm:$0xf] %vm2629_vm1, %v3174_v4  ;;  %2710 = vst.msk [vmem:[%s3759_s19 + $0x140] sm:$0xf] %vm2629_vm1, %v3238_v5  ;;  %v2006_v10 = vmax.f32 %v1878_v6, 0.0  ;;  %v2070_v11 = vmax.f32 %v1942_v7, 0.0  ;;  %v1745_v12 = vmul.f32 %v3734_v52, %v1280_v8  ;;  %v1809_v13 = vmul.f32 %v3734_v52, %v1536_v9 }
 0x13a   : > { %v1282_v14 = vpop.f32.mrf.mxu0  ;;  %v1538_v15 = vpop.f32.mrf.mxu1 }
 0x13b   : > { %v3175_v16 = vpack.c.bf16 %v2006_v10, %v2006_v10  ;;  %v3239_v17 = vpack.c.bf16 %v2070_v11, %v2070_v11  ;;  %v1879_v18 = vadd.f32 %v3739_v54, %v1745_v12  ;;  %v1943_v19 = vadd.f32 %v3739_v54, %v1809_v13 }
 0x13c   : > { %v1283_v20 = vpop.f32.mrf.mxu0  ;;  %v1539_v21 = vpop.f32.mrf.mxu1 }
 0x13d   : > { %2647 = vst.msk [vmem:[%s3759_s19 + $0x44] sm:$0xf] %vm2629_vm1, %v3175_v16  ;;  %2711 = vst.msk [vmem:[%s3759_s19 + $0x144] sm:$0xf] %vm2629_vm1, %v3239_v17  ;;  %v2007_v22 = vmax.f32 %v1879_v18, 0.0  ;;  %v2071_v23 = vmax.f32 %v1943_v19, 0.0  ;;  %v1746_v24 = vmul.f32 %v3734_v52, %v1283_v20  ;;  %v1810_v25 = vmul.f32 %v3734_v52, %v1539_v21 }
 0x13e   : > { %v1285_v26 = vpop.f32.mrf.mxu0  ;;  %v1541_v27 = vpop.f32.mrf.mxu1 }
 0x13f   : > { %v3176_v28 = vpack.c.bf16 %v2007_v22, %v2007_v22  ;;  %v3240_v29 = vpack.c.bf16 %v2071_v23, %v2071_v23  ;;  %v1880_v30 = vadd.f32 %v3739_v54, %v1746_v24  ;;  %v1944_v31 = vadd.f32 %v3739_v54, %v1810_v25 }
 0x140   : > { %v1288_v32 = vpop.f32.mrf.mxu0  ;;  %v1544_v33 = vpop.f32.mrf.mxu1 }
 0x141   : > { %2648 = vst.msk [vmem:[%s3759_s19 + $0x48] sm:$0xf] %vm2629_vm1, %v3176_v28  ;;  %2712 = vst.msk [vmem:[%s3759_s19 + $0x148] sm:$0xf] %vm2629_vm1, %v3240_v29  ;;  %v2008_v34 = vmax.f32 %v1880_v30, 0.0  ;;  %v2072_v35 = vmax.f32 %v1944_v31, 0.0  ;;  %v1747_v36 = vmul.f32 %v3734_v52, %v1288_v32  ;;  %v1811_v37 = vmul.f32 %v3734_v52, %v1544_v33 }
 0x142   : > { %v1290_v38 = vpop.f32.mrf.mxu0  ;;  %v1546_v39 = vpop.f32.mrf.mxu1 }
 0x143   : > { %v3177_v40 = vpack.c.bf16 %v2008_v34, %v2008_v34  ;;  %v3241_v41 = vpack.c.bf16 %v2072_v35, %v2072_v35  ;;  %v1881_v42 = vadd.f32 %v3739_v54, %v1747_v36  ;;  %v1945_v43 = vadd.f32 %v3739_v54, %v1811_v37 }
 0x144   : > { %v1291_v44 = vpop.f32.mrf.mxu0  ;;  %v1547_v45 = vpop.f32.mrf.mxu1 }
 0x145   : > { %2649 = vst.msk [vmem:[%s3759_s19 + $0x4c] sm:$0xf] %vm2629_vm1, %v3177_v40  ;;  %2713 = vst.msk [vmem:[%s3759_s19 + $0x14c] sm:$0xf] %vm2629_vm1, %v3241_v41  ;;  %v2009_v46 = vmax.f32 %v1881_v42, 0.0  ;;  %v2073_v47 = vmax.f32 %v1945_v43, 0.0  ;;  %v1748_v48 = vmul.f32 %v3734_v52, %v1291_v44  ;;  %v1812_v49 = vmul.f32 %v3734_v52, %v1547_v45 }
 0x146   : > { %v1293_v50 = vpop.f32.mrf.mxu0  ;;  %v1549_v51 = vpop.f32.mrf.mxu1 }
 0x147   : > { %v3178_v53 = vpack.c.bf16 %v2009_v46, %v2009_v46  ;;  %v3242_v55 = vpack.c.bf16 %v2073_v47, %v2073_v47  ;;  %v1882_v56 = vadd.f32 %v3739_v54, %v1748_v48  ;;  %v1946_v57 = vadd.f32 %v3739_v54, %v1812_v49 }
 0x148   : > { %v1296_v58 = vpop.f32.mrf.mxu0  ;;  %v1552_v59 = vpop.f32.mrf.mxu1 }
 0x149   : > { %2650 = vst.msk [vmem:[%s3759_s19 + $0x50] sm:$0xf] %vm2629_vm1, %v3178_v53  ;;  %2714 = vst.msk [vmem:[%s3759_s19 + $0x150] sm:$0xf] %vm2629_vm1, %v3242_v55  ;;  %v2010_v60 = vmax.f32 %v1882_v56, 0.0  ;;  %v2074_v61 = vmax.f32 %v1946_v57, 0.0  ;;  %v1749_v62 = vmul.f32 %v3734_v52, %v1296_v58  ;;  %v1813_v63 = vmul.f32 %v3734_v52, %v1552_v59 }
 0x14a   : > { %v1298_v0 = vpop.f32.mrf.mxu0  ;;  %v1554_v1 = vpop.f32.mrf.mxu1 }
 0x14b   : > { %v3179_v2 = vpack.c.bf16 %v2010_v60, %v2010_v60  ;;  %v3243_v3 = vpack.c.bf16 %v2074_v61, %v2074_v61  ;;  %v1883_v4 = vadd.f32 %v3739_v54, %v1749_v62  ;;  %v1947_v5 = vadd.f32 %v3739_v54, %v1813_v63 }
 0x14c   : > { %v1299_v6 = vpop.f32.mrf.mxu0  ;;  %v1555_v7 = vpop.f32.mrf.mxu1 }
 0x14d   : > { %2651 = vst.msk [vmem:[%s3759_s19 + $0x54] sm:$0xf] %vm2629_vm1, %v3179_v2  ;;  %2715 = vst.msk [vmem:[%s3759_s19 + $0x154] sm:$0xf] %vm2629_vm1, %v3243_v3  ;;  %v2011_v8 = vmax.f32 %v1883_v4, 0.0  ;;  %v2075_v9 = vmax.f32 %v1947_v5, 0.0  ;;  %v1750_v10 = vmul.f32 %v3734_v52, %v1299_v6  ;;  %v1814_v11 = vmul.f32 %v3734_v52, %v1555_v7 }
 0x14e   : > { %v1301_v12 = vpop.f32.mrf.mxu0  ;;  %v1557_v13 = vpop.f32.mrf.mxu1 }
 0x14f   : > { %v3180_v14 = vpack.c.bf16 %v2011_v8, %v2011_v8  ;;  %v3244_v15 = vpack.c.bf16 %v2075_v9, %v2075_v9  ;;  %v1884_v16 = vadd.f32 %v3739_v54, %v1750_v10  ;;  %v1948_v17 = vadd.f32 %v3739_v54, %v1814_v11 }
 0x150   : > { %v1304_v18 = vpop.f32.mrf.mxu0  ;;  %v1560_v19 = vpop.f32.mrf.mxu1 }
 0x151   : > { %2652 = vst.msk [vmem:[%s3759_s19 + $0x58] sm:$0xf] %vm2629_vm1, %v3180_v14  ;;  %2716 = vst.msk [vmem:[%s3759_s19 + $0x158] sm:$0xf] %vm2629_vm1, %v3244_v15  ;;  %v2012_v20 = vmax.f32 %v1884_v16, 0.0  ;;  %v2076_v21 = vmax.f32 %v1948_v17, 0.0  ;;  %v1751_v22 = vmul.f32 %v3734_v52, %v1304_v18  ;;  %v1815_v23 = vmul.f32 %v3734_v52, %v1560_v19 }
 0x152   : > { %v1306_v24 = vpop.f32.mrf.mxu0  ;;  %v1562_v25 = vpop.f32.mrf.mxu1 }
 0x153   : > { %v3181_v26 = vpack.c.bf16 %v2012_v20, %v2012_v20  ;;  %v3245_v27 = vpack.c.bf16 %v2076_v21, %v2076_v21  ;;  %v1885_v28 = vadd.f32 %v3739_v54, %v1751_v22  ;;  %v1949_v29 = vadd.f32 %v3739_v54, %v1815_v23 }
 0x154   : > { %v1307_v30 = vpop.f32.mrf.mxu0  ;;  %v1563_v31 = vpop.f32.mrf.mxu1 }
 0x155   : > { %2653 = vst.msk [vmem:[%s3759_s19 + $0x5c] sm:$0xf] %vm2629_vm1, %v3181_v26  ;;  %2717 = vst.msk [vmem:[%s3759_s19 + $0x15c] sm:$0xf] %vm2629_vm1, %v3245_v27  ;;  %v2013_v32 = vmax.f32 %v1885_v28, 0.0  ;;  %v2077_v33 = vmax.f32 %v1949_v29, 0.0  ;;  %v1752_v34 = vmul.f32 %v3734_v52, %v1307_v30  ;;  %v1816_v35 = vmul.f32 %v3734_v52, %v1563_v31 }
 0x156   : > { %v1309_v36 = vpop.f32.mrf.mxu0  ;;  %v1565_v37 = vpop.f32.mrf.mxu1 }
 0x157   : > { %v3182_v38 = vpack.c.bf16 %v2013_v32, %v2013_v32  ;;  %v3246_v39 = vpack.c.bf16 %v2077_v33, %v2077_v33  ;;  %v1886_v40 = vadd.f32 %v3739_v54, %v1752_v34  ;;  %v1950_v41 = vadd.f32 %v3739_v54, %v1816_v35 }
 0x158   : > { %v1312_v42 = vpop.f32.mrf.mxu0  ;;  %v1568_v43 = vpop.f32.mrf.mxu1 }
 0x159   : > { %2654 = vst.msk [vmem:[%s3759_s19 + $0x60] sm:$0xf] %vm2629_vm1, %v3182_v38  ;;  %2718 = vst.msk [vmem:[%s3759_s19 + $0x160] sm:$0xf] %vm2629_vm1, %v3246_v39  ;;  %v2014_v44 = vmax.f32 %v1886_v40, 0.0  ;;  %v2078_v45 = vmax.f32 %v1950_v41, 0.0  ;;  %v1753_v46 = vmul.f32 %v3734_v52, %v1312_v42  ;;  %v1817_v47 = vmul.f32 %v3734_v52, %v1568_v43 }
 0x15a   : > { %v1314_v48 = vpop.f32.mrf.mxu0  ;;  %v1570_v49 = vpop.f32.mrf.mxu1  ;;  %v4043_v39 = vld [vmem:[%s4329_s3] ss:$0 sm:$0xff] }
 0x15b   : > { %v3183_v50 = vpack.c.bf16 %v2014_v44, %v2014_v44  ;;  %v3247_v51 = vpack.c.bf16 %v2078_v45, %v2078_v45  ;;  %v1887_v53 = vadd.f32 %v3739_v54, %v1753_v46  ;;  %v1951_v55 = vadd.f32 %v3739_v54, %v1817_v47 }
 0x15c   : > { %v1315_v56 = vpop.f32.mrf.mxu0  ;;  %v1571_v57 = vpop.f32.mrf.mxu1 }
 0x15d   : > { %2655 = vst.msk [vmem:[%s3759_s19 + $0x64] sm:$0xf] %vm2629_vm1, %v3183_v50  ;;  %2719 = vst.msk [vmem:[%s3759_s19 + $0x164] sm:$0xf] %vm2629_vm1, %v3247_v51  ;;  %v2015_v58 = vmax.f32 %v1887_v53, 0.0  ;;  %v2079_v59 = vmax.f32 %v1951_v55, 0.0  ;;  %v1754_v60 = vmul.f32 %v3734_v52, %v1315_v56  ;;  %v1818_v61 = vmul.f32 %v3734_v52, %v1571_v57 }
 0x15e   : > { %v1317_v62 = vpop.f32.mrf.mxu0  ;;  %v1573_v63 = vpop.f32.mrf.mxu1 }
 0x15f   : > { %v3184_v0 = vpack.c.bf16 %v2015_v58, %v2015_v58  ;;  %v3248_v1 = vpack.c.bf16 %v2079_v59, %v2079_v59  ;;  %v1888_v2 = vadd.f32 %v3739_v54, %v1754_v60  ;;  %v1952_v3 = vadd.f32 %v3739_v54, %v1818_v61 }
 0x160   : > { %v1320_v4 = vpop.f32.mrf.mxu0  ;;  %v1576_v5 = vpop.f32.mrf.mxu1 }
 0x161   : > { %2656 = vst.msk [vmem:[%s3759_s19 + $0x68] sm:$0xf] %vm2629_vm1, %v3184_v0  ;;  %2720 = vst.msk [vmem:[%s3759_s19 + $0x168] sm:$0xf] %vm2629_vm1, %v3248_v1  ;;  %v2016_v6 = vmax.f32 %v1888_v2, 0.0  ;;  %v2080_v7 = vmax.f32 %v1952_v3, 0.0  ;;  %v1755_v8 = vmul.f32 %v3734_v52, %v1320_v4  ;;  %v1819_v9 = vmul.f32 %v3734_v52, %v1576_v5 }
 0x162   : > { %v1322_v10 = vpop.f32.mrf.mxu0  ;;  %v1578_v11 = vpop.f32.mrf.mxu1 }
 0x163   : > { %v3185_v12 = vpack.c.bf16 %v2016_v6, %v2016_v6  ;;  %v3249_v13 = vpack.c.bf16 %v2080_v7, %v2080_v7  ;;  %v1889_v14 = vadd.f32 %v3739_v54, %v1755_v8  ;;  %v1953_v15 = vadd.f32 %v3739_v54, %v1819_v9 }
 0x164   : > { %v1323_v16 = vpop.f32.mrf.mxu0  ;;  %v1579_v17 = vpop.f32.mrf.mxu1 }
 0x165   : > { %2657 = vst.msk [vmem:[%s3759_s19 + $0x6c] sm:$0xf] %vm2629_vm1, %v3185_v12  ;;  %2721 = vst.msk [vmem:[%s3759_s19 + $0x16c] sm:$0xf] %vm2629_vm1, %v3249_v13  ;;  %v2017_v18 = vmax.f32 %v1889_v14, 0.0  ;;  %v2081_v19 = vmax.f32 %v1953_v15, 0.0  ;;  %v1756_v20 = vmul.f32 %v3734_v52, %v1323_v16  ;;  %v1820_v21 = vmul.f32 %v3734_v52, %v1579_v17 }
 0x166   : > { %v1325_v22 = vpop.f32.mrf.mxu0  ;;  %v1581_v23 = vpop.f32.mrf.mxu1 }
 0x167   : > { %v3186_v24 = vpack.c.bf16 %v2017_v18, %v2017_v18  ;;  %v3250_v25 = vpack.c.bf16 %v2081_v19, %v2081_v19  ;;  %v1890_v26 = vadd.f32 %v3739_v54, %v1756_v20  ;;  %v1954_v27 = vadd.f32 %v3739_v54, %v1820_v21 }
 0x168   : > { %v1328_v28 = vpop.f32.mrf.mxu0  ;;  %v1584_v29 = vpop.f32.mrf.mxu1 }
 0x169   : > { %2658 = vst.msk [vmem:[%s3759_s19 + $0x70] sm:$0xf] %vm2629_vm1, %v3186_v24  ;;  %2722 = vst.msk [vmem:[%s3759_s19 + $0x170] sm:$0xf] %vm2629_vm1, %v3250_v25  ;;  %v2018_v30 = vmax.f32 %v1890_v26, 0.0  ;;  %v2082_v31 = vmax.f32 %v1954_v27, 0.0  ;;  %v1757_v32 = vmul.f32 %v3734_v52, %v1328_v28  ;;  %v1821_v33 = vmul.f32 %v3734_v52, %v1584_v29 }
 0x16a   : > { %v1330_v34 = vpop.f32.mrf.mxu0  ;;  %v1586_v35 = vpop.f32.mrf.mxu1 }
 0x16b   : > { %v3187_v36 = vpack.c.bf16 %v2018_v30, %v2018_v30  ;;  %v3251_v37 = vpack.c.bf16 %v2082_v31, %v2082_v31  ;;  %v1891_v38 = vadd.f32 %v3739_v54, %v1757_v32  ;;  %v1955_v40 = vadd.f32 %v4043_v39, %v1821_v33  ;;  %v4053_v54 = vld [vmem:[%s4328_s2] ss:$0 sm:$0xff] }
 0x16c   : > { %v1331_v41 = vpop.f32.mrf.mxu0  ;;  %v1587_v42 = vpop.f32.mrf.mxu1 }
 0x16d   : > { %2659 = vst.msk [vmem:[%s3759_s19 + $0x74] sm:$0xf] %vm2629_vm1, %v3187_v36  ;;  %2723 = vst.msk [vmem:[%s3759_s19 + $0x174] sm:$0xf] %vm2629_vm1, %v3251_v37  ;;  %v2019_v52 = vmax.f32 %v1891_v38, 0.0  ;;  %v2083_v43 = vmax.f32 %v1955_v40, 0.0  ;;  %v1758_v44 = vmul.f32 %v4053_v54, %v1331_v41  ;;  %v1822_v45 = vmul.f32 %v4053_v54, %v1587_v42 }
 0x16e   : > { %v1333_v46 = vpop.f32.mrf.mxu0  ;;  %v1589_v47 = vpop.f32.mrf.mxu1 }
 0x16f   : > { %v3188_v48 = vpack.c.bf16 %v2019_v52, %v2019_v52  ;;  %v3252_v49 = vpack.c.bf16 %v2083_v43, %v2083_v43  ;;  %v1892_v50 = vadd.f32 %v4043_v39, %v1758_v44  ;;  %v1956_v51 = vadd.f32 %v4043_v39, %v1822_v45 }
 0x170   : > { %v1336_v53 = vpop.f32.mrf.mxu0  ;;  %v1592_v55 = vpop.f32.mrf.mxu1 }
 0x171   : > { %2660 = vst.msk [vmem:[%s3759_s19 + $0x78] sm:$0xf] %vm2629_vm1, %v3188_v48  ;;  %2724 = vst.msk [vmem:[%s3759_s19 + $0x178] sm:$0xf] %vm2629_vm1, %v3252_v49  ;;  %v2020_v56 = vmax.f32 %v1892_v50, 0.0  ;;  %v2084_v57 = vmax.f32 %v1956_v51, 0.0  ;;  %v1759_v58 = vmul.f32 %v4053_v54, %v1336_v53  ;;  %v1823_v59 = vmul.f32 %v4053_v54, %v1592_v55 }
 0x172   : > { %v1338_v60 = vpop.f32.mrf.mxu0  ;;  %v1594_v61 = vpop.f32.mrf.mxu1 }
 0x173   : > { %v3189_v62 = vpack.c.bf16 %v2020_v56, %v2020_v56  ;;  %v3253_v63 = vpack.c.bf16 %v2084_v57, %v2084_v57  ;;  %v1893_v0 = vadd.f32 %v4043_v39, %v1759_v58  ;;  %v1957_v1 = vadd.f32 %v4043_v39, %v1823_v59 }
 0x174   : > { %v1339_v2 = vpop.f32.mrf.mxu0  ;;  %v1595_v3 = vpop.f32.mrf.mxu1 }
 0x175   : > { %2661 = vst.msk [vmem:[%s3759_s19 + $0x7c] sm:$0xf] %vm2629_vm1, %v3189_v62  ;;  %2725 = vst.msk [vmem:[%s3759_s19 + $0x17c] sm:$0xf] %vm2629_vm1, %v3253_v63  ;;  %v2021_v4 = vmax.f32 %v1893_v0, 0.0  ;;  %v2085_v5 = vmax.f32 %v1957_v1, 0.0  ;;  %v1760_v6 = vmul.f32 %v4053_v54, %v1339_v2  ;;  %v1824_v7 = vmul.f32 %v4053_v54, %v1595_v3 }
 0x176   : > { %v1341_v8 = vpop.f32.mrf.mxu0  ;;  %v1597_v9 = vpop.f32.mrf.mxu1 }
 0x177   : > { %v3190_v10 = vpack.c.bf16 %v2021_v4, %v2021_v4  ;;  %v3254_v11 = vpack.c.bf16 %v2085_v5, %v2085_v5  ;;  %v1894_v12 = vadd.f32 %v4043_v39, %v1760_v6  ;;  %v1958_v13 = vadd.f32 %v4043_v39, %v1824_v7 }
 0x178   : > { %v1344_v14 = vpop.f32.mrf.mxu0  ;;  %v1600_v15 = vpop.f32.mrf.mxu1 }
 0x179   : > { %2662 = vst.msk [vmem:[%s3759_s19 + $0x80] sm:$0xf] %vm2629_vm1, %v3190_v10  ;;  %2726 = vst.msk [vmem:[%s3759_s19 + $0x180] sm:$0xf] %vm2629_vm1, %v3254_v11  ;;  %v2022_v16 = vmax.f32 %v1894_v12, 0.0  ;;  %v2086_v17 = vmax.f32 %v1958_v13, 0.0  ;;  %v1761_v18 = vmul.f32 %v4053_v54, %v1344_v14  ;;  %v1825_v19 = vmul.f32 %v4053_v54, %v1600_v15 }
 0x17a   : > { %v1346_v20 = vpop.f32.mrf.mxu0  ;;  %v1602_v21 = vpop.f32.mrf.mxu1 }
 0x17b   : > { %v3191_v22 = vpack.c.bf16 %v2022_v16, %v2022_v16  ;;  %v3255_v23 = vpack.c.bf16 %v2086_v17, %v2086_v17  ;;  %v1895_v24 = vadd.f32 %v4043_v39, %v1761_v18  ;;  %v1959_v25 = vadd.f32 %v4043_v39, %v1825_v19 }
 0x17c   : > { %v1347_v26 = vpop.f32.mrf.mxu0  ;;  %v1603_v27 = vpop.f32.mrf.mxu1 }
 0x17d   : > { %2663 = vst.msk [vmem:[%s3759_s19 + $0x84] sm:$0xf] %vm2629_vm1, %v3191_v22  ;;  %2727 = vst.msk [vmem:[%s3759_s19 + $0x184] sm:$0xf] %vm2629_vm1, %v3255_v23  ;;  %v2023_v28 = vmax.f32 %v1895_v24, 0.0  ;;  %v2087_v29 = vmax.f32 %v1959_v25, 0.0  ;;  %v1762_v30 = vmul.f32 %v4053_v54, %v1347_v26  ;;  %v1826_v31 = vmul.f32 %v4053_v54, %v1603_v27 }
 0x17e   : > { %v1349_v32 = vpop.f32.mrf.mxu0  ;;  %v1605_v33 = vpop.f32.mrf.mxu1 }
 0x17f   : > { %v3192_v34 = vpack.c.bf16 %v2023_v28, %v2023_v28  ;;  %v3256_v35 = vpack.c.bf16 %v2087_v29, %v2087_v29  ;;  %v1896_v36 = vadd.f32 %v4043_v39, %v1762_v30  ;;  %v1960_v37 = vadd.f32 %v4043_v39, %v1826_v31 }
 0x180   : > { %v1352_v38 = vpop.f32.mrf.mxu0  ;;  %v1608_v40 = vpop.f32.mrf.mxu1 }
 0x181   : > { %2664 = vst.msk [vmem:[%s3759_s19 + $0x88] sm:$0xf] %vm2629_vm1, %v3192_v34  ;;  %2728 = vst.msk [vmem:[%s3759_s19 + $0x188] sm:$0xf] %vm2629_vm1, %v3256_v35  ;;  %v2024_v41 = vmax.f32 %v1896_v36, 0.0  ;;  %v2088_v42 = vmax.f32 %v1960_v37, 0.0  ;;  %v1763_v52 = vmul.f32 %v4053_v54, %v1352_v38  ;;  %v1827_v43 = vmul.f32 %v4053_v54, %v1608_v40 }
 0x182   : > { %v1354_v44 = vpop.f32.mrf.mxu0  ;;  %v1610_v45 = vpop.f32.mrf.mxu1 }
 0x183   : > { %v3193_v46 = vpack.c.bf16 %v2024_v41, %v2024_v41  ;;  %v3257_v47 = vpack.c.bf16 %v2088_v42, %v2088_v42  ;;  %v1897_v48 = vadd.f32 %v4043_v39, %v1763_v52  ;;  %v1961_v49 = vadd.f32 %v4043_v39, %v1827_v43 }
 0x184   : > { %v1355_v50 = vpop.f32.mrf.mxu0  ;;  %v1611_v51 = vpop.f32.mrf.mxu1 }
 0x185   : > { %2665 = vst.msk [vmem:[%s3759_s19 + $0x8c] sm:$0xf] %vm2629_vm1, %v3193_v46  ;;  %2729 = vst.msk [vmem:[%s3759_s19 + $0x18c] sm:$0xf] %vm2629_vm1, %v3257_v47  ;;  %v2025_v53 = vmax.f32 %v1897_v48, 0.0  ;;  %v2089_v55 = vmax.f32 %v1961_v49, 0.0  ;;  %v1764_v56 = vmul.f32 %v4053_v54, %v1355_v50  ;;  %v1828_v57 = vmul.f32 %v4053_v54, %v1611_v51 }
 0x186   : > { %v1357_v58 = vpop.f32.mrf.mxu0  ;;  %v1613_v59 = vpop.f32.mrf.mxu1 }
 0x187   : > { %v3194_v60 = vpack.c.bf16 %v2025_v53, %v2025_v53  ;;  %v3258_v61 = vpack.c.bf16 %v2089_v55, %v2089_v55  ;;  %v1898_v62 = vadd.f32 %v4043_v39, %v1764_v56  ;;  %v1962_v63 = vadd.f32 %v4043_v39, %v1828_v57 }
 0x188   : > { %v1360_v0 = vpop.f32.mrf.mxu0  ;;  %v1616_v1 = vpop.f32.mrf.mxu1 }
 0x189   : > { %2666 = vst.msk [vmem:[%s3759_s19 + $0x90] sm:$0xf] %vm2629_vm1, %v3194_v60  ;;  %2730 = vst.msk [vmem:[%s3759_s19 + $0x190] sm:$0xf] %vm2629_vm1, %v3258_v61  ;;  %v2026_v2 = vmax.f32 %v1898_v62, 0.0  ;;  %v2090_v3 = vmax.f32 %v1962_v63, 0.0  ;;  %v1765_v4 = vmul.f32 %v4053_v54, %v1360_v0  ;;  %v1829_v5 = vmul.f32 %v4053_v54, %v1616_v1 }
 0x18a   : > { %v1362_v6 = vpop.f32.mrf.mxu0  ;;  %v1618_v7 = vpop.f32.mrf.mxu1 }
 0x18b   : > { %v3195_v8 = vpack.c.bf16 %v2026_v2, %v2026_v2  ;;  %v3259_v9 = vpack.c.bf16 %v2090_v3, %v2090_v3  ;;  %v1899_v10 = vadd.f32 %v4043_v39, %v1765_v4  ;;  %v1963_v11 = vadd.f32 %v4043_v39, %v1829_v5 }
 0x18c   : > { %v1363_v12 = vpop.f32.mrf.mxu0  ;;  %v1619_v13 = vpop.f32.mrf.mxu1 }
 0x18d   : > { %2667 = vst.msk [vmem:[%s3759_s19 + $0x94] sm:$0xf] %vm2629_vm1, %v3195_v8  ;;  %2731 = vst.msk [vmem:[%s3759_s19 + $0x194] sm:$0xf] %vm2629_vm1, %v3259_v9  ;;  %v2027_v14 = vmax.f32 %v1899_v10, 0.0  ;;  %v2091_v15 = vmax.f32 %v1963_v11, 0.0  ;;  %v1766_v16 = vmul.f32 %v4053_v54, %v1363_v12  ;;  %v1830_v17 = vmul.f32 %v4053_v54, %v1619_v13 }
 0x18e   : > { %v1365_v18 = vpop.f32.mrf.mxu0  ;;  %v1621_v19 = vpop.f32.mrf.mxu1 }
 0x18f   : > { %v3196_v20 = vpack.c.bf16 %v2027_v14, %v2027_v14  ;;  %v3260_v21 = vpack.c.bf16 %v2091_v15, %v2091_v15  ;;  %v1900_v22 = vadd.f32 %v4043_v39, %v1766_v16  ;;  %v1964_v23 = vadd.f32 %v4043_v39, %v1830_v17 }
 0x190   : > { %v1368_v24 = vpop.f32.mrf.mxu0  ;;  %v1624_v25 = vpop.f32.mrf.mxu1 }
 0x191   : > { %2668 = vst.msk [vmem:[%s3759_s19 + $0x98] sm:$0xf] %vm2629_vm1, %v3196_v20  ;;  %2732 = vst.msk [vmem:[%s3759_s19 + $0x198] sm:$0xf] %vm2629_vm1, %v3260_v21  ;;  %v2028_v26 = vmax.f32 %v1900_v22, 0.0  ;;  %v2092_v27 = vmax.f32 %v1964_v23, 0.0  ;;  %v1767_v28 = vmul.f32 %v4053_v54, %v1368_v24  ;;  %v1831_v29 = vmul.f32 %v4053_v54, %v1624_v25 }
 0x192   : > { %v1370_v30 = vpop.f32.mrf.mxu0  ;;  %v1626_v31 = vpop.f32.mrf.mxu1 }
 0x193   : > { %v3197_v32 = vpack.c.bf16 %v2028_v26, %v2028_v26  ;;  %v3261_v33 = vpack.c.bf16 %v2092_v27, %v2092_v27  ;;  %v1901_v34 = vadd.f32 %v4043_v39, %v1767_v28  ;;  %v1965_v35 = vadd.f32 %v4043_v39, %v1831_v29 }
 0x194   : > { %v1371_v36 = vpop.f32.mrf.mxu0  ;;  %v1627_v37 = vpop.f32.mrf.mxu1 }
 0x195   : > { %2669 = vst.msk [vmem:[%s3759_s19 + $0x9c] sm:$0xf] %vm2629_vm1, %v3197_v32  ;;  %2733 = vst.msk [vmem:[%s3759_s19 + $0x19c] sm:$0xf] %vm2629_vm1, %v3261_v33  ;;  %v2029_v38 = vmax.f32 %v1901_v34, 0.0  ;;  %v2093_v40 = vmax.f32 %v1965_v35, 0.0  ;;  %v1768_v41 = vmul.f32 %v4053_v54, %v1371_v36  ;;  %v1832_v42 = vmul.f32 %v4053_v54, %v1627_v37 }
 0x196   : > { %v1373_v52 = vpop.f32.mrf.mxu0  ;;  %v1629_v43 = vpop.f32.mrf.mxu1 }
 0x197   : > { %v3198_v44 = vpack.c.bf16 %v2029_v38, %v2029_v38  ;;  %v3262_v45 = vpack.c.bf16 %v2093_v40, %v2093_v40  ;;  %v1902_v46 = vadd.f32 %v4043_v39, %v1768_v41  ;;  %v1966_v47 = vadd.f32 %v4043_v39, %v1832_v42 }
 0x198   : > { %v1376_v48 = vpop.f32.mrf.mxu0  ;;  %v1632_v49 = vpop.f32.mrf.mxu1 }
 0x199   : > { %2670 = vst.msk [vmem:[%s3759_s19 + $0xa0] sm:$0xf] %vm2629_vm1, %v3198_v44  ;;  %2734 = vst.msk [vmem:[%s3759_s19 + $0x1a0] sm:$0xf] %vm2629_vm1, %v3262_v45  ;;  %v2030_v50 = vmax.f32 %v1902_v46, 0.0  ;;  %v2094_v51 = vmax.f32 %v1966_v47, 0.0  ;;  %v1769_v53 = vmul.f32 %v4053_v54, %v1376_v48  ;;  %v1833_v55 = vmul.f32 %v4053_v54, %v1632_v49 }
 0x19a   : > { %v1378_v56 = vpop.f32.mrf.mxu0  ;;  %v1634_v57 = vpop.f32.mrf.mxu1 }
 0x19b   : > { %v3199_v58 = vpack.c.bf16 %v2030_v50, %v2030_v50  ;;  %v3263_v59 = vpack.c.bf16 %v2094_v51, %v2094_v51  ;;  %v1903_v60 = vadd.f32 %v4043_v39, %v1769_v53  ;;  %v1967_v61 = vadd.f32 %v4043_v39, %v1833_v55 }
 0x19c   : > { %v1379_v62 = vpop.f32.mrf.mxu0  ;;  %v1635_v63 = vpop.f32.mrf.mxu1 }
 0x19d   : > { %2671 = vst.msk [vmem:[%s3759_s19 + $0xa4] sm:$0xf] %vm2629_vm1, %v3199_v58  ;;  %2735 = vst.msk [vmem:[%s3759_s19 + $0x1a4] sm:$0xf] %vm2629_vm1, %v3263_v59  ;;  %v2031_v0 = vmax.f32 %v1903_v60, 0.0  ;;  %v2095_v1 = vmax.f32 %v1967_v61, 0.0  ;;  %v1770_v2 = vmul.f32 %v4053_v54, %v1379_v62  ;;  %v1834_v3 = vmul.f32 %v4053_v54, %v1635_v63 }
 0x19e   : > { %v1381_v4 = vpop.f32.mrf.mxu0  ;;  %v1637_v5 = vpop.f32.mrf.mxu1 }
 0x19f   : > { %v3200_v6 = vpack.c.bf16 %v2031_v0, %v2031_v0  ;;  %v3264_v7 = vpack.c.bf16 %v2095_v1, %v2095_v1  ;;  %v1904_v8 = vadd.f32 %v4043_v39, %v1770_v2  ;;  %v1968_v9 = vadd.f32 %v4043_v39, %v1834_v3 }
 0x1a0   : > { %v1384_v10 = vpop.f32.mrf.mxu0  ;;  %v1640_v11 = vpop.f32.mrf.mxu1 }
 0x1a1   : > { %2672 = vst.msk [vmem:[%s3759_s19 + $0xa8] sm:$0xf] %vm2629_vm1, %v3200_v6  ;;  %2736 = vst.msk [vmem:[%s3759_s19 + $0x1a8] sm:$0xf] %vm2629_vm1, %v3264_v7  ;;  %v2032_v12 = vmax.f32 %v1904_v8, 0.0  ;;  %v2096_v13 = vmax.f32 %v1968_v9, 0.0  ;;  %v1771_v14 = vmul.f32 %v4053_v54, %v1384_v10  ;;  %v1835_v15 = vmul.f32 %v4053_v54, %v1640_v11 }
 0x1a2   : > { %v1386_v16 = vpop.f32.mrf.mxu0  ;;  %v1642_v17 = vpop.f32.mrf.mxu1 }
 0x1a3   : > { %v3201_v18 = vpack.c.bf16 %v2032_v12, %v2032_v12  ;;  %v3265_v19 = vpack.c.bf16 %v2096_v13, %v2096_v13  ;;  %v1905_v20 = vadd.f32 %v4043_v39, %v1771_v14  ;;  %v1969_v21 = vadd.f32 %v4043_v39, %v1835_v15 }
 0x1a4   : > { %v1387_v22 = vpop.f32.mrf.mxu0  ;;  %v1643_v23 = vpop.f32.mrf.mxu1 }
 0x1a5   : > { %2673 = vst.msk [vmem:[%s3759_s19 + $0xac] sm:$0xf] %vm2629_vm1, %v3201_v18  ;;  %2737 = vst.msk [vmem:[%s3759_s19 + $0x1ac] sm:$0xf] %vm2629_vm1, %v3265_v19  ;;  %v2033_v24 = vmax.f32 %v1905_v20, 0.0  ;;  %v2097_v25 = vmax.f32 %v1969_v21, 0.0  ;;  %v1772_v26 = vmul.f32 %v4053_v54, %v1387_v22  ;;  %v1836_v27 = vmul.f32 %v4053_v54, %v1643_v23 }
 0x1a6   : > { %v1389_v28 = vpop.f32.mrf.mxu0  ;;  %v1645_v29 = vpop.f32.mrf.mxu1 }
 0x1a7   : > { %v3202_v30 = vpack.c.bf16 %v2033_v24, %v2033_v24  ;;  %v3266_v31 = vpack.c.bf16 %v2097_v25, %v2097_v25  ;;  %v1906_v32 = vadd.f32 %v4043_v39, %v1772_v26  ;;  %v1970_v33 = vadd.f32 %v4043_v39, %v1836_v27 }
 0x1a8   : > { %v1392_v34 = vpop.f32.mrf.mxu0  ;;  %v1648_v35 = vpop.f32.mrf.mxu1 }
 0x1a9   : > { %2674 = vst.msk [vmem:[%s3759_s19 + $0xb0] sm:$0xf] %vm2629_vm1, %v3202_v30  ;;  %2738 = vst.msk [vmem:[%s3759_s19 + $0x1b0] sm:$0xf] %vm2629_vm1, %v3266_v31  ;;  %v2034_v36 = vmax.f32 %v1906_v32, 0.0  ;;  %v2098_v37 = vmax.f32 %v1970_v33, 0.0  ;;  %v1773_v38 = vmul.f32 %v4053_v54, %v1392_v34  ;;  %v1837_v40 = vmul.f32 %v4053_v54, %v1648_v35 }
 0x1aa   : > { %v1394_v41 = vpop.f32.mrf.mxu0  ;;  %v1650_v42 = vpop.f32.mrf.mxu1 }
 0x1ab   : > { %v3203_v52 = vpack.c.bf16 %v2034_v36, %v2034_v36  ;;  %v3267_v43 = vpack.c.bf16 %v2098_v37, %v2098_v37  ;;  %v1907_v44 = vadd.f32 %v4043_v39, %v1773_v38  ;;  %v1971_v45 = vadd.f32 %v4043_v39, %v1837_v40 }
 0x1ac   : > { %v1395_v46 = vpop.f32.mrf.mxu0  ;;  %v1651_v47 = vpop.f32.mrf.mxu1 }
 0x1ad   : > { %2675 = vst.msk [vmem:[%s3759_s19 + $0xb4] sm:$0xf] %vm2629_vm1, %v3203_v52  ;;  %2739 = vst.msk [vmem:[%s3759_s19 + $0x1b4] sm:$0xf] %vm2629_vm1, %v3267_v43  ;;  %v2035_v48 = vmax.f32 %v1907_v44, 0.0  ;;  %v2099_v49 = vmax.f32 %v1971_v45, 0.0  ;;  %v1774_v50 = vmul.f32 %v4053_v54, %v1395_v46  ;;  %v1838_v51 = vmul.f32 %v4053_v54, %v1651_v47 }
 0x1ae   : > { %v1397_v53 = vpop.f32.mrf.mxu0  ;;  %v1653_v55 = vpop.f32.mrf.mxu1 }
 0x1af   : > { %v3204_v56 = vpack.c.bf16 %v2035_v48, %v2035_v48  ;;  %v3268_v57 = vpack.c.bf16 %v2099_v49, %v2099_v49  ;;  %v1908_v58 = vadd.f32 %v4043_v39, %v1774_v50  ;;  %v1972_v59 = vadd.f32 %v4043_v39, %v1838_v51 }
 0x1b0   : > { %v1400_v60 = vpop.f32.mrf.mxu0  ;;  %v1656_v61 = vpop.f32.mrf.mxu1 }
 0x1b1   : > { %2676 = vst.msk [vmem:[%s3759_s19 + $0xb8] sm:$0xf] %vm2629_vm1, %v3204_v56  ;;  %2740 = vst.msk [vmem:[%s3759_s19 + $0x1b8] sm:$0xf] %vm2629_vm1, %v3268_v57  ;;  %v2036_v62 = vmax.f32 %v1908_v58, 0.0  ;;  %v2100_v63 = vmax.f32 %v1972_v59, 0.0  ;;  %v1775_v0 = vmul.f32 %v4053_v54, %v1400_v60  ;;  %v1839_v1 = vmul.f32 %v4053_v54, %v1656_v61 }
 0x1b2   : > { %v1402_v2 = vpop.f32.mrf.mxu0  ;;  %v1658_v3 = vpop.f32.mrf.mxu1 }
 0x1b3   : > { %v3205_v4 = vpack.c.bf16 %v2036_v62, %v2036_v62  ;;  %v3269_v5 = vpack.c.bf16 %v2100_v63, %v2100_v63  ;;  %v1909_v6 = vadd.f32 %v4043_v39, %v1775_v0  ;;  %v1973_v7 = vadd.f32 %v4043_v39, %v1839_v1 }
 0x1b4   : > { %v1403_v8 = vpop.f32.mrf.mxu0  ;;  %v1659_v9 = vpop.f32.mrf.mxu1 }
 0x1b5   : > { %2677 = vst.msk [vmem:[%s3759_s19 + $0xbc] sm:$0xf] %vm2629_vm1, %v3205_v4  ;;  %2741 = vst.msk [vmem:[%s3759_s19 + $0x1bc] sm:$0xf] %vm2629_vm1, %v3269_v5  ;;  %v2037_v10 = vmax.f32 %v1909_v6, 0.0  ;;  %v2101_v11 = vmax.f32 %v1973_v7, 0.0  ;;  %v1776_v12 = vmul.f32 %v4053_v54, %v1403_v8  ;;  %v1840_v13 = vmul.f32 %v4053_v54, %v1659_v9 }
 0x1b6   : > { %v1405_v14 = vpop.f32.mrf.mxu0  ;;  %v1661_v15 = vpop.f32.mrf.mxu1 }
 0x1b7   : > { %v3206_v16 = vpack.c.bf16 %v2037_v10, %v2037_v10  ;;  %v3270_v17 = vpack.c.bf16 %v2101_v11, %v2101_v11  ;;  %v1910_v18 = vadd.f32 %v4043_v39, %v1776_v12  ;;  %v1974_v19 = vadd.f32 %v4043_v39, %v1840_v13 }
 0x1b8   : > { %v1408_v20 = vpop.f32.mrf.mxu0  ;;  %v1664_v21 = vpop.f32.mrf.mxu1 }
 0x1b9   : > { %2678 = vst.msk [vmem:[%s3759_s19 + $0xc0] sm:$0xf] %vm2629_vm1, %v3206_v16  ;;  %2742 = vst.msk [vmem:[%s3759_s19 + $0x1c0] sm:$0xf] %vm2629_vm1, %v3270_v17  ;;  %v2038_v22 = vmax.f32 %v1910_v18, 0.0  ;;  %v2102_v23 = vmax.f32 %v1974_v19, 0.0  ;;  %v1777_v24 = vmul.f32 %v4053_v54, %v1408_v20  ;;  %v1841_v25 = vmul.f32 %v4053_v54, %v1664_v21 }
 0x1ba   : > { %v1410_v26 = vpop.f32.mrf.mxu0  ;;  %v1666_v27 = vpop.f32.mrf.mxu1 }
 0x1bb   : > { %v3207_v28 = vpack.c.bf16 %v2038_v22, %v2038_v22  ;;  %v3271_v29 = vpack.c.bf16 %v2102_v23, %v2102_v23  ;;  %v1911_v30 = vadd.f32 %v4043_v39, %v1777_v24  ;;  %v1975_v31 = vadd.f32 %v4043_v39, %v1841_v25 }
 0x1bc   : > { %v1411_v32 = vpop.f32.mrf.mxu0  ;;  %v1667_v33 = vpop.f32.mrf.mxu1 }
 0x1bd   : > { %2679 = vst.msk [vmem:[%s3759_s19 + $0xc4] sm:$0xf] %vm2629_vm1, %v3207_v28  ;;  %2743 = vst.msk [vmem:[%s3759_s19 + $0x1c4] sm:$0xf] %vm2629_vm1, %v3271_v29  ;;  %v2039_v34 = vmax.f32 %v1911_v30, 0.0  ;;  %v2103_v35 = vmax.f32 %v1975_v31, 0.0  ;;  %v1778_v36 = vmul.f32 %v4053_v54, %v1411_v32  ;;  %v1842_v37 = vmul.f32 %v4053_v54, %v1667_v33 }
 0x1be   : > { %v1413_v38 = vpop.f32.mrf.mxu0  ;;  %v1669_v40 = vpop.f32.mrf.mxu1 }
 0x1bf   : > { %v3208_v41 = vpack.c.bf16 %v2039_v34, %v2039_v34  ;;  %v3272_v42 = vpack.c.bf16 %v2103_v35, %v2103_v35  ;;  %v1912_v52 = vadd.f32 %v4043_v39, %v1778_v36  ;;  %v1976_v43 = vadd.f32 %v4043_v39, %v1842_v37 }
 0x1c0   : > { %v1416_v44 = vpop.f32.mrf.mxu0  ;;  %v1672_v45 = vpop.f32.mrf.mxu1 }
 0x1c1   : > { %2680 = vst.msk [vmem:[%s3759_s19 + $0xc8] sm:$0xf] %vm2629_vm1, %v3208_v41  ;;  %2744 = vst.msk [vmem:[%s3759_s19 + $0x1c8] sm:$0xf] %vm2629_vm1, %v3272_v42  ;;  %v2040_v46 = vmax.f32 %v1912_v52, 0.0  ;;  %v2104_v47 = vmax.f32 %v1976_v43, 0.0  ;;  %v1779_v48 = vmul.f32 %v4053_v54, %v1416_v44  ;;  %v1843_v49 = vmul.f32 %v4053_v54, %v1672_v45 }
 0x1c2   : > { %v1418_v50 = vpop.f32.mrf.mxu0  ;;  %v1674_v51 = vpop.f32.mrf.mxu1 }
 0x1c3   : > { %v3209_v53 = vpack.c.bf16 %v2040_v46, %v2040_v46  ;;  %v3273_v55 = vpack.c.bf16 %v2104_v47, %v2104_v47  ;;  %v1913_v56 = vadd.f32 %v4043_v39, %v1779_v48  ;;  %v1977_v57 = vadd.f32 %v4043_v39, %v1843_v49 }
 0x1c4   : > { %v1419_v58 = vpop.f32.mrf.mxu0  ;;  %v1675_v59 = vpop.f32.mrf.mxu1 }
 0x1c5   : > { %2681 = vst.msk [vmem:[%s3759_s19 + $0xcc] sm:$0xf] %vm2629_vm1, %v3209_v53  ;;  %2745 = vst.msk [vmem:[%s3759_s19 + $0x1cc] sm:$0xf] %vm2629_vm1, %v3273_v55  ;;  %v2041_v60 = vmax.f32 %v1913_v56, 0.0  ;;  %v2105_v61 = vmax.f32 %v1977_v57, 0.0  ;;  %v1780_v62 = vmul.f32 %v4053_v54, %v1419_v58  ;;  %v1844_v63 = vmul.f32 %v4053_v54, %v1675_v59 }
 0x1c6   : > { %v1421_v0 = vpop.f32.mrf.mxu0  ;;  %v1677_v1 = vpop.f32.mrf.mxu1 }
 0x1c7   : > { %v3210_v2 = vpack.c.bf16 %v2041_v60, %v2041_v60  ;;  %v3274_v3 = vpack.c.bf16 %v2105_v61, %v2105_v61  ;;  %v1914_v4 = vadd.f32 %v4043_v39, %v1780_v62  ;;  %v1978_v5 = vadd.f32 %v4043_v39, %v1844_v63 }
 0x1c8   : > { %v1424_v6 = vpop.f32.mrf.mxu0  ;;  %v1680_v7 = vpop.f32.mrf.mxu1 }
 0x1c9   : > { %2682 = vst.msk [vmem:[%s3759_s19 + $0xd0] sm:$0xf] %vm2629_vm1, %v3210_v2  ;;  %2746 = vst.msk [vmem:[%s3759_s19 + $0x1d0] sm:$0xf] %vm2629_vm1, %v3274_v3  ;;  %v2042_v8 = vmax.f32 %v1914_v4, 0.0  ;;  %v2106_v9 = vmax.f32 %v1978_v5, 0.0  ;;  %v1781_v10 = vmul.f32 %v4053_v54, %v1424_v6  ;;  %v1845_v11 = vmul.f32 %v4053_v54, %v1680_v7 }
 0x1ca   : > { %v1426_v12 = vpop.f32.mrf.mxu0  ;;  %v1682_v13 = vpop.f32.mrf.mxu1 }
 0x1cb   : > { %v3211_v14 = vpack.c.bf16 %v2042_v8, %v2042_v8  ;;  %v3275_v15 = vpack.c.bf16 %v2106_v9, %v2106_v9  ;;  %v1915_v16 = vadd.f32 %v4043_v39, %v1781_v10  ;;  %v1979_v17 = vadd.f32 %v4043_v39, %v1845_v11 }
 0x1cc   : > { %v1427_v18 = vpop.f32.mrf.mxu0  ;;  %v1683_v19 = vpop.f32.mrf.mxu1 }
 0x1cd   : > { %2683 = vst.msk [vmem:[%s3759_s19 + $0xd4] sm:$0xf] %vm2629_vm1, %v3211_v14  ;;  %2747 = vst.msk [vmem:[%s3759_s19 + $0x1d4] sm:$0xf] %vm2629_vm1, %v3275_v15  ;;  %v2043_v20 = vmax.f32 %v1915_v16, 0.0  ;;  %v2107_v21 = vmax.f32 %v1979_v17, 0.0  ;;  %v1782_v22 = vmul.f32 %v4053_v54, %v1427_v18  ;;  %v1846_v23 = vmul.f32 %v4053_v54, %v1683_v19 }
 0x1ce   : > { %v1429_v24 = vpop.f32.mrf.mxu0  ;;  %v1685_v25 = vpop.f32.mrf.mxu1 }
 0x1cf   : > { %v3212_v26 = vpack.c.bf16 %v2043_v20, %v2043_v20  ;;  %v3276_v27 = vpack.c.bf16 %v2107_v21, %v2107_v21  ;;  %v1916_v28 = vadd.f32 %v4043_v39, %v1782_v22  ;;  %v1980_v29 = vadd.f32 %v4043_v39, %v1846_v23 }
 0x1d0   : > { %v1432_v30 = vpop.f32.mrf.mxu0  ;;  %v1688_v31 = vpop.f32.mrf.mxu1 }
 0x1d1   : > { %2684 = vst.msk [vmem:[%s3759_s19 + $0xd8] sm:$0xf] %vm2629_vm1, %v3212_v26  ;;  %2748 = vst.msk [vmem:[%s3759_s19 + $0x1d8] sm:$0xf] %vm2629_vm1, %v3276_v27  ;;  %v2044_v32 = vmax.f32 %v1916_v28, 0.0  ;;  %v2108_v33 = vmax.f32 %v1980_v29, 0.0  ;;  %v1783_v34 = vmul.f32 %v4053_v54, %v1432_v30  ;;  %v1847_v35 = vmul.f32 %v4053_v54, %v1688_v31 }
 0x1d2   : > { %v1434_v36 = vpop.f32.mrf.mxu0  ;;  %v1690_v37 = vpop.f32.mrf.mxu1 }
 0x1d3   : > { %v3213_v38 = vpack.c.bf16 %v2044_v32, %v2044_v32  ;;  %v3277_v40 = vpack.c.bf16 %v2108_v33, %v2108_v33  ;;  %v1917_v41 = vadd.f32 %v4043_v39, %v1783_v34  ;;  %v1981_v42 = vadd.f32 %v4043_v39, %v1847_v35 }
 0x1d4   : > { %v1435_v52 = vpop.f32.mrf.mxu0  ;;  %v1691_v43 = vpop.f32.mrf.mxu1 }
 0x1d5   : > { %2685 = vst.msk [vmem:[%s3759_s19 + $0xdc] sm:$0xf] %vm2629_vm1, %v3213_v38  ;;  %2749 = vst.msk [vmem:[%s3759_s19 + $0x1dc] sm:$0xf] %vm2629_vm1, %v3277_v40  ;;  %v2045_v44 = vmax.f32 %v1917_v41, 0.0  ;;  %v2109_v45 = vmax.f32 %v1981_v42, 0.0  ;;  %v1784_v46 = vmul.f32 %v4053_v54, %v1435_v52  ;;  %v1848_v47 = vmul.f32 %v4053_v54, %v1691_v43 }
 0x1d6   : > { %v1437_v48 = vpop.f32.mrf.mxu0  ;;  %v1693_v49 = vpop.f32.mrf.mxu1 }
 0x1d7   : > { %v3214_v50 = vpack.c.bf16 %v2045_v44, %v2045_v44  ;;  %v3278_v51 = vpack.c.bf16 %v2109_v45, %v2109_v45  ;;  %v1918_v53 = vadd.f32 %v4043_v39, %v1784_v46  ;;  %v1982_v55 = vadd.f32 %v4043_v39, %v1848_v47 }
 0x1d8   : > { %v1440_v56 = vpop.f32.mrf.mxu0  ;;  %v1696_v57 = vpop.f32.mrf.mxu1 }
 0x1d9   : > { %2686 = vst.msk [vmem:[%s3759_s19 + $0xe0] sm:$0xf] %vm2629_vm1, %v3214_v50  ;;  %2750 = vst.msk [vmem:[%s3759_s19 + $0x1e0] sm:$0xf] %vm2629_vm1, %v3278_v51  ;;  %v2046_v58 = vmax.f32 %v1918_v53, 0.0  ;;  %v2110_v59 = vmax.f32 %v1982_v55, 0.0  ;;  %v1785_v60 = vmul.f32 %v4053_v54, %v1440_v56  ;;  %v1849_v61 = vmul.f32 %v4053_v54, %v1696_v57 }
 0x1da   : > { %v1442_v62 = vpop.f32.mrf.mxu0  ;;  %v1698_v63 = vpop.f32.mrf.mxu1 }
 0x1db   : > { %v3215_v0 = vpack.c.bf16 %v2046_v58, %v2046_v58  ;;  %v3279_v1 = vpack.c.bf16 %v2110_v59, %v2110_v59  ;;  %v1919_v2 = vadd.f32 %v4043_v39, %v1785_v60  ;;  %v1983_v3 = vadd.f32 %v4043_v39, %v1849_v61 }
 0x1dc   : > { %v1443_v4 = vpop.f32.mrf.mxu0  ;;  %v1699_v5 = vpop.f32.mrf.mxu1 }
 0x1dd   : > { %2687 = vst.msk [vmem:[%s3759_s19 + $0xe4] sm:$0xf] %vm2629_vm1, %v3215_v0  ;;  %2751 = vst.msk [vmem:[%s3759_s19 + $0x1e4] sm:$0xf] %vm2629_vm1, %v3279_v1  ;;  %v2047_v6 = vmax.f32 %v1919_v2, 0.0  ;;  %v2111_v7 = vmax.f32 %v1983_v3, 0.0  ;;  %v1786_v8 = vmul.f32 %v4053_v54, %v1443_v4  ;;  %v1850_v9 = vmul.f32 %v4053_v54, %v1699_v5 }
 0x1de   : > { %v1445_v10 = vpop.f32.mrf.mxu0  ;;  %v1701_v11 = vpop.f32.mrf.mxu1 }
 0x1df   : > { %v3216_v12 = vpack.c.bf16 %v2047_v6, %v2047_v6  ;;  %v3280_v13 = vpack.c.bf16 %v2111_v7, %v2111_v7  ;;  %v1920_v14 = vadd.f32 %v4043_v39, %v1786_v8  ;;  %v1984_v15 = vadd.f32 %v4043_v39, %v1850_v9 }
 0x1e0   : > { %v1448_v16 = vpop.f32.mrf.mxu0  ;;  %v1704_v17 = vpop.f32.mrf.mxu1 }
 0x1e1   : > { %2688 = vst.msk [vmem:[%s3759_s19 + $0xe8] sm:$0xf] %vm2629_vm1, %v3216_v12  ;;  %2752 = vst.msk [vmem:[%s3759_s19 + $0x1e8] sm:$0xf] %vm2629_vm1, %v3280_v13  ;;  %v2048_v18 = vmax.f32 %v1920_v14, 0.0  ;;  %v2112_v19 = vmax.f32 %v1984_v15, 0.0  ;;  %v1787_v20 = vmul.f32 %v4053_v54, %v1448_v16  ;;  %v1851_v21 = vmul.f32 %v4053_v54, %v1704_v17 }
 0x1e2   : > { %v1450_v22 = vpop.f32.mrf.mxu0  ;;  %v1706_v23 = vpop.f32.mrf.mxu1 }
 0x1e3   : > { %v3217_v24 = vpack.c.bf16 %v2048_v18, %v2048_v18  ;;  %v3281_v25 = vpack.c.bf16 %v2112_v19, %v2112_v19  ;;  %v1921_v26 = vadd.f32 %v4043_v39, %v1787_v20  ;;  %v1985_v27 = vadd.f32 %v4043_v39, %v1851_v21 }
 0x1e4   : > { %v1451_v28 = vpop.f32.mrf.mxu0  ;;  %v1707_v29 = vpop.f32.mrf.mxu1 }
 0x1e5   : > { %2689 = vst.msk [vmem:[%s3759_s19 + $0xec] sm:$0xf] %vm2629_vm1, %v3217_v24  ;;  %2753 = vst.msk [vmem:[%s3759_s19 + $0x1ec] sm:$0xf] %vm2629_vm1, %v3281_v25  ;;  %v2049_v30 = vmax.f32 %v1921_v26, 0.0  ;;  %v2113_v31 = vmax.f32 %v1985_v27, 0.0  ;;  %v1788_v32 = vmul.f32 %v4053_v54, %v1451_v28  ;;  %v1852_v33 = vmul.f32 %v4053_v54, %v1707_v29 }
 0x1e6   : > { %v1453_v34 = vpop.f32.mrf.mxu0  ;;  %v1709_v35 = vpop.f32.mrf.mxu1 }
 0x1e7   : > { %v3218_v36 = vpack.c.bf16 %v2049_v30, %v2049_v30  ;;  %v3282_v37 = vpack.c.bf16 %v2113_v31, %v2113_v31  ;;  %v1922_v38 = vadd.f32 %v4043_v39, %v1788_v32  ;;  %v1986_v40 = vadd.f32 %v4043_v39, %v1852_v33 }
 0x1e8   : > { %v1456_v41 = vpop.f32.mrf.mxu0  ;;  %v1712_v42 = vpop.f32.mrf.mxu1 }
 0x1e9   : > { %2690 = vst.msk [vmem:[%s3759_s19 + $0xf0] sm:$0xf] %vm2629_vm1, %v3218_v36  ;;  %2754 = vst.msk [vmem:[%s3759_s19 + $0x1f0] sm:$0xf] %vm2629_vm1, %v3282_v37  ;;  %v2050_v52 = vmax.f32 %v1922_v38, 0.0  ;;  %v2114_v43 = vmax.f32 %v1986_v40, 0.0  ;;  %v1789_v44 = vmul.f32 %v4053_v54, %v1456_v41  ;;  %v1853_v45 = vmul.f32 %v4053_v54, %v1712_v42 }
 0x1ea   : > { %v1458_v46 = vpop.f32.mrf.mxu0  ;;  %v1714_v47 = vpop.f32.mrf.mxu1 }
 0x1eb   : > { %v3219_v48 = vpack.c.bf16 %v2050_v52, %v2050_v52  ;;  %v3283_v49 = vpack.c.bf16 %v2114_v43, %v2114_v43  ;;  %v1923_v50 = vadd.f32 %v4043_v39, %v1789_v44  ;;  %v1987_v51 = vadd.f32 %v4043_v39, %v1853_v45 }
 0x1ec   : > { %v1459_v53 = vpop.f32.mrf.mxu0  ;;  %v1715_v55 = vpop.f32.mrf.mxu1 }
 0x1ed   : > { %2691 = vst.msk [vmem:[%s3759_s19 + $0xf4] sm:$0xf] %vm2629_vm1, %v3219_v48  ;;  %2755 = vst.msk [vmem:[%s3759_s19 + $0x1f4] sm:$0xf] %vm2629_vm1, %v3283_v49  ;;  %v2051_v56 = vmax.f32 %v1923_v50, 0.0  ;;  %v2115_v57 = vmax.f32 %v1987_v51, 0.0  ;;  %v1790_v58 = vmul.f32 %v4053_v54, %v1459_v53  ;;  %v1854_v59 = vmul.f32 %v4053_v54, %v1715_v55 }
 0x1ee   : > { %v1461_v60 = vpop.f32.mrf.mxu0  ;;  %v1717_v61 = vpop.f32.mrf.mxu1 }
 0x1ef   : > { %v3220_v62 = vpack.c.bf16 %v2051_v56, %v2051_v56  ;;  %v3284_v63 = vpack.c.bf16 %v2115_v57, %v2115_v57  ;;  %v1924_v0 = vadd.f32 %v4043_v39, %v1790_v58  ;;  %v1988_v1 = vadd.f32 %v4043_v39, %v1854_v59 }
 0x1f1   : > { %2692 = vst.msk [vmem:[%s3759_s19 + $0xf8] sm:$0xf] %vm2629_vm1, %v3220_v62  ;;  %2756 = vst.msk [vmem:[%s3759_s19 + $0x1f8] sm:$0xf] %vm2629_vm1, %v3284_v63  ;;  %v2052_v2 = vmax.f32 %v1924_v0, 0.0  ;;  %v2116_v3 = vmax.f32 %v1988_v1, 0.0 }
 0x1f3   : > { %v3221_v4 = vpack.c.bf16 %v2052_v2, %v2052_v2  ;;  %v3285_v5 = vpack.c.bf16 %v2116_v3, %v2116_v3 }
 0x1f5   : > { %2693 = vst.msk [vmem:[%s3759_s19 + $0xfc] sm:$0xf] %vm2629_vm1, %v3221_v4  ;;  %2757 = vst.msk [vmem:[%s3759_s19 + $0x1fc] sm:$0xf] %vm2629_vm1, %v3285_v5 }
 0x1f6 PF: > { %s14_s15 = sadd.s32 1, %s3506_s15  }
 0x1f7   : > { %p11_p4 = scmp.ge.s32.totalorder %s14_s15, 4  }
 0x1f9   :  { %13 = sbr.rel (!%p11_p4) target bundleno = 1 (0x1), region = 66 }

// kernel: wideresnet_forward.9
= control target key start
LH: loop header
LB: loop body
LE: loop exit
PB: predicated region body
PF: predicated region fallthrough
CT: control target
= control target key end

     0   :  { %s4179_s18 = smov 0   ;;  %s5094_s0 = inlined_call_operand.vmem [shape: bf16[2048,144], index: 0, kind: input, shape index: {}]   ;;  %s5095_s1 = inlined_call_operand.vmem [shape: bf16[144,16], index: 1, kind: input, shape index: {}]   ;;  %s5096_s2 = inlined_call_operand.vmem [shape: bf16[2048,16], index: 2, kind: input, shape index: {}]   ;;  %s5097_s3 = inlined_call_operand.vmem [shape: f32[1,16], index: 3, kind: input, shape index: {}]   ;;  %s5098_s4 = inlined_call_operand.vmem [shape: f32[1,16], index: 4, kind: input, shape index: {}]   ;;  %s5099_s5 = inlined_call_operand.vmem [shape: bf16[2048,16], index: 5, kind: output, shape index: {}]  }
   0x1 LB: > { %s3131_s19 = sadd.s32 4294967295, %s4146_s18   ;;  %p3135_p0 = scmp.ge.s32.totalorder %s4146_s18, 1  ;;  %s4146_s18 = sphi %s4179_s18, %s15_s18  }
   0x2   : > { %p200_p1 = scmp.lt.s32.totalorder %s4146_s18, 3 }
   0x4   : > { %p201_p2 = pnand %p3135_p0, %p200_p1 }
   0x5   : > { %s3136_s22 = sshll.u32 (!%p201_p2), %s3131_s19, 7 }
   0x6   : > { %204 = sbr.rel (%p201_p2) target bundleno = 504 (0x1f8), region = 40  ;;  %p235_p3 = scmp.lt.s32.totalorder (!%p201_p2), %s3136_s22, 255 }
   0xb   : > { %v3951_v0 = vld [vmem:[%s5095_s1 + $0x38] sm:$0xff]   ;;  %v4148_v1 = vmov 0   ;;  %v3952_v2 = vld [vmem:[%s5095_s1 + $0x30] sm:$0xff]   ;;  %s5101_s22 = smov (!%p235_p3, %s3136_s22), 255  ;;  %v3953_v3 = vld [vmem:[%s5095_s1 + $0x28] sm:$0xff]   ;;  %vm1286_vm0 = vcmask 130048  }
   0xc   : > { %1479 = vmatprep.subr.bf16.mxu0 %v4148_v1  ;;  %3924 = vmatprep.subr.bf16.mxu1 %v4148_v1  ;;  %s3476_s27 = sshll.u32 %s5101_s22, 3  ;;  %v3954_v4 = vld [vmem:[%s5095_s1 + $0x20] sm:$0xff]   ;;  %v3955_v7 = vld [vmem:[%s5095_s1 + $0x18] sm:$0xff]   ;;  %v3956_v8 = vld [vmem:[%s5095_s1 + $0x10] sm:$0xff]   ;;  %s3140_s19 = sshll.u32 %s5101_s22, 2  ;;  %vm2934_vm1 = vcmask 125952  }
   0xd   : > { %1480 = vmatpush1.bf16.msra.mxu0 %v3951_v0  ;;  %3933 = vmatpush1.bf16.msra.mxu1 %v3951_v0  ;;  %s4202_s30 = scalar_lea.vmem %s5094_s0, %s3476_s27  ;;  %v3957_v9 = vld [vmem:[%s5095_s1 + $0x8] sm:$0xff]   ;;  %v3958_v10 = vld [vmem:[%s5095_s1] sm:$0xff]   ;;  %s4374_s23 = scalar_lea.vmem %s5096_s2, %s3140_s19 }
   0xe   : > { %1481 = vmatprep.subr.bf16.mxu0 %v4148_v1  ;;  %3925 = vmatprep.subr.bf16.mxu1 %v4148_v1  ;;  %v3962_v5 = vld [vmem:[%s4202_s30 + $0x4] ss:$8 sps:$4 sm:$0xff]   ;;  %v3960_v12 = vld [vmem:[%s4202_s30] ss:$8 sps:$4 sm:$0xff]   ;;  %v3966_v14 = vld [vmem:[%s4202_s30 + $0x14] ss:$8 sps:$4 sm:$0xff]   ;;  %s4418_s6 = scalar_lea.vmem %s5099_s5, %s3140_s19 }
   0xf   : > { %v3965_v6 = vld [vmem:[%s4202_s30 + $0x204] ss:$8 sps:$4 sm:$0xff]   ;;  %3280 = vmatprep.mubr.msk.bf16.mxu0 %vm1286_vm0, %v3962_v5  ;;  %v3963_v13 = vld [vmem:[%s4202_s30 + $0x200] ss:$8 sps:$4 sm:$0xff]   ;;  %v3968_v15 = vld [vmem:[%s4202_s30 + $0x214] ss:$8 sps:$4 sm:$0xff]  }
  0x10   : > { %3312 = vmatprep.mubr.msk.bf16.mxu1 %vm1286_vm0, %v3965_v6  ;;  %v3959_v11 = vld [vmem:[%s5095_s1 + $0x40] sm:$0xff]   ;;  %v3970_v16 = vld [vmem:[%s4202_s30 + $0x10] ss:$8 sps:$4 sm:$0xff]   ;;  %v3978_v22 = vld [vmem:[%s4202_s30 + $0x34] ss:$8 sps:$4 sm:$0xff]  }
  0x11   : > { %1482 = vmatpush1.bf16.msra.mxu0 %v3952_v2  ;;  %3934 = vmatpush1.bf16.msra.mxu1 %v3952_v2  ;;  %v3971_v17 = vld [vmem:[%s4202_s30 + $0x210] ss:$8 sps:$4 sm:$0xff]   ;;  %v3972_v18 = vld [vmem:[%s4202_s30 + $0x24] ss:$8 sps:$4 sm:$0xff]   ;;  %v3976_v20 = vld [vmem:[%s4202_s30 + $0x20] ss:$8 sps:$4 sm:$0xff]  }
  0x12   : > { %1483 = vmatprep.subr.bf16.mxu0 %v4148_v1  ;;  %3926 = vmatprep.subr.bf16.mxu1 %v4148_v1  ;;  %v3974_v19 = vld [vmem:[%s4202_s30 + $0x224] ss:$8 sps:$4 sm:$0xff]   ;;  %v3977_v21 = vld [vmem:[%s4202_s30 + $0x220] ss:$8 sps:$4 sm:$0xff]   ;;  %v3980_v23 = vld [vmem:[%s4202_s30 + $0x234] ss:$8 sps:$4 sm:$0xff]  }
  0x13   : > { %v3982_v24 = vld [vmem:[%s4202_s30 + $0x30] ss:$8 sps:$4 sm:$0xff]   ;;  %v3984_v26 = vld [vmem:[%s4202_s30 + $0x44] ss:$8 sps:$4 sm:$0xff]   ;;  %v3988_v28 = vld [vmem:[%s4202_s30 + $0x40] ss:$8 sps:$4 sm:$0xff]  }
  0x14   : > { %v3983_v25 = vld [vmem:[%s4202_s30 + $0x230] ss:$8 sps:$4 sm:$0xff]   ;;  %v3986_v27 = vld [vmem:[%s4202_s30 + $0x244] ss:$8 sps:$4 sm:$0xff]   ;;  %v3989_v29 = vld [vmem:[%s4202_s30 + $0x240] ss:$8 sps:$4 sm:$0xff]  }
  0x15   : > { %1484 = vmatpush1.bf16.msra.mxu0 %v3953_v3  ;;  %3935 = vmatpush1.bf16.msra.mxu1 %v3953_v3  ;;  %v3990_v30 = vld [vmem:[%s4202_s30 + $0x54] ss:$8 sps:$4 sm:$0xff]   ;;  %v3994_v32 = vld [vmem:[%s4202_s30 + $0x50] ss:$8 sps:$4 sm:$0xff]   ;;  %v3996_v34 = vld [vmem:[%s4202_s30 + $0x64] ss:$8 sps:$4 sm:$0xff]  }
  0x16   : > { %1485 = vmatprep.subr.bf16.mxu0 %v4148_v1  ;;  %3927 = vmatprep.subr.bf16.mxu1 %v4148_v1  ;;  %v3992_v31 = vld [vmem:[%s4202_s30 + $0x254] ss:$8 sps:$4 sm:$0xff]   ;;  %v3995_v33 = vld [vmem:[%s4202_s30 + $0x250] ss:$8 sps:$4 sm:$0xff]   ;;  %v3998_v35 = vld [vmem:[%s4202_s30 + $0x264] ss:$8 sps:$4 sm:$0xff]  }
  0x17   : > { %v4000_v36 = vld [vmem:[%s4202_s30 + $0x60] ss:$8 sps:$4 sm:$0xff]   ;;  %v4002_v38 = vld [vmem:[%s4202_s30 + $0x74] ss:$8 sps:$4 sm:$0xff]   ;;  %v4006_v40 = vld [vmem:[%s4202_s30 + $0x70] ss:$8 sps:$4 sm:$0xff]  }
  0x18   : > { %v4001_v37 = vld [vmem:[%s4202_s30 + $0x260] ss:$8 sps:$4 sm:$0xff]   ;;  %v4004_v39 = vld [vmem:[%s4202_s30 + $0x274] ss:$8 sps:$4 sm:$0xff]   ;;  %v4007_v41 = vld [vmem:[%s4202_s30 + $0x270] ss:$8 sps:$4 sm:$0xff]  }
  0x19   : > { %1486 = vmatpush1.bf16.msra.mxu0 %v3954_v4  ;;  %3936 = vmatpush1.bf16.msra.mxu1 %v3954_v4  ;;  %v4008_v42 = vld [vmem:[%s4202_s30 + $0x84] ss:$8 sps:$4 sm:$0xff]   ;;  %v4012_v44 = vld [vmem:[%s4202_s30 + $0x80] ss:$8 sps:$4 sm:$0xff]   ;;  %v4014_v46 = vld [vmem:[%s4202_s30 + $0x94] ss:$8 sps:$4 sm:$0xff]  }
  0x1a   : > { %1487 = vmatprep.subr.bf16.mxu0 %v4148_v1  ;;  %3928 = vmatprep.subr.bf16.mxu1 %v4148_v1  ;;  %v4010_v43 = vld [vmem:[%s4202_s30 + $0x284] ss:$8 sps:$4 sm:$0xff]   ;;  %v4013_v45 = vld [vmem:[%s4202_s30 + $0x280] ss:$8 sps:$4 sm:$0xff]   ;;  %v4016_v47 = vld [vmem:[%s4202_s30 + $0x294] ss:$8 sps:$4 sm:$0xff]  }
  0x1b   : > { %v4018_v48 = vld [vmem:[%s4202_s30 + $0x90] ss:$8 sps:$4 sm:$0xff]   ;;  %v4020_v50 = vld [vmem:[%s4202_s30 + $0xa4] ss:$8 sps:$4 sm:$0xff]   ;;  %v4024_v52 = vld [vmem:[%s4202_s30 + $0xa0] ss:$8 sps:$4 sm:$0xff]  }
  0x1c   : > { %v4019_v49 = vld [vmem:[%s4202_s30 + $0x290] ss:$8 sps:$4 sm:$0xff]   ;;  %v4022_v51 = vld [vmem:[%s4202_s30 + $0x2a4] ss:$8 sps:$4 sm:$0xff]   ;;  %v4025_v53 = vld [vmem:[%s4202_s30 + $0x2a0] ss:$8 sps:$4 sm:$0xff]  }
  0x1d   : > { %1488 = vmatpush1.bf16.msra.mxu0 %v3955_v7  ;;  %3937 = vmatpush1.bf16.msra.mxu1 %v3955_v7  ;;  %v4026_v54 = vld [vmem:[%s4202_s30 + $0xb4] ss:$8 sps:$4 sm:$0xff]   ;;  %v4030_v56 = vld [vmem:[%s4202_s30 + $0xb0] ss:$8 sps:$4 sm:$0xff]   ;;  %v4032_v58 = vld [vmem:[%s4202_s30 + $0xc4] ss:$8 sps:$4 sm:$0xff]  }
  0x1e   : > { %1489 = vmatprep.subr.bf16.mxu0 %v4148_v1  ;;  %3929 = vmatprep.subr.bf16.mxu1 %v4148_v1  ;;  %v4028_v55 = vld [vmem:[%s4202_s30 + $0x2b4] ss:$8 sps:$4 sm:$0xff]   ;;  %v4031_v57 = vld [vmem:[%s4202_s30 + $0x2b0] ss:$8 sps:$4 sm:$0xff]   ;;  %v4034_v59 = vld [vmem:[%s4202_s30 + $0x2c4] ss:$8 sps:$4 sm:$0xff]  }
  0x1f   : > { %v4036_v60 = vld [vmem:[%s4202_s30 + $0xc0] ss:$8 sps:$4 sm:$0xff]   ;;  %v4038_v62 = vld [vmem:[%s4202_s30 + $0xd4] ss:$8 sps:$4 sm:$0xff]   ;;  %v4042_v0 = vld [vmem:[%s4202_s30 + $0xd0] ss:$8 sps:$4 sm:$0xff]  }
  0x20   : > { %v4037_v61 = vld [vmem:[%s4202_s30 + $0x2c0] ss:$8 sps:$4 sm:$0xff]   ;;  %v4040_v63 = vld [vmem:[%s4202_s30 + $0x2d4] ss:$8 sps:$4 sm:$0xff]   ;;  %v4044_v2 = vld [vmem:[%s4202_s30 + $0xe4] ss:$8 sps:$4 sm:$0xff]  }
  0x21   : > { %1490 = vmatpush1.bf16.msra.mxu0 %v3956_v8  ;;  %3938 = vmatpush1.bf16.msra.mxu1 %v3956_v8  ;;  %v4046_v3 = vld [vmem:[%s4202_s30 + $0x2e4] ss:$8 sps:$4 sm:$0xff]   ;;  %v4048_v4 = vld [vmem:[%s4202_s30 + $0xe0] ss:$8 sps:$4 sm:$0xff]   ;;  %v4050_v6 = vld [vmem:[%s4202_s30 + $0xf4] ss:$8 sps:$4 sm:$0xff]  }
  0x22   : > { %1491 = vmatprep.subr.bf16.mxu0 %v4148_v1  ;;  %3930 = vmatprep.subr.bf16.mxu1 %v4148_v1  ;;  %v4049_v5 = vld [vmem:[%s4202_s30 + $0x2e0] ss:$8 sps:$4 sm:$0xff]   ;;  %v4052_v7 = vld [vmem:[%s4202_s30 + $0x2f4] ss:$8 sps:$4 sm:$0xff]   ;;  %v4054_v8 = vld [vmem:[%s4202_s30 + $0xf0] ss:$8 sps:$4 sm:$0xff]  }
  0x25   : > { %1492 = vmatpush1.bf16.msra.mxu0 %v3957_v9  ;;  %3939 = vmatpush1.bf16.msra.mxu1 %v3957_v9  ;;  %v4055_v9 = vld [vmem:[%s4202_s30 + $0x2f0] ss:$8 sps:$4 sm:$0xff]  }
  0x26   : > { %1493 = vmatprep.subr.bf16.mxu0 %v4148_v1  ;;  %3931 = vmatprep.subr.bf16.mxu1 %v4148_v1 }
  0x29   : > { %1494 = vmatpush1.bf16.msra.mxu0 %v3958_v10  ;;  %3940 = vmatpush1.bf16.msra.mxu1 %v3958_v10  ;;  %v4056_v10 = vld [vmem:[%s4202_s30 + $0x104] ss:$8 sps:$4 sm:$0xff]  }
  0x2a   : > { %1509 = vmatprep.subr.bf16.mxu0 %v4148_v1  ;;  %3932 = vmatprep.subr.bf16.mxu1 %v4148_v1  ;;  %v4043_v1 = vld [vmem:[%s4202_s30 + $0x2d0] ss:$8 sps:$4 sm:$0xff]  }
  0x2d   : > { %1510 = vmatpush2.bf16.msra.mxu0 %v3959_v11  ;;  %3941 = vmatpush2.bf16.msra.mxu1 %v3959_v11  ;;  %v4058_v11 = vld [vmem:[%s4202_s30 + $0x304] ss:$8 sps:$4 sm:$0xff]  }
  0x30   : > { %1512 = vmatmul.mubr.bf16.vlgmr.msra.gmra.mxu0 %v3960_v12  ;;  %1768 = vmatmul.mubr.bf16.vlgmr.msra.gmra.mxu1 %v3963_v13  ;;  %v4060_v12 = vld [vmem:[%s4202_s30 + $0x100] ss:$8 sps:$4 sm:$0xff]  }
  0x31   : > { %3281 = vmatprep.mubr.msk.bf16.mxu0 %vm1286_vm0, %v3966_v14  ;;  %3313 = vmatprep.mubr.msk.bf16.mxu1 %vm1286_vm0, %v3968_v15  ;;  %v4061_v13 = vld [vmem:[%s4202_s30 + $0x300] ss:$8 sps:$4 sm:$0xff]   ;;  %v4062_v14 = vld [vmem:[%s4202_s30 + $0x114] ss:$8 sps:$4 sm:$0xff]  }
  0x32   : > { %v4064_v15 = vld [vmem:[%s4202_s30 + $0x314] ss:$8 sps:$4 sm:$0xff]  }
  0x38   : > { %1520 = vmatmul.mubr.bf16.gmra.mxu0 %v3970_v16  ;;  %1776 = vmatmul.mubr.bf16.gmra.mxu1 %v3971_v17  ;;  %v4066_v16 = vld [vmem:[%s4202_s30 + $0x110] ss:$8 sps:$4 sm:$0xff]  }
  0x39   : > { %3282 = vmatprep.mubr.msk.bf16.mxu0 %vm1286_vm0, %v3972_v18  ;;  %3314 = vmatprep.mubr.msk.bf16.mxu1 %vm1286_vm0, %v3974_v19  ;;  %v4067_v17 = vld [vmem:[%s4202_s30 + $0x310] ss:$8 sps:$4 sm:$0xff]   ;;  %v4068_v18 = vld [vmem:[%s4202_s30 + $0x124] ss:$8 sps:$4 sm:$0xff]  }
  0x3a   : > { %v4070_v19 = vld [vmem:[%s4202_s30 + $0x324] ss:$8 sps:$4 sm:$0xff]  }
  0x40   : > { %1528 = vmatmul.mubr.bf16.gmra.mxu0 %v3976_v20  ;;  %1784 = vmatmul.mubr.bf16.gmra.mxu1 %v3977_v21  ;;  %v4072_v20 = vld [vmem:[%s4202_s30 + $0x120] ss:$8 sps:$4 sm:$0xff]  }
  0x41   : > { %3283 = vmatprep.mubr.msk.bf16.mxu0 %vm1286_vm0, %v3978_v22  ;;  %3315 = vmatprep.mubr.msk.bf16.mxu1 %vm1286_vm0, %v3980_v23  ;;  %v4073_v21 = vld [vmem:[%s4202_s30 + $0x320] ss:$8 sps:$4 sm:$0xff]   ;;  %v4074_v22 = vld [vmem:[%s4202_s30 + $0x134] ss:$8 sps:$4 sm:$0xff]  }
  0x42   : > { %v4076_v23 = vld [vmem:[%s4202_s30 + $0x334] ss:$8 sps:$4 sm:$0xff]  }
  0x48   : > { %1536 = vmatmul.mubr.bf16.gmra.mxu0 %v3982_v24  ;;  %1792 = vmatmul.mubr.bf16.gmra.mxu1 %v3983_v25  ;;  %v4078_v24 = vld [vmem:[%s4202_s30 + $0x130] ss:$8 sps:$4 sm:$0xff]  }
  0x49   : > { %3284 = vmatprep.mubr.msk.bf16.mxu0 %vm1286_vm0, %v3984_v26  ;;  %3316 = vmatprep.mubr.msk.bf16.mxu1 %vm1286_vm0, %v3986_v27  ;;  %v4079_v25 = vld [vmem:[%s4202_s30 + $0x330] ss:$8 sps:$4 sm:$0xff]   ;;  %v4080_v26 = vld [vmem:[%s4202_s30 + $0x144] ss:$8 sps:$4 sm:$0xff]  }
  0x4a   : > { %v4082_v27 = vld [vmem:[%s4202_s30 + $0x344] ss:$8 sps:$4 sm:$0xff]  }
  0x50   : > { %1544 = vmatmul.mubr.bf16.gmra.mxu0 %v3988_v28  ;;  %1800 = vmatmul.mubr.bf16.gmra.mxu1 %v3989_v29  ;;  %v4084_v28 = vld [vmem:[%s4202_s30 + $0x140] ss:$8 sps:$4 sm:$0xff]  }
  0x51   : > { %3285 = vmatprep.mubr.msk.bf16.mxu0 %vm1286_vm0, %v3990_v30  ;;  %3317 = vmatprep.mubr.msk.bf16.mxu1 %vm1286_vm0, %v3992_v31  ;;  %v4085_v29 = vld [vmem:[%s4202_s30 + $0x340] ss:$8 sps:$4 sm:$0xff]   ;;  %v4086_v30 = vld [vmem:[%s4202_s30 + $0x154] ss:$8 sps:$4 sm:$0xff]  }
  0x52   : > { %v4088_v31 = vld [vmem:[%s4202_s30 + $0x354] ss:$8 sps:$4 sm:$0xff]  }
  0x58   : > { %1552 = vmatmul.mubr.bf16.gmra.mxu0 %v3994_v32  ;;  %1808 = vmatmul.mubr.bf16.gmra.mxu1 %v3995_v33  ;;  %v4090_v32 = vld [vmem:[%s4202_s30 + $0x150] ss:$8 sps:$4 sm:$0xff]  }
  0x59   : > { %3286 = vmatprep.mubr.msk.bf16.mxu0 %vm1286_vm0, %v3996_v34  ;;  %3318 = vmatprep.mubr.msk.bf16.mxu1 %vm1286_vm0, %v3998_v35  ;;  %v4091_v33 = vld [vmem:[%s4202_s30 + $0x350] ss:$8 sps:$4 sm:$0xff]   ;;  %v4092_v34 = vld [vmem:[%s4202_s30 + $0x164] ss:$8 sps:$4 sm:$0xff]  }
  0x5a   : > { %v4094_v35 = vld [vmem:[%s4202_s30 + $0x364] ss:$8 sps:$4 sm:$0xff]  }
  0x60   : > { %1560 = vmatmul.mubr.bf16.gmra.mxu0 %v4000_v36  ;;  %1816 = vmatmul.mubr.bf16.gmra.mxu1 %v4001_v37  ;;  %v4096_v36 = vld [vmem:[%s4202_s30 + $0x160] ss:$8 sps:$4 sm:$0xff]  }
  0x61   : > { %3287 = vmatprep.mubr.msk.bf16.mxu0 %vm1286_vm0, %v4002_v38  ;;  %3319 = vmatprep.mubr.msk.bf16.mxu1 %vm1286_vm0, %v4004_v39  ;;  %v4097_v37 = vld [vmem:[%s4202_s30 + $0x360] ss:$8 sps:$4 sm:$0xff]   ;;  %v4098_v38 = vld [vmem:[%s4202_s30 + $0x174] ss:$8 sps:$4 sm:$0xff]  }
  0x62   : > { %v4100_v39 = vld [vmem:[%s4202_s30 + $0x374] ss:$8 sps:$4 sm:$0xff]  }
  0x68   : > { %1568 = vmatmul.mubr.bf16.gmra.mxu0 %v4006_v40  ;;  %1824 = vmatmul.mubr.bf16.gmra.mxu1 %v4007_v41  ;;  %v4102_v40 = vld [vmem:[%s4202_s30 + $0x170] ss:$8 sps:$4 sm:$0xff]  }
  0x69   : > { %3288 = vmatprep.mubr.msk.bf16.mxu0 %vm1286_vm0, %v4008_v42  ;;  %3320 = vmatprep.mubr.msk.bf16.mxu1 %vm1286_vm0, %v4010_v43  ;;  %v4103_v41 = vld [vmem:[%s4202_s30 + $0x370] ss:$8 sps:$4 sm:$0xff]   ;;  %v4104_v42 = vld [vmem:[%s4202_s30 + $0x184] ss:$8 sps:$4 sm:$0xff]  }
  0x6a   : > { %v4106_v43 = vld [vmem:[%s4202_s30 + $0x384] ss:$8 sps:$4 sm:$0xff]  }
  0x70   : > { %1576 = vmatmul.mubr.bf16.gmra.mxu0 %v4012_v44  ;;  %1832 = vmatmul.mubr.bf16.gmra.mxu1 %v4013_v45  ;;  %v302_v44 = vld [vmem:[%s4202_s30 + $0x180] sm:$0xff]  ;;  %v303_v45 = vld [vmem:[%s4202_s30 + $0x188] sm:$0xff] }
  0x71   : > { %3289 = vmatprep.mubr.msk.bf16.mxu0 %vm1286_vm0, %v4014_v46  ;;  %3321 = vmatprep.mubr.msk.bf16.mxu1 %vm1286_vm0, %v4016_v47  ;;  %v366_v46 = vld [vmem:[%s4202_s30 + $0x380] sm:$0xff]  ;;  %v367_v47 = vld [vmem:[%s4202_s30 + $0x388] sm:$0xff] }
  0x78   : > { %1584 = vmatmul.mubr.bf16.gmra.mxu0 %v4018_v48  ;;  %1840 = vmatmul.mubr.bf16.gmra.mxu1 %v4019_v49  ;;  %v3606_v48 = vld [vmem:[%s4374_s23] sm:$0xff]  }
  0x79   : > { %3290 = vmatprep.mubr.msk.bf16.mxu0 %vm1286_vm0, %v4020_v50  ;;  %3322 = vmatprep.mubr.msk.bf16.mxu1 %vm1286_vm0, %v4022_v51  ;;  %v3892_v49 = vld [vmem:[%s4374_s23 + $0x100] sm:$0xff]   ;;  %v3191_v50 = vcombine.low %v302_v44, %v303_v45  ;;  %v3255_v51 = vcombine.low %v366_v46, %v367_v47 }
  0x80   : > { %1592 = vmatmul.mubr.bf16.gmra.mxu0 %v4024_v52  ;;  %1848 = vmatmul.mubr.bf16.gmra.mxu1 %v4025_v53  ;;  %v3607_v52 = vunpack.c.l.bf16 %v3606_v48  ;;  %v3735_v53 = vunpack.c.l.bf16 %v3892_v49 }
  0x81   : > { %3291 = vmatprep.mubr.msk.bf16.mxu0 %vm1286_vm0, %v4026_v54  ;;  %3323 = vmatprep.mubr.msk.bf16.mxu1 %vm1286_vm0, %v4028_v55  ;;  %v4108_v54 = vld [vmem:[%s4202_s30 + $0x194] ss:$8 sps:$4 sm:$0xff]  }
  0x82   : > { %v4110_v55 = vld [vmem:[%s4202_s30 + $0x394] ss:$8 sps:$4 sm:$0xff]  }
  0x88   : > { %1600 = vmatmul.mubr.bf16.gmra.mxu0 %v4030_v56  ;;  %1856 = vmatmul.mubr.bf16.gmra.mxu1 %v4031_v57  ;;  %v4389_v57 = vld [vmem:[%s5097_s3] ss:$0 sm:$0xff] }
  0x89   : > { %3292 = vmatprep.mubr.msk.bf16.mxu0 %vm1286_vm0, %v4032_v58  ;;  %3324 = vmatprep.mubr.msk.bf16.mxu1 %vm1286_vm0, %v4034_v59  ;;  %v304_v59 = vld [vmem:[%s4202_s30 + $0x190] sm:$0xff] }
  0x90   : > { %1608 = vmatmul.mubr.bf16.gmra.mxu0 %v4036_v60  ;;  %1864 = vmatmul.mubr.bf16.gmra.mxu1 %v4037_v61 }
  0x91   : > { %3293 = vmatprep.mubr.msk.bf16.mxu0 %vm1286_vm0, %v4038_v62  ;;  %3325 = vmatprep.mubr.msk.bf16.mxu1 %vm1286_vm0, %v4040_v63  ;;  %v3608_v62 = vunpack.c.h.bf16 %v3606_v48  ;;  %v3736_v63 = vunpack.c.h.bf16 %v3892_v49 }
  0x98   : > { %1616 = vmatmul.mubr.bf16.gmra.mxu0 %v4042_v0  ;;  %1872 = vmatmul.mubr.bf16.gmra.mxu1 %v4043_v1  ;;  %v305_v0 = vld [vmem:[%s4202_s30 + $0x198] sm:$0xff]  ;;  %v368_v1 = vld [vmem:[%s4202_s30 + $0x390] sm:$0xff] }
  0x99   : > { %3294 = vmatprep.mubr.msk.bf16.mxu0 %vm1286_vm0, %v4044_v2  ;;  %3326 = vmatprep.mubr.msk.bf16.mxu1 %vm1286_vm0, %v4046_v3  ;;  %v369_v2 = vld [vmem:[%s4202_s30 + $0x398] sm:$0xff]  ;;  %v4400_v3 = vld [vmem:[%s5098_s4] ss:$0 sm:$0xff] }
  0xa0   : > { %1624 = vmatmul.mubr.bf16.gmra.mxu0 %v4048_v4  ;;  %1880 = vmatmul.mubr.bf16.gmra.mxu1 %v4049_v5 }
  0xa1   : > { %3295 = vmatprep.mubr.msk.bf16.mxu0 %vm1286_vm0, %v4050_v6  ;;  %3327 = vmatprep.mubr.msk.bf16.mxu1 %vm1286_vm0, %v4052_v7 }
  0xa8   : > { %1632 = vmatmul.mubr.bf16.gmra.mxu0 %v4054_v8  ;;  %1888 = vmatmul.mubr.bf16.gmra.mxu1 %v4055_v9  ;;  %v3861_v8 = vld [vmem:[%s4374_s23 + $0x8] sm:$0xff]  }
  0xa9   : > { %3296 = vmatprep.mubr.msk.bf16.mxu0 %vm1286_vm0, %v4056_v10  ;;  %3328 = vmatprep.mubr.msk.bf16.mxu1 %vm1286_vm0, %v4058_v11  ;;  %v3893_v9 = vld [vmem:[%s4374_s23 + $0x108] sm:$0xff]  }
  0xb0   : > { %1640 = vmatmul.mubr.bf16.gmra.mxu0 %v4060_v12  ;;  %1896 = vmatmul.mubr.bf16.gmra.mxu1 %v4061_v13  ;;  %v3193_v12 = vcombine.low %v304_v59, %v305_v0  ;;  %v3257_v13 = vcombine.low %v368_v1, %v369_v2  ;;  %v4118_v2 = vld [vmem:[%s4202_s30 + $0x3b4] ss:$8 sps:$4 sm:$0xff]  }
  0xb1   : > { %3297 = vmatprep.mubr.msk.bf16.mxu0 %vm1286_vm0, %v4062_v14  ;;  %3329 = vmatprep.mubr.msk.bf16.mxu1 %vm1286_vm0, %v4064_v15 }
  0xb8   : > { %1648 = vmatmul.mubr.bf16.gmra.mxu0 %v4066_v16  ;;  %1904 = vmatmul.mubr.bf16.gmra.mxu1 %v4067_v17 }
  0xb9   : > { %3298 = vmatprep.mubr.msk.bf16.mxu0 %vm1286_vm0, %v4068_v18  ;;  %3330 = vmatprep.mubr.msk.bf16.mxu1 %vm1286_vm0, %v4070_v19  ;;  %v4112_v18 = vld [vmem:[%s4202_s30 + $0x1a4] ss:$8 sps:$4 sm:$0xff]  }
  0xc0   : > { %1656 = vmatmul.mubr.bf16.gmra.mxu0 %v4072_v20  ;;  %1912 = vmatmul.mubr.bf16.gmra.mxu1 %v4073_v21  ;;  %v3611_v21 = vunpack.c.l.bf16 %v3861_v8 }
  0xc1   : > { %3299 = vmatprep.mubr.msk.bf16.mxu0 %vm1286_vm0, %v4074_v22  ;;  %3331 = vmatprep.mubr.msk.bf16.mxu1 %vm1286_vm0, %v4076_v23  ;;  %v3739_v22 = vunpack.c.l.bf16 %v3893_v9  ;;  %v4114_v23 = vld [vmem:[%s4202_s30 + $0x3a4] ss:$8 sps:$4 sm:$0xff]  }
  0xc8   : > { %1664 = vmatmul.mubr.bf16.gmra.mxu0 %v4078_v24  ;;  %1920 = vmatmul.mubr.bf16.gmra.mxu1 %v4079_v25 }
  0xc9   : > { %3300 = vmatprep.mubr.msk.bf16.mxu0 %vm1286_vm0, %v4080_v26  ;;  %3332 = vmatprep.mubr.msk.bf16.mxu1 %vm1286_vm0, %v4082_v27 }
  0xd0   : > { %1672 = vmatmul.mubr.bf16.gmra.mxu0 %v4084_v28  ;;  %1928 = vmatmul.mubr.bf16.gmra.mxu1 %v4085_v29  ;;  %v306_v28 = vld [vmem:[%s4202_s30 + $0x1a0] sm:$0xff] }
  0xd1   : > { %3301 = vmatprep.mubr.msk.bf16.mxu0 %vm1286_vm0, %v4086_v30  ;;  %3333 = vmatprep.mubr.msk.bf16.mxu1 %vm1286_vm0, %v4088_v31  ;;  %v3612_v31 = vunpack.c.h.bf16 %v3861_v8 }
  0xd8   : > { %1680 = vmatmul.mubr.bf16.gmra.mxu0 %v4090_v32  ;;  %1936 = vmatmul.mubr.bf16.gmra.mxu1 %v4091_v33  ;;  %v3740_v32 = vunpack.c.h.bf16 %v3893_v9  ;;  %v307_v33 = vld [vmem:[%s4202_s30 + $0x1a8] sm:$0xff] }
  0xd9   : > { %3302 = vmatprep.mubr.msk.bf16.mxu0 %vm1286_vm0, %v4092_v34  ;;  %3334 = vmatprep.mubr.msk.bf16.mxu1 %vm1286_vm0, %v4094_v35  ;;  %v370_v34 = vld [vmem:[%s4202_s30 + $0x3a0] sm:$0xff]  ;;  %v371_v35 = vld [vmem:[%s4202_s30 + $0x3a8] sm:$0xff]  ;;  %v3195_v48 = vcombine.low %v306_v28, %v307_v33 }
  0xda   : > { %v3259_v49 = vcombine.low %v370_v34, %v371_v35 }
  0xe0   : > { %1688 = vmatmul.mubr.bf16.gmra.mxu0 %v4096_v36  ;;  %1944 = vmatmul.mubr.bf16.gmra.mxu1 %v4097_v37 }
  0xe1   : > { %3303 = vmatprep.mubr.msk.bf16.mxu0 %vm1286_vm0, %v4098_v38  ;;  %3335 = vmatprep.mubr.msk.bf16.mxu1 %vm1286_vm0, %v4100_v39 }
  0xe8   : > { %1696 = vmatmul.mubr.bf16.gmra.mxu0 %v4102_v40  ;;  %1952 = vmatmul.mubr.bf16.gmra.mxu1 %v4103_v41  ;;  %v4427_v40 = vld [vmem:[%s4374_s23 + $0x10] sm:$0xff]  }
  0xe9   : > { %3304 = vmatprep.mubr.msk.bf16.mxu0 %vm1286_vm0, %v4104_v42  ;;  %3336 = vmatprep.mubr.msk.bf16.mxu1 %vm1286_vm0, %v4106_v43  ;;  %v4430_v41 = vld [vmem:[%s4374_s23 + $0x110] sm:$0xff]  }
  0xf0   : > { %v1513_v56 = vpop.f32.mrf.mxu0  ;;  %1704 = vmatmul.mubr.bf16.gmra.mxu0 %v3191_v50  ;;  %v1769_v58 = vpop.f32.mrf.mxu1  ;;  %1960 = vmatmul.mubr.bf16.gmra.mxu1 %v3255_v51 }
  0xf1   : > { %v1514_v60 = vadd.f32 %v3607_v52, %v1513_v56  ;;  %v1770_v61 = vadd.f32 %v3735_v53, %v1769_v58  ;;  %3305 = vmatprep.mubr.msk.bf16.mxu0 %vm1286_vm0, %v4108_v54  ;;  %3337 = vmatprep.mubr.msk.bf16.mxu1 %vm1286_vm0, %v4110_v55  ;;  %v3615_v54 = vunpack.c.l.bf16 %v4427_v40  ;;  %v3743_v55 = vunpack.c.l.bf16 %v4430_v41 }
  0xf2   : > { %v1515_v4 = vpop.f32.mrf.mxu0  ;;  %v1771_v5 = vpop.f32.mrf.mxu1 }
  0xf3   : > { %v2032_v6 = vmul.f32 %v4389_v57, %v1514_v60  ;;  %v2096_v7 = vmul.f32 %v4389_v57, %v1770_v61  ;;  %v4116_v61 = vld [vmem:[%s4202_s30 + $0x1b4] ss:$8 sps:$4 sm:$0xff]  }
  0xf4   : > { %v1516_v10 = vpop.f32.mrf.mxu0  ;;  %v1772_v11 = vpop.f32.mrf.mxu1 }
  0xf5   : > { %v2166_v14 = vadd.f32 %v4400_v3, %v2032_v6  ;;  %v2230_v15 = vadd.f32 %v4400_v3, %v2096_v7  ;;  %v1517_v16 = vadd.f32 %v3608_v62, %v1516_v10  ;;  %v1773_v17 = vadd.f32 %v3736_v63, %v1772_v11  ;;  %v308_v10 = vld [vmem:[%s4202_s30 + $0x1b0] sm:$0xff]  ;;  %v309_v11 = vld [vmem:[%s4202_s30 + $0x1b8] sm:$0xff] }
  0xf6   : > { %v1518_v19 = vpop.f32.mrf.mxu0  ;;  %v1774_v20 = vpop.f32.mrf.mxu1  ;;  %v3197_v33 = vcombine.low %v308_v10, %v309_v11 }
  0xf7   : > { %v2294_v24 = vmax.f32 %v2166_v14, 0.0  ;;  %v2358_v25 = vmax.f32 %v2230_v15, 0.0  ;;  %v2033_v26 = vmul.f32 %v4389_v57, %v1517_v16  ;;  %v2097_v27 = vmul.f32 %v4389_v57, %v1773_v17  ;;  %v373_v17 = vld [vmem:[%s4202_s30 + $0x3b8] sm:$0xff] }
  0xf8   : > { %v1521_v29 = vpop.f32.mrf.mxu0  ;;  %1712 = vmatmul.mubr.bf16.gmra.mxu0 %v3193_v12  ;;  %v1777_v30 = vpop.f32.mrf.mxu1  ;;  %1968 = vmatmul.mubr.bf16.gmra.mxu1 %v3257_v13  ;;  %v372_v12 = vld [vmem:[%s4202_s30 + $0x3b0] sm:$0xff]  ;;  %v4462_v19 = vld [vmem:[%s4374_s23 + $0x118] sm:$0xff]  }
  0xf9   : > { %v3477_v36 = vpack.c.bf16 %v2294_v24, %v2294_v24  ;;  %v3541_v37 = vpack.c.bf16 %v2358_v25, %v2358_v25  ;;  %v2167_v38 = vadd.f32 %v4400_v3, %v2033_v26  ;;  %v2231_v39 = vadd.f32 %v4400_v3, %v2097_v27  ;;  %3306 = vmatprep.mubr.msk.bf16.mxu0 %vm1286_vm0, %v4112_v18  ;;  %v4459_v18 = vld [vmem:[%s4374_s23 + $0x18] sm:$0xff]  }
  0xfa   : > { %v1522_v42 = vadd.f32 %v3611_v21, %v1521_v29  ;;  %v1778_v43 = vadd.f32 %v3739_v22, %v1777_v30  ;;  %v1523_v44 = vpop.f32.mrf.mxu0  ;;  %v1779_v45 = vpop.f32.mrf.mxu1  ;;  %3338 = vmatprep.mubr.msk.bf16.mxu1 %vm1286_vm0, %v4114_v23  ;;  %v3616_v24 = vunpack.c.h.bf16 %v4427_v40  ;;  %v3744_v25 = vunpack.c.h.bf16 %v4430_v41  ;;  %v4120_v40 = vld [vmem:[%s4202_s30 + $0x1c4] ss:$8 sps:$4 sm:$0xff]  }
  0xfb   : > { %2935 = vst.msk [vmem:[%s4418_s6] sm:$0xf] %vm2934_vm1, %v3477_v36  ;;  %2999 = vst.msk [vmem:[%s4418_s6 + $0x100] sm:$0xf] %vm2934_vm1, %v3541_v37  ;;  %v2295_v46 = vmax.f32 %v2167_v38, 0.0  ;;  %v2359_v47 = vmax.f32 %v2231_v39, 0.0  ;;  %v3747_v34 = vunpack.c.l.bf16 %v4462_v19  ;;  %v3261_v35 = vcombine.low %v372_v12, %v373_v17 }
  0xfc   : > { %v2034_v50 = vmul.f32 %v4389_v57, %v1522_v42  ;;  %v2098_v51 = vmul.f32 %v4389_v57, %v1778_v43  ;;  %v1524_v52 = vpop.f32.mrf.mxu0  ;;  %v1780_v53 = vpop.f32.mrf.mxu1  ;;  %v4122_v45 = vld [vmem:[%s4202_s30 + $0x3c4] ss:$8 sps:$4 sm:$0xff]  }
  0xfd   : > { %v3478_v56 = vpack.c.bf16 %v2295_v46, %v2295_v46  ;;  %v3542_v58 = vpack.c.bf16 %v2359_v47, %v2359_v47  ;;  %v1525_v59 = vadd.f32 %v3612_v31, %v1524_v52  ;;  %v1781_v60 = vadd.f32 %v3740_v32, %v1780_v53 }
  0xfe   : > { %v2168_v62 = vadd.f32 %v4400_v3, %v2034_v50  ;;  %v2232_v63 = vadd.f32 %v4400_v3, %v2098_v51  ;;  %v1526_v0 = vpop.f32.mrf.mxu0  ;;  %v1782_v1 = vpop.f32.mrf.mxu1  ;;  %v3619_v32 = vunpack.c.l.bf16 %v4459_v18  ;;  %v3620_v52 = vunpack.c.h.bf16 %v4459_v18  ;;  %v4124_v18 = vld [vmem:[%s4202_s30 + $0x1d4] ss:$8 sps:$4 sm:$0xff]  }
  0xff   : > { %2936 = vst.msk [vmem:[%s4418_s6 + $0x4] sm:$0xf] %vm2934_vm1, %v3478_v56  ;;  %3000 = vst.msk [vmem:[%s4418_s6 + $0x104] sm:$0xf] %vm2934_vm1, %v3542_v58  ;;  %v2035_v4 = vmul.f32 %v4389_v57, %v1525_v59  ;;  %v2099_v5 = vmul.f32 %v4389_v57, %v1781_v60  ;;  %v3748_v53 = vunpack.c.h.bf16 %v4462_v19  ;;  %v311_v60 = vld [vmem:[%s4202_s30 + $0x1c8] sm:$0xff] }
 0x100   : > { %v2296_v6 = vmax.f32 %v2168_v62, 0.0  ;;  %v2360_v7 = vmax.f32 %v2232_v63, 0.0  ;;  %v1529_v8 = vpop.f32.mrf.mxu0  ;;  %1720 = vmatmul.mubr.bf16.gmra.mxu0 %v3195_v48  ;;  %v1785_v9 = vpop.f32.mrf.mxu1  ;;  %1976 = vmatmul.mubr.bf16.gmra.mxu1 %v3259_v49  ;;  %v375_v62 = vld [vmem:[%s4202_s30 + $0x3c8] sm:$0xff] }
 0x101   : > { %v2169_v13 = vadd.f32 %v4400_v3, %v2035_v4  ;;  %v2233_v14 = vadd.f32 %v4400_v3, %v2099_v5  ;;  %v1530_v15 = vadd.f32 %v3615_v54, %v1529_v8  ;;  %v1786_v16 = vadd.f32 %v3743_v55, %v1785_v9  ;;  %3307 = vmatprep.mubr.msk.bf16.mxu0 %vm1286_vm0, %v4116_v61  ;;  %v310_v54 = vld [vmem:[%s4202_s30 + $0x1c0] sm:$0xff] }
 0x102   : > { %v3479_v20 = vpack.c.bf16 %v2296_v6, %v2296_v6  ;;  %v3543_v21 = vpack.c.bf16 %v2360_v7, %v2360_v7  ;;  %v1531_v22 = vpop.f32.mrf.mxu0  ;;  %v1787_v23 = vpop.f32.mrf.mxu1  ;;  %3339 = vmatprep.mubr.msk.bf16.mxu1 %vm1286_vm0, %v4118_v2  ;;  %v374_v61 = vld [vmem:[%s4202_s30 + $0x3c0] sm:$0xff]  ;;  %v3199_v12 = vcombine.low %v310_v54, %v311_v60 }
 0x103   : > { %v2297_v26 = vmax.f32 %v2169_v13, 0.0  ;;  %v2361_v27 = vmax.f32 %v2233_v14, 0.0  ;;  %v2036_v28 = vmul.f32 %v4389_v57, %v1530_v15  ;;  %v2100_v29 = vmul.f32 %v4389_v57, %v1786_v16  ;;  %v4502_v6 = vld [vmem:[%s4374_s23 + $0x20] sm:$0xff]  }
 0x104   : > { %2937 = vst.msk [vmem:[%s4418_s6 + $0x8] sm:$0xf] %vm2934_vm1, %v3479_v20  ;;  %3001 = vst.msk [vmem:[%s4418_s6 + $0x108] sm:$0xf] %vm2934_vm1, %v3543_v21  ;;  %v1532_v30 = vpop.f32.mrf.mxu0  ;;  %v1788_v31 = vpop.f32.mrf.mxu1  ;;  %v4505_v7 = vld [vmem:[%s4374_s23 + $0x120] sm:$0xff]   ;;  %v3263_v13 = vcombine.low %v374_v61, %v375_v62  ;;  %v3623_v23 = vunpack.c.l.bf16 %v4502_v6 }
 0x105   : > { %v3480_v36 = vpack.c.bf16 %v2297_v26, %v2297_v26  ;;  %v3544_v37 = vpack.c.bf16 %v2361_v27, %v2361_v27  ;;  %v2170_v38 = vadd.f32 %v4400_v3, %v2036_v28  ;;  %v2234_v39 = vadd.f32 %v4400_v3, %v2100_v29 }
 0x106   : > { %v1533_v41 = vadd.f32 %v3616_v24, %v1532_v30  ;;  %v1789_v42 = vadd.f32 %v3744_v25, %v1788_v31  ;;  %v1534_v43 = vpop.f32.mrf.mxu0  ;;  %v1790_v44 = vpop.f32.mrf.mxu1  ;;  %v3751_v24 = vunpack.c.l.bf16 %v4505_v7  ;;  %v4126_v25 = vld [vmem:[%s4202_s30 + $0x3d4] ss:$8 sps:$4 sm:$0xff]  }
 0x107   : > { %2938 = vst.msk [vmem:[%s4418_s6 + $0xc] sm:$0xf] %vm2934_vm1, %v3480_v36  ;;  %3002 = vst.msk [vmem:[%s4418_s6 + $0x10c] sm:$0xf] %vm2934_vm1, %v3544_v37  ;;  %v2298_v46 = vmax.f32 %v2170_v38, 0.0  ;;  %v2362_v47 = vmax.f32 %v2234_v39, 0.0 }
 0x108   : > { %v2037_v48 = vmul.f32 %v4389_v57, %v1533_v41  ;;  %v2101_v49 = vmul.f32 %v4389_v57, %v1789_v42  ;;  %v1537_v50 = vpop.f32.mrf.mxu0  ;;  %1728 = vmatmul.mubr.bf16.gmra.mxu0 %v3197_v33  ;;  %v1793_v51 = vpop.f32.mrf.mxu1  ;;  %1984 = vmatmul.mubr.bf16.gmra.mxu1 %v3261_v35  ;;  %v312_v30 = vld [vmem:[%s4202_s30 + $0x1d0] sm:$0xff]  ;;  %v3624_v33 = vunpack.c.h.bf16 %v4502_v6  ;;  %v313_v35 = vld [vmem:[%s4202_s30 + $0x1d8] sm:$0xff]  ;;  %v4529_v42 = vld [vmem:[%s4374_s23 + $0x28] sm:$0xff]  }
 0x109   : > { %v3481_v55 = vpack.c.bf16 %v2298_v46, %v2298_v46  ;;  %v3545_v56 = vpack.c.bf16 %v2362_v47, %v2362_v47  ;;  %v1538_v58 = vadd.f32 %v3619_v32, %v1537_v50  ;;  %v1794_v59 = vadd.f32 %v3747_v34, %v1793_v51  ;;  %3308 = vmatprep.mubr.msk.bf16.mxu0 %vm1286_vm0, %v4120_v40  ;;  %v376_v36 = vld [vmem:[%s4202_s30 + $0x3d0] sm:$0xff]  ;;  %v377_v37 = vld [vmem:[%s4202_s30 + $0x3d8] sm:$0xff]  ;;  %v4532_v43 = vld [vmem:[%s4374_s23 + $0x128] sm:$0xff]  }
 0x10a   : > { %v2171_v63 = vadd.f32 %v4400_v3, %v2037_v48  ;;  %v2235_v0 = vadd.f32 %v4400_v3, %v2101_v49  ;;  %v1539_v1 = vpop.f32.mrf.mxu0  ;;  %v1795_v2 = vpop.f32.mrf.mxu1  ;;  %3340 = vmatprep.mubr.msk.bf16.mxu1 %vm1286_vm0, %v4122_v45  ;;  %v3752_v34 = vunpack.c.h.bf16 %v4505_v7  ;;  %v3201_v50 = vcombine.low %v312_v30, %v313_v35 }
 0x10b   : > { %2939 = vst.msk [vmem:[%s4418_s6 + $0x10] sm:$0xf] %vm2934_vm1, %v3481_v55  ;;  %3003 = vst.msk [vmem:[%s4418_s6 + $0x110] sm:$0xf] %vm2934_vm1, %v3545_v56  ;;  %v2038_v4 = vmul.f32 %v4389_v57, %v1538_v58  ;;  %v2102_v5 = vmul.f32 %v4389_v57, %v1794_v59  ;;  %v3265_v51 = vcombine.low %v376_v36, %v377_v37  ;;  %v3627_v56 = vunpack.c.l.bf16 %v4529_v42 }
 0x10c   : > { %v2299_v8 = vmax.f32 %v2171_v63, 0.0  ;;  %v2363_v9 = vmax.f32 %v2235_v0, 0.0  ;;  %v1540_v10 = vpop.f32.mrf.mxu0  ;;  %v1796_v11 = vpop.f32.mrf.mxu1  ;;  %v3755_v58 = vunpack.c.l.bf16 %v4532_v43  ;;  %v4128_v63 = vld [vmem:[%s4202_s30 + $0x1e4] ss:$8 sps:$4 sm:$0xff]  }
 0x10d   : > { %v2172_v14 = vadd.f32 %v4400_v3, %v2038_v4  ;;  %v2236_v15 = vadd.f32 %v4400_v3, %v2102_v5  ;;  %v1541_v16 = vadd.f32 %v3620_v52, %v1540_v10  ;;  %v1797_v17 = vadd.f32 %v3748_v53, %v1796_v11  ;;  %v4130_v5 = vld [vmem:[%s4202_s30 + $0x3e4] ss:$8 sps:$4 sm:$0xff]  }
 0x10e   : > { %v3482_v19 = vpack.c.bf16 %v2299_v8, %v2299_v8  ;;  %v3546_v20 = vpack.c.bf16 %v2363_v9, %v2363_v9  ;;  %v1542_v21 = vpop.f32.mrf.mxu0  ;;  %v1798_v22 = vpop.f32.mrf.mxu1 }
 0x10f   : > { %v2300_v26 = vmax.f32 %v2172_v14, 0.0  ;;  %v2364_v27 = vmax.f32 %v2236_v15, 0.0  ;;  %v2039_v28 = vmul.f32 %v4389_v57, %v1541_v16  ;;  %v2103_v29 = vmul.f32 %v4389_v57, %v1797_v17  ;;  %v378_v14 = vld [vmem:[%s4202_s30 + $0x3e0] sm:$0xff]  ;;  %v4564_v21 = vld [vmem:[%s4374_s23 + $0x130] sm:$0xff]  }
 0x110   : > { %2940 = vst.msk [vmem:[%s4418_s6 + $0x14] sm:$0xf] %vm2934_vm1, %v3482_v19  ;;  %3004 = vst.msk [vmem:[%s4418_s6 + $0x114] sm:$0xf] %vm2934_vm1, %v3546_v20  ;;  %v1545_v31 = vpop.f32.mrf.mxu0  ;;  %1736 = vmatmul.mubr.bf16.gmra.mxu0 %v3199_v12  ;;  %v1801_v32 = vpop.f32.mrf.mxu1  ;;  %1992 = vmatmul.mubr.bf16.gmra.mxu1 %v3263_v13  ;;  %v314_v12 = vld [vmem:[%s4202_s30 + $0x1e0] sm:$0xff]  ;;  %v315_v13 = vld [vmem:[%s4202_s30 + $0x1e8] sm:$0xff]  ;;  %v3759_v36 = vunpack.c.l.bf16 %v4564_v21 }
 0x111   : > { %v3483_v38 = vpack.c.bf16 %v2300_v26, %v2300_v26  ;;  %v3547_v39 = vpack.c.bf16 %v2364_v27, %v2364_v27  ;;  %v2173_v40 = vadd.f32 %v4400_v3, %v2039_v28  ;;  %v2237_v41 = vadd.f32 %v4400_v3, %v2103_v29  ;;  %3309 = vmatprep.mubr.msk.bf16.mxu0 %vm1286_vm0, %v4124_v18  ;;  %v379_v19 = vld [vmem:[%s4202_s30 + $0x3e8] sm:$0xff]  ;;  %v4561_v20 = vld [vmem:[%s4374_s23 + $0x30] sm:$0xff]  }
 0x112   : > { %v1546_v44 = vadd.f32 %v3623_v23, %v1545_v31  ;;  %v1802_v45 = vadd.f32 %v3751_v24, %v1801_v32  ;;  %v1547_v46 = vpop.f32.mrf.mxu0  ;;  %v1803_v47 = vpop.f32.mrf.mxu1  ;;  %3341 = vmatprep.mubr.msk.bf16.mxu1 %vm1286_vm0, %v4126_v25  ;;  %v3628_v26 = vunpack.c.h.bf16 %v4529_v42  ;;  %v3756_v27 = vunpack.c.h.bf16 %v4532_v43  ;;  %v4132_v42 = vld [vmem:[%s4202_s30 + $0x1f4] ss:$8 sps:$4 sm:$0xff]  }
 0x113   : > { %2941 = vst.msk [vmem:[%s4418_s6 + $0x18] sm:$0xf] %vm2934_vm1, %v3483_v38  ;;  %3005 = vst.msk [vmem:[%s4418_s6 + $0x118] sm:$0xf] %vm2934_vm1, %v3547_v39  ;;  %v2301_v48 = vmax.f32 %v2173_v40, 0.0  ;;  %v2365_v49 = vmax.f32 %v2237_v41, 0.0  ;;  %v3203_v35 = vcombine.low %v314_v12, %v315_v13  ;;  %v3267_v37 = vcombine.low %v378_v14, %v379_v19 }
 0x114   : > { %v2040_v52 = vmul.f32 %v4389_v57, %v1546_v44  ;;  %v2104_v53 = vmul.f32 %v4389_v57, %v1802_v45  ;;  %v1548_v54 = vpop.f32.mrf.mxu0  ;;  %v1804_v55 = vpop.f32.mrf.mxu1  ;;  %v4134_v47 = vld [vmem:[%s4202_s30 + $0x3f4] ss:$8 sps:$4 sm:$0xff]  }
 0x115   : > { %v3484_v59 = vpack.c.bf16 %v2301_v48, %v2301_v48  ;;  %v3548_v60 = vpack.c.bf16 %v2365_v49, %v2365_v49  ;;  %v1549_v61 = vadd.f32 %v3624_v33, %v1548_v54  ;;  %v1805_v62 = vadd.f32 %v3752_v34, %v1804_v55 }
 0x116   : > { %v2174_v0 = vadd.f32 %v4400_v3, %v2040_v52  ;;  %v2238_v1 = vadd.f32 %v4400_v3, %v2104_v53  ;;  %v1550_v2 = vpop.f32.mrf.mxu0  ;;  %v1806_v4 = vpop.f32.mrf.mxu1  ;;  %v3631_v34 = vunpack.c.l.bf16 %v4561_v20  ;;  %v3632_v54 = vunpack.c.h.bf16 %v4561_v20 }
 0x117   : > { %2942 = vst.msk [vmem:[%s4418_s6 + $0x1c] sm:$0xf] %vm2934_vm1, %v3484_v59  ;;  %3006 = vst.msk [vmem:[%s4418_s6 + $0x11c] sm:$0xf] %vm2934_vm1, %v3548_v60  ;;  %v2041_v6 = vmul.f32 %v4389_v57, %v1549_v61  ;;  %v2105_v7 = vmul.f32 %v4389_v57, %v1805_v62  ;;  %v3760_v55 = vunpack.c.h.bf16 %v4564_v21  ;;  %v317_v62 = vld [vmem:[%s4202_s30 + $0x1f8] sm:$0xff] }
 0x118   : > { %v2302_v8 = vmax.f32 %v2174_v0, 0.0  ;;  %v2366_v9 = vmax.f32 %v2238_v1, 0.0  ;;  %v1553_v10 = vpop.f32.mrf.mxu0  ;;  %1744 = vmatmul.mubr.bf16.gmra.mxu0 %v3201_v50  ;;  %v1809_v11 = vpop.f32.mrf.mxu1  ;;  %2000 = vmatmul.mubr.bf16.gmra.mxu1 %v3265_v51  ;;  %v381_v0 = vld [vmem:[%s4202_s30 + $0x3f8] sm:$0xff] }
 0x119   : > { %v2175_v15 = vadd.f32 %v4400_v3, %v2041_v6  ;;  %v2239_v16 = vadd.f32 %v4400_v3, %v2105_v7  ;;  %v1554_v17 = vadd.f32 %v3627_v56, %v1553_v10  ;;  %v1810_v18 = vadd.f32 %v3755_v58, %v1809_v11  ;;  %3310 = vmatprep.mubr.msk.bf16.mxu0 %vm1286_vm0, %v4128_v63  ;;  %v316_v56 = vld [vmem:[%s4202_s30 + $0x1f0] sm:$0xff] }
 0x11a   : > { %v3485_v22 = vpack.c.bf16 %v2302_v8, %v2302_v8  ;;  %v3549_v23 = vpack.c.bf16 %v2366_v9, %v2366_v9  ;;  %v1555_v24 = vpop.f32.mrf.mxu0  ;;  %v1811_v25 = vpop.f32.mrf.mxu1  ;;  %3342 = vmatprep.mubr.msk.bf16.mxu1 %vm1286_vm0, %v4130_v5  ;;  %v380_v63 = vld [vmem:[%s4202_s30 + $0x3f0] sm:$0xff]  ;;  %v3867_v8 = vld [vmem:[%s4374_s23 + $0x38] sm:$0xff]   ;;  %v3205_v14 = vcombine.low %v316_v56, %v317_v62 }
 0x11b   : > { %v2303_v28 = vmax.f32 %v2175_v15, 0.0  ;;  %v2367_v29 = vmax.f32 %v2239_v16, 0.0  ;;  %v2042_v30 = vmul.f32 %v4389_v57, %v1554_v17  ;;  %v2106_v31 = vmul.f32 %v4389_v57, %v1810_v18  ;;  %v3899_v9 = vld [vmem:[%s4374_s23 + $0x138] sm:$0xff]  }
 0x11c   : > { %2943 = vst.msk [vmem:[%s4418_s6 + $0x20] sm:$0xf] %vm2934_vm1, %v3485_v22  ;;  %3007 = vst.msk [vmem:[%s4418_s6 + $0x120] sm:$0xf] %vm2934_vm1, %v3549_v23  ;;  %v1556_v32 = vpop.f32.mrf.mxu0  ;;  %v1812_v33 = vpop.f32.mrf.mxu1  ;;  %v3269_v15 = vcombine.low %v380_v63, %v381_v0  ;;  %v3635_v24 = vunpack.c.l.bf16 %v3867_v8  ;;  %v3763_v25 = vunpack.c.l.bf16 %v3899_v9 }
 0x11d   : > { %v3486_v38 = vpack.c.bf16 %v2303_v28, %v2303_v28  ;;  %v3550_v39 = vpack.c.bf16 %v2367_v29, %v2367_v29  ;;  %v2176_v40 = vadd.f32 %v4400_v3, %v2042_v30  ;;  %v2240_v41 = vadd.f32 %v4400_v3, %v2106_v31 }
 0x11e   : > { %v1557_v43 = vadd.f32 %v3628_v26, %v1556_v32  ;;  %v1813_v44 = vadd.f32 %v3756_v27, %v1812_v33  ;;  %v1558_v45 = vpop.f32.mrf.mxu0  ;;  %v1814_v46 = vpop.f32.mrf.mxu1  ;;  %v3636_v32 = vunpack.c.h.bf16 %v3867_v8  ;;  %v3764_v33 = vunpack.c.h.bf16 %v3899_v9  ;;  %v3869_v8 = vld [vmem:[%s4374_s23 + $0x48] sm:$0xff]  }
 0x11f   : > { %2944 = vst.msk [vmem:[%s4418_s6 + $0x24] sm:$0xf] %vm2934_vm1, %v3486_v38  ;;  %3008 = vst.msk [vmem:[%s4418_s6 + $0x124] sm:$0xf] %vm2934_vm1, %v3550_v39  ;;  %v2304_v48 = vmax.f32 %v2176_v40, 0.0  ;;  %v2368_v49 = vmax.f32 %v2240_v41, 0.0 }
 0x120   : > { %v2043_v50 = vmul.f32 %v4389_v57, %v1557_v43  ;;  %v2107_v51 = vmul.f32 %v4389_v57, %v1813_v44  ;;  %v1561_v52 = vpop.f32.mrf.mxu0  ;;  %1752 = vmatmul.mubr.bf16.gmra.mxu0 %v3203_v35  ;;  %v1817_v53 = vpop.f32.mrf.mxu1  ;;  %2008 = vmatmul.mubr.bf16.gmra.mxu1 %v3267_v37  ;;  %v3868_v38 = vld [vmem:[%s4374_s23 + $0x40] sm:$0xff]   ;;  %v3901_v9 = vld [vmem:[%s4374_s23 + $0x148] sm:$0xff]  }
 0x121   : > { %v3487_v58 = vpack.c.bf16 %v2304_v48, %v2304_v48  ;;  %v3551_v59 = vpack.c.bf16 %v2368_v49, %v2368_v49  ;;  %v1562_v60 = vadd.f32 %v3631_v34, %v1561_v52  ;;  %v1818_v61 = vadd.f32 %v3759_v36, %v1817_v53  ;;  %3311 = vmatprep.mubr.msk.bf16.mxu0 %vm1286_vm0, %v4132_v42  ;;  %v3900_v39 = vld [vmem:[%s4374_s23 + $0x140] sm:$0xff]  }
 0x122   : > { %v2177_v1 = vadd.f32 %v4400_v3, %v2043_v50  ;;  %v2241_v2 = vadd.f32 %v4400_v3, %v2107_v51  ;;  %v1563_v4 = vpop.f32.mrf.mxu0  ;;  %v1819_v5 = vpop.f32.mrf.mxu1  ;;  %3343 = vmatprep.mubr.msk.bf16.mxu1 %vm1286_vm0, %v4134_v47  ;;  %v3639_v50 = vunpack.c.l.bf16 %v3868_v38  ;;  %v3767_v51 = vunpack.c.l.bf16 %v3900_v39 }
 0x123   : > { %2945 = vst.msk [vmem:[%s4418_s6 + $0x28] sm:$0xf] %vm2934_vm1, %v3487_v58  ;;  %3009 = vst.msk [vmem:[%s4418_s6 + $0x128] sm:$0xf] %vm2934_vm1, %v3551_v59  ;;  %v2044_v6 = vmul.f32 %v4389_v57, %v1562_v60  ;;  %v2108_v7 = vmul.f32 %v4389_v57, %v1818_v61 }
 0x124   : > { %v2305_v10 = vmax.f32 %v2177_v1, 0.0  ;;  %v2369_v11 = vmax.f32 %v2241_v2, 0.0  ;;  %v1564_v12 = vpop.f32.mrf.mxu0  ;;  %v1820_v13 = vpop.f32.mrf.mxu1 }
 0x125   : > { %v2178_v16 = vadd.f32 %v4400_v3, %v2044_v6  ;;  %v2242_v17 = vadd.f32 %v4400_v3, %v2108_v7  ;;  %v1565_v18 = vadd.f32 %v3632_v54, %v1564_v12  ;;  %v1821_v19 = vadd.f32 %v3760_v55, %v1820_v13 }
 0x126   : > { %v3488_v20 = vpack.c.bf16 %v2305_v10, %v2305_v10  ;;  %v3552_v21 = vpack.c.bf16 %v2369_v11, %v2369_v11  ;;  %v1566_v22 = vpop.f32.mrf.mxu0  ;;  %v1822_v23 = vpop.f32.mrf.mxu1 }
 0x127   : > { %v2306_v26 = vmax.f32 %v2178_v16, 0.0  ;;  %v2370_v27 = vmax.f32 %v2242_v17, 0.0  ;;  %v2045_v28 = vmul.f32 %v4389_v57, %v1565_v18  ;;  %v2109_v29 = vmul.f32 %v4389_v57, %v1821_v19 }
 0x128   : > { %2946 = vst.msk [vmem:[%s4418_s6 + $0x2c] sm:$0xf] %vm2934_vm1, %v3488_v20  ;;  %3010 = vst.msk [vmem:[%s4418_s6 + $0x12c] sm:$0xf] %vm2934_vm1, %v3552_v21  ;;  %v1569_v30 = vpop.f32.mrf.mxu0  ;;  %1760 = vmatmul.mubr.bf16.gmra.mxu0 %v3205_v14  ;;  %v1825_v31 = vpop.f32.mrf.mxu1  ;;  %2016 = vmatmul.mubr.bf16.gmra.mxu1 %v3269_v15  ;;  %v3640_v14 = vunpack.c.h.bf16 %v3868_v38  ;;  %v3768_v15 = vunpack.c.h.bf16 %v3900_v39  ;;  %v3643_v22 = vunpack.c.l.bf16 %v3869_v8  ;;  %v3771_v23 = vunpack.c.l.bf16 %v3901_v9 }
 0x129   : > { %v3489_v34 = vpack.c.bf16 %v2306_v26, %v2306_v26  ;;  %v3553_v35 = vpack.c.bf16 %v2370_v27, %v2370_v27  ;;  %v2179_v36 = vadd.f32 %v4400_v3, %v2045_v28  ;;  %v2243_v37 = vadd.f32 %v4400_v3, %v2109_v29 }
 0x12a   : > { %v1570_v40 = vadd.f32 %v3635_v24, %v1569_v30  ;;  %v1826_v41 = vadd.f32 %v3763_v25, %v1825_v31  ;;  %v1571_v42 = vpop.f32.mrf.mxu0  ;;  %v1827_v43 = vpop.f32.mrf.mxu1  ;;  %v3644_v38 = vunpack.c.h.bf16 %v3869_v8  ;;  %v3772_v39 = vunpack.c.h.bf16 %v3901_v9 }
 0x12b   : > { %2947 = vst.msk [vmem:[%s4418_s6 + $0x30] sm:$0xf] %vm2934_vm1, %v3489_v34  ;;  %3011 = vst.msk [vmem:[%s4418_s6 + $0x130] sm:$0xf] %vm2934_vm1, %v3553_v35  ;;  %v2307_v44 = vmax.f32 %v2179_v36, 0.0  ;;  %v2371_v45 = vmax.f32 %v2243_v37, 0.0 }
 0x12c   : > { %v2046_v46 = vmul.f32 %v4389_v57, %v1570_v40  ;;  %v2110_v47 = vmul.f32 %v4389_v57, %v1826_v41  ;;  %v1572_v48 = vpop.f32.mrf.mxu0  ;;  %v1828_v49 = vpop.f32.mrf.mxu1 }
 0x12d   : > { %v3490_v52 = vpack.c.bf16 %v2307_v44, %v2307_v44  ;;  %v3554_v53 = vpack.c.bf16 %v2371_v45, %v2371_v45  ;;  %v1573_v54 = vadd.f32 %v3636_v32, %v1572_v48  ;;  %v1829_v55 = vadd.f32 %v3764_v33, %v1828_v49 }
 0x12e   : > { %v2180_v56 = vadd.f32 %v4400_v3, %v2046_v46  ;;  %v2244_v58 = vadd.f32 %v4400_v3, %v2110_v47  ;;  %v1574_v59 = vpop.f32.mrf.mxu0  ;;  %v1830_v60 = vpop.f32.mrf.mxu1 }
 0x12f   : > { %2948 = vst.msk [vmem:[%s4418_s6 + $0x34] sm:$0xf] %vm2934_vm1, %v3490_v52  ;;  %3012 = vst.msk [vmem:[%s4418_s6 + $0x134] sm:$0xf] %vm2934_vm1, %v3554_v53  ;;  %v2047_v61 = vmul.f32 %v4389_v57, %v1573_v54  ;;  %v2111_v62 = vmul.f32 %v4389_v57, %v1829_v55 }
 0x130   : > { %v2308_v63 = vmax.f32 %v2180_v56, 0.0  ;;  %v2372_v0 = vmax.f32 %v2244_v58, 0.0  ;;  %v1577_v1 = vpop.f32.mrf.mxu0  ;;  %v1833_v2 = vpop.f32.mrf.mxu1 }
 0x131   : > { %v2181_v4 = vadd.f32 %v4400_v3, %v2047_v61  ;;  %v2245_v5 = vadd.f32 %v4400_v3, %v2111_v62  ;;  %v1578_v6 = vadd.f32 %v3639_v50, %v1577_v1  ;;  %v1834_v7 = vadd.f32 %v3767_v51, %v1833_v2  ;;  %v3870_v50 = vld [vmem:[%s4374_s23 + $0x50] sm:$0xff]  }
 0x132   : > { %v3491_v10 = vpack.c.bf16 %v2308_v63, %v2308_v63  ;;  %v3555_v11 = vpack.c.bf16 %v2372_v0, %v2372_v0  ;;  %v1579_v12 = vpop.f32.mrf.mxu0  ;;  %v1835_v13 = vpop.f32.mrf.mxu1  ;;  %v3902_v51 = vld [vmem:[%s4374_s23 + $0x150] sm:$0xff]   ;;  %v3647_v1 = vunpack.c.l.bf16 %v3870_v50 }
 0x133   : > { %v2309_v16 = vmax.f32 %v2181_v4, 0.0  ;;  %v2373_v17 = vmax.f32 %v2245_v5, 0.0  ;;  %v2048_v18 = vmul.f32 %v4389_v57, %v1578_v6  ;;  %v2112_v19 = vmul.f32 %v4389_v57, %v1834_v7 }
 0x134   : > { %2949 = vst.msk [vmem:[%s4418_s6 + $0x38] sm:$0xf] %vm2934_vm1, %v3491_v10  ;;  %3013 = vst.msk [vmem:[%s4418_s6 + $0x138] sm:$0xf] %vm2934_vm1, %v3555_v11  ;;  %v1580_v20 = vpop.f32.mrf.mxu0  ;;  %v1836_v21 = vpop.f32.mrf.mxu1  ;;  %v3775_v2 = vunpack.c.l.bf16 %v3902_v51  ;;  %v3648_v10 = vunpack.c.h.bf16 %v3870_v50  ;;  %v3776_v11 = vunpack.c.h.bf16 %v3902_v51 }
 0x135   : > { %v3492_v24 = vpack.c.bf16 %v2309_v16, %v2309_v16  ;;  %v3556_v25 = vpack.c.bf16 %v2373_v17, %v2373_v17  ;;  %v2182_v26 = vadd.f32 %v4400_v3, %v2048_v18  ;;  %v2246_v27 = vadd.f32 %v4400_v3, %v2112_v19  ;;  %v3871_v16 = vld [vmem:[%s4374_s23 + $0x58] sm:$0xff]  }
 0x136   : > { %v1581_v28 = vadd.f32 %v3640_v14, %v1580_v20  ;;  %v1837_v29 = vadd.f32 %v3768_v15, %v1836_v21  ;;  %v1582_v30 = vpop.f32.mrf.mxu0  ;;  %v1838_v31 = vpop.f32.mrf.mxu1  ;;  %v3903_v17 = vld [vmem:[%s4374_s23 + $0x158] sm:$0xff]  }
 0x137   : > { %2950 = vst.msk [vmem:[%s4418_s6 + $0x3c] sm:$0xf] %vm2934_vm1, %v3492_v24  ;;  %3014 = vst.msk [vmem:[%s4418_s6 + $0x13c] sm:$0xf] %vm2934_vm1, %v3556_v25  ;;  %v2310_v32 = vmax.f32 %v2182_v26, 0.0  ;;  %v2374_v33 = vmax.f32 %v2246_v27, 0.0 }
 0x138   : > { %v2049_v34 = vmul.f32 %v4389_v57, %v1581_v28  ;;  %v2113_v35 = vmul.f32 %v4389_v57, %v1837_v29  ;;  %v1585_v36 = vpop.f32.mrf.mxu0  ;;  %v1841_v37 = vpop.f32.mrf.mxu1  ;;  %v3651_v28 = vunpack.c.l.bf16 %v3871_v16  ;;  %v3779_v29 = vunpack.c.l.bf16 %v3903_v17 }
 0x139   : > { %v3493_v40 = vpack.c.bf16 %v2310_v32, %v2310_v32  ;;  %v3557_v41 = vpack.c.bf16 %v2374_v33, %v2374_v33  ;;  %v1586_v42 = vadd.f32 %v3643_v22, %v1585_v36  ;;  %v1842_v43 = vadd.f32 %v3771_v23, %v1841_v37 }
 0x13a   : > { %v2183_v44 = vadd.f32 %v4400_v3, %v2049_v34  ;;  %v2247_v45 = vadd.f32 %v4400_v3, %v2113_v35  ;;  %v1587_v46 = vpop.f32.mrf.mxu0  ;;  %v1843_v47 = vpop.f32.mrf.mxu1 }
 0x13b   : > { %2951 = vst.msk [vmem:[%s4418_s6 + $0x40] sm:$0xf] %vm2934_vm1, %v3493_v40  ;;  %3015 = vst.msk [vmem:[%s4418_s6 + $0x140] sm:$0xf] %vm2934_vm1, %v3557_v41  ;;  %v2050_v48 = vmul.f32 %v4389_v57, %v1586_v42  ;;  %v2114_v49 = vmul.f32 %v4389_v57, %v1842_v43 }
 0x13c   : > { %v2311_v52 = vmax.f32 %v2183_v44, 0.0  ;;  %v2375_v53 = vmax.f32 %v2247_v45, 0.0  ;;  %v1588_v54 = vpop.f32.mrf.mxu0  ;;  %v1844_v55 = vpop.f32.mrf.mxu1 }
 0x13d   : > { %v2184_v56 = vadd.f32 %v4400_v3, %v2050_v48  ;;  %v2248_v58 = vadd.f32 %v4400_v3, %v2114_v49  ;;  %v1589_v59 = vadd.f32 %v3644_v38, %v1588_v54  ;;  %v1845_v60 = vadd.f32 %v3772_v39, %v1844_v55  ;;  %v3872_v48 = vld [vmem:[%s4374_s23 + $0x60] sm:$0xff]  }
 0x13e   : > { %v3494_v61 = vpack.c.bf16 %v2311_v52, %v2311_v52  ;;  %v3558_v62 = vpack.c.bf16 %v2375_v53, %v2375_v53  ;;  %v1590_v63 = vpop.f32.mrf.mxu0  ;;  %v1846_v0 = vpop.f32.mrf.mxu1  ;;  %v3904_v49 = vld [vmem:[%s4374_s23 + $0x160] sm:$0xff]   ;;  %v3652_v54 = vunpack.c.h.bf16 %v3871_v16  ;;  %v3780_v55 = vunpack.c.h.bf16 %v3903_v17 }
 0x13f   : > { %v2312_v4 = vmax.f32 %v2184_v56, 0.0  ;;  %v2376_v5 = vmax.f32 %v2248_v58, 0.0  ;;  %v2051_v6 = vmul.f32 %v4389_v57, %v1589_v59  ;;  %v2115_v7 = vmul.f32 %v4389_v57, %v1845_v60 }
 0x140   : > { %2952 = vst.msk [vmem:[%s4418_s6 + $0x44] sm:$0xf] %vm2934_vm1, %v3494_v61  ;;  %3016 = vst.msk [vmem:[%s4418_s6 + $0x144] sm:$0xf] %vm2934_vm1, %v3558_v62  ;;  %v1593_v8 = vpop.f32.mrf.mxu0  ;;  %v1849_v9 = vpop.f32.mrf.mxu1  ;;  %v3655_v63 = vunpack.c.l.bf16 %v3872_v48  ;;  %v3783_v0 = vunpack.c.l.bf16 %v3904_v49  ;;  %v3784_v16 = vunpack.c.h.bf16 %v3904_v49 }
 0x141   : > { %v3495_v12 = vpack.c.bf16 %v2312_v4, %v2312_v4  ;;  %v3559_v13 = vpack.c.bf16 %v2376_v5, %v2376_v5  ;;  %v2185_v14 = vadd.f32 %v4400_v3, %v2051_v6  ;;  %v2249_v15 = vadd.f32 %v4400_v3, %v2115_v7 }
 0x142   : > { %v1594_v18 = vadd.f32 %v3647_v1, %v1593_v8  ;;  %v1850_v19 = vadd.f32 %v3775_v2, %v1849_v9  ;;  %v1595_v20 = vpop.f32.mrf.mxu0  ;;  %v1851_v21 = vpop.f32.mrf.mxu1 }
 0x143   : > { %2953 = vst.msk [vmem:[%s4418_s6 + $0x48] sm:$0xf] %vm2934_vm1, %v3495_v12  ;;  %3017 = vst.msk [vmem:[%s4418_s6 + $0x148] sm:$0xf] %vm2934_vm1, %v3559_v13  ;;  %v2313_v22 = vmax.f32 %v2185_v14, 0.0  ;;  %v2377_v23 = vmax.f32 %v2249_v15, 0.0  ;;  %v3656_v15 = vunpack.c.h.bf16 %v3872_v48 }
 0x144   : > { %v2052_v24 = vmul.f32 %v4389_v57, %v1594_v18  ;;  %v2116_v25 = vmul.f32 %v4389_v57, %v1850_v19  ;;  %v1596_v26 = vpop.f32.mrf.mxu0  ;;  %v1852_v27 = vpop.f32.mrf.mxu1  ;;  %v4711_v21 = vld [vmem:[%s5098_s4] ss:$0 sm:$0xff] }
 0x145   : > { %v3496_v30 = vpack.c.bf16 %v2313_v22, %v2313_v22  ;;  %v3560_v31 = vpack.c.bf16 %v2377_v23, %v2377_v23  ;;  %v1597_v32 = vadd.f32 %v3648_v10, %v1596_v26  ;;  %v1853_v33 = vadd.f32 %v3776_v11, %v1852_v27  ;;  %v4704_v11 = vld [vmem:[%s5097_s3] ss:$0 sm:$0xff] }
 0x146   : > { %v2186_v34 = vadd.f32 %v4400_v3, %v2052_v24  ;;  %v2250_v35 = vadd.f32 %v4400_v3, %v2116_v25  ;;  %v1598_v36 = vpop.f32.mrf.mxu0  ;;  %v1854_v37 = vpop.f32.mrf.mxu1 }
 0x147   : > { %2954 = vst.msk [vmem:[%s4418_s6 + $0x4c] sm:$0xf] %vm2934_vm1, %v3496_v30  ;;  %3018 = vst.msk [vmem:[%s4418_s6 + $0x14c] sm:$0xf] %vm2934_vm1, %v3560_v31  ;;  %v2053_v38 = vmul.f32 %v4389_v57, %v1597_v32  ;;  %v2117_v39 = vmul.f32 %v4389_v57, %v1853_v33 }
 0x148   : > { %v2314_v40 = vmax.f32 %v2186_v34, 0.0  ;;  %v2378_v41 = vmax.f32 %v2250_v35, 0.0  ;;  %v1601_v42 = vpop.f32.mrf.mxu0  ;;  %v1857_v43 = vpop.f32.mrf.mxu1 }
 0x149   : > { %v2187_v44 = vadd.f32 %v4400_v3, %v2053_v38  ;;  %v2251_v45 = vadd.f32 %v4400_v3, %v2117_v39  ;;  %v1602_v46 = vadd.f32 %v3651_v28, %v1601_v42  ;;  %v1858_v47 = vadd.f32 %v3779_v29, %v1857_v43  ;;  %v3873_v28 = vld [vmem:[%s4374_s23 + $0x68] sm:$0xff]  }
 0x14a   : > { %v3497_v50 = vpack.c.bf16 %v2314_v40, %v2314_v40  ;;  %v3561_v51 = vpack.c.bf16 %v2378_v41, %v2378_v41  ;;  %v1603_v52 = vpop.f32.mrf.mxu0  ;;  %v1859_v53 = vpop.f32.mrf.mxu1  ;;  %v3905_v29 = vld [vmem:[%s4374_s23 + $0x168] sm:$0xff]   ;;  %v3659_v42 = vunpack.c.l.bf16 %v3873_v28 }
 0x14b   : > { %v2315_v56 = vmax.f32 %v2187_v44, 0.0  ;;  %v2379_v58 = vmax.f32 %v2251_v45, 0.0  ;;  %v2054_v59 = vmul.f32 %v4389_v57, %v1602_v46  ;;  %v2118_v60 = vmul.f32 %v4389_v57, %v1858_v47 }
 0x14c   : > { %2955 = vst.msk [vmem:[%s4418_s6 + $0x50] sm:$0xf] %vm2934_vm1, %v3497_v50  ;;  %3019 = vst.msk [vmem:[%s4418_s6 + $0x150] sm:$0xf] %vm2934_vm1, %v3561_v51  ;;  %v1604_v61 = vpop.f32.mrf.mxu0  ;;  %v1860_v62 = vpop.f32.mrf.mxu1  ;;  %v3787_v43 = vunpack.c.l.bf16 %v3905_v29  ;;  %v3660_v50 = vunpack.c.h.bf16 %v3873_v28  ;;  %v3788_v51 = vunpack.c.h.bf16 %v3905_v29 }
 0x14d   : > { %v3498_v1 = vpack.c.bf16 %v2315_v56, %v2315_v56  ;;  %v3562_v2 = vpack.c.bf16 %v2379_v58, %v2379_v58  ;;  %v2188_v4 = vadd.f32 %v4400_v3, %v2054_v59  ;;  %v2252_v5 = vadd.f32 %v4400_v3, %v2118_v60  ;;  %v3874_v56 = vld [vmem:[%s4374_s23 + $0x70] sm:$0xff]  }
 0x14e   : > { %v1605_v6 = vadd.f32 %v3652_v54, %v1604_v61  ;;  %v1861_v7 = vadd.f32 %v3780_v55, %v1860_v62  ;;  %v1606_v8 = vpop.f32.mrf.mxu0  ;;  %v1862_v9 = vpop.f32.mrf.mxu1  ;;  %v3906_v58 = vld [vmem:[%s4374_s23 + $0x170] sm:$0xff]  }
 0x14f   : > { %2956 = vst.msk [vmem:[%s4418_s6 + $0x54] sm:$0xf] %vm2934_vm1, %v3498_v1  ;;  %3020 = vst.msk [vmem:[%s4418_s6 + $0x154] sm:$0xf] %vm2934_vm1, %v3562_v2  ;;  %v2316_v57 = vmax.f32 %v2188_v4, 0.0  ;;  %v2380_v10 = vmax.f32 %v2252_v5, 0.0 }
 0x150   : > { %v2055_v12 = vmul.f32 %v4704_v11, %v1605_v6  ;;  %v2119_v3 = vmul.f32 %v4704_v11, %v1861_v7  ;;  %v1609_v13 = vpop.f32.mrf.mxu0  ;;  %v1865_v14 = vpop.f32.mrf.mxu1  ;;  %v3663_v6 = vunpack.c.l.bf16 %v3874_v56  ;;  %v3791_v7 = vunpack.c.l.bf16 %v3906_v58 }
 0x151   : > { %v3499_v17 = vpack.c.bf16 %v2316_v57, %v2316_v57  ;;  %v3563_v18 = vpack.c.bf16 %v2380_v10, %v2380_v10  ;;  %v1610_v19 = vadd.f32 %v3655_v63, %v1609_v13  ;;  %v1866_v20 = vadd.f32 %v3783_v0, %v1865_v14 }
 0x152   : > { %v2189_v22 = vadd.f32 %v4711_v21, %v2055_v12  ;;  %v2253_v23 = vadd.f32 %v4711_v21, %v2119_v3  ;;  %v1611_v24 = vpop.f32.mrf.mxu0  ;;  %v1867_v25 = vpop.f32.mrf.mxu1 }
 0x153   : > { %2957 = vst.msk [vmem:[%s4418_s6 + $0x58] sm:$0xf] %vm2934_vm1, %v3499_v17  ;;  %3021 = vst.msk [vmem:[%s4418_s6 + $0x158] sm:$0xf] %vm2934_vm1, %v3563_v18  ;;  %v2056_v26 = vmul.f32 %v4704_v11, %v1610_v19  ;;  %v2120_v27 = vmul.f32 %v4704_v11, %v1866_v20 }
 0x154   : > { %v2317_v30 = vmax.f32 %v2189_v22, 0.0  ;;  %v2381_v31 = vmax.f32 %v2253_v23, 0.0  ;;  %v1612_v32 = vpop.f32.mrf.mxu0  ;;  %v1868_v33 = vpop.f32.mrf.mxu1 }
 0x155   : > { %v2190_v34 = vadd.f32 %v4711_v21, %v2056_v26  ;;  %v2254_v35 = vadd.f32 %v4711_v21, %v2120_v27  ;;  %v1613_v36 = vadd.f32 %v3656_v15, %v1612_v32  ;;  %v1869_v37 = vadd.f32 %v3784_v16, %v1868_v33  ;;  %v3875_v26 = vld [vmem:[%s4374_s23 + $0x78] sm:$0xff]  }
 0x156   : > { %v3500_v38 = vpack.c.bf16 %v2317_v30, %v2317_v30  ;;  %v3564_v39 = vpack.c.bf16 %v2381_v31, %v2381_v31  ;;  %v1614_v40 = vpop.f32.mrf.mxu0  ;;  %v1870_v41 = vpop.f32.mrf.mxu1  ;;  %v3907_v27 = vld [vmem:[%s4374_s23 + $0x178] sm:$0xff]   ;;  %v3664_v32 = vunpack.c.h.bf16 %v3874_v56  ;;  %v3792_v33 = vunpack.c.h.bf16 %v3906_v58 }
 0x157   : > { %v2318_v44 = vmax.f32 %v2190_v34, 0.0  ;;  %v2382_v45 = vmax.f32 %v2254_v35, 0.0  ;;  %v2057_v46 = vmul.f32 %v4704_v11, %v1613_v36  ;;  %v2121_v47 = vmul.f32 %v4704_v11, %v1869_v37 }
 0x158   : > { %2958 = vst.msk [vmem:[%s4418_s6 + $0x5c] sm:$0xf] %vm2934_vm1, %v3500_v38  ;;  %3022 = vst.msk [vmem:[%s4418_s6 + $0x15c] sm:$0xf] %vm2934_vm1, %v3564_v39  ;;  %v1617_v48 = vpop.f32.mrf.mxu0  ;;  %v1873_v49 = vpop.f32.mrf.mxu1  ;;  %v3667_v40 = vunpack.c.l.bf16 %v3875_v26  ;;  %v3795_v41 = vunpack.c.l.bf16 %v3907_v27  ;;  %v3668_v56 = vunpack.c.h.bf16 %v3875_v26  ;;  %v3796_v58 = vunpack.c.h.bf16 %v3907_v27 }
 0x159   : > { %v3501_v52 = vpack.c.bf16 %v2318_v44, %v2318_v44  ;;  %v3565_v53 = vpack.c.bf16 %v2382_v45, %v2382_v45  ;;  %v2191_v54 = vadd.f32 %v4711_v21, %v2057_v46  ;;  %v2255_v55 = vadd.f32 %v4711_v21, %v2121_v47 }
 0x15a   : > { %v1618_v59 = vadd.f32 %v3659_v42, %v1617_v48  ;;  %v1874_v60 = vadd.f32 %v3787_v43, %v1873_v49  ;;  %v1619_v61 = vpop.f32.mrf.mxu0  ;;  %v1875_v62 = vpop.f32.mrf.mxu1 }
 0x15b   : > { %2959 = vst.msk [vmem:[%s4418_s6 + $0x60] sm:$0xf] %vm2934_vm1, %v3501_v52  ;;  %3023 = vst.msk [vmem:[%s4418_s6 + $0x160] sm:$0xf] %vm2934_vm1, %v3565_v53  ;;  %v2319_v63 = vmax.f32 %v2191_v54, 0.0  ;;  %v2383_v0 = vmax.f32 %v2255_v55, 0.0 }
 0x15c   : > { %v2058_v1 = vmul.f32 %v4704_v11, %v1618_v59  ;;  %v2122_v2 = vmul.f32 %v4704_v11, %v1874_v60  ;;  %v1620_v4 = vpop.f32.mrf.mxu0  ;;  %v1876_v5 = vpop.f32.mrf.mxu1 }
 0x15d   : > { %v3502_v8 = vpack.c.bf16 %v2319_v63, %v2319_v63  ;;  %v3566_v9 = vpack.c.bf16 %v2383_v0, %v2383_v0  ;;  %v1621_v57 = vadd.f32 %v3660_v50, %v1620_v4  ;;  %v1877_v10 = vadd.f32 %v3788_v51, %v1876_v5 }
 0x15e   : > { %v2192_v12 = vadd.f32 %v4711_v21, %v2058_v1  ;;  %v2256_v3 = vadd.f32 %v4711_v21, %v2122_v2  ;;  %v1622_v13 = vpop.f32.mrf.mxu0  ;;  %v1878_v14 = vpop.f32.mrf.mxu1 }
 0x15f   : > { %2960 = vst.msk [vmem:[%s4418_s6 + $0x64] sm:$0xf] %vm2934_vm1, %v3502_v8  ;;  %3024 = vst.msk [vmem:[%s4418_s6 + $0x164] sm:$0xf] %vm2934_vm1, %v3566_v9  ;;  %v2059_v15 = vmul.f32 %v4704_v11, %v1621_v57  ;;  %v2123_v16 = vmul.f32 %v4704_v11, %v1877_v10 }
 0x160   : > { %v2320_v17 = vmax.f32 %v2192_v12, 0.0  ;;  %v2384_v18 = vmax.f32 %v2256_v3, 0.0  ;;  %v1625_v19 = vpop.f32.mrf.mxu0  ;;  %v1881_v20 = vpop.f32.mrf.mxu1 }
 0x161   : > { %v2193_v22 = vadd.f32 %v4711_v21, %v2059_v15  ;;  %v2257_v23 = vadd.f32 %v4711_v21, %v2123_v16  ;;  %v1626_v24 = vadd.f32 %v3663_v6, %v1625_v19  ;;  %v1882_v25 = vadd.f32 %v3791_v7, %v1881_v20  ;;  %v3876_v6 = vld [vmem:[%s4374_s23 + $0x80] sm:$0xff]  }
 0x162   : > { %v3503_v28 = vpack.c.bf16 %v2320_v17, %v2320_v17  ;;  %v3567_v29 = vpack.c.bf16 %v2384_v18, %v2384_v18  ;;  %v1627_v30 = vpop.f32.mrf.mxu0  ;;  %v1883_v31 = vpop.f32.mrf.mxu1  ;;  %v3908_v7 = vld [vmem:[%s4374_s23 + $0x180] sm:$0xff]   ;;  %v3671_v19 = vunpack.c.l.bf16 %v3876_v6 }
 0x163   : > { %v2321_v34 = vmax.f32 %v2193_v22, 0.0  ;;  %v2385_v35 = vmax.f32 %v2257_v23, 0.0  ;;  %v2060_v36 = vmul.f32 %v4704_v11, %v1626_v24  ;;  %v2124_v37 = vmul.f32 %v4704_v11, %v1882_v25 }
 0x164   : > { %2961 = vst.msk [vmem:[%s4418_s6 + $0x68] sm:$0xf] %vm2934_vm1, %v3503_v28  ;;  %3025 = vst.msk [vmem:[%s4418_s6 + $0x168] sm:$0xf] %vm2934_vm1, %v3567_v29  ;;  %v1628_v38 = vpop.f32.mrf.mxu0  ;;  %v1884_v39 = vpop.f32.mrf.mxu1  ;;  %v3799_v20 = vunpack.c.l.bf16 %v3908_v7  ;;  %v3672_v28 = vunpack.c.h.bf16 %v3876_v6  ;;  %v3800_v29 = vunpack.c.h.bf16 %v3908_v7 }
 0x165   : > { %v3504_v42 = vpack.c.bf16 %v2321_v34, %v2321_v34  ;;  %v3568_v43 = vpack.c.bf16 %v2385_v35, %v2385_v35  ;;  %v2194_v44 = vadd.f32 %v4711_v21, %v2060_v36  ;;  %v2258_v45 = vadd.f32 %v4711_v21, %v2124_v37  ;;  %v3877_v34 = vld [vmem:[%s4374_s23 + $0x88] sm:$0xff]  }
 0x166   : > { %v1629_v46 = vadd.f32 %v3664_v32, %v1628_v38  ;;  %v1885_v47 = vadd.f32 %v3792_v33, %v1884_v39  ;;  %v1630_v48 = vpop.f32.mrf.mxu0  ;;  %v1886_v49 = vpop.f32.mrf.mxu1  ;;  %v3909_v35 = vld [vmem:[%s4374_s23 + $0x188] sm:$0xff]  }
 0x167   : > { %2962 = vst.msk [vmem:[%s4418_s6 + $0x6c] sm:$0xf] %vm2934_vm1, %v3504_v42  ;;  %3026 = vst.msk [vmem:[%s4418_s6 + $0x16c] sm:$0xf] %vm2934_vm1, %v3568_v43  ;;  %v2322_v50 = vmax.f32 %v2194_v44, 0.0  ;;  %v2386_v51 = vmax.f32 %v2258_v45, 0.0 }
 0x168   : > { %v2061_v52 = vmul.f32 %v4704_v11, %v1629_v46  ;;  %v2125_v53 = vmul.f32 %v4704_v11, %v1885_v47  ;;  %v1633_v54 = vpop.f32.mrf.mxu0  ;;  %v1889_v55 = vpop.f32.mrf.mxu1  ;;  %v3675_v46 = vunpack.c.l.bf16 %v3877_v34  ;;  %v3803_v47 = vunpack.c.l.bf16 %v3909_v35 }
 0x169   : > { %v3505_v59 = vpack.c.bf16 %v2322_v50, %v2322_v50  ;;  %v3569_v60 = vpack.c.bf16 %v2386_v51, %v2386_v51  ;;  %v1634_v61 = vadd.f32 %v3667_v40, %v1633_v54  ;;  %v1890_v62 = vadd.f32 %v3795_v41, %v1889_v55 }
 0x16a   : > { %v2195_v63 = vadd.f32 %v4711_v21, %v2061_v52  ;;  %v2259_v0 = vadd.f32 %v4711_v21, %v2125_v53  ;;  %v1635_v1 = vpop.f32.mrf.mxu0  ;;  %v1891_v2 = vpop.f32.mrf.mxu1 }
 0x16b   : > { %2963 = vst.msk [vmem:[%s4418_s6 + $0x70] sm:$0xf] %vm2934_vm1, %v3505_v59  ;;  %3027 = vst.msk [vmem:[%s4418_s6 + $0x170] sm:$0xf] %vm2934_vm1, %v3569_v60  ;;  %v2062_v4 = vmul.f32 %v4704_v11, %v1634_v61  ;;  %v2126_v5 = vmul.f32 %v4704_v11, %v1890_v62 }
 0x16c   : > { %v2323_v8 = vmax.f32 %v2195_v63, 0.0  ;;  %v2387_v9 = vmax.f32 %v2259_v0, 0.0  ;;  %v1636_v57 = vpop.f32.mrf.mxu0  ;;  %v1892_v10 = vpop.f32.mrf.mxu1 }
 0x16d   : > { %v2196_v12 = vadd.f32 %v4711_v21, %v2062_v4  ;;  %v2260_v3 = vadd.f32 %v4711_v21, %v2126_v5  ;;  %v1637_v13 = vadd.f32 %v3668_v56, %v1636_v57  ;;  %v1893_v14 = vadd.f32 %v3796_v58, %v1892_v10  ;;  %v3878_v4 = vld [vmem:[%s4374_s23 + $0x90] sm:$0xff]  }
 0x16e   : > { %v3506_v15 = vpack.c.bf16 %v2323_v8, %v2323_v8  ;;  %v3570_v16 = vpack.c.bf16 %v2387_v9, %v2387_v9  ;;  %v1638_v17 = vpop.f32.mrf.mxu0  ;;  %v1894_v18 = vpop.f32.mrf.mxu1  ;;  %v3910_v5 = vld [vmem:[%s4374_s23 + $0x190] sm:$0xff]   ;;  %v3676_v57 = vunpack.c.h.bf16 %v3877_v34  ;;  %v3804_v10 = vunpack.c.h.bf16 %v3909_v35 }
 0x16f   : > { %v2324_v22 = vmax.f32 %v2196_v12, 0.0  ;;  %v2388_v23 = vmax.f32 %v2260_v3, 0.0  ;;  %v2063_v24 = vmul.f32 %v4704_v11, %v1637_v13  ;;  %v2127_v25 = vmul.f32 %v4704_v11, %v1893_v14 }
 0x170   : > { %2964 = vst.msk [vmem:[%s4418_s6 + $0x74] sm:$0xf] %vm2934_vm1, %v3506_v15  ;;  %3028 = vst.msk [vmem:[%s4418_s6 + $0x174] sm:$0xf] %vm2934_vm1, %v3570_v16  ;;  %v1641_v26 = vpop.f32.mrf.mxu0  ;;  %v1897_v27 = vpop.f32.mrf.mxu1  ;;  %v3679_v17 = vunpack.c.l.bf16 %v3878_v4  ;;  %v3807_v18 = vunpack.c.l.bf16 %v3910_v5  ;;  %v3680_v34 = vunpack.c.h.bf16 %v3878_v4  ;;  %v3808_v35 = vunpack.c.h.bf16 %v3910_v5 }
 0x171   : > { %v3507_v30 = vpack.c.bf16 %v2324_v22, %v2324_v22  ;;  %v3571_v31 = vpack.c.bf16 %v2388_v23, %v2388_v23  ;;  %v2197_v32 = vadd.f32 %v4711_v21, %v2063_v24  ;;  %v2261_v33 = vadd.f32 %v4711_v21, %v2127_v25 }
 0x172   : > { %v1642_v36 = vadd.f32 %v3671_v19, %v1641_v26  ;;  %v1898_v37 = vadd.f32 %v3799_v20, %v1897_v27  ;;  %v1643_v38 = vpop.f32.mrf.mxu0  ;;  %v1899_v39 = vpop.f32.mrf.mxu1 }
 0x173   : > { %2965 = vst.msk [vmem:[%s4418_s6 + $0x78] sm:$0xf] %vm2934_vm1, %v3507_v30  ;;  %3029 = vst.msk [vmem:[%s4418_s6 + $0x178] sm:$0xf] %vm2934_vm1, %v3571_v31  ;;  %v2325_v40 = vmax.f32 %v2197_v32, 0.0  ;;  %v2389_v41 = vmax.f32 %v2261_v33, 0.0 }
 0x174   : > { %v2064_v42 = vmul.f32 %v4704_v11, %v1642_v36  ;;  %v2128_v43 = vmul.f32 %v4704_v11, %v1898_v37  ;;  %v1644_v44 = vpop.f32.mrf.mxu0  ;;  %v1900_v45 = vpop.f32.mrf.mxu1 }
 0x175   : > { %v3508_v48 = vpack.c.bf16 %v2325_v40, %v2325_v40  ;;  %v3572_v49 = vpack.c.bf16 %v2389_v41, %v2389_v41  ;;  %v1645_v50 = vadd.f32 %v3672_v28, %v1644_v44  ;;  %v1901_v51 = vadd.f32 %v3800_v29, %v1900_v45 }
 0x176   : > { %v2198_v52 = vadd.f32 %v4711_v21, %v2064_v42  ;;  %v2262_v53 = vadd.f32 %v4711_v21, %v2128_v43  ;;  %v1646_v54 = vpop.f32.mrf.mxu0  ;;  %v1902_v55 = vpop.f32.mrf.mxu1 }
 0x177   : > { %2966 = vst.msk [vmem:[%s4418_s6 + $0x7c] sm:$0xf] %vm2934_vm1, %v3508_v48  ;;  %3030 = vst.msk [vmem:[%s4418_s6 + $0x17c] sm:$0xf] %vm2934_vm1, %v3572_v49  ;;  %v2065_v56 = vmul.f32 %v4704_v11, %v1645_v50  ;;  %v2129_v58 = vmul.f32 %v4704_v11, %v1901_v51 }
 0x178   : > { %v2326_v59 = vmax.f32 %v2198_v52, 0.0  ;;  %v2390_v60 = vmax.f32 %v2262_v53, 0.0  ;;  %v1649_v61 = vpop.f32.mrf.mxu0  ;;  %v1905_v62 = vpop.f32.mrf.mxu1 }
 0x179   : > { %v2199_v63 = vadd.f32 %v4711_v21, %v2065_v56  ;;  %v2263_v0 = vadd.f32 %v4711_v21, %v2129_v58  ;;  %v1650_v1 = vadd.f32 %v3675_v46, %v1649_v61  ;;  %v1906_v2 = vadd.f32 %v3803_v47, %v1905_v62  ;;  %v3879_v46 = vld [vmem:[%s4374_s23 + $0x98] sm:$0xff]  }
 0x17a   : > { %v3509_v6 = vpack.c.bf16 %v2326_v59, %v2326_v59  ;;  %v3573_v7 = vpack.c.bf16 %v2390_v60, %v2390_v60  ;;  %v1651_v8 = vpop.f32.mrf.mxu0  ;;  %v1907_v9 = vpop.f32.mrf.mxu1  ;;  %v3911_v47 = vld [vmem:[%s4374_s23 + $0x198] sm:$0xff]   ;;  %v3683_v61 = vunpack.c.l.bf16 %v3879_v46 }
 0x17b   : > { %v2327_v12 = vmax.f32 %v2199_v63, 0.0  ;;  %v2391_v3 = vmax.f32 %v2263_v0, 0.0  ;;  %v2066_v13 = vmul.f32 %v4704_v11, %v1650_v1  ;;  %v2130_v14 = vmul.f32 %v4704_v11, %v1906_v2 }
 0x17c   : > { %2967 = vst.msk [vmem:[%s4418_s6 + $0x80] sm:$0xf] %vm2934_vm1, %v3509_v6  ;;  %3031 = vst.msk [vmem:[%s4418_s6 + $0x180] sm:$0xf] %vm2934_vm1, %v3573_v7  ;;  %v1652_v15 = vpop.f32.mrf.mxu0  ;;  %v1908_v16 = vpop.f32.mrf.mxu1  ;;  %v3811_v62 = vunpack.c.l.bf16 %v3911_v47  ;;  %v3684_v6 = vunpack.c.h.bf16 %v3879_v46  ;;  %v3812_v7 = vunpack.c.h.bf16 %v3911_v47 }
 0x17d   : > { %v3510_v19 = vpack.c.bf16 %v2327_v12, %v2327_v12  ;;  %v3574_v20 = vpack.c.bf16 %v2391_v3, %v2391_v3  ;;  %v2200_v22 = vadd.f32 %v4711_v21, %v2066_v13  ;;  %v2264_v23 = vadd.f32 %v4711_v21, %v2130_v14  ;;  %v3880_v12 = vld [vmem:[%s4374_s23 + $0xa0] sm:$0xff]  }
 0x17e   : > { %v1653_v24 = vadd.f32 %v3676_v57, %v1652_v15  ;;  %v1909_v25 = vadd.f32 %v3804_v10, %v1908_v16  ;;  %v1654_v26 = vpop.f32.mrf.mxu0  ;;  %v1910_v27 = vpop.f32.mrf.mxu1  ;;  %v3912_v3 = vld [vmem:[%s4374_s23 + $0x1a0] sm:$0xff]  }
 0x17f   : > { %2968 = vst.msk [vmem:[%s4418_s6 + $0x84] sm:$0xf] %vm2934_vm1, %v3510_v19  ;;  %3032 = vst.msk [vmem:[%s4418_s6 + $0x184] sm:$0xf] %vm2934_vm1, %v3574_v20  ;;  %v2328_v28 = vmax.f32 %v2200_v22, 0.0  ;;  %v2392_v29 = vmax.f32 %v2264_v23, 0.0 }
 0x180   : > { %v2067_v30 = vmul.f32 %v4704_v11, %v1653_v24  ;;  %v2131_v31 = vmul.f32 %v4704_v11, %v1909_v25  ;;  %v1657_v32 = vpop.f32.mrf.mxu0  ;;  %v1913_v33 = vpop.f32.mrf.mxu1  ;;  %v3687_v24 = vunpack.c.l.bf16 %v3880_v12  ;;  %v3815_v25 = vunpack.c.l.bf16 %v3912_v3 }
 0x181   : > { %v3511_v36 = vpack.c.bf16 %v2328_v28, %v2328_v28  ;;  %v3575_v37 = vpack.c.bf16 %v2392_v29, %v2392_v29  ;;  %v1658_v38 = vadd.f32 %v3679_v17, %v1657_v32  ;;  %v1914_v39 = vadd.f32 %v3807_v18, %v1913_v33 }
 0x182   : > { %v2201_v40 = vadd.f32 %v4711_v21, %v2067_v30  ;;  %v2265_v41 = vadd.f32 %v4711_v21, %v2131_v31  ;;  %v1659_v42 = vpop.f32.mrf.mxu0  ;;  %v1915_v43 = vpop.f32.mrf.mxu1 }
 0x183   : > { %2969 = vst.msk [vmem:[%s4418_s6 + $0x88] sm:$0xf] %vm2934_vm1, %v3511_v36  ;;  %3033 = vst.msk [vmem:[%s4418_s6 + $0x188] sm:$0xf] %vm2934_vm1, %v3575_v37  ;;  %v2068_v44 = vmul.f32 %v4704_v11, %v1658_v38  ;;  %v2132_v45 = vmul.f32 %v4704_v11, %v1914_v39 }
 0x184   : > { %v2329_v48 = vmax.f32 %v2201_v40, 0.0  ;;  %v2393_v49 = vmax.f32 %v2265_v41, 0.0  ;;  %v1660_v50 = vpop.f32.mrf.mxu0  ;;  %v1916_v51 = vpop.f32.mrf.mxu1 }
 0x185   : > { %v2202_v52 = vadd.f32 %v4711_v21, %v2068_v44  ;;  %v2266_v53 = vadd.f32 %v4711_v21, %v2132_v45  ;;  %v1661_v54 = vadd.f32 %v3680_v34, %v1660_v50  ;;  %v1917_v55 = vadd.f32 %v3808_v35, %v1916_v51  ;;  %v3881_v44 = vld [vmem:[%s4374_s23 + $0xa8] sm:$0xff]  }
 0x186   : > { %v3512_v56 = vpack.c.bf16 %v2329_v48, %v2329_v48  ;;  %v3576_v58 = vpack.c.bf16 %v2393_v49, %v2393_v49  ;;  %v1662_v59 = vpop.f32.mrf.mxu0  ;;  %v1918_v60 = vpop.f32.mrf.mxu1  ;;  %v3913_v45 = vld [vmem:[%s4374_s23 + $0x1a8] sm:$0xff]   ;;  %v3688_v50 = vunpack.c.h.bf16 %v3880_v12  ;;  %v3816_v51 = vunpack.c.h.bf16 %v3912_v3 }
 0x187   : > { %v2330_v63 = vmax.f32 %v2202_v52, 0.0  ;;  %v2394_v0 = vmax.f32 %v2266_v53, 0.0  ;;  %v2069_v1 = vmul.f32 %v4704_v11, %v1661_v54  ;;  %v2133_v2 = vmul.f32 %v4704_v11, %v1917_v55 }
 0x188   : > { %2970 = vst.msk [vmem:[%s4418_s6 + $0x8c] sm:$0xf] %vm2934_vm1, %v3512_v56  ;;  %3034 = vst.msk [vmem:[%s4418_s6 + $0x18c] sm:$0xf] %vm2934_vm1, %v3576_v58  ;;  %v1665_v4 = vpop.f32.mrf.mxu0  ;;  %v1921_v5 = vpop.f32.mrf.mxu1  ;;  %v3691_v59 = vunpack.c.l.bf16 %v3881_v44  ;;  %v3819_v60 = vunpack.c.l.bf16 %v3913_v45  ;;  %v3692_v12 = vunpack.c.h.bf16 %v3881_v44  ;;  %v3820_v3 = vunpack.c.h.bf16 %v3913_v45 }
 0x189   : > { %v3513_v8 = vpack.c.bf16 %v2330_v63, %v2330_v63  ;;  %v3577_v9 = vpack.c.bf16 %v2394_v0, %v2394_v0  ;;  %v2203_v57 = vadd.f32 %v4711_v21, %v2069_v1  ;;  %v2267_v10 = vadd.f32 %v4711_v21, %v2133_v2 }
 0x18a   : > { %v1666_v13 = vadd.f32 %v3683_v61, %v1665_v4  ;;  %v1922_v14 = vadd.f32 %v3811_v62, %v1921_v5  ;;  %v1667_v15 = vpop.f32.mrf.mxu0  ;;  %v1923_v16 = vpop.f32.mrf.mxu1 }
 0x18b   : > { %2971 = vst.msk [vmem:[%s4418_s6 + $0x90] sm:$0xf] %vm2934_vm1, %v3513_v8  ;;  %3035 = vst.msk [vmem:[%s4418_s6 + $0x190] sm:$0xf] %vm2934_vm1, %v3577_v9  ;;  %v2331_v17 = vmax.f32 %v2203_v57, 0.0  ;;  %v2395_v18 = vmax.f32 %v2267_v10, 0.0 }
 0x18c   : > { %v2070_v19 = vmul.f32 %v4704_v11, %v1666_v13  ;;  %v2134_v20 = vmul.f32 %v4704_v11, %v1922_v14  ;;  %v1668_v22 = vpop.f32.mrf.mxu0  ;;  %v1924_v23 = vpop.f32.mrf.mxu1 }
 0x18d   : > { %v3514_v26 = vpack.c.bf16 %v2331_v17, %v2331_v17  ;;  %v3578_v27 = vpack.c.bf16 %v2395_v18, %v2395_v18  ;;  %v1669_v28 = vadd.f32 %v3684_v6, %v1668_v22  ;;  %v1925_v29 = vadd.f32 %v3812_v7, %v1924_v23 }
 0x18e   : > { %v2204_v30 = vadd.f32 %v4711_v21, %v2070_v19  ;;  %v2268_v31 = vadd.f32 %v4711_v21, %v2134_v20  ;;  %v1670_v32 = vpop.f32.mrf.mxu0  ;;  %v1926_v33 = vpop.f32.mrf.mxu1 }
 0x18f   : > { %2972 = vst.msk [vmem:[%s4418_s6 + $0x94] sm:$0xf] %vm2934_vm1, %v3514_v26  ;;  %3036 = vst.msk [vmem:[%s4418_s6 + $0x194] sm:$0xf] %vm2934_vm1, %v3578_v27  ;;  %v2071_v34 = vmul.f32 %v4704_v11, %v1669_v28  ;;  %v2135_v35 = vmul.f32 %v4704_v11, %v1925_v29 }
 0x190   : > { %v2332_v36 = vmax.f32 %v2204_v30, 0.0  ;;  %v2396_v37 = vmax.f32 %v2268_v31, 0.0  ;;  %v1673_v38 = vpop.f32.mrf.mxu0  ;;  %v1929_v39 = vpop.f32.mrf.mxu1 }
 0x191   : > { %v2205_v40 = vadd.f32 %v4711_v21, %v2071_v34  ;;  %v2269_v41 = vadd.f32 %v4711_v21, %v2135_v35  ;;  %v1674_v42 = vadd.f32 %v3687_v24, %v1673_v38  ;;  %v1930_v43 = vadd.f32 %v3815_v25, %v1929_v39  ;;  %v3882_v24 = vld [vmem:[%s4374_s23 + $0xb0] sm:$0xff]  }
 0x192   : > { %v3515_v46 = vpack.c.bf16 %v2332_v36, %v2332_v36  ;;  %v3579_v47 = vpack.c.bf16 %v2396_v37, %v2396_v37  ;;  %v1675_v48 = vpop.f32.mrf.mxu0  ;;  %v1931_v49 = vpop.f32.mrf.mxu1  ;;  %v3914_v25 = vld [vmem:[%s4374_s23 + $0x1b0] sm:$0xff]   ;;  %v3695_v38 = vunpack.c.l.bf16 %v3882_v24 }
 0x193   : > { %v2333_v52 = vmax.f32 %v2205_v40, 0.0  ;;  %v2397_v53 = vmax.f32 %v2269_v41, 0.0  ;;  %v2072_v54 = vmul.f32 %v4704_v11, %v1674_v42  ;;  %v2136_v55 = vmul.f32 %v4704_v11, %v1930_v43 }
 0x194   : > { %2973 = vst.msk [vmem:[%s4418_s6 + $0x98] sm:$0xf] %vm2934_vm1, %v3515_v46  ;;  %3037 = vst.msk [vmem:[%s4418_s6 + $0x198] sm:$0xf] %vm2934_vm1, %v3579_v47  ;;  %v1676_v56 = vpop.f32.mrf.mxu0  ;;  %v1932_v58 = vpop.f32.mrf.mxu1  ;;  %v3823_v39 = vunpack.c.l.bf16 %v3914_v25  ;;  %v3696_v46 = vunpack.c.h.bf16 %v3882_v24  ;;  %v3824_v47 = vunpack.c.h.bf16 %v3914_v25 }
 0x195   : > { %v3516_v61 = vpack.c.bf16 %v2333_v52, %v2333_v52  ;;  %v3580_v62 = vpack.c.bf16 %v2397_v53, %v2397_v53  ;;  %v2206_v63 = vadd.f32 %v4711_v21, %v2072_v54  ;;  %v2270_v0 = vadd.f32 %v4711_v21, %v2136_v55  ;;  %v3883_v52 = vld [vmem:[%s4374_s23 + $0xb8] sm:$0xff]  }
 0x196   : > { %v1677_v1 = vadd.f32 %v3688_v50, %v1676_v56  ;;  %v1933_v2 = vadd.f32 %v3816_v51, %v1932_v58  ;;  %v1678_v4 = vpop.f32.mrf.mxu0  ;;  %v1934_v5 = vpop.f32.mrf.mxu1  ;;  %v3915_v53 = vld [vmem:[%s4374_s23 + $0x1b8] sm:$0xff]  }
 0x197   : > { %2974 = vst.msk [vmem:[%s4418_s6 + $0x9c] sm:$0xf] %vm2934_vm1, %v3516_v61  ;;  %3038 = vst.msk [vmem:[%s4418_s6 + $0x19c] sm:$0xf] %vm2934_vm1, %v3580_v62  ;;  %v2334_v6 = vmax.f32 %v2206_v63, 0.0  ;;  %v2398_v7 = vmax.f32 %v2270_v0, 0.0 }
 0x198   : > { %v2073_v8 = vmul.f32 %v4704_v11, %v1677_v1  ;;  %v2137_v9 = vmul.f32 %v4704_v11, %v1933_v2  ;;  %v1681_v57 = vpop.f32.mrf.mxu0  ;;  %v1937_v10 = vpop.f32.mrf.mxu1  ;;  %v3699_v1 = vunpack.c.l.bf16 %v3883_v52  ;;  %v3827_v2 = vunpack.c.l.bf16 %v3915_v53 }
 0x199   : > { %v3517_v13 = vpack.c.bf16 %v2334_v6, %v2334_v6  ;;  %v3581_v14 = vpack.c.bf16 %v2398_v7, %v2398_v7  ;;  %v1682_v15 = vadd.f32 %v3691_v59, %v1681_v57  ;;  %v1938_v16 = vadd.f32 %v3819_v60, %v1937_v10 }
 0x19a   : > { %v2207_v17 = vadd.f32 %v4711_v21, %v2073_v8  ;;  %v2271_v18 = vadd.f32 %v4711_v21, %v2137_v9  ;;  %v1683_v19 = vpop.f32.mrf.mxu0  ;;  %v1939_v20 = vpop.f32.mrf.mxu1 }
 0x19b   : > { %2975 = vst.msk [vmem:[%s4418_s6 + $0xa0] sm:$0xf] %vm2934_vm1, %v3517_v13  ;;  %3039 = vst.msk [vmem:[%s4418_s6 + $0x1a0] sm:$0xf] %vm2934_vm1, %v3581_v14  ;;  %v2074_v22 = vmul.f32 %v4704_v11, %v1682_v15  ;;  %v2138_v23 = vmul.f32 %v4704_v11, %v1938_v16 }
 0x19c   : > { %v2335_v26 = vmax.f32 %v2207_v17, 0.0  ;;  %v2399_v27 = vmax.f32 %v2271_v18, 0.0  ;;  %v1684_v28 = vpop.f32.mrf.mxu0  ;;  %v1940_v29 = vpop.f32.mrf.mxu1 }
 0x19d   : > { %v2208_v30 = vadd.f32 %v4711_v21, %v2074_v22  ;;  %v2272_v31 = vadd.f32 %v4711_v21, %v2138_v23  ;;  %v1685_v32 = vadd.f32 %v3692_v12, %v1684_v28  ;;  %v1941_v33 = vadd.f32 %v3820_v3, %v1940_v29  ;;  %v3884_v22 = vld [vmem:[%s4374_s23 + $0xc0] sm:$0xff]  }
 0x19e   : > { %v3518_v34 = vpack.c.bf16 %v2335_v26, %v2335_v26  ;;  %v3582_v35 = vpack.c.bf16 %v2399_v27, %v2399_v27  ;;  %v1686_v36 = vpop.f32.mrf.mxu0  ;;  %v1942_v37 = vpop.f32.mrf.mxu1  ;;  %v3916_v23 = vld [vmem:[%s4374_s23 + $0x1c0] sm:$0xff]   ;;  %v3700_v28 = vunpack.c.h.bf16 %v3883_v52  ;;  %v3828_v29 = vunpack.c.h.bf16 %v3915_v53 }
 0x19f   : > { %v2336_v40 = vmax.f32 %v2208_v30, 0.0  ;;  %v2400_v41 = vmax.f32 %v2272_v31, 0.0  ;;  %v2075_v42 = vmul.f32 %v4704_v11, %v1685_v32  ;;  %v2139_v43 = vmul.f32 %v4704_v11, %v1941_v33 }
 0x1a0   : > { %2976 = vst.msk [vmem:[%s4418_s6 + $0xa4] sm:$0xf] %vm2934_vm1, %v3518_v34  ;;  %3040 = vst.msk [vmem:[%s4418_s6 + $0x1a4] sm:$0xf] %vm2934_vm1, %v3582_v35  ;;  %v1689_v44 = vpop.f32.mrf.mxu0  ;;  %v1945_v45 = vpop.f32.mrf.mxu1  ;;  %v3703_v36 = vunpack.c.l.bf16 %v3884_v22  ;;  %v3831_v37 = vunpack.c.l.bf16 %v3916_v23  ;;  %v3704_v52 = vunpack.c.h.bf16 %v3884_v22  ;;  %v3832_v53 = vunpack.c.h.bf16 %v3916_v23 }
 0x1a1   : > { %v3519_v48 = vpack.c.bf16 %v2336_v40, %v2336_v40  ;;  %v3583_v49 = vpack.c.bf16 %v2400_v41, %v2400_v41  ;;  %v2209_v50 = vadd.f32 %v4711_v21, %v2075_v42  ;;  %v2273_v51 = vadd.f32 %v4711_v21, %v2139_v43 }
 0x1a2   : > { %v1690_v54 = vadd.f32 %v3695_v38, %v1689_v44  ;;  %v1946_v55 = vadd.f32 %v3823_v39, %v1945_v45  ;;  %v1691_v56 = vpop.f32.mrf.mxu0  ;;  %v1947_v58 = vpop.f32.mrf.mxu1 }
 0x1a3   : > { %2977 = vst.msk [vmem:[%s4418_s6 + $0xa8] sm:$0xf] %vm2934_vm1, %v3519_v48  ;;  %3041 = vst.msk [vmem:[%s4418_s6 + $0x1a8] sm:$0xf] %vm2934_vm1, %v3583_v49  ;;  %v2337_v59 = vmax.f32 %v2209_v50, 0.0  ;;  %v2401_v60 = vmax.f32 %v2273_v51, 0.0 }
 0x1a4   : > { %v2076_v61 = vmul.f32 %v4704_v11, %v1690_v54  ;;  %v2140_v62 = vmul.f32 %v4704_v11, %v1946_v55  ;;  %v1692_v63 = vpop.f32.mrf.mxu0  ;;  %v1948_v0 = vpop.f32.mrf.mxu1 }
 0x1a5   : > { %v3520_v4 = vpack.c.bf16 %v2337_v59, %v2337_v59  ;;  %v3584_v5 = vpack.c.bf16 %v2401_v60, %v2401_v60  ;;  %v1693_v6 = vadd.f32 %v3696_v46, %v1692_v63  ;;  %v1949_v7 = vadd.f32 %v3824_v47, %v1948_v0 }
 0x1a6   : > { %v2210_v8 = vadd.f32 %v4711_v21, %v2076_v61  ;;  %v2274_v9 = vadd.f32 %v4711_v21, %v2140_v62  ;;  %v1694_v57 = vpop.f32.mrf.mxu0  ;;  %v1950_v10 = vpop.f32.mrf.mxu1 }
 0x1a7   : > { %2978 = vst.msk [vmem:[%s4418_s6 + $0xac] sm:$0xf] %vm2934_vm1, %v3520_v4  ;;  %3042 = vst.msk [vmem:[%s4418_s6 + $0x1ac] sm:$0xf] %vm2934_vm1, %v3584_v5  ;;  %v2077_v12 = vmul.f32 %v4704_v11, %v1693_v6  ;;  %v2141_v3 = vmul.f32 %v4704_v11, %v1949_v7 }
 0x1a8   : > { %v2338_v13 = vmax.f32 %v2210_v8, 0.0  ;;  %v2402_v14 = vmax.f32 %v2274_v9, 0.0  ;;  %v1697_v15 = vpop.f32.mrf.mxu0  ;;  %v1953_v16 = vpop.f32.mrf.mxu1 }
 0x1a9   : > { %v2211_v17 = vadd.f32 %v4711_v21, %v2077_v12  ;;  %v2275_v18 = vadd.f32 %v4711_v21, %v2141_v3  ;;  %v1698_v19 = vadd.f32 %v3699_v1, %v1697_v15  ;;  %v1954_v20 = vadd.f32 %v3827_v2, %v1953_v16  ;;  %v3885_v1 = vld [vmem:[%s4374_s23 + $0xc8] sm:$0xff]  }
 0x1aa   : > { %v3521_v24 = vpack.c.bf16 %v2338_v13, %v2338_v13  ;;  %v3585_v25 = vpack.c.bf16 %v2402_v14, %v2402_v14  ;;  %v1699_v26 = vpop.f32.mrf.mxu0  ;;  %v1955_v27 = vpop.f32.mrf.mxu1  ;;  %v3917_v2 = vld [vmem:[%s4374_s23 + $0x1c8] sm:$0xff]   ;;  %v3707_v15 = vunpack.c.l.bf16 %v3885_v1 }
 0x1ab   : > { %v2339_v30 = vmax.f32 %v2211_v17, 0.0  ;;  %v2403_v31 = vmax.f32 %v2275_v18, 0.0  ;;  %v2078_v32 = vmul.f32 %v4704_v11, %v1698_v19  ;;  %v2142_v33 = vmul.f32 %v4704_v11, %v1954_v20 }
 0x1ac   : > { %2979 = vst.msk [vmem:[%s4418_s6 + $0xb0] sm:$0xf] %vm2934_vm1, %v3521_v24  ;;  %3043 = vst.msk [vmem:[%s4418_s6 + $0x1b0] sm:$0xf] %vm2934_vm1, %v3585_v25  ;;  %v1700_v34 = vpop.f32.mrf.mxu0  ;;  %v1956_v35 = vpop.f32.mrf.mxu1  ;;  %v3835_v16 = vunpack.c.l.bf16 %v3917_v2  ;;  %v3708_v24 = vunpack.c.h.bf16 %v3885_v1  ;;  %v3836_v25 = vunpack.c.h.bf16 %v3917_v2 }
 0x1ad   : > { %v3522_v38 = vpack.c.bf16 %v2339_v30, %v2339_v30  ;;  %v3586_v39 = vpack.c.bf16 %v2403_v31, %v2403_v31  ;;  %v2212_v40 = vadd.f32 %v4711_v21, %v2078_v32  ;;  %v2276_v41 = vadd.f32 %v4711_v21, %v2142_v33  ;;  %v3886_v30 = vld [vmem:[%s4374_s23 + $0xd0] sm:$0xff]  }
 0x1ae   : > { %v1701_v42 = vadd.f32 %v3700_v28, %v1700_v34  ;;  %v1957_v43 = vadd.f32 %v3828_v29, %v1956_v35  ;;  %v1702_v44 = vpop.f32.mrf.mxu0  ;;  %v1958_v45 = vpop.f32.mrf.mxu1  ;;  %v3918_v31 = vld [vmem:[%s4374_s23 + $0x1d0] sm:$0xff]  }
 0x1af   : > { %2980 = vst.msk [vmem:[%s4418_s6 + $0xb4] sm:$0xf] %vm2934_vm1, %v3522_v38  ;;  %3044 = vst.msk [vmem:[%s4418_s6 + $0x1b4] sm:$0xf] %vm2934_vm1, %v3586_v39  ;;  %v2340_v46 = vmax.f32 %v2212_v40, 0.0  ;;  %v2404_v47 = vmax.f32 %v2276_v41, 0.0  ;;  %v3711_v41 = vunpack.c.l.bf16 %v3886_v30 }
 0x1b0   : > { %v2079_v48 = vmul.f32 %v4704_v11, %v1701_v42  ;;  %v2143_v49 = vmul.f32 %v4704_v11, %v1957_v43  ;;  %v1705_v50 = vpop.f32.mrf.mxu0  ;;  %v1961_v51 = vpop.f32.mrf.mxu1  ;;  %v3839_v42 = vunpack.c.l.bf16 %v3918_v31 }
 0x1b1   : > { %v3523_v54 = vpack.c.bf16 %v2340_v46, %v2340_v46  ;;  %v3587_v55 = vpack.c.bf16 %v2404_v47, %v2404_v47  ;;  %v1706_v56 = vadd.f32 %v3703_v36, %v1705_v50  ;;  %v1962_v58 = vadd.f32 %v3831_v37, %v1961_v51  ;;  %v4958_v37 = vld [vmem:[%s5097_s3] ss:$0 sm:$0xff] }
 0x1b2   : > { %v2213_v59 = vadd.f32 %v4711_v21, %v2079_v48  ;;  %v2277_v60 = vadd.f32 %v4711_v21, %v2143_v49  ;;  %v1707_v61 = vpop.f32.mrf.mxu0  ;;  %v1963_v62 = vpop.f32.mrf.mxu1  ;;  %v4965_v47 = vld [vmem:[%s5098_s4] ss:$0 sm:$0xff] }
 0x1b3   : > { %2981 = vst.msk [vmem:[%s4418_s6 + $0xb8] sm:$0xf] %vm2934_vm1, %v3523_v54  ;;  %3045 = vst.msk [vmem:[%s4418_s6 + $0x1b8] sm:$0xf] %vm2934_vm1, %v3587_v55  ;;  %v2080_v63 = vmul.f32 %v4704_v11, %v1706_v56  ;;  %v2144_v0 = vmul.f32 %v4704_v11, %v1962_v58 }
 0x1b4   : > { %v2341_v4 = vmax.f32 %v2213_v59, 0.0  ;;  %v2405_v5 = vmax.f32 %v2277_v60, 0.0  ;;  %v1708_v6 = vpop.f32.mrf.mxu0  ;;  %v1964_v7 = vpop.f32.mrf.mxu1 }
 0x1b5   : > { %v2214_v8 = vadd.f32 %v4711_v21, %v2080_v63  ;;  %v2278_v9 = vadd.f32 %v4711_v21, %v2144_v0  ;;  %v1709_v57 = vadd.f32 %v3704_v52, %v1708_v6  ;;  %v1965_v10 = vadd.f32 %v3832_v53, %v1964_v7  ;;  %v3887_v63 = vld [vmem:[%s4374_s23 + $0xd8] sm:$0xff]  }
 0x1b6   : > { %v3524_v12 = vpack.c.bf16 %v2341_v4, %v2341_v4  ;;  %v3588_v3 = vpack.c.bf16 %v2405_v5, %v2405_v5  ;;  %v1710_v13 = vpop.f32.mrf.mxu0  ;;  %v1966_v14 = vpop.f32.mrf.mxu1  ;;  %v3919_v0 = vld [vmem:[%s4374_s23 + $0x1d8] sm:$0xff]   ;;  %v3712_v6 = vunpack.c.h.bf16 %v3886_v30  ;;  %v3840_v7 = vunpack.c.h.bf16 %v3918_v31 }
 0x1b7   : > { %v2342_v17 = vmax.f32 %v2214_v8, 0.0  ;;  %v2406_v18 = vmax.f32 %v2278_v9, 0.0  ;;  %v2081_v19 = vmul.f32 %v4704_v11, %v1709_v57  ;;  %v2145_v20 = vmul.f32 %v4704_v11, %v1965_v10 }
 0x1b8   : > { %2982 = vst.msk [vmem:[%s4418_s6 + $0xbc] sm:$0xf] %vm2934_vm1, %v3524_v12  ;;  %3046 = vst.msk [vmem:[%s4418_s6 + $0x1bc] sm:$0xf] %vm2934_vm1, %v3588_v3  ;;  %v1713_v22 = vpop.f32.mrf.mxu0  ;;  %v1969_v23 = vpop.f32.mrf.mxu1  ;;  %v3715_v13 = vunpack.c.l.bf16 %v3887_v63  ;;  %v3843_v14 = vunpack.c.l.bf16 %v3919_v0  ;;  %v3716_v30 = vunpack.c.h.bf16 %v3887_v63  ;;  %v3844_v31 = vunpack.c.h.bf16 %v3919_v0 }
 0x1b9   : > { %v3525_v26 = vpack.c.bf16 %v2342_v17, %v2342_v17  ;;  %v3589_v27 = vpack.c.bf16 %v2406_v18, %v2406_v18  ;;  %v2215_v28 = vadd.f32 %v4711_v21, %v2081_v19  ;;  %v2279_v29 = vadd.f32 %v4711_v21, %v2145_v20 }
 0x1ba   : > { %v1714_v32 = vadd.f32 %v3707_v15, %v1713_v22  ;;  %v1970_v11 = vadd.f32 %v3835_v16, %v1969_v23  ;;  %v1715_v33 = vpop.f32.mrf.mxu0  ;;  %v1971_v34 = vpop.f32.mrf.mxu1 }
 0x1bb   : > { %2983 = vst.msk [vmem:[%s4418_s6 + $0xc0] sm:$0xf] %vm2934_vm1, %v3525_v26  ;;  %3047 = vst.msk [vmem:[%s4418_s6 + $0x1c0] sm:$0xf] %vm2934_vm1, %v3589_v27  ;;  %v2343_v35 = vmax.f32 %v2215_v28, 0.0  ;;  %v2407_v36 = vmax.f32 %v2279_v29, 0.0 }
 0x1bc   : > { %v2082_v21 = vmul.f32 %v4958_v37, %v1714_v32  ;;  %v2146_v38 = vmul.f32 %v4958_v37, %v1970_v11  ;;  %v1716_v39 = vpop.f32.mrf.mxu0  ;;  %v1972_v40 = vpop.f32.mrf.mxu1 }
 0x1bd   : > { %v3526_v43 = vpack.c.bf16 %v2343_v35, %v2343_v35  ;;  %v3590_v44 = vpack.c.bf16 %v2407_v36, %v2407_v36  ;;  %v1717_v45 = vadd.f32 %v3708_v24, %v1716_v39  ;;  %v1973_v46 = vadd.f32 %v3836_v25, %v1972_v40 }
 0x1be   : > { %v2216_v48 = vadd.f32 %v4965_v47, %v2082_v21  ;;  %v2280_v49 = vadd.f32 %v4965_v47, %v2146_v38  ;;  %v1718_v50 = vpop.f32.mrf.mxu0  ;;  %v1974_v51 = vpop.f32.mrf.mxu1 }
 0x1bf   : > { %2984 = vst.msk [vmem:[%s4418_s6 + $0xc4] sm:$0xf] %vm2934_vm1, %v3526_v43  ;;  %3048 = vst.msk [vmem:[%s4418_s6 + $0x1c4] sm:$0xf] %vm2934_vm1, %v3590_v44  ;;  %v2083_v52 = vmul.f32 %v4958_v37, %v1717_v45  ;;  %v2147_v53 = vmul.f32 %v4958_v37, %v1973_v46 }
 0x1c0   : > { %v2344_v54 = vmax.f32 %v2216_v48, 0.0  ;;  %v2408_v55 = vmax.f32 %v2280_v49, 0.0  ;;  %v1721_v56 = vpop.f32.mrf.mxu0  ;;  %v1977_v58 = vpop.f32.mrf.mxu1 }
 0x1c1   : > { %v2217_v59 = vadd.f32 %v4965_v47, %v2083_v52  ;;  %v2281_v60 = vadd.f32 %v4965_v47, %v2147_v53  ;;  %v1722_v61 = vadd.f32 %v3711_v41, %v1721_v56  ;;  %v1978_v62 = vadd.f32 %v3839_v42, %v1977_v58  ;;  %v3888_v41 = vld [vmem:[%s4374_s23 + $0xe0] sm:$0xff]  }
 0x1c2   : > { %v3527_v1 = vpack.c.bf16 %v2344_v54, %v2344_v54  ;;  %v3591_v2 = vpack.c.bf16 %v2408_v55, %v2408_v55  ;;  %v1723_v4 = vpop.f32.mrf.mxu0  ;;  %v1979_v5 = vpop.f32.mrf.mxu1  ;;  %v3920_v42 = vld [vmem:[%s4374_s23 + $0x1e0] sm:$0xff]   ;;  %v3719_v56 = vunpack.c.l.bf16 %v3888_v41 }
 0x1c3   : > { %v2345_v8 = vmax.f32 %v2217_v59, 0.0  ;;  %v2409_v9 = vmax.f32 %v2281_v60, 0.0  ;;  %v2084_v57 = vmul.f32 %v4958_v37, %v1722_v61  ;;  %v2148_v10 = vmul.f32 %v4958_v37, %v1978_v62 }
 0x1c4   : > { %2985 = vst.msk [vmem:[%s4418_s6 + $0xc8] sm:$0xf] %vm2934_vm1, %v3527_v1  ;;  %3049 = vst.msk [vmem:[%s4418_s6 + $0x1c8] sm:$0xf] %vm2934_vm1, %v3591_v2  ;;  %v1724_v12 = vpop.f32.mrf.mxu0  ;;  %v1980_v3 = vpop.f32.mrf.mxu1  ;;  %v3847_v58 = vunpack.c.l.bf16 %v3920_v42  ;;  %v3720_v1 = vunpack.c.h.bf16 %v3888_v41  ;;  %v3848_v2 = vunpack.c.h.bf16 %v3920_v42 }
 0x1c5   : > { %v3528_v15 = vpack.c.bf16 %v2345_v8, %v2345_v8  ;;  %v3592_v16 = vpack.c.bf16 %v2409_v9, %v2409_v9  ;;  %v2218_v17 = vadd.f32 %v4965_v47, %v2084_v57  ;;  %v2282_v18 = vadd.f32 %v4965_v47, %v2148_v10  ;;  %v3889_v8 = vld [vmem:[%s4374_s23 + $0xe8] sm:$0xff]  }
 0x1c6   : > { %v1725_v19 = vadd.f32 %v3712_v6, %v1724_v12  ;;  %v1981_v20 = vadd.f32 %v3840_v7, %v1980_v3  ;;  %v1726_v22 = vpop.f32.mrf.mxu0  ;;  %v1982_v23 = vpop.f32.mrf.mxu1  ;;  %v3921_v9 = vld [vmem:[%s4374_s23 + $0x1e8] sm:$0xff]  }
 0x1c7   : > { %2986 = vst.msk [vmem:[%s4418_s6 + $0xcc] sm:$0xf] %vm2934_vm1, %v3528_v15  ;;  %3050 = vst.msk [vmem:[%s4418_s6 + $0x1cc] sm:$0xf] %vm2934_vm1, %v3592_v16  ;;  %v2346_v24 = vmax.f32 %v2218_v17, 0.0  ;;  %v2410_v25 = vmax.f32 %v2282_v18, 0.0 }
 0x1c8   : > { %v2085_v26 = vmul.f32 %v4958_v37, %v1725_v19  ;;  %v2149_v27 = vmul.f32 %v4958_v37, %v1981_v20  ;;  %v1729_v28 = vpop.f32.mrf.mxu0  ;;  %v1985_v29 = vpop.f32.mrf.mxu1  ;;  %v3723_v19 = vunpack.c.l.bf16 %v3889_v8  ;;  %v3851_v20 = vunpack.c.l.bf16 %v3921_v9 }
 0x1c9   : > { %v3529_v32 = vpack.c.bf16 %v2346_v24, %v2346_v24  ;;  %v3593_v11 = vpack.c.bf16 %v2410_v25, %v2410_v25  ;;  %v1730_v33 = vadd.f32 %v3715_v13, %v1729_v28  ;;  %v1986_v34 = vadd.f32 %v3843_v14, %v1985_v29 }
 0x1ca   : > { %v2219_v35 = vadd.f32 %v4965_v47, %v2085_v26  ;;  %v2283_v36 = vadd.f32 %v4965_v47, %v2149_v27  ;;  %v1731_v21 = vpop.f32.mrf.mxu0  ;;  %v1987_v38 = vpop.f32.mrf.mxu1 }
 0x1cb   : > { %2987 = vst.msk [vmem:[%s4418_s6 + $0xd0] sm:$0xf] %vm2934_vm1, %v3529_v32  ;;  %3051 = vst.msk [vmem:[%s4418_s6 + $0x1d0] sm:$0xf] %vm2934_vm1, %v3593_v11  ;;  %v2086_v39 = vmul.f32 %v4958_v37, %v1730_v33  ;;  %v2150_v40 = vmul.f32 %v4958_v37, %v1986_v34 }
 0x1cc   : > { %v2347_v43 = vmax.f32 %v2219_v35, 0.0  ;;  %v2411_v44 = vmax.f32 %v2283_v36, 0.0  ;;  %v1732_v45 = vpop.f32.mrf.mxu0  ;;  %v1988_v46 = vpop.f32.mrf.mxu1 }
 0x1cd   : > { %v2220_v48 = vadd.f32 %v4965_v47, %v2086_v39  ;;  %v2284_v49 = vadd.f32 %v4965_v47, %v2150_v40  ;;  %v1733_v50 = vadd.f32 %v3716_v30, %v1732_v45  ;;  %v1989_v51 = vadd.f32 %v3844_v31, %v1988_v46  ;;  %v3890_v39 = vld [vmem:[%s4374_s23 + $0xf0] sm:$0xff]  }
 0x1ce   : > { %v3530_v52 = vpack.c.bf16 %v2347_v43, %v2347_v43  ;;  %v3594_v53 = vpack.c.bf16 %v2411_v44, %v2411_v44  ;;  %v1734_v54 = vpop.f32.mrf.mxu0  ;;  %v1990_v55 = vpop.f32.mrf.mxu1  ;;  %v3922_v40 = vld [vmem:[%s4374_s23 + $0x1f0] sm:$0xff]   ;;  %v3724_v45 = vunpack.c.h.bf16 %v3889_v8  ;;  %v3852_v46 = vunpack.c.h.bf16 %v3921_v9 }
 0x1cf   : > { %v2348_v59 = vmax.f32 %v2220_v48, 0.0  ;;  %v2412_v60 = vmax.f32 %v2284_v49, 0.0  ;;  %v2087_v61 = vmul.f32 %v4958_v37, %v1733_v50  ;;  %v2151_v62 = vmul.f32 %v4958_v37, %v1989_v51 }
 0x1d0   : > { %2988 = vst.msk [vmem:[%s4418_s6 + $0xd4] sm:$0xf] %vm2934_vm1, %v3530_v52  ;;  %3052 = vst.msk [vmem:[%s4418_s6 + $0x1d4] sm:$0xf] %vm2934_vm1, %v3594_v53  ;;  %v1737_v63 = vpop.f32.mrf.mxu0  ;;  %v1993_v0 = vpop.f32.mrf.mxu1  ;;  %v3727_v54 = vunpack.c.l.bf16 %v3890_v39  ;;  %v3855_v55 = vunpack.c.l.bf16 %v3922_v40  ;;  %v3728_v8 = vunpack.c.h.bf16 %v3890_v39  ;;  %v3856_v9 = vunpack.c.h.bf16 %v3922_v40 }
 0x1d1   : > { %v3531_v4 = vpack.c.bf16 %v2348_v59, %v2348_v59  ;;  %v3595_v5 = vpack.c.bf16 %v2412_v60, %v2412_v60  ;;  %v2221_v6 = vadd.f32 %v4965_v47, %v2087_v61  ;;  %v2285_v7 = vadd.f32 %v4965_v47, %v2151_v62 }
 0x1d2   : > { %v1738_v57 = vadd.f32 %v3719_v56, %v1737_v63  ;;  %v1994_v10 = vadd.f32 %v3847_v58, %v1993_v0  ;;  %v1739_v12 = vpop.f32.mrf.mxu0  ;;  %v1995_v3 = vpop.f32.mrf.mxu1 }
 0x1d3   : > { %2989 = vst.msk [vmem:[%s4418_s6 + $0xd8] sm:$0xf] %vm2934_vm1, %v3531_v4  ;;  %3053 = vst.msk [vmem:[%s4418_s6 + $0x1d8] sm:$0xf] %vm2934_vm1, %v3595_v5  ;;  %v2349_v13 = vmax.f32 %v2221_v6, 0.0  ;;  %v2413_v14 = vmax.f32 %v2285_v7, 0.0 }
 0x1d4   : > { %v2088_v15 = vmul.f32 %v4958_v37, %v1738_v57  ;;  %v2152_v16 = vmul.f32 %v4958_v37, %v1994_v10  ;;  %v1740_v17 = vpop.f32.mrf.mxu0  ;;  %v1996_v18 = vpop.f32.mrf.mxu1 }
 0x1d5   : > { %v3532_v22 = vpack.c.bf16 %v2349_v13, %v2349_v13  ;;  %v3596_v23 = vpack.c.bf16 %v2413_v14, %v2413_v14  ;;  %v1741_v24 = vadd.f32 %v3720_v1, %v1740_v17  ;;  %v1997_v25 = vadd.f32 %v3848_v2, %v1996_v18 }
 0x1d6   : > { %v2222_v26 = vadd.f32 %v4965_v47, %v2088_v15  ;;  %v2286_v27 = vadd.f32 %v4965_v47, %v2152_v16  ;;  %v1742_v28 = vpop.f32.mrf.mxu0  ;;  %v1998_v29 = vpop.f32.mrf.mxu1 }
 0x1d7   : > { %2990 = vst.msk [vmem:[%s4418_s6 + $0xdc] sm:$0xf] %vm2934_vm1, %v3532_v22  ;;  %3054 = vst.msk [vmem:[%s4418_s6 + $0x1dc] sm:$0xf] %vm2934_vm1, %v3596_v23  ;;  %v2089_v30 = vmul.f32 %v4958_v37, %v1741_v24  ;;  %v2153_v31 = vmul.f32 %v4958_v37, %v1997_v25 }
 0x1d8   : > { %v2350_v32 = vmax.f32 %v2222_v26, 0.0  ;;  %v2414_v11 = vmax.f32 %v2286_v27, 0.0  ;;  %v1745_v33 = vpop.f32.mrf.mxu0  ;;  %v2001_v34 = vpop.f32.mrf.mxu1 }
 0x1d9   : > { %v2223_v35 = vadd.f32 %v4965_v47, %v2089_v30  ;;  %v2287_v36 = vadd.f32 %v4965_v47, %v2153_v31  ;;  %v1746_v21 = vadd.f32 %v3723_v19, %v1745_v33  ;;  %v2002_v38 = vadd.f32 %v3851_v20, %v2001_v34  ;;  %v3891_v19 = vld [vmem:[%s4374_s23 + $0xf8] sm:$0xff]  }
 0x1da   : > { %v3533_v41 = vpack.c.bf16 %v2350_v32, %v2350_v32  ;;  %v3597_v42 = vpack.c.bf16 %v2414_v11, %v2414_v11  ;;  %v1747_v43 = vpop.f32.mrf.mxu0  ;;  %v2003_v44 = vpop.f32.mrf.mxu1  ;;  %v3923_v20 = vld [vmem:[%s4374_s23 + $0x1f8] sm:$0xff]   ;;  %v3731_v33 = vunpack.c.l.bf16 %v3891_v19 }
 0x1db   : > { %v2351_v48 = vmax.f32 %v2223_v35, 0.0  ;;  %v2415_v49 = vmax.f32 %v2287_v36, 0.0  ;;  %v2090_v50 = vmul.f32 %v4958_v37, %v1746_v21  ;;  %v2154_v51 = vmul.f32 %v4958_v37, %v2002_v38 }
 0x1dc   : > { %2991 = vst.msk [vmem:[%s4418_s6 + $0xe0] sm:$0xf] %vm2934_vm1, %v3533_v41  ;;  %3055 = vst.msk [vmem:[%s4418_s6 + $0x1e0] sm:$0xf] %vm2934_vm1, %v3597_v42  ;;  %v1748_v52 = vpop.f32.mrf.mxu0  ;;  %v2004_v53 = vpop.f32.mrf.mxu1  ;;  %v3859_v34 = vunpack.c.l.bf16 %v3923_v20  ;;  %v3732_v41 = vunpack.c.h.bf16 %v3891_v19  ;;  %v3860_v42 = vunpack.c.h.bf16 %v3923_v20 }
 0x1dd   : > { %v3534_v56 = vpack.c.bf16 %v2351_v48, %v2351_v48  ;;  %v3598_v58 = vpack.c.bf16 %v2415_v49, %v2415_v49  ;;  %v2224_v59 = vadd.f32 %v4965_v47, %v2090_v50  ;;  %v2288_v60 = vadd.f32 %v4965_v47, %v2154_v51 }
 0x1de   : > { %v1749_v61 = vadd.f32 %v3724_v45, %v1748_v52  ;;  %v2005_v62 = vadd.f32 %v3852_v46, %v2004_v53  ;;  %v1750_v63 = vpop.f32.mrf.mxu0  ;;  %v2006_v0 = vpop.f32.mrf.mxu1 }
 0x1df   : > { %2992 = vst.msk [vmem:[%s4418_s6 + $0xe4] sm:$0xf] %vm2934_vm1, %v3534_v56  ;;  %3056 = vst.msk [vmem:[%s4418_s6 + $0x1e4] sm:$0xf] %vm2934_vm1, %v3598_v58  ;;  %v2352_v1 = vmax.f32 %v2224_v59, 0.0  ;;  %v2416_v2 = vmax.f32 %v2288_v60, 0.0 }
 0x1e0   : > { %v2091_v4 = vmul.f32 %v4958_v37, %v1749_v61  ;;  %v2155_v5 = vmul.f32 %v4958_v37, %v2005_v62  ;;  %v1753_v6 = vpop.f32.mrf.mxu0  ;;  %v2009_v7 = vpop.f32.mrf.mxu1 }
 0x1e1   : > { %v3535_v57 = vpack.c.bf16 %v2352_v1, %v2352_v1  ;;  %v3599_v10 = vpack.c.bf16 %v2416_v2, %v2416_v2  ;;  %v1754_v12 = vadd.f32 %v3727_v54, %v1753_v6  ;;  %v2010_v3 = vadd.f32 %v3855_v55, %v2009_v7 }
 0x1e2   : > { %v2225_v13 = vadd.f32 %v4965_v47, %v2091_v4  ;;  %v2289_v14 = vadd.f32 %v4965_v47, %v2155_v5  ;;  %v1755_v15 = vpop.f32.mrf.mxu0  ;;  %v2011_v16 = vpop.f32.mrf.mxu1 }
 0x1e3   : > { %2993 = vst.msk [vmem:[%s4418_s6 + $0xe8] sm:$0xf] %vm2934_vm1, %v3535_v57  ;;  %3057 = vst.msk [vmem:[%s4418_s6 + $0x1e8] sm:$0xf] %vm2934_vm1, %v3599_v10  ;;  %v2092_v17 = vmul.f32 %v4958_v37, %v1754_v12  ;;  %v2156_v18 = vmul.f32 %v4958_v37, %v2010_v3 }
 0x1e4   : > { %v2353_v22 = vmax.f32 %v2225_v13, 0.0  ;;  %v2417_v23 = vmax.f32 %v2289_v14, 0.0  ;;  %v1756_v24 = vpop.f32.mrf.mxu0  ;;  %v2012_v25 = vpop.f32.mrf.mxu1 }
 0x1e5   : > { %v2226_v26 = vadd.f32 %v4965_v47, %v2092_v17  ;;  %v2290_v27 = vadd.f32 %v4965_v47, %v2156_v18  ;;  %v1757_v28 = vadd.f32 %v3728_v8, %v1756_v24  ;;  %v2013_v29 = vadd.f32 %v3856_v9, %v2012_v25 }
 0x1e6   : > { %v3536_v30 = vpack.c.bf16 %v2353_v22, %v2353_v22  ;;  %v3600_v31 = vpack.c.bf16 %v2417_v23, %v2417_v23  ;;  %v1758_v32 = vpop.f32.mrf.mxu0  ;;  %v2014_v11 = vpop.f32.mrf.mxu1 }
 0x1e7   : > { %v2354_v35 = vmax.f32 %v2226_v26, 0.0  ;;  %v2418_v36 = vmax.f32 %v2290_v27, 0.0  ;;  %v2093_v21 = vmul.f32 %v4958_v37, %v1757_v28  ;;  %v2157_v38 = vmul.f32 %v4958_v37, %v2013_v29 }
 0x1e8   : > { %2994 = vst.msk [vmem:[%s4418_s6 + $0xec] sm:$0xf] %vm2934_vm1, %v3536_v30  ;;  %3058 = vst.msk [vmem:[%s4418_s6 + $0x1ec] sm:$0xf] %vm2934_vm1, %v3600_v31  ;;  %v1761_v39 = vpop.f32.mrf.mxu0  ;;  %v2017_v40 = vpop.f32.mrf.mxu1 }
 0x1e9   : > { %v3537_v43 = vpack.c.bf16 %v2354_v35, %v2354_v35  ;;  %v3601_v44 = vpack.c.bf16 %v2418_v36, %v2418_v36  ;;  %v2227_v45 = vadd.f32 %v4965_v47, %v2093_v21  ;;  %v2291_v46 = vadd.f32 %v4965_v47, %v2157_v38 }
 0x1ea   : > { %v1762_v48 = vadd.f32 %v3731_v33, %v1761_v39  ;;  %v2018_v49 = vadd.f32 %v3859_v34, %v2017_v40  ;;  %v1763_v50 = vpop.f32.mrf.mxu0  ;;  %v2019_v51 = vpop.f32.mrf.mxu1 }
 0x1eb   : > { %2995 = vst.msk [vmem:[%s4418_s6 + $0xf0] sm:$0xf] %vm2934_vm1, %v3537_v43  ;;  %3059 = vst.msk [vmem:[%s4418_s6 + $0x1f0] sm:$0xf] %vm2934_vm1, %v3601_v44  ;;  %v2355_v52 = vmax.f32 %v2227_v45, 0.0  ;;  %v2419_v53 = vmax.f32 %v2291_v46, 0.0 }
 0x1ec   : > { %v2094_v54 = vmul.f32 %v4958_v37, %v1762_v48  ;;  %v2158_v55 = vmul.f32 %v4958_v37, %v2018_v49  ;;  %v1764_v56 = vpop.f32.mrf.mxu0  ;;  %v2020_v58 = vpop.f32.mrf.mxu1 }
 0x1ed   : > { %v3538_v59 = vpack.c.bf16 %v2355_v52, %v2355_v52  ;;  %v3602_v60 = vpack.c.bf16 %v2419_v53, %v2419_v53  ;;  %v1765_v61 = vadd.f32 %v3732_v41, %v1764_v56  ;;  %v2021_v62 = vadd.f32 %v3860_v42, %v2020_v58 }
 0x1ee   : > { %v2228_v63 = vadd.f32 %v4965_v47, %v2094_v54  ;;  %v2292_v0 = vadd.f32 %v4965_v47, %v2158_v55  ;;  %v1766_v1 = vpop.f32.mrf.mxu0  ;;  %v2022_v2 = vpop.f32.mrf.mxu1 }
 0x1ef   : > { %2996 = vst.msk [vmem:[%s4418_s6 + $0xf4] sm:$0xf] %vm2934_vm1, %v3538_v59  ;;  %3060 = vst.msk [vmem:[%s4418_s6 + $0x1f4] sm:$0xf] %vm2934_vm1, %v3602_v60  ;;  %v2095_v4 = vmul.f32 %v4958_v37, %v1765_v61  ;;  %v2159_v5 = vmul.f32 %v4958_v37, %v2021_v62 }
 0x1f0   : > { %v2356_v6 = vmax.f32 %v2228_v63, 0.0  ;;  %v2420_v7 = vmax.f32 %v2292_v0, 0.0 }
 0x1f1   : > { %v2229_v8 = vadd.f32 %v4965_v47, %v2095_v4  ;;  %v2293_v9 = vadd.f32 %v4965_v47, %v2159_v5 }
 0x1f2   : > { %v3539_v57 = vpack.c.bf16 %v2356_v6, %v2356_v6  ;;  %v3603_v10 = vpack.c.bf16 %v2420_v7, %v2420_v7 }
 0x1f3   : > { %v2357_v12 = vmax.f32 %v2229_v8, 0.0  ;;  %v2421_v3 = vmax.f32 %v2293_v9, 0.0 }
 0x1f4   : > { %2997 = vst.msk [vmem:[%s4418_s6 + $0xf8] sm:$0xf] %vm2934_vm1, %v3539_v57  ;;  %3061 = vst.msk [vmem:[%s4418_s6 + $0x1f8] sm:$0xf] %vm2934_vm1, %v3603_v10 }
 0x1f5   : > { %v3540_v13 = vpack.c.bf16 %v2357_v12, %v2357_v12  ;;  %v3604_v14 = vpack.c.bf16 %v2421_v3, %v2421_v3 }
 0x1f7   : > { %2998 = vst.msk [vmem:[%s4418_s6 + $0xfc] sm:$0xf] %vm2934_vm1, %v3540_v13  ;;  %3062 = vst.msk [vmem:[%s4418_s6 + $0x1fc] sm:$0xf] %vm2934_vm1, %v3604_v14 }
 0x1f8 PF: > { %s15_s18 = sadd.s32 1, %s4146_s18  }
 0x1f9   : > { %p12_p4 = scmp.ge.s32.totalorder %s15_s18, 4  }
 0x1fb   :  { %14 = sbr.rel (!%p12_p4) target bundleno = 1 (0x1), region = 73 }

// kernel: wideresnet_forward.10
= control target key start
LH: loop header
LB: loop body
LE: loop exit
PB: predicated region body
PF: predicated region fallthrough
CT: control target
= control target key end

     0   :  { %s1831_s21 = smov 0   ;;  %s2181_s0 = inlined_call_operand.vmem [shape: bf16[512,144], index: 0, kind: input, shape index: {}]   ;;  %s2182_s1 = inlined_call_operand.vmem [shape: bf16[144,32], index: 1, kind: input, shape index: {}]   ;;  %s2183_s2 = inlined_call_operand.vmem [shape: bf16[144,32], index: 2, kind: input, shape index: {}]   ;;  %s2184_s3 = inlined_call_operand.vmem [shape: f32[1,32], index: 3, kind: input, shape index: {}]   ;;  %s2185_s4 = inlined_call_operand.vmem [shape: f32[1,32], index: 4, kind: input, shape index: {}]   ;;  %s2186_s5 = inlined_call_operand.vmem [shape: bf16[512,32], index: 5, kind: output, shape index: {0}]   ;;  %s2187_s6 = inlined_call_operand.vmem [shape: bf16[512,32], index: 6, kind: output, shape index: {1}]  }
   0x1 LB: > { %s1485_s22 = sadd.s32 4294967295, %s1793_s21   ;;  %p1489_p0 = scmp.ge.s32.totalorder %s1793_s21, 1  ;;  %s1793_s21 = sphi %s1831_s21, %s17_s21  }
   0x2   : > { %p217_p1 = scmp.lt.s32.totalorder %s1793_s21, 3 }
   0x4   : > { %p218_p2 = pnand %p1489_p0, %p217_p1 }
   0x5   : > { %s1490_s29 = sshll.u32 (!%p218_p2), %s1485_s22, 5 }
   0x6   : > { %221 = sbr.rel (%p218_p2) target bundleno = 374 (0x176), region = 40  ;;  %p254_p3 = scmp.lt.s32.totalorder (!%p218_p2), %s1490_s29, 63 }
   0xb   : > { %v1721_v0 = vld [vmem:[%s2182_s1 + $0x38] sm:$0xff]   ;;  %v1795_v1 = vmov 0   ;;  %v1723_v3 = vld [vmem:[%s2182_s1 + $0x30] sm:$0xff]   ;;  %v1725_v5 = vld [vmem:[%s2182_s1 + $0x28] sm:$0xff]   ;;  %s2189_s29 = smov (!%p254_p3, %s1490_s29), 63  ;;  %vm521_vm0 = vcmask 130048  }
   0xc   : > { %570 = vmatprep.subr.bf16.mxu0 %v1795_v1  ;;  %803 = vmatprep.subr.bf16.mxu1 %v1795_v1  ;;  %v1722_v2 = vld [vmem:[%s2183_s2 + $0x38] sm:$0xff]   ;;  %v1724_v4 = vld [vmem:[%s2183_s2 + $0x30] sm:$0xff]   ;;  %v1726_v6 = vld [vmem:[%s2183_s2 + $0x28] sm:$0xff]   ;;  %s1647_s16 = sshll.u32 %s2189_s29, 3  ;;  %s1494_s18 = sshll.u32 %s2189_s29, 2  ;;  %vm1202_vm1 = vcmask 257024  }
   0xd   : > { %571 = vmatpush1.bf16.msra.mxu0 %v1721_v0  ;;  %804 = vmatpush1.bf16.msra.mxu1 %v1722_v2  ;;  %v1727_v7 = vld [vmem:[%s2182_s1 + $0x20] sm:$0xff]   ;;  %v1729_v9 = vld [vmem:[%s2182_s1 + $0x18] sm:$0xff]   ;;  %s1875_s24 = scalar_lea.vmem %s2181_s0, %s1647_s16  ;;  %v1731_v11 = vld [vmem:[%s2182_s1 + $0x10] sm:$0xff]   ;;  %s1989_s28 = scalar_lea.vmem %s2186_s5, %s1494_s18 }
   0xe   : > { %572 = vmatprep.subr.bf16.mxu0 %v1795_v1  ;;  %805 = vmatprep.subr.bf16.mxu1 %v1795_v1  ;;  %v1728_v8 = vld [vmem:[%s2183_s2 + $0x20] sm:$0xff]   ;;  %v1730_v10 = vld [vmem:[%s2183_s2 + $0x18] sm:$0xff]   ;;  %v1732_v12 = vld [vmem:[%s2183_s2 + $0x10] sm:$0xff]  }
   0xf   : > { %v1741_v13 = vld [vmem:[%s1875_s24 + $0x4] ss:$8 sps:$4 sm:$0xff]   ;;  %v1739_v20 = vld [vmem:[%s1875_s24] ss:$8 sps:$4 sm:$0xff]   ;;  %v1742_v21 = vld [vmem:[%s1875_s24 + $0x14] ss:$8 sps:$4 sm:$0xff]  }
  0x10   : > { %1538 = vmatprep.mubr.msk.bf16.mxu0 %vm521_vm0, %v1741_v13  ;;  %1563 = vmatprep.mubr.msk.bf16.mxu1 %vm521_vm0, %v1741_v13  ;;  %v1733_v14 = vld [vmem:[%s2182_s1 + $0x8] sm:$0xff]   ;;  %v1735_v16 = vld [vmem:[%s2182_s1] sm:$0xff]   ;;  %v1744_v22 = vld [vmem:[%s1875_s24 + $0x10] ss:$8 sps:$4 sm:$0xff]  }
  0x11   : > { %573 = vmatpush1.bf16.msra.mxu0 %v1723_v3  ;;  %806 = vmatpush1.bf16.msra.mxu1 %v1724_v4  ;;  %v1734_v15 = vld [vmem:[%s2183_s2 + $0x8] sm:$0xff]   ;;  %v1736_v17 = vld [vmem:[%s2183_s2] sm:$0xff]   ;;  %v1748_v25 = vld [vmem:[%s1875_s24 + $0x34] ss:$8 sps:$4 sm:$0xff]  }
  0x12   : > { %574 = vmatprep.subr.bf16.mxu0 %v1795_v1  ;;  %807 = vmatprep.subr.bf16.mxu1 %v1795_v1  ;;  %v1737_v18 = vld [vmem:[%s2182_s1 + $0x40] sm:$0xff]   ;;  %v1750_v26 = vld [vmem:[%s1875_s24 + $0x30] ss:$8 sps:$4 sm:$0xff]   ;;  %v1754_v29 = vld [vmem:[%s1875_s24 + $0x54] ss:$8 sps:$4 sm:$0xff]  }
  0x13   : > { %v1738_v19 = vld [vmem:[%s2183_s2 + $0x40] sm:$0xff]   ;;  %v1756_v30 = vld [vmem:[%s1875_s24 + $0x50] ss:$8 sps:$4 sm:$0xff]   ;;  %v1760_v33 = vld [vmem:[%s1875_s24 + $0x74] ss:$8 sps:$4 sm:$0xff]  }
  0x14   : > { %v1745_v23 = vld [vmem:[%s1875_s24 + $0x24] ss:$8 sps:$4 sm:$0xff]   ;;  %v1747_v24 = vld [vmem:[%s1875_s24 + $0x20] ss:$8 sps:$4 sm:$0xff]   ;;  %v1762_v34 = vld [vmem:[%s1875_s24 + $0x70] ss:$8 sps:$4 sm:$0xff]  }
  0x15   : > { %575 = vmatpush1.bf16.msra.mxu0 %v1725_v5  ;;  %808 = vmatpush1.bf16.msra.mxu1 %v1726_v6  ;;  %v1751_v27 = vld [vmem:[%s1875_s24 + $0x44] ss:$8 sps:$4 sm:$0xff]   ;;  %v1753_v28 = vld [vmem:[%s1875_s24 + $0x40] ss:$8 sps:$4 sm:$0xff]   ;;  %v1766_v37 = vld [vmem:[%s1875_s24 + $0x94] ss:$8 sps:$4 sm:$0xff]  }
  0x16   : > { %576 = vmatprep.subr.bf16.mxu0 %v1795_v1  ;;  %809 = vmatprep.subr.bf16.mxu1 %v1795_v1  ;;  %v1757_v31 = vld [vmem:[%s1875_s24 + $0x64] ss:$8 sps:$4 sm:$0xff]   ;;  %v1759_v32 = vld [vmem:[%s1875_s24 + $0x60] ss:$8 sps:$4 sm:$0xff]   ;;  %v1768_v38 = vld [vmem:[%s1875_s24 + $0x90] ss:$8 sps:$4 sm:$0xff]  }
  0x17   : > { %v1763_v35 = vld [vmem:[%s1875_s24 + $0x84] ss:$8 sps:$4 sm:$0xff]   ;;  %v1765_v36 = vld [vmem:[%s1875_s24 + $0x80] ss:$8 sps:$4 sm:$0xff]   ;;  %v1772_v41 = vld [vmem:[%s1875_s24 + $0xb4] ss:$8 sps:$4 sm:$0xff]  }
  0x18   : > { %v1769_v39 = vld [vmem:[%s1875_s24 + $0xa4] ss:$8 sps:$4 sm:$0xff]   ;;  %v1771_v40 = vld [vmem:[%s1875_s24 + $0xa0] ss:$8 sps:$4 sm:$0xff]   ;;  %v1774_v42 = vld [vmem:[%s1875_s24 + $0xb0] ss:$8 sps:$4 sm:$0xff]  }
  0x19   : > { %577 = vmatpush1.bf16.msra.mxu0 %v1727_v7  ;;  %810 = vmatpush1.bf16.msra.mxu1 %v1728_v8  ;;  %v1775_v43 = vld [vmem:[%s1875_s24 + $0xc4] ss:$8 sps:$4 sm:$0xff]   ;;  %v1777_v44 = vld [vmem:[%s1875_s24 + $0xc0] ss:$8 sps:$4 sm:$0xff]   ;;  %v1778_v45 = vld [vmem:[%s1875_s24 + $0xd4] ss:$8 sps:$4 sm:$0xff]  }
  0x1a   : > { %578 = vmatprep.subr.bf16.mxu0 %v1795_v1  ;;  %811 = vmatprep.subr.bf16.mxu1 %v1795_v1  ;;  %v1780_v46 = vld [vmem:[%s1875_s24 + $0xd0] ss:$8 sps:$4 sm:$0xff]   ;;  %v1781_v47 = vld [vmem:[%s1875_s24 + $0xe4] ss:$8 sps:$4 sm:$0xff]   ;;  %v1783_v48 = vld [vmem:[%s1875_s24 + $0xe0] ss:$8 sps:$4 sm:$0xff]  }
  0x1b   : > { %v1784_v49 = vld [vmem:[%s1875_s24 + $0xf4] ss:$8 sps:$4 sm:$0xff]   ;;  %v1786_v50 = vld [vmem:[%s1875_s24 + $0xf0] ss:$8 sps:$4 sm:$0xff]   ;;  %v1969_v51 = vld [vmem:[%s2184_s3] ss:$0 sm:$0xff]  ;;  %s1980_s24 = scalar_lea.vmem %s2187_s6, %s1494_s18 }
  0x1c   : > { %v1974_v53 = vld [vmem:[%s2185_s4] ss:$0 sm:$0xff] }
  0x1d   : > { %579 = vmatpush1.bf16.msra.mxu0 %v1729_v9  ;;  %812 = vmatpush1.bf16.msra.mxu1 %v1730_v10 }
  0x1e   : > { %580 = vmatprep.subr.bf16.mxu0 %v1795_v1  ;;  %813 = vmatprep.subr.bf16.mxu1 %v1795_v1 }
  0x21   : > { %581 = vmatpush1.bf16.msra.mxu0 %v1731_v11  ;;  %814 = vmatpush1.bf16.msra.mxu1 %v1732_v12 }
  0x22   : > { %582 = vmatprep.subr.bf16.mxu0 %v1795_v1  ;;  %815 = vmatprep.subr.bf16.mxu1 %v1795_v1 }
  0x25   : > { %583 = vmatpush1.bf16.msra.mxu0 %v1733_v14  ;;  %816 = vmatpush1.bf16.msra.mxu1 %v1734_v15 }
  0x26   : > { %584 = vmatprep.subr.bf16.mxu0 %v1795_v1  ;;  %817 = vmatprep.subr.bf16.mxu1 %v1795_v1 }
  0x29   : > { %585 = vmatpush1.bf16.msra.mxu0 %v1735_v16  ;;  %818 = vmatpush1.bf16.msra.mxu1 %v1736_v17 }
  0x2a   : > { %600 = vmatprep.subr.bf16.mxu0 %v1795_v1  ;;  %833 = vmatprep.subr.bf16.mxu1 %v1795_v1 }
  0x2d   : > { %601 = vmatpush2.bf16.msra.mxu0 %v1737_v18  ;;  %834 = vmatpush2.bf16.msra.mxu1 %v1738_v19 }
  0x30   : > { %603 = vmatmul.mubr.bf16.vlgmr.msra.gmra.mxu0 %v1739_v20  ;;  %836 = vmatmul.mubr.bf16.vlgmr.msra.gmra.mxu1 %v1739_v20 }
  0x31   : > { %1539 = vmatprep.mubr.msk.bf16.mxu0 %vm521_vm0, %v1742_v21  ;;  %1564 = vmatprep.mubr.msk.bf16.mxu1 %vm521_vm0, %v1742_v21 }
  0x38   : > { %611 = vmatmul.mubr.bf16.gmra.mxu0 %v1744_v22  ;;  %844 = vmatmul.mubr.bf16.gmra.mxu1 %v1744_v22 }
  0x39   : > { %1540 = vmatprep.mubr.msk.bf16.mxu0 %vm521_vm0, %v1745_v23  ;;  %1565 = vmatprep.mubr.msk.bf16.mxu1 %vm521_vm0, %v1745_v23 }
  0x40   : > { %619 = vmatmul.mubr.bf16.gmra.mxu0 %v1747_v24  ;;  %852 = vmatmul.mubr.bf16.gmra.mxu1 %v1747_v24 }
  0x41   : > { %1541 = vmatprep.mubr.msk.bf16.mxu0 %vm521_vm0, %v1748_v25  ;;  %1566 = vmatprep.mubr.msk.bf16.mxu1 %vm521_vm0, %v1748_v25 }
  0x48   : > { %627 = vmatmul.mubr.bf16.gmra.mxu0 %v1750_v26  ;;  %860 = vmatmul.mubr.bf16.gmra.mxu1 %v1750_v26 }
  0x49   : > { %1542 = vmatprep.mubr.msk.bf16.mxu0 %vm521_vm0, %v1751_v27  ;;  %1567 = vmatprep.mubr.msk.bf16.mxu1 %vm521_vm0, %v1751_v27 }
  0x50   : > { %635 = vmatmul.mubr.bf16.gmra.mxu0 %v1753_v28  ;;  %868 = vmatmul.mubr.bf16.gmra.mxu1 %v1753_v28 }
  0x51   : > { %1543 = vmatprep.mubr.msk.bf16.mxu0 %vm521_vm0, %v1754_v29  ;;  %1568 = vmatprep.mubr.msk.bf16.mxu1 %vm521_vm0, %v1754_v29 }
  0x58   : > { %643 = vmatmul.mubr.bf16.gmra.mxu0 %v1756_v30  ;;  %876 = vmatmul.mubr.bf16.gmra.mxu1 %v1756_v30 }
  0x59   : > { %1544 = vmatprep.mubr.msk.bf16.mxu0 %vm521_vm0, %v1757_v31  ;;  %1569 = vmatprep.mubr.msk.bf16.mxu1 %vm521_vm0, %v1757_v31 }
  0x60   : > { %651 = vmatmul.mubr.bf16.gmra.mxu0 %v1759_v32  ;;  %884 = vmatmul.mubr.bf16.gmra.mxu1 %v1759_v32 }
  0x61   : > { %1545 = vmatprep.mubr.msk.bf16.mxu0 %vm521_vm0, %v1760_v33  ;;  %1570 = vmatprep.mubr.msk.bf16.mxu1 %vm521_vm0, %v1760_v33 }
  0x68   : > { %659 = vmatmul.mubr.bf16.gmra.mxu0 %v1762_v34  ;;  %892 = vmatmul.mubr.bf16.gmra.mxu1 %v1762_v34 }
  0x69   : > { %1546 = vmatprep.mubr.msk.bf16.mxu0 %vm521_vm0, %v1763_v35  ;;  %1571 = vmatprep.mubr.msk.bf16.mxu1 %vm521_vm0, %v1763_v35 }
  0x70   : > { %667 = vmatmul.mubr.bf16.gmra.mxu0 %v1765_v36  ;;  %900 = vmatmul.mubr.bf16.gmra.mxu1 %v1765_v36 }
  0x71   : > { %1547 = vmatprep.mubr.msk.bf16.mxu0 %vm521_vm0, %v1766_v37  ;;  %1572 = vmatprep.mubr.msk.bf16.mxu1 %vm521_vm0, %v1766_v37 }
  0x78   : > { %675 = vmatmul.mubr.bf16.gmra.mxu0 %v1768_v38  ;;  %908 = vmatmul.mubr.bf16.gmra.mxu1 %v1768_v38 }
  0x79   : > { %1548 = vmatprep.mubr.msk.bf16.mxu0 %vm521_vm0, %v1769_v39  ;;  %1573 = vmatprep.mubr.msk.bf16.mxu1 %vm521_vm0, %v1769_v39 }
  0x80   : > { %683 = vmatmul.mubr.bf16.gmra.mxu0 %v1771_v40  ;;  %916 = vmatmul.mubr.bf16.gmra.mxu1 %v1771_v40 }
  0x81   : > { %1549 = vmatprep.mubr.msk.bf16.mxu0 %vm521_vm0, %v1772_v41  ;;  %1574 = vmatprep.mubr.msk.bf16.mxu1 %vm521_vm0, %v1772_v41 }
  0x88   : > { %691 = vmatmul.mubr.bf16.gmra.mxu0 %v1774_v42  ;;  %924 = vmatmul.mubr.bf16.gmra.mxu1 %v1774_v42 }
  0x89   : > { %1550 = vmatprep.mubr.msk.bf16.mxu0 %vm521_vm0, %v1775_v43  ;;  %1575 = vmatprep.mubr.msk.bf16.mxu1 %vm521_vm0, %v1775_v43 }
  0x90   : > { %699 = vmatmul.mubr.bf16.gmra.mxu0 %v1777_v44  ;;  %932 = vmatmul.mubr.bf16.gmra.mxu1 %v1777_v44 }
  0x91   : > { %1551 = vmatprep.mubr.msk.bf16.mxu0 %vm521_vm0, %v1778_v45  ;;  %1576 = vmatprep.mubr.msk.bf16.mxu1 %vm521_vm0, %v1778_v45 }
  0x98   : > { %707 = vmatmul.mubr.bf16.gmra.mxu0 %v1780_v46  ;;  %940 = vmatmul.mubr.bf16.gmra.mxu1 %v1780_v46 }
  0x99   : > { %1552 = vmatprep.mubr.msk.bf16.mxu0 %vm521_vm0, %v1781_v47  ;;  %1577 = vmatprep.mubr.msk.bf16.mxu1 %vm521_vm0, %v1781_v47 }
  0xa0   : > { %715 = vmatmul.mubr.bf16.gmra.mxu0 %v1783_v48  ;;  %948 = vmatmul.mubr.bf16.gmra.mxu1 %v1783_v48 }
  0xa1   : > { %1553 = vmatprep.mubr.msk.bf16.mxu0 %vm521_vm0, %v1784_v49  ;;  %1578 = vmatprep.mubr.msk.bf16.mxu1 %vm521_vm0, %v1784_v49 }
  0xa8   : > { %723 = vmatmul.mubr.bf16.gmra.mxu0 %v1786_v50  ;;  %956 = vmatmul.mubr.bf16.gmra.mxu1 %v1786_v50 }
  0xf0   : > { %v604_v52 = vpop.f32.mrf.mxu0  ;;  %v837_v55 = vpop.f32.mrf.mxu1 }
  0xf1   : > { %v972_v54 = vmul.f32 %v1969_v51, %v604_v52  ;;  %v1680_v56 = vpack.c.bf16 %v837_v55, %v837_v55 }
  0xf2   : > { %v606_v57 = vpop.f32.mrf.mxu0  ;;  %v839_v59 = vpop.f32.mrf.mxu1 }
  0xf3   : > { %v1010_v58 = vadd.f32 %v1974_v53, %v972_v54  ;;  %1363 = vst.msk [vmem:[%s1980_s24] sm:$0xf] %vm1202_vm1, %v1680_v56 }
  0xf4   : > { %v607_v60 = vpop.f32.mrf.mxu0  ;;  %v840_v63 = vpop.f32.mrf.mxu1 }
  0xf5   : > { %v1042_v61 = vmax.f32 %v1010_v58, 0.0  ;;  %v973_v62 = vmul.f32 %v1969_v51, %v607_v60  ;;  %v1681_v0 = vpack.c.bf16 %v840_v63, %v840_v63 }
  0xf6   : > { %v609_v1 = vpop.f32.mrf.mxu0  ;;  %v842_v4 = vpop.f32.mrf.mxu1 }
  0xf7   : > { %v1648_v2 = vpack.c.bf16 %v1042_v61, %v1042_v61  ;;  %v1011_v3 = vadd.f32 %v1974_v53, %v973_v62  ;;  %1364 = vst.msk [vmem:[%s1980_s24 + $0x4] sm:$0xf] %vm1202_vm1, %v1681_v0 }
  0xf8   : > { %v612_v5 = vpop.f32.mrf.mxu0  ;;  %v845_v8 = vpop.f32.mrf.mxu1 }
  0xf9   : > { %1203 = vst.msk [vmem:[%s1989_s28] sm:$0xf] %vm1202_vm1, %v1648_v2  ;;  %v1043_v6 = vmax.f32 %v1011_v3, 0.0  ;;  %v974_v7 = vmul.f32 %v1969_v51, %v612_v5  ;;  %v1682_v9 = vpack.c.bf16 %v845_v8, %v845_v8 }
  0xfa   : > { %v614_v10 = vpop.f32.mrf.mxu0  ;;  %v847_v13 = vpop.f32.mrf.mxu1 }
  0xfb   : > { %v1649_v11 = vpack.c.bf16 %v1043_v6, %v1043_v6  ;;  %v1012_v12 = vadd.f32 %v1974_v53, %v974_v7  ;;  %1365 = vst.msk [vmem:[%s1980_s24 + $0x8] sm:$0xf] %vm1202_vm1, %v1682_v9 }
  0xfc   : > { %v615_v14 = vpop.f32.mrf.mxu0  ;;  %v848_v17 = vpop.f32.mrf.mxu1 }
  0xfd   : > { %1204 = vst.msk [vmem:[%s1989_s28 + $0x4] sm:$0xf] %vm1202_vm1, %v1649_v11  ;;  %v1044_v15 = vmax.f32 %v1012_v12, 0.0  ;;  %v975_v16 = vmul.f32 %v1969_v51, %v615_v14  ;;  %v1683_v18 = vpack.c.bf16 %v848_v17, %v848_v17 }
  0xfe   : > { %v617_v19 = vpop.f32.mrf.mxu0  ;;  %v850_v22 = vpop.f32.mrf.mxu1 }
  0xff   : > { %v1650_v20 = vpack.c.bf16 %v1044_v15, %v1044_v15  ;;  %v1013_v21 = vadd.f32 %v1974_v53, %v975_v16  ;;  %1366 = vst.msk [vmem:[%s1980_s24 + $0xc] sm:$0xf] %vm1202_vm1, %v1683_v18 }
 0x100   : > { %v620_v23 = vpop.f32.mrf.mxu0  ;;  %v853_v26 = vpop.f32.mrf.mxu1 }
 0x101   : > { %1205 = vst.msk [vmem:[%s1989_s28 + $0x8] sm:$0xf] %vm1202_vm1, %v1650_v20  ;;  %v1045_v24 = vmax.f32 %v1013_v21, 0.0  ;;  %v976_v25 = vmul.f32 %v1969_v51, %v620_v23  ;;  %v1684_v27 = vpack.c.bf16 %v853_v26, %v853_v26 }
 0x102   : > { %v622_v28 = vpop.f32.mrf.mxu0  ;;  %v855_v31 = vpop.f32.mrf.mxu1 }
 0x103   : > { %v1651_v29 = vpack.c.bf16 %v1045_v24, %v1045_v24  ;;  %v1014_v30 = vadd.f32 %v1974_v53, %v976_v25  ;;  %1367 = vst.msk [vmem:[%s1980_s24 + $0x10] sm:$0xf] %vm1202_vm1, %v1684_v27 }
 0x104   : > { %v623_v32 = vpop.f32.mrf.mxu0  ;;  %v856_v35 = vpop.f32.mrf.mxu1 }
 0x105   : > { %1206 = vst.msk [vmem:[%s1989_s28 + $0xc] sm:$0xf] %vm1202_vm1, %v1651_v29  ;;  %v1046_v33 = vmax.f32 %v1014_v30, 0.0  ;;  %v977_v34 = vmul.f32 %v1969_v51, %v623_v32  ;;  %v1685_v36 = vpack.c.bf16 %v856_v35, %v856_v35 }
 0x106   : > { %v625_v37 = vpop.f32.mrf.mxu0  ;;  %v858_v40 = vpop.f32.mrf.mxu1 }
 0x107   : > { %v1652_v38 = vpack.c.bf16 %v1046_v33, %v1046_v33  ;;  %v1015_v39 = vadd.f32 %v1974_v53, %v977_v34  ;;  %1368 = vst.msk [vmem:[%s1980_s24 + $0x14] sm:$0xf] %vm1202_vm1, %v1685_v36 }
 0x108   : > { %v628_v41 = vpop.f32.mrf.mxu0  ;;  %v861_v44 = vpop.f32.mrf.mxu1 }
 0x109   : > { %1207 = vst.msk [vmem:[%s1989_s28 + $0x10] sm:$0xf] %vm1202_vm1, %v1652_v38  ;;  %v1047_v42 = vmax.f32 %v1015_v39, 0.0  ;;  %v978_v43 = vmul.f32 %v1969_v51, %v628_v41  ;;  %v1686_v45 = vpack.c.bf16 %v861_v44, %v861_v44 }
 0x10a   : > { %v630_v46 = vpop.f32.mrf.mxu0  ;;  %v863_v49 = vpop.f32.mrf.mxu1 }
 0x10b   : > { %v1653_v47 = vpack.c.bf16 %v1047_v42, %v1047_v42  ;;  %v1016_v48 = vadd.f32 %v1974_v53, %v978_v43  ;;  %1369 = vst.msk [vmem:[%s1980_s24 + $0x18] sm:$0xf] %vm1202_vm1, %v1686_v45 }
 0x10c   : > { %v631_v50 = vpop.f32.mrf.mxu0  ;;  %v864_v55 = vpop.f32.mrf.mxu1 }
 0x10d   : > { %1208 = vst.msk [vmem:[%s1989_s28 + $0x14] sm:$0xf] %vm1202_vm1, %v1653_v47  ;;  %v1048_v52 = vmax.f32 %v1016_v48, 0.0  ;;  %v979_v54 = vmul.f32 %v1969_v51, %v631_v50  ;;  %v1687_v56 = vpack.c.bf16 %v864_v55, %v864_v55 }
 0x10e   : > { %v633_v57 = vpop.f32.mrf.mxu0  ;;  %v866_v60 = vpop.f32.mrf.mxu1 }
 0x10f   : > { %v1654_v58 = vpack.c.bf16 %v1048_v52, %v1048_v52  ;;  %v1017_v59 = vadd.f32 %v1974_v53, %v979_v54  ;;  %1370 = vst.msk [vmem:[%s1980_s24 + $0x1c] sm:$0xf] %vm1202_vm1, %v1687_v56 }
 0x110   : > { %v636_v61 = vpop.f32.mrf.mxu0  ;;  %v869_v0 = vpop.f32.mrf.mxu1 }
 0x111   : > { %1209 = vst.msk [vmem:[%s1989_s28 + $0x18] sm:$0xf] %vm1202_vm1, %v1654_v58  ;;  %v1049_v62 = vmax.f32 %v1017_v59, 0.0  ;;  %v980_v63 = vmul.f32 %v1969_v51, %v636_v61  ;;  %v1688_v1 = vpack.c.bf16 %v869_v0, %v869_v0 }
 0x112   : > { %v638_v2 = vpop.f32.mrf.mxu0  ;;  %v871_v5 = vpop.f32.mrf.mxu1 }
 0x113   : > { %v1655_v3 = vpack.c.bf16 %v1049_v62, %v1049_v62  ;;  %v1018_v4 = vadd.f32 %v1974_v53, %v980_v63  ;;  %1371 = vst.msk [vmem:[%s1980_s24 + $0x20] sm:$0xf] %vm1202_vm1, %v1688_v1 }
 0x114   : > { %v639_v6 = vpop.f32.mrf.mxu0  ;;  %v872_v9 = vpop.f32.mrf.mxu1 }
 0x115   : > { %1210 = vst.msk [vmem:[%s1989_s28 + $0x1c] sm:$0xf] %vm1202_vm1, %v1655_v3  ;;  %v1050_v7 = vmax.f32 %v1018_v4, 0.0  ;;  %v981_v8 = vmul.f32 %v1969_v51, %v639_v6  ;;  %v1689_v10 = vpack.c.bf16 %v872_v9, %v872_v9 }
 0x116   : > { %v641_v11 = vpop.f32.mrf.mxu0  ;;  %v874_v14 = vpop.f32.mrf.mxu1 }
 0x117   : > { %v1656_v12 = vpack.c.bf16 %v1050_v7, %v1050_v7  ;;  %v1019_v13 = vadd.f32 %v1974_v53, %v981_v8  ;;  %1372 = vst.msk [vmem:[%s1980_s24 + $0x24] sm:$0xf] %vm1202_vm1, %v1689_v10 }
 0x118   : > { %v644_v15 = vpop.f32.mrf.mxu0  ;;  %v877_v18 = vpop.f32.mrf.mxu1 }
 0x119   : > { %1211 = vst.msk [vmem:[%s1989_s28 + $0x20] sm:$0xf] %vm1202_vm1, %v1656_v12  ;;  %v1051_v16 = vmax.f32 %v1019_v13, 0.0  ;;  %v982_v17 = vmul.f32 %v1969_v51, %v644_v15  ;;  %v1690_v19 = vpack.c.bf16 %v877_v18, %v877_v18 }
 0x11a   : > { %v646_v20 = vpop.f32.mrf.mxu0  ;;  %v879_v23 = vpop.f32.mrf.mxu1 }
 0x11b   : > { %v1657_v21 = vpack.c.bf16 %v1051_v16, %v1051_v16  ;;  %v1020_v22 = vadd.f32 %v1974_v53, %v982_v17  ;;  %1373 = vst.msk [vmem:[%s1980_s24 + $0x28] sm:$0xf] %vm1202_vm1, %v1690_v19 }
 0x11c   : > { %v647_v24 = vpop.f32.mrf.mxu0  ;;  %v880_v27 = vpop.f32.mrf.mxu1 }
 0x11d   : > { %1212 = vst.msk [vmem:[%s1989_s28 + $0x24] sm:$0xf] %vm1202_vm1, %v1657_v21  ;;  %v1052_v25 = vmax.f32 %v1020_v22, 0.0  ;;  %v983_v26 = vmul.f32 %v1969_v51, %v647_v24  ;;  %v1691_v28 = vpack.c.bf16 %v880_v27, %v880_v27 }
 0x11e   : > { %v649_v29 = vpop.f32.mrf.mxu0  ;;  %v882_v32 = vpop.f32.mrf.mxu1 }
 0x11f   : > { %v1658_v30 = vpack.c.bf16 %v1052_v25, %v1052_v25  ;;  %v1021_v31 = vadd.f32 %v1974_v53, %v983_v26  ;;  %1374 = vst.msk [vmem:[%s1980_s24 + $0x2c] sm:$0xf] %vm1202_vm1, %v1691_v28 }
 0x120   : > { %v652_v33 = vpop.f32.mrf.mxu0  ;;  %v885_v36 = vpop.f32.mrf.mxu1 }
 0x121   : > { %1213 = vst.msk [vmem:[%s1989_s28 + $0x28] sm:$0xf] %vm1202_vm1, %v1658_v30  ;;  %v1053_v34 = vmax.f32 %v1021_v31, 0.0  ;;  %v984_v35 = vmul.f32 %v1969_v51, %v652_v33  ;;  %v1692_v37 = vpack.c.bf16 %v885_v36, %v885_v36 }
 0x122   : > { %v654_v38 = vpop.f32.mrf.mxu0  ;;  %v887_v41 = vpop.f32.mrf.mxu1 }
 0x123   : > { %v1659_v39 = vpack.c.bf16 %v1053_v34, %v1053_v34  ;;  %v1022_v40 = vadd.f32 %v1974_v53, %v984_v35  ;;  %1375 = vst.msk [vmem:[%s1980_s24 + $0x30] sm:$0xf] %vm1202_vm1, %v1692_v37 }
 0x124   : > { %v655_v42 = vpop.f32.mrf.mxu0  ;;  %v888_v45 = vpop.f32.mrf.mxu1 }
 0x125   : > { %1214 = vst.msk [vmem:[%s1989_s28 + $0x2c] sm:$0xf] %vm1202_vm1, %v1659_v39  ;;  %v1054_v43 = vmax.f32 %v1022_v40, 0.0  ;;  %v985_v44 = vmul.f32 %v1969_v51, %v655_v42  ;;  %v1693_v46 = vpack.c.bf16 %v888_v45, %v888_v45 }
 0x126   : > { %v657_v47 = vpop.f32.mrf.mxu0  ;;  %v890_v50 = vpop.f32.mrf.mxu1 }
 0x127   : > { %v1660_v48 = vpack.c.bf16 %v1054_v43, %v1054_v43  ;;  %v1023_v49 = vadd.f32 %v1974_v53, %v985_v44  ;;  %1376 = vst.msk [vmem:[%s1980_s24 + $0x34] sm:$0xf] %vm1202_vm1, %v1693_v46 }
 0x128   : > { %v660_v52 = vpop.f32.mrf.mxu0  ;;  %v893_v56 = vpop.f32.mrf.mxu1 }
 0x129   : > { %1215 = vst.msk [vmem:[%s1989_s28 + $0x30] sm:$0xf] %vm1202_vm1, %v1660_v48  ;;  %v1055_v54 = vmax.f32 %v1023_v49, 0.0  ;;  %v986_v55 = vmul.f32 %v1969_v51, %v660_v52  ;;  %v1694_v57 = vpack.c.bf16 %v893_v56, %v893_v56 }
 0x12a   : > { %v662_v58 = vpop.f32.mrf.mxu0  ;;  %v895_v61 = vpop.f32.mrf.mxu1 }
 0x12b   : > { %v1661_v59 = vpack.c.bf16 %v1055_v54, %v1055_v54  ;;  %v1024_v60 = vadd.f32 %v1974_v53, %v986_v55  ;;  %1377 = vst.msk [vmem:[%s1980_s24 + $0x38] sm:$0xf] %vm1202_vm1, %v1694_v57 }
 0x12c   : > { %v663_v62 = vpop.f32.mrf.mxu0  ;;  %v896_v1 = vpop.f32.mrf.mxu1 }
 0x12d   : > { %1216 = vst.msk [vmem:[%s1989_s28 + $0x34] sm:$0xf] %vm1202_vm1, %v1661_v59  ;;  %v1056_v63 = vmax.f32 %v1024_v60, 0.0  ;;  %v987_v0 = vmul.f32 %v1969_v51, %v663_v62  ;;  %v1695_v2 = vpack.c.bf16 %v896_v1, %v896_v1 }
 0x12e   : > { %v665_v3 = vpop.f32.mrf.mxu0  ;;  %v898_v6 = vpop.f32.mrf.mxu1 }
 0x12f   : > { %v1662_v4 = vpack.c.bf16 %v1056_v63, %v1056_v63  ;;  %v1025_v5 = vadd.f32 %v1974_v53, %v987_v0  ;;  %1378 = vst.msk [vmem:[%s1980_s24 + $0x3c] sm:$0xf] %vm1202_vm1, %v1695_v2 }
 0x130   : > { %v668_v7 = vpop.f32.mrf.mxu0  ;;  %v901_v10 = vpop.f32.mrf.mxu1 }
 0x131   : > { %1217 = vst.msk [vmem:[%s1989_s28 + $0x38] sm:$0xf] %vm1202_vm1, %v1662_v4  ;;  %v1057_v8 = vmax.f32 %v1025_v5, 0.0  ;;  %v988_v9 = vmul.f32 %v1969_v51, %v668_v7  ;;  %v1696_v11 = vpack.c.bf16 %v901_v10, %v901_v10 }
 0x132   : > { %v670_v12 = vpop.f32.mrf.mxu0  ;;  %v903_v15 = vpop.f32.mrf.mxu1 }
 0x133   : > { %v1663_v13 = vpack.c.bf16 %v1057_v8, %v1057_v8  ;;  %v1026_v14 = vadd.f32 %v1974_v53, %v988_v9  ;;  %1379 = vst.msk [vmem:[%s1980_s24 + $0x40] sm:$0xf] %vm1202_vm1, %v1696_v11 }
 0x134   : > { %v671_v16 = vpop.f32.mrf.mxu0  ;;  %v904_v19 = vpop.f32.mrf.mxu1 }
 0x135   : > { %1218 = vst.msk [vmem:[%s1989_s28 + $0x3c] sm:$0xf] %vm1202_vm1, %v1663_v13  ;;  %v1058_v17 = vmax.f32 %v1026_v14, 0.0  ;;  %v989_v18 = vmul.f32 %v1969_v51, %v671_v16  ;;  %v1697_v20 = vpack.c.bf16 %v904_v19, %v904_v19 }
 0x136   : > { %v673_v21 = vpop.f32.mrf.mxu0  ;;  %v906_v24 = vpop.f32.mrf.mxu1 }
 0x137   : > { %v1664_v22 = vpack.c.bf16 %v1058_v17, %v1058_v17  ;;  %v1027_v23 = vadd.f32 %v1974_v53, %v989_v18  ;;  %1380 = vst.msk [vmem:[%s1980_s24 + $0x44] sm:$0xf] %vm1202_vm1, %v1697_v20 }
 0x138   : > { %v676_v25 = vpop.f32.mrf.mxu0  ;;  %v909_v28 = vpop.f32.mrf.mxu1 }
 0x139   : > { %1219 = vst.msk [vmem:[%s1989_s28 + $0x40] sm:$0xf] %vm1202_vm1, %v1664_v22  ;;  %v1059_v26 = vmax.f32 %v1027_v23, 0.0  ;;  %v990_v27 = vmul.f32 %v1969_v51, %v676_v25  ;;  %v1698_v29 = vpack.c.bf16 %v909_v28, %v909_v28 }
 0x13a   : > { %v678_v30 = vpop.f32.mrf.mxu0  ;;  %v911_v33 = vpop.f32.mrf.mxu1 }
 0x13b   : > { %v1665_v31 = vpack.c.bf16 %v1059_v26, %v1059_v26  ;;  %v1028_v32 = vadd.f32 %v1974_v53, %v990_v27  ;;  %1381 = vst.msk [vmem:[%s1980_s24 + $0x48] sm:$0xf] %vm1202_vm1, %v1698_v29 }
 0x13c   : > { %v679_v34 = vpop.f32.mrf.mxu0  ;;  %v912_v37 = vpop.f32.mrf.mxu1 }
 0x13d   : > { %1220 = vst.msk [vmem:[%s1989_s28 + $0x44] sm:$0xf] %vm1202_vm1, %v1665_v31  ;;  %v1060_v35 = vmax.f32 %v1028_v32, 0.0  ;;  %v991_v36 = vmul.f32 %v1969_v51, %v679_v34  ;;  %v1699_v38 = vpack.c.bf16 %v912_v37, %v912_v37 }
 0x13e   : > { %v681_v39 = vpop.f32.mrf.mxu0  ;;  %v914_v42 = vpop.f32.mrf.mxu1 }
 0x13f   : > { %v1666_v40 = vpack.c.bf16 %v1060_v35, %v1060_v35  ;;  %v1029_v41 = vadd.f32 %v1974_v53, %v991_v36  ;;  %1382 = vst.msk [vmem:[%s1980_s24 + $0x4c] sm:$0xf] %vm1202_vm1, %v1699_v38 }
 0x140   : > { %v684_v43 = vpop.f32.mrf.mxu0  ;;  %v917_v46 = vpop.f32.mrf.mxu1 }
 0x141   : > { %1221 = vst.msk [vmem:[%s1989_s28 + $0x48] sm:$0xf] %vm1202_vm1, %v1666_v40  ;;  %v1061_v44 = vmax.f32 %v1029_v41, 0.0  ;;  %v992_v45 = vmul.f32 %v1969_v51, %v684_v43  ;;  %v1700_v47 = vpack.c.bf16 %v917_v46, %v917_v46 }
 0x142   : > { %v686_v48 = vpop.f32.mrf.mxu0  ;;  %v919_v52 = vpop.f32.mrf.mxu1 }
 0x143   : > { %v1667_v49 = vpack.c.bf16 %v1061_v44, %v1061_v44  ;;  %v1030_v50 = vadd.f32 %v1974_v53, %v992_v45  ;;  %1383 = vst.msk [vmem:[%s1980_s24 + $0x50] sm:$0xf] %vm1202_vm1, %v1700_v47 }
 0x144   : > { %v687_v54 = vpop.f32.mrf.mxu0  ;;  %v920_v57 = vpop.f32.mrf.mxu1 }
 0x145   : > { %1222 = vst.msk [vmem:[%s1989_s28 + $0x4c] sm:$0xf] %vm1202_vm1, %v1667_v49  ;;  %v1062_v55 = vmax.f32 %v1030_v50, 0.0  ;;  %v993_v56 = vmul.f32 %v1969_v51, %v687_v54  ;;  %v1701_v58 = vpack.c.bf16 %v920_v57, %v920_v57 }
 0x146   : > { %v689_v59 = vpop.f32.mrf.mxu0  ;;  %v922_v62 = vpop.f32.mrf.mxu1 }
 0x147   : > { %v1668_v60 = vpack.c.bf16 %v1062_v55, %v1062_v55  ;;  %v1031_v61 = vadd.f32 %v1974_v53, %v993_v56  ;;  %1384 = vst.msk [vmem:[%s1980_s24 + $0x54] sm:$0xf] %vm1202_vm1, %v1701_v58 }
 0x148   : > { %v692_v63 = vpop.f32.mrf.mxu0  ;;  %v925_v2 = vpop.f32.mrf.mxu1 }
 0x149   : > { %1223 = vst.msk [vmem:[%s1989_s28 + $0x50] sm:$0xf] %vm1202_vm1, %v1668_v60  ;;  %v1063_v0 = vmax.f32 %v1031_v61, 0.0  ;;  %v994_v1 = vmul.f32 %v1969_v51, %v692_v63  ;;  %v1702_v3 = vpack.c.bf16 %v925_v2, %v925_v2 }
 0x14a   : > { %v694_v4 = vpop.f32.mrf.mxu0  ;;  %v927_v7 = vpop.f32.mrf.mxu1 }
 0x14b   : > { %v1669_v5 = vpack.c.bf16 %v1063_v0, %v1063_v0  ;;  %v1032_v6 = vadd.f32 %v1974_v53, %v994_v1  ;;  %1385 = vst.msk [vmem:[%s1980_s24 + $0x58] sm:$0xf] %vm1202_vm1, %v1702_v3 }
 0x14c   : > { %v695_v8 = vpop.f32.mrf.mxu0  ;;  %v928_v11 = vpop.f32.mrf.mxu1 }
 0x14d   : > { %1224 = vst.msk [vmem:[%s1989_s28 + $0x54] sm:$0xf] %vm1202_vm1, %v1669_v5  ;;  %v1064_v9 = vmax.f32 %v1032_v6, 0.0  ;;  %v995_v10 = vmul.f32 %v1969_v51, %v695_v8  ;;  %v1703_v12 = vpack.c.bf16 %v928_v11, %v928_v11 }
 0x14e   : > { %v697_v13 = vpop.f32.mrf.mxu0  ;;  %v930_v16 = vpop.f32.mrf.mxu1 }
 0x14f   : > { %v1670_v14 = vpack.c.bf16 %v1064_v9, %v1064_v9  ;;  %v1033_v15 = vadd.f32 %v1974_v53, %v995_v10  ;;  %1386 = vst.msk [vmem:[%s1980_s24 + $0x5c] sm:$0xf] %vm1202_vm1, %v1703_v12 }
 0x150   : > { %v700_v17 = vpop.f32.mrf.mxu0  ;;  %v933_v20 = vpop.f32.mrf.mxu1 }
 0x151   : > { %1225 = vst.msk [vmem:[%s1989_s28 + $0x58] sm:$0xf] %vm1202_vm1, %v1670_v14  ;;  %v1065_v18 = vmax.f32 %v1033_v15, 0.0  ;;  %v996_v19 = vmul.f32 %v1969_v51, %v700_v17  ;;  %v1704_v21 = vpack.c.bf16 %v933_v20, %v933_v20 }
 0x152   : > { %v702_v22 = vpop.f32.mrf.mxu0  ;;  %v935_v25 = vpop.f32.mrf.mxu1 }
 0x153   : > { %v1671_v23 = vpack.c.bf16 %v1065_v18, %v1065_v18  ;;  %v1034_v24 = vadd.f32 %v1974_v53, %v996_v19  ;;  %1387 = vst.msk [vmem:[%s1980_s24 + $0x60] sm:$0xf] %vm1202_vm1, %v1704_v21 }
 0x154   : > { %v703_v26 = vpop.f32.mrf.mxu0  ;;  %v936_v29 = vpop.f32.mrf.mxu1 }
 0x155   : > { %1226 = vst.msk [vmem:[%s1989_s28 + $0x5c] sm:$0xf] %vm1202_vm1, %v1671_v23  ;;  %v1066_v27 = vmax.f32 %v1034_v24, 0.0  ;;  %v997_v28 = vmul.f32 %v1969_v51, %v703_v26  ;;  %v1705_v30 = vpack.c.bf16 %v936_v29, %v936_v29 }
 0x156   : > { %v705_v31 = vpop.f32.mrf.mxu0  ;;  %v938_v34 = vpop.f32.mrf.mxu1 }
 0x157   : > { %v1672_v32 = vpack.c.bf16 %v1066_v27, %v1066_v27  ;;  %v1035_v33 = vadd.f32 %v1974_v53, %v997_v28  ;;  %1388 = vst.msk [vmem:[%s1980_s24 + $0x64] sm:$0xf] %vm1202_vm1, %v1705_v30 }
 0x158   : > { %v708_v35 = vpop.f32.mrf.mxu0  ;;  %v941_v38 = vpop.f32.mrf.mxu1 }
 0x159   : > { %1227 = vst.msk [vmem:[%s1989_s28 + $0x60] sm:$0xf] %vm1202_vm1, %v1672_v32  ;;  %v1067_v36 = vmax.f32 %v1035_v33, 0.0  ;;  %v998_v37 = vmul.f32 %v1969_v51, %v708_v35  ;;  %v1706_v39 = vpack.c.bf16 %v941_v38, %v941_v38 }
 0x15a   : > { %v710_v40 = vpop.f32.mrf.mxu0  ;;  %v943_v43 = vpop.f32.mrf.mxu1 }
 0x15b   : > { %v1673_v41 = vpack.c.bf16 %v1067_v36, %v1067_v36  ;;  %v1036_v42 = vadd.f32 %v1974_v53, %v998_v37  ;;  %1389 = vst.msk [vmem:[%s1980_s24 + $0x68] sm:$0xf] %vm1202_vm1, %v1706_v39 }
 0x15c   : > { %v711_v44 = vpop.f32.mrf.mxu0  ;;  %v944_v47 = vpop.f32.mrf.mxu1 }
 0x15d   : > { %1228 = vst.msk [vmem:[%s1989_s28 + $0x64] sm:$0xf] %vm1202_vm1, %v1673_v41  ;;  %v1068_v45 = vmax.f32 %v1036_v42, 0.0  ;;  %v999_v46 = vmul.f32 %v1969_v51, %v711_v44  ;;  %v1707_v48 = vpack.c.bf16 %v944_v47, %v944_v47 }
 0x15e   : > { %v713_v49 = vpop.f32.mrf.mxu0  ;;  %v946_v54 = vpop.f32.mrf.mxu1 }
 0x15f   : > { %v1674_v50 = vpack.c.bf16 %v1068_v45, %v1068_v45  ;;  %v1037_v52 = vadd.f32 %v1974_v53, %v999_v46  ;;  %1390 = vst.msk [vmem:[%s1980_s24 + $0x6c] sm:$0xf] %vm1202_vm1, %v1707_v48 }
 0x160   : > { %v716_v55 = vpop.f32.mrf.mxu0  ;;  %v949_v58 = vpop.f32.mrf.mxu1 }
 0x161   : > { %1229 = vst.msk [vmem:[%s1989_s28 + $0x68] sm:$0xf] %vm1202_vm1, %v1674_v50  ;;  %v1069_v56 = vmax.f32 %v1037_v52, 0.0  ;;  %v1000_v57 = vmul.f32 %v1969_v51, %v716_v55  ;;  %v1708_v59 = vpack.c.bf16 %v949_v58, %v949_v58 }
 0x162   : > { %v718_v60 = vpop.f32.mrf.mxu0  ;;  %v951_v63 = vpop.f32.mrf.mxu1 }
 0x163   : > { %v1675_v61 = vpack.c.bf16 %v1069_v56, %v1069_v56  ;;  %v1038_v62 = vadd.f32 %v1974_v53, %v1000_v57  ;;  %1391 = vst.msk [vmem:[%s1980_s24 + $0x70] sm:$0xf] %vm1202_vm1, %v1708_v59 }
 0x164   : > { %v719_v0 = vpop.f32.mrf.mxu0  ;;  %v952_v3 = vpop.f32.mrf.mxu1 }
 0x165   : > { %1230 = vst.msk [vmem:[%s1989_s28 + $0x6c] sm:$0xf] %vm1202_vm1, %v1675_v61  ;;  %v1070_v1 = vmax.f32 %v1038_v62, 0.0  ;;  %v1001_v2 = vmul.f32 %v1969_v51, %v719_v0  ;;  %v1709_v4 = vpack.c.bf16 %v952_v3, %v952_v3 }
 0x166   : > { %v721_v5 = vpop.f32.mrf.mxu0  ;;  %v954_v8 = vpop.f32.mrf.mxu1 }
 0x167   : > { %v1676_v6 = vpack.c.bf16 %v1070_v1, %v1070_v1  ;;  %v1039_v7 = vadd.f32 %v1974_v53, %v1001_v2  ;;  %1392 = vst.msk [vmem:[%s1980_s24 + $0x74] sm:$0xf] %vm1202_vm1, %v1709_v4 }
 0x168   : > { %v724_v9 = vpop.f32.mrf.mxu0  ;;  %v957_v12 = vpop.f32.mrf.mxu1 }
 0x169   : > { %1231 = vst.msk [vmem:[%s1989_s28 + $0x70] sm:$0xf] %vm1202_vm1, %v1676_v6  ;;  %v1071_v10 = vmax.f32 %v1039_v7, 0.0  ;;  %v1002_v11 = vmul.f32 %v1969_v51, %v724_v9  ;;  %v1710_v13 = vpack.c.bf16 %v957_v12, %v957_v12 }
 0x16a   : > { %v726_v14 = vpop.f32.mrf.mxu0  ;;  %v959_v17 = vpop.f32.mrf.mxu1 }
 0x16b   : > { %v1677_v15 = vpack.c.bf16 %v1071_v10, %v1071_v10  ;;  %v1040_v16 = vadd.f32 %v1974_v53, %v1002_v11  ;;  %1393 = vst.msk [vmem:[%s1980_s24 + $0x78] sm:$0xf] %vm1202_vm1, %v1710_v13 }
 0x16c   : > { %v727_v18 = vpop.f32.mrf.mxu0  ;;  %v960_v21 = vpop.f32.mrf.mxu1 }
 0x16d   : > { %1232 = vst.msk [vmem:[%s1989_s28 + $0x74] sm:$0xf] %vm1202_vm1, %v1677_v15  ;;  %v1072_v19 = vmax.f32 %v1040_v16, 0.0  ;;  %v1003_v20 = vmul.f32 %v1969_v51, %v727_v18  ;;  %v1711_v22 = vpack.c.bf16 %v960_v21, %v960_v21 }
 0x16e   : > { %v729_v23 = vpop.f32.mrf.mxu0  ;;  %v962_v26 = vpop.f32.mrf.mxu1 }
 0x16f   : > { %v1678_v24 = vpack.c.bf16 %v1072_v19, %v1072_v19  ;;  %v1041_v25 = vadd.f32 %v1974_v53, %v1003_v20  ;;  %1394 = vst.msk [vmem:[%s1980_s24 + $0x7c] sm:$0xf] %vm1202_vm1, %v1711_v22 }
 0x171   : > { %1233 = vst.msk [vmem:[%s1989_s28 + $0x78] sm:$0xf] %vm1202_vm1, %v1678_v24  ;;  %v1073_v27 = vmax.f32 %v1041_v25, 0.0 }
 0x173   : > { %v1679_v28 = vpack.c.bf16 %v1073_v27, %v1073_v27 }
 0x175   : > { %1234 = vst.msk [vmem:[%s1989_s28 + $0x7c] sm:$0xf] %vm1202_vm1, %v1679_v28 }
 0x176 PF: > { %s17_s21 = sadd.s32 1, %s1793_s21  }
 0x177   : > { %p14_p4 = scmp.ge.s32.totalorder %s17_s21, 4  }
 0x179   :  { %16 = sbr.rel (!%p14_p4) target bundleno = 1 (0x1), region = 82 }

// kernel: wideresnet_forward.11
= control target key start
LH: loop header
LB: loop body
LE: loop exit
PB: predicated region body
PF: predicated region fallthrough
CT: control target
= control target key end

     0   :  { %s3811_s0 = inlined_call_operand.vmem [shape: bf16[512,288], index: 0, kind: input, shape index: {}]   ;;  %s3812_s1 = inlined_call_operand.vmem [shape: bf16[288,32], index: 1, kind: input, shape index: {}]   ;;  %s3813_s2 = inlined_call_operand.vmem [shape: bf16[512,32], index: 2, kind: input, shape index: {}]   ;;  %s3814_s3 = inlined_call_operand.vmem [shape: f32[1,32], index: 3, kind: input, shape index: {}]   ;;  %s3815_s4 = inlined_call_operand.vmem [shape: f32[1,32], index: 4, kind: input, shape index: {}]   ;;  %s3816_s5 = inlined_call_operand.vmem [shape: f32[32,10], index: 5, kind: input, shape index: {}]   ;;  %s3817_s6 = inlined_call_operand.vmem [shape: f32[10,32], index: 6, kind: input, shape index: {}]   ;;  %s3818_s7 = inlined_call_operand.vmem [shape: f32[1,10], index: 7, kind: input, shape index: {}]   ;;  %s3819_s8 = inlined_call_operand.hbm [shape: bf16[512,32], index: 8, kind: output, shape index: {0}]   ;;  %s3820_s9 = inlined_call_operand.vmem [shape: bf16[512,32], index: 9, kind: output, shape index: {1}]   ;;  %s3821_s10 = inlined_call_operand.hbm [shape: f32[2,1,10], index: 10, kind: output, shape index: {2}]   ;;  %s3822_s11 = inlined_call_operand.vmem [shape: f32[2,1,32], index: 11, kind: output, shape index: {3}]  }
   0x1   :  { %3824 = sst [smem:[#allocation9_spill]] %s3811_s0 }
   0x2   :  { %3825 = sst [smem:[#allocation10_spill]] %s3812_s1 }
   0x3   :  { %3826 = sst [smem:[#allocation11_spill]] %s3813_s2 }
   0x4   :  { %3827 = sst [smem:[#allocation12_spill]] %s3814_s3 }
   0x5   :  { %3828 = sst [smem:[#allocation13_spill]] %s3815_s4 }
   0x6   :  { %3829 = sst [smem:[#allocation14_spill]] %s3816_s5 }
   0x7   :  { %17 = vsyncpa [#allocation3], 0 }
   0x8   :  { %19 = vsyncpa [#allocation3 + $0x1], 0 }
   0x9   :  { %20 = vsyncpa [#allocation5], 0 }
   0xa   :  { %22 = vsyncpa [#allocation5 + $0x1], 0  ;;  %s3019_s17 = smov 0   ;;  %s3021_s18 = smov 0  }
   0xb   :  { %s3023_s19 = smov 0   ;;  %s3025_s20 = smov 0  }
   0xc LB: > { %s3040_s21 = sadd.s32 4294967295, %s2951_s20   ;;  %s2209_s22 = sadd.s32 4294967294, %s2951_s20   ;;  %s2951_s20 = sphi %s3025_s20, %s3845_s20   ;;  %s2947_s19 = sphi %s3023_s19, %s3844_s19   ;;  %s2943_s18 = sphi %s3021_s18, %s3843_s18   ;;  %s2939_s17 = sphi %s3019_s17, %s3842_s17  }
   0xd   : > { %s3044_s23 = sadd.s32 1, %s2951_s20   ;;  %s213_s24 = sadd.s32 1, %s2947_s19 }
   0xe   : > { %s210_s25 = ssub.s32 %s2951_s20, %s3044_s23  ;;  %p223_p0 = scmp.ne.s32.totalorder %s2947_s19, %s2943_s18 }
   0xf   : > { %p211_p1 = scmp.eq.s32.totalorder %s210_s25, 0  ;;  %p224_p2 = scmp.eq.s32.totalorder %s3040_s21, 1 }
  0x10   : > { %p229_p3 = scmp.ne.s32.totalorder %s2943_s18, %s2939_s17  ;;  %p230_p4 = scmp.eq.s32.totalorder %s2209_s22, 1 }
  0x11   : > { %s3055_s26 = scalar_select %p211_p1, %s2947_s19, %s213_s24  }
  0x12   : > { %p3057_p5 = por %p224_p2, %p223_p0  ;;  %p3061_p6 = por %p230_p4, %p229_p3 }
  0x13   : > { %3830 = sst [smem:[#allocation8_spill]] %s3055_s26  ;;  %p2212_p7 = scmp.ge.s32.totalorder %s2951_s20, 1 }
  0x14   : > { %p363_p8 = scmp.lt.s32.totalorder %s2951_s20, 3 }
  0x16   : > { %p364_p9 = pnand %p2212_p7, %p363_p8 }
  0x17   : > { %s3833_s1 = sld [smem:[#allocation10_spill]] (!%p364_p9)  ;;  %s2214_s12 = sshll.u32 (!%p364_p9), %s3040_s21, 5 }
  0x18   : > { %367 = sbr.rel (%p364_p9) target bundleno = 1220 (0x4c4), region = 52  ;;  %p422_p10 = scmp.lt.s32.totalorder (!%p364_p9), %s2214_s12, 63 }
  0x19   : > { %s3834_s0 = sld [smem:[#allocation9_spill]] (!%p364_p9)  ;;  %s3238_s22 = sand.u32 (!%p364_p9), 1, %s2943_s18  }
  0x1a   : > { %s3835_s5 = sld [smem:[#allocation14_spill]] (!%p364_p9)  ;;  %s2213_s24 = sshll.u32 (!%p364_p9), %s3238_s22, 7 }
  0x1b   : > { %s3836_s2 = sld [smem:[#allocation11_spill]] (!%p364_p9)  ;;  %s3256_s13 = scalar_lea.vmem (!%p364_p9), [#allocation2], %s2213_s24 }
  0x1c   : > { %s3837_s3 = sld [smem:[#allocation12_spill]] (!%p364_p9)  ;;  %s2442_s24 = sshll.u32 (!%p364_p9), %s3040_s21, 11 }
  0x1d   : > { %v2779_v0 = vld [vmem:[%s3833_s1 + $0x78] sm:$0xff]   ;;  %v2781_v2 = vld [vmem:[%s3833_s1 + $0x70] sm:$0xff]   ;;  %v2783_v4 = vld [vmem:[%s3833_s1 + $0x68] sm:$0xff]   ;;  %s3847_s12 = smov (!%p422_p10, %s2214_s12), 63  ;;  %vm957_vm0 = vcmask 261120   ;;  %vm2954_vm1 = vmmov 0  }
  0x1e   : > { %v2780_v1 = vld [vmem:[%s3833_s1 + $0x38] sm:$0xff]   ;;  %2522 = vmatprep.subr.bf16.mxu0 %v2779_v0  ;;  %2714 = vmatprep.subr.bf16.mxu1 %v2779_v0  ;;  %v2782_v3 = vld [vmem:[%s3833_s1 + $0x30] sm:$0xff]   ;;  %v2784_v5 = vld [vmem:[%s3833_s1 + $0x28] sm:$0xff]   ;;  %s2730_s16 = smul.u32 12, %s3847_s12  ;;  %s2217_s30 = sshll.u32 %s3847_s12, 2  ;;  %vm1456_vm2 = vcmask 257024  }
  0x1f   : > { %2523 = vmatpush3.bf16.msra.mxu0 %v2780_v1  ;;  %2722 = vmatpush3.bf16.msra.mxu1 %v2780_v1  ;;  %v2785_v6 = vld [vmem:[%s3833_s1 + $0x60] sm:$0xff]   ;;  %v2787_v8 = vld [vmem:[%s3833_s1 + $0x58] sm:$0xff]   ;;  %v2789_v10 = vld [vmem:[%s3833_s1 + $0x50] sm:$0xff]   ;;  %s3838_s4 = sld [smem:[#allocation13_spill]]  ;;  %vm1910_vm3 = vcmask 73728   ;;  %vm1940_vm6 = vcmask 1041408  }
  0x20   : > { %2524 = vmatprep.subr.bf16.mxu0 %v2781_v2  ;;  %2715 = vmatprep.subr.bf16.mxu1 %v2781_v2  ;;  %v2786_v7 = vld [vmem:[%s3833_s1 + $0x20] sm:$0xff]   ;;  %s3101_s26 = scalar_lea.vmem %s3834_s0, %s2730_s16  ;;  %v2788_v9 = vld [vmem:[%s3833_s1 + $0x18] sm:$0xff]   ;;  %v2790_v13 = vld [vmem:[%s3833_s1 + $0x10] sm:$0xff]   ;;  %vm1936_vm7 = vcmask 80896   ;;  %s2043_s16 = sshll.u32 %s3256_s13, 4  ;;  %s3745_s16 = int_to_ptr.vmem [resolvable:$true] %s2043_s16 }
  0x21   : > { %v2797_v11 = vld [vmem:[%s3101_s26 + $0x4] ss:$12 sps:$4 sm:$0xff]   ;;  %v2800_v12 = vld [vmem:[%s3101_s26 + $0x13c] ss:$12 sps:$4 sm:$0xff]   ;;  %v2795_v19 = vld [vmem:[%s3101_s26] ss:$12 sps:$4 sm:$0xff]   ;;  %s3227_s15 = scalar_lea.vmem %s3836_s2, %s2217_s30 }
  0x22   : > { %v2791_v14 = vld [vmem:[%s3833_s1 + $0x48] sm:$0xff]   ;;  %1038 = vmatprep.mubr.bf16.mxu0 %v2797_v11  ;;  %1142 = vmatprep.mubr.bf16.mxu1 %v2800_v12  ;;  %v2793_v16 = vld [vmem:[%s3833_s1 + $0x40] sm:$0xff]   ;;  %v2806_v25 = vld [vmem:[%s3101_s26 + $0x150] ss:$12 sps:$4 sm:$0xff]   ;;  %s2861_s29 = scalar_lea.vmem %s3745_s16, 2048  ;;  %s2955_s14 = smov [#allocation2]  }
  0x23   : > { %2525 = vmatpush3.bf16.msra.mxu0 %v2782_v3  ;;  %2723 = vmatpush3.bf16.msra.mxu1 %v2782_v3  ;;  %v2792_v15 = vld [vmem:[%s3833_s1 + $0x8] sm:$0xff]   ;;  %v2794_v17 = vld [vmem:[%s3833_s1] sm:$0xff]   ;;  %v2811_v28 = vld [vmem:[%s3101_s26 + $0x30] ss:$12 sps:$4 sm:$0xff]   ;;  %v2953_v3 = vmov 0.0   ;;  %p2862_p11 = scmp.ne.s32.totalorder %s3745_s16, %s2861_s29 }
  0x24   : > { %2526 = vmatprep.subr.bf16.mxu0 %v2783_v4  ;;  %2716 = vmatprep.subr.bf16.mxu1 %v2783_v4  ;;  %v2813_v18 = vld [vmem:[%s3833_s1 + $0x88] sm:$0xff]   ;;  %v2798_v20 = vld [vmem:[%s3101_s26 + $0x138] ss:$12 sps:$4 sm:$0xff]   ;;  %v2803_v22 = vld [vmem:[%s3101_s26 + $0x154] ss:$12 sps:$4 sm:$0xff]  }
  0x25   : > { %v2801_v21 = vld [vmem:[%s3101_s26 + $0x1c] ss:$12 sps:$4 sm:$0xff]   ;;  %v2814_v23 = vld [vmem:[%s3833_s1 + $0x80] sm:$0xff]   ;;  %v2809_v27 = vld [vmem:[%s3101_s26 + $0x16c] ss:$12 sps:$4 sm:$0xff]   ;;  %p2863_p12 = pnand %p2862_p11, %p3057_p5 }
  0x26   : > { %v2805_v24 = vld [vmem:[%s3101_s26 + $0x18] ss:$12 sps:$4 sm:$0xff]   ;;  %v2807_v26 = vld [vmem:[%s3101_s26 + $0x34] ss:$12 sps:$4 sm:$0xff]   ;;  %v2824_v37 = vld [vmem:[%s3101_s26 + $0x50] ss:$12 sps:$4 sm:$0xff]  }
  0x27   : > { %2527 = vmatpush3.bf16.msra.mxu0 %v2784_v5  ;;  %2724 = vmatpush3.bf16.msra.mxu1 %v2784_v5  ;;  %v2812_v29 = vld [vmem:[%s3101_s26 + $0x168] ss:$12 sps:$4 sm:$0xff]   ;;  %v2815_v30 = vld [vmem:[%s3101_s26 + $0x4c] ss:$12 sps:$4 sm:$0xff]   ;;  %v2820_v34 = vld [vmem:[%s3101_s26 + $0x64] ss:$12 sps:$4 sm:$0xff]   ;;  %p2864_p13 = pneg %p2863_p12 }
  0x28   : > { %2528 = vmatprep.subr.bf16.mxu0 %v2785_v6  ;;  %2717 = vmatprep.subr.bf16.mxu1 %v2785_v6  ;;  %v2817_v31 = vld [vmem:[%s3101_s26 + $0x8] ss:$12 sps:$4 sm:$0xff]   ;;  %v2819_v33 = vld [vmem:[%s3101_s26 + $0x20] ss:$12 sps:$4 sm:$0xff]   ;;  %v2822_v35 = vld [vmem:[%s3101_s26 + $0x38] ss:$12 sps:$4 sm:$0xff]  }
  0x29   : > { %v2818_v32 = vld [vmem:[%s3101_s26 + $0x48] ss:$12 sps:$4 sm:$0xff]   ;;  %v2823_v36 = vld [vmem:[%s3101_s26 + $0x60] ss:$12 sps:$4 sm:$0xff]   ;;  %v2828_v40 = vld [vmem:[%s3101_s26 + $0x78] ss:$12 sps:$4 sm:$0xff]  }
  0x2a   : > { %v2825_v38 = vld [vmem:[%s3101_s26 + $0x7c] ss:$12 sps:$4 sm:$0xff]   ;;  %v2829_v41 = vld [vmem:[%s3101_s26 + $0x80] ss:$12 sps:$4 sm:$0xff]   ;;  %v2832_v43 = vld [vmem:[%s3101_s26 + $0x98] ss:$12 sps:$4 sm:$0xff]  }
  0x2b   : > { %2529 = vmatpush3.bf16.msra.mxu0 %v2786_v7  ;;  %2725 = vmatpush3.bf16.msra.mxu1 %v2786_v7  ;;  %v2827_v39 = vld [vmem:[%s3101_s26 + $0x68] ss:$12 sps:$4 sm:$0xff]   ;;  %v2833_v44 = vld [vmem:[%s3101_s26 + $0x90] ss:$12 sps:$4 sm:$0xff]   ;;  %v2835_v46 = vld [vmem:[%s3101_s26 + $0xac] ss:$12 sps:$4 sm:$0xff]  }
  0x2c   : > { %2530 = vmatprep.subr.bf16.mxu0 %v2787_v8  ;;  %2718 = vmatprep.subr.bf16.mxu1 %v2787_v8  ;;  %v2830_v42 = vld [vmem:[%s3101_s26 + $0x94] ss:$12 sps:$4 sm:$0xff]   ;;  %v2834_v45 = vld [vmem:[%s3101_s26 + $0xb0] ss:$12 sps:$4 sm:$0xff]   ;;  %v2842_v51 = vld [vmem:[%s3101_s26 + $0xf8] ss:$12 sps:$4 sm:$0xff]  }
  0x2d   : > { %v2837_v47 = vld [vmem:[%s3101_s26 + $0xc8] ss:$12 sps:$4 sm:$0xff]   ;;  %v2839_v49 = vld [vmem:[%s3101_s26 + $0xe0] ss:$12 sps:$4 sm:$0xff]   ;;  %v2840_v50 = vld [vmem:[%s3101_s26 + $0xc4] ss:$12 sps:$4 sm:$0xff]  }
  0x2e   : > { %v2838_v48 = vld [vmem:[%s3101_s26 + $0xa8] ss:$12 sps:$4 sm:$0xff]   ;;  %v2843_v52 = vld [vmem:[%s3101_s26 + $0xc0] ss:$12 sps:$4 sm:$0xff]   ;;  %v2844_v53 = vld [vmem:[%s3101_s26 + $0x110] ss:$12 sps:$4 sm:$0xff]  }
  0x2f   : > { %2531 = vmatpush3.bf16.msra.mxu0 %v2788_v9  ;;  %2726 = vmatpush3.bf16.msra.mxu1 %v2788_v9  ;;  %v2845_v54 = vld [vmem:[%s3101_s26 + $0xdc] ss:$12 sps:$4 sm:$0xff]   ;;  %v2848_v56 = vld [vmem:[%s3101_s26 + $0xd8] ss:$12 sps:$4 sm:$0xff]   ;;  %v2849_v57 = vld [vmem:[%s3101_s26 + $0x140] ss:$12 sps:$4 sm:$0xff]  }
  0x30   : > { %2532 = vmatprep.subr.bf16.mxu0 %v2789_v10  ;;  %2719 = vmatprep.subr.bf16.mxu1 %v2789_v10  ;;  %v2847_v55 = vld [vmem:[%s3101_s26 + $0x128] ss:$12 sps:$4 sm:$0xff]   ;;  %v2852_v59 = vld [vmem:[%s3101_s26 + $0x158] ss:$12 sps:$4 sm:$0xff]   ;;  %v2853_v60 = vld [vmem:[%s3101_s26 + $0xf0] ss:$12 sps:$4 sm:$0xff]  }
  0x31   : > { %v2850_v58 = vld [vmem:[%s3101_s26 + $0xf4] ss:$12 sps:$4 sm:$0xff]   ;;  %v2854_v61 = vld [vmem:[%s3101_s26 + $0x170] ss:$12 sps:$4 sm:$0xff]   ;;  %v2855_v62 = vld [vmem:[%s3101_s26 + $0x10c] ss:$12 sps:$4 sm:$0xff]  }
  0x32   : > { %v2857_v63 = vld [vmem:[%s3101_s26 + $0x108] ss:$12 sps:$4 sm:$0xff]   ;;  %v2858_v0 = vld [vmem:[%s3101_s26 + $0x124] ss:$12 sps:$4 sm:$0xff]   ;;  %v2860_v1 = vld [vmem:[%s3101_s26 + $0x120] ss:$12 sps:$4 sm:$0xff]   ;;  %s3273_s26 = scalar_lea.vmem %s3820_s9, %s2217_s30  ;;  %s3742_s30 = scalar_lea.hbm %s3819_s8, %s2442_s24 }
  0x33   : > { %2533 = vmatpush3.bf16.msra.mxu0 %v2790_v13  ;;  %2727 = vmatpush3.bf16.msra.mxu1 %v2790_v13  ;;  %v1833_v2 = vld [vmem:[%s3835_s5 + $0x18] sm:$0xff]  ;;  %v1832_v4 = vld [vmem:[%s3835_s5 + $0x10] sm:$0xff]  ;;  %v1831_v7 = vld [vmem:[%s3835_s5 + $0x8] sm:$0xff] }
  0x34   : > { %2534 = vmatprep.subr.bf16.mxu0 %v2791_v14  ;;  %2720 = vmatprep.subr.bf16.mxu1 %v2791_v14  ;;  %v1830_v8 = vld [vmem:[%s3835_s5] sm:$0xff] }
  0x37   : > { %2535 = vmatpush3.bf16.msra.mxu0 %v2792_v15  ;;  %2728 = vmatpush3.bf16.msra.mxu1 %v2792_v15 }
  0x38   : > { %2536 = vmatprep.subr.bf16.mxu0 %v2793_v16  ;;  %2721 = vmatprep.subr.bf16.mxu1 %v2793_v16 }
  0x3b   : > { %2537 = vmatpush3.bf16.msra.mxu0 %v2794_v17  ;;  %2729 = vmatpush3.bf16.msra.mxu1 %v2794_v17 }
  0x3c   : > { %2660 = vmatprep.subr.bf16.mxu1 %v2813_v18 }
  0x3e   : > { %1039 = vmatmul.mubr.bf16.vlgmr.msra.gmra.mxu0 %v2795_v19  ;;  %1143 = vmatmul.mubr.bf16.vlgmr.msra.gmra.mxu1 %v2798_v20 }
  0x3f   : > { %1046 = vmatprep.mubr.bf16.mxu0 %v2801_v21  ;;  %1150 = vmatprep.mubr.bf16.mxu1 %v2803_v22 }
  0x40   : > { %2661 = vmatpush3.bf16.msra.mxu1 %v2813_v18 }
  0x41   : > { %2662 = vmatprep.subr.bf16.mxu1 %v2814_v23 }
  0x44   : > { %2663 = vmatpush3.bf16.msra.mxu1 %v2814_v23 }
  0x45   : > { %2696 = vmatprep.subr.mxu1 %v2953_v3 }
  0x46   : > { %1047 = vmatmul.mubr.bf16.gmra.mxu0 %v2805_v24  ;;  %1151 = vmatmul.mubr.bf16.gmra.mxu1 %v2806_v25 }
  0x47   : > { %1054 = vmatprep.mubr.bf16.mxu0 %v2807_v26  ;;  %1158 = vmatprep.mubr.bf16.mxu1 %v2809_v27 }
  0x4e   : > { %1055 = vmatmul.mubr.bf16.gmra.mxu0 %v2811_v28  ;;  %1159 = vmatmul.mubr.bf16.gmra.mxu1 %v2812_v29  ;;  %v2507_v29 = vld [vmem:[%s3227_s15 + $0x8] sm:$0xff]  }
  0x4f   : > { %1062 = vmatprep.mubr.bf16.mxu0 %v2815_v30  ;;  %2664 = vmatprep.mubr.msk.bf16.mxu1 %vm957_vm0, %v2817_v31 }
  0x56   : > { %1063 = vmatmul.mubr.bf16.gmra.mxu0 %v2818_v32  ;;  %2665 = vmatmul.mubr.msk.bf16.vlgmr.msra.gmra.mxu1 %vm957_vm0, %v2819_v33  ;;  %v2444_v32 = vld [vmem:[%s3227_s15] sm:$0xff]  }
  0x57   : > { %1070 = vmatprep.mubr.bf16.mxu0 %v2820_v34  ;;  %2668 = vmatprep.mubr.msk.bf16.mxu1 %vm957_vm0, %v2822_v35  ;;  %v2449_v34 = vunpack.c.l.bf16 %v2507_v29 }
  0x58   : > { %2697 = vmatpush3.msra.mxu1 %v1833_v2 }
  0x59   : > { %2698 = vmatprep.subr.mxu1 %v2953_v3 }
  0x5a   : > { %2699 = vmatpush3.msra.mxu1 %v1832_v4 }
  0x5b   : > { %2700 = vmatprep.subr.mxu1 %v2953_v3 }
  0x5c   : > { %2701 = vmatpush3.msra.mxu1 %v1831_v7 }
  0x5d   : > { %2702 = vmatprep.subr.mxu1 %v2953_v3 }
  0x5e   : > { %1071 = vmatmul.mubr.bf16.gmra.mxu0 %v2823_v36  ;;  %2669 = vmatmul.mubr.msk.bf16.gmra.mxu1 %vm957_vm0, %v2824_v37 }
  0x5f   : > { %1078 = vmatprep.mubr.bf16.mxu0 %v2825_v38  ;;  %2672 = vmatprep.mubr.msk.bf16.mxu1 %vm957_vm0, %v2827_v39  ;;  %v2445_v38 = vunpack.c.l.bf16 %v2444_v32 }
  0x60   : > { %2703 = vmatpush3.msra.mxu1 %v1830_v8 }
  0x61   : > { %2707 = vmatprep.subr.mxu1 %v2953_v3 }
  0x66   : > { %1079 = vmatmul.mubr.bf16.gmra.mxu0 %v2828_v40  ;;  %2673 = vmatmul.mubr.msk.bf16.gmra.mxu1 %vm957_vm0, %v2829_v41 }
  0x67   : > { %1086 = vmatprep.mubr.bf16.mxu0 %v2830_v42  ;;  %2676 = vmatprep.mubr.msk.bf16.mxu1 %vm957_vm0, %v2832_v43  ;;  %v2450_v43 = vunpack.c.h.bf16 %v2507_v29 }
  0x6e   : > { %1087 = vmatmul.mubr.bf16.gmra.mxu0 %v2833_v44  ;;  %2677 = vmatmul.mubr.msk.bf16.gmra.mxu1 %vm957_vm0, %v2834_v45 }
  0x6f   : > { %1094 = vmatprep.mubr.bf16.mxu0 %v2835_v46  ;;  %2680 = vmatprep.mubr.msk.bf16.mxu1 %vm957_vm0, %v2837_v47  ;;  %v3246_v46 = vld [vmem:[%s3837_s3] ss:$0 sm:$0xff] }
  0x76   : > { %1095 = vmatmul.mubr.bf16.gmra.mxu0 %v2838_v48  ;;  %2681 = vmatmul.mubr.msk.bf16.gmra.mxu1 %vm957_vm0, %v2839_v49  ;;  %v2509_v49 = vld [vmem:[%s3227_s15 + $0x18] sm:$0xff]  }
  0x77   : > { %1102 = vmatprep.mubr.bf16.mxu0 %v2840_v50  ;;  %2684 = vmatprep.mubr.msk.bf16.mxu1 %vm957_vm0, %v2842_v51  ;;  %v3252_v51 = vld [vmem:[%s3838_s4] ss:$0 sm:$0xff] }
  0x7e   : > { %1103 = vmatmul.mubr.bf16.gmra.mxu0 %v2843_v52  ;;  %2685 = vmatmul.mubr.msk.bf16.gmra.mxu1 %vm957_vm0, %v2844_v53 }
  0x7f   : > { %1110 = vmatprep.mubr.bf16.mxu0 %v2845_v54  ;;  %2688 = vmatprep.mubr.msk.bf16.mxu1 %vm957_vm0, %v2847_v55  ;;  %v2446_v54 = vunpack.c.h.bf16 %v2444_v32 }
  0x86   : > { %1111 = vmatmul.mubr.bf16.gmra.mxu0 %v2848_v56  ;;  %2689 = vmatmul.mubr.msk.bf16.gmra.mxu1 %vm957_vm0, %v2849_v57 }
  0x87   : > { %1118 = vmatprep.mubr.bf16.mxu0 %v2850_v58  ;;  %2692 = vmatprep.mubr.msk.bf16.mxu1 %vm957_vm0, %v2852_v59  ;;  %v2508_v59 = vld [vmem:[%s3227_s15 + $0x10] sm:$0xff]  }
  0x8e   : > { %1119 = vmatmul.mubr.bf16.gmra.mxu0 %v2853_v60  ;;  %2693 = vmatmul.mubr.msk.bf16.gmra.mxu1 %vm957_vm0, %v2854_v61 }
  0x8f   : > { %1126 = vmatprep.mubr.bf16.mxu0 %v2855_v62  ;;  %2704 = vmatprep.mubr.msk.f32.mxu1 %vm2954_vm1, %v2953_v3 }
  0x96   : > { %1127 = vmatmul.mubr.bf16.gmra.mxu0 %v2857_v63  ;;  %v2457_v63 = vunpack.c.l.bf16 %v2509_v49 }
  0x97   : > { %1134 = vmatprep.mubr.bf16.mxu0 %v2858_v0 }
  0x9e   : > { %1135 = vmatmul.mubr.bf16.gmra.mxu0 %v2860_v1 }
  0xfe   : > { %v2538_v5 = vpop.f32.mrf.mxu0  ;;  %v2616_v6 = vpop.f32.mrf.mxu1 }
 0x100   : > { %v2539_v9 = vpop.f32.mrf.mxu0  ;;  %v2617_v10 = vpop.f32.mrf.mxu1 }
 0x101   : > { %v3211_v11 = vadd.f32 %v2617_v10, %v2616_v6  ;;  %v2540_v37 = vadd.f32 %v2539_v9, %v2538_v5  ;;  %v2453_v9 = vunpack.c.l.bf16 %v2508_v59  ;;  %v2458_v10 = vunpack.c.h.bf16 %v2509_v49 }
 0x102   : > { %v2541_v12 = vpop.f32.mrf.mxu0  ;;  %v2619_v13 = vpop.f32.mrf.mxu1 }
 0x103   : > { %v1041_v48 = vadd.f32 %v2540_v37, %v2445_v38 }
 0x104   : > { %v2542_v14 = vpop.f32.mrf.mxu0  ;;  %v2620_v15 = vpop.f32.mrf.mxu1 }
 0x105   : > { %v3215_v16 = vadd.f32 %v2620_v15, %v2619_v13  ;;  %v2543_v50 = vadd.f32 %v2542_v14, %v2541_v12 }
 0x106   : > { %v2544_v17 = vpop.f32.mrf.mxu0  ;;  %v2622_v18 = vpop.f32.mrf.mxu1 }
 0x107   : > { %v1044_v7 = vadd.f32 %v2543_v50, %v2446_v54 }
 0x108   : > { %v2545_v19 = vpop.f32.mrf.mxu0  ;;  %v2623_v20 = vpop.f32.mrf.mxu1 }
 0x109   : > { %v3217_v21 = vadd.f32 %v2623_v20, %v2622_v18  ;;  %v2546_v33 = vadd.f32 %v2545_v19, %v2544_v17 }
 0x10a   : > { %v2547_v22 = vpop.f32.mrf.mxu0  ;;  %v2625_v23 = vpop.f32.mrf.mxu1 }
 0x10b   : > { %v1049_v42 = vadd.f32 %v2546_v33, %v2449_v34 }
 0x10c   : > { %v2548_v24 = vpop.f32.mrf.mxu0  ;;  %v2626_v25 = vpop.f32.mrf.mxu1 }
 0x10d   : > { %v3220_v26 = vadd.f32 %v2626_v25, %v2625_v23  ;;  %v2549_v41 = vadd.f32 %v2548_v24, %v2547_v22  ;;  %v2454_v23 = vunpack.c.h.bf16 %v2508_v59  ;;  %v3276_v24 = vld [vmem:[%s3227_s15 + $0x20] sm:$0xff]  }
 0x10e   : > { %v2550_v27 = vpop.f32.mrf.mxu0  ;;  %v3229_v28 = vpop.f32.mrf.mxu1 }
 0x10f   : > { %v1052_v58 = vadd.f32 %v2549_v41, %v2450_v43  ;;  %v2461_v43 = vunpack.c.l.bf16 %v3276_v24 }
 0x110   : > { %v2551_v30 = vpop.f32.mrf.mxu0  ;;  %v3232_v31 = vpop.f32.mrf.mxu1 }
 0x111   : > { %v2552_v5 = vadd.f32 %v2551_v30, %v2550_v27 }
 0x112   : > { %v2553_v35 = vpop.f32.mrf.mxu0  ;;  %v3235_v36 = vpop.f32.mrf.mxu1 }
 0x113   : > { %v1057_v38 = vadd.f32 %v2552_v5, %v2453_v9 }
 0x114   : > { %v2554_v39 = vpop.f32.mrf.mxu0  ;;  %v3240_v40 = vpop.f32.mrf.mxu1 }
 0x115   : > { %v2555_v25 = vadd.f32 %v2554_v39, %v2553_v35 }
 0x116   : > { %v2556_v44 = vpop.f32.mrf.mxu0  ;;  %v2666_v45 = vpop.f32.mrf.mxu1 }
 0x117   : > { %v1210_v47 = vadd.f32 %v2666_v45, %v1049_v42 }
 0x118   : > { %v2557_v52 = vpop.f32.mrf.mxu0  ;;  %v1201_v53 = vpop.f32.mrf.mxu1 }
 0x119   : > { %v2380_v55 = vpack.c.bf16 %v1210_v47, %v1210_v47  ;;  %v1499_v56 = vmul.f32 %v3246_v46, %v1210_v47  ;;  %v1202_v57 = vadd.f32 %v1201_v53, %v1041_v48  ;;  %v2558_v60 = vadd.f32 %v2557_v52, %v2556_v44 }
 0x11a   : > { %v2559_v61 = vpop.f32.mrf.mxu0  ;;  %v2667_v62 = vpop.f32.mrf.mxu1 }
 0x11b   : > { %1459 = vst.msk [vmem:[%s3256_s13 + $0x8] sm:$0xf] %vm1456_vm2, %v2380_v55  ;;  %v1537_v0 = vadd.f32 %v3252_v51, %v1499_v56  ;;  %v2378_v1 = vpack.c.bf16 %v1202_v57, %v1202_v57  ;;  %v1497_v2 = vmul.f32 %v3246_v46, %v1202_v57  ;;  %v1213_v4 = vadd.f32 %v2667_v62, %v1052_v58  ;;  %v2511_v62 = vld [vmem:[%s3227_s15 + $0x28] sm:$0xff]  }
 0x11c   : > { %v2560_v6 = vpop.f32.mrf.mxu0  ;;  %v1204_v8 = vpop.f32.mrf.mxu1  ;;  %v1065_v20 = vadd.f32 %v2558_v60, %v2457_v63  ;;  %v1060_v55 = vadd.f32 %v2555_v25, %v2454_v23 }
 0x11d   : > { %v3262_v12 = vmax.f32 %v1537_v0, 0.0  ;;  %1457 = vst.msk [vmem:[%s3256_s13] sm:$0xf] %vm1456_vm2, %v2378_v1  ;;  %v1535_v13 = vadd.f32 %v3252_v51, %v1497_v2  ;;  %v2381_v14 = vpack.c.bf16 %v1213_v4, %v1213_v4  ;;  %v1500_v15 = vmul.f32 %v3246_v46, %v1213_v4 }
 0x11e   : > { %v2561_v17 = vadd.f32 %v2560_v6, %v2559_v61  ;;  %v1205_v18 = vadd.f32 %v1204_v8, %v1044_v7  ;;  %v2562_v19 = vpop.f32.mrf.mxu0  ;;  %v2670_v22 = vpop.f32.mrf.mxu1  ;;  %v2462_v8 = vunpack.c.h.bf16 %v3276_v24 }
 0x11f   : > { %v2412_v27 = vpack.c.bf16 %v3262_v12, %v3262_v12  ;;  %v3280_v29 = vmax.f32 %v1535_v13, 0.0  ;;  %1460 = vst.msk [vmem:[%s3256_s13 + $0xc] sm:$0xf] %vm1456_vm2, %v2381_v14  ;;  %v1538_v30 = vadd.f32 %v3252_v51, %v1500_v15  ;;  %v1226_v34 = vadd.f32 %v2670_v22, %v1065_v20 }
 0x120   : > { %v2379_v32 = vpack.c.bf16 %v1205_v18, %v1205_v18  ;;  %v1498_v33 = vmul.f32 %v3246_v46, %v1205_v18  ;;  %v2563_v37 = vpop.f32.mrf.mxu0  ;;  %v1217_v41 = vpop.f32.mrf.mxu1  ;;  %v1068_v42 = vadd.f32 %v2561_v17, %v2458_v10  ;;  %v2465_v14 = vunpack.c.l.bf16 %v2511_v62 }
 0x121   : > { %1729 = vst.msk [vmem:[%s3273_s26 + $0x8] sm:$0xf] %vm1456_vm2, %v2412_v27  ;;  %v2410_v35 = vpack.c.bf16 %v3280_v29, %v3280_v29  ;;  %v3290_v39 = vmax.f32 %v1538_v30, 0.0  ;;  %v2384_v45 = vpack.c.bf16 %v1226_v34, %v1226_v34  ;;  %v1503_v47 = vmul.f32 %v3246_v46, %v1226_v34 }
 0x122   : > { %1458 = vst.msk [vmem:[%s3256_s13 + $0x4] sm:$0xf] %vm1456_vm2, %v2379_v32  ;;  %v1536_v44 = vadd.f32 %v3252_v51, %v1498_v33  ;;  %v1218_v48 = vadd.f32 %v1217_v41, %v1057_v38  ;;  %v2565_v49 = vpop.f32.mrf.mxu0  ;;  %v2671_v50 = vpop.f32.mrf.mxu1  ;;  %v2564_v53 = vadd.f32 %v2563_v37, %v2562_v19  ;;  %v2466_v41 = vunpack.c.h.bf16 %v2511_v62 }
 0x123   : > { %1727 = vst.msk [vmem:[%s3273_s26] sm:$0xf] %vm1456_vm2, %v2410_v35  ;;  %v2413_v52 = vpack.c.bf16 %v3290_v39, %v3290_v39  ;;  %v1229_v54 = vadd.f32 %v2671_v50, %v1068_v42  ;;  %1463 = vst.msk [vmem:[%s3256_s13 + $0x18] sm:$0xf] %vm1456_vm2, %v2384_v45  ;;  %v1541_v57 = vadd.f32 %v3252_v51, %v1503_v47 }
 0x124   : > { %v1568_v56 = vmax.f32 %v1536_v44, 0.0  ;;  %v2382_v58 = vpack.c.bf16 %v1218_v48, %v1218_v48  ;;  %v1501_v59 = vmul.f32 %v3246_v46, %v1218_v48  ;;  %v2566_v60 = vpop.f32.mrf.mxu0  ;;  %v1220_v61 = vpop.f32.mrf.mxu1  ;;  %v1073_v20 = vadd.f32 %v2564_v53, %v2461_v43  ;;  %v2512_v48 = vld [vmem:[%s3227_s15 + $0x30] sm:$0xff]  }
 0x125   : > { %1730 = vst.msk [vmem:[%s3273_s26 + $0xc] sm:$0xf] %vm1456_vm2, %v2413_v52  ;;  %v2385_v63 = vpack.c.bf16 %v1229_v54, %v1229_v54  ;;  %v1504_v0 = vmul.f32 %v3246_v46, %v1229_v54  ;;  %v1221_v1 = vadd.f32 %v1220_v61, %v1060_v55  ;;  %v3309_v4 = vmax.f32 %v1541_v57, 0.0 }
 0x126   : > { %v2411_v2 = vpack.c.bf16 %v1568_v56, %v1568_v56  ;;  %1461 = vst.msk [vmem:[%s3256_s13 + $0x10] sm:$0xf] %vm1456_vm2, %v2382_v58  ;;  %v1539_v5 = vadd.f32 %v3252_v51, %v1501_v59  ;;  %v2568_v6 = vpop.f32.mrf.mxu0  ;;  %v2674_v7 = vpop.f32.mrf.mxu1  ;;  %v2567_v18 = vadd.f32 %v2566_v60, %v2565_v49  ;;  %v1760_v34 = vsel %vm957_vm0, %v1568_v56, 0.0 }
 0x127   : > { %1464 = vst.msk [vmem:[%s3256_s13 + $0x1c] sm:$0xf] %vm1456_vm2, %v2385_v63  ;;  %v1542_v9 = vadd.f32 %v3252_v51, %v1504_v0  ;;  %v2383_v10 = vpack.c.bf16 %v1221_v1, %v1221_v1  ;;  %v1502_v13 = vmul.f32 %v3246_v46, %v1221_v1  ;;  %v2416_v15 = vpack.c.bf16 %v3309_v4, %v3309_v4 }
 0x128   : > { %1728 = vst.msk [vmem:[%s3273_s26 + $0x4] sm:$0xf] %vm1456_vm2, %v2411_v2  ;;  %v3323_v17 = vmax.f32 %v1539_v5, 0.0  ;;  %v2569_v19 = vpop.f32.mrf.mxu0  ;;  %v1233_v22 = vpop.f32.mrf.mxu1  ;;  %v1076_v45 = vadd.f32 %v2567_v18, %v2462_v8  ;;  %v1759_v49 = vsel %vm957_vm0, %v3280_v29, 0.0  ;;  %v2469_v59 = vunpack.c.l.bf16 %v2512_v48 }
 0x129   : > { %v3325_v23 = vmax.f32 %v1542_v9, 0.0  ;;  %1462 = vst.msk [vmem:[%s3256_s13 + $0x14] sm:$0xf] %vm1456_vm2, %v2383_v10  ;;  %v1540_v24 = vadd.f32 %v3252_v51, %v1502_v13  ;;  %v2570_v25 = vadd.f32 %v2569_v19, %v2568_v6  ;;  %1733 = vst.msk [vmem:[%s3273_s26 + $0x18] sm:$0xf] %vm1456_vm2, %v2416_v15  ;;  %v1234_v30 = vadd.f32 %v1233_v22, %v1073_v20 }
 0x12a   : > { %v2414_v27 = vpack.c.bf16 %v3323_v17, %v3323_v17  ;;  %v2571_v32 = vpop.f32.mrf.mxu0  ;;  %v2675_v33 = vpop.f32.mrf.mxu1  ;;  %v1761_v53 = vadd.f32 %v1760_v34, %v1759_v49  ;;  %v1762_v2 = vsel %vm957_vm0, %v3262_v12, 0.0  ;;  %v2470_v19 = vunpack.c.h.bf16 %v2512_v48 }
 0x12b   : > { %v2417_v37 = vpack.c.bf16 %v3325_v23, %v3325_v23  ;;  %v3337_v38 = vmax.f32 %v1540_v24, 0.0  ;;  %v1081_v35 = vadd.f32 %v2570_v25, %v2465_v14  ;;  %v2386_v42 = vpack.c.bf16 %v1234_v30, %v1234_v30 }
 0x12c   : > { %1731 = vst.msk [vmem:[%s3273_s26 + $0x10] sm:$0xf] %vm1456_vm2, %v2414_v27  ;;  %v1505_v43 = vmul.f32 %v3246_v46, %v1234_v30  ;;  %v2572_v44 = vpop.f32.mrf.mxu0  ;;  %v1236_v47 = vpop.f32.mrf.mxu1  ;;  %v1763_v8 = vadd.f32 %v1762_v2, %v1761_v53  ;;  %v2513_v27 = vld [vmem:[%s3227_s15 + $0x38] sm:$0xff]   ;;  %v1764_v30 = vsel %vm957_vm0, %v3290_v39, 0.0  ;;  %v1766_v53 = vsel %vm957_vm0, %v3323_v17, 0.0  ;;  %v3418_v2 = vld [vmem:[%s3227_s15 + $0x70] sm:$0xff]  }
 0x12d   : > { %1734 = vst.msk [vmem:[%s3273_s26 + $0x1c] sm:$0xf] %vm1456_vm2, %v2417_v37  ;;  %v2415_v50 = vpack.c.bf16 %v3337_v38, %v3337_v38  ;;  %v2573_v52 = vadd.f32 %v2572_v44, %v2571_v32  ;;  %v1242_v54 = vadd.f32 %v2674_v7, %v1081_v35  ;;  %1465 = vst.msk [vmem:[%s3256_s13 + $0x20] sm:$0xf] %vm1456_vm2, %v2386_v42  ;;  %v1768_v17 = vsel %vm957_vm0, %v3337_v38, 0.0 }
 0x12e   : > { %v1543_v55 = vadd.f32 %v3252_v51, %v1505_v43  ;;  %v1237_v56 = vadd.f32 %v1236_v47, %v1076_v45  ;;  %v2574_v57 = vpop.f32.mrf.mxu0  ;;  %v3352_v58 = vpop.f32.mrf.mxu1  ;;  %v1765_v37 = vadd.f32 %v1764_v30, %v1763_v8  ;;  %v2473_v47 = vunpack.c.l.bf16 %v2513_v27 }
 0x12f   : > { %1732 = vst.msk [vmem:[%s3273_s26 + $0x14] sm:$0xf] %vm1456_vm2, %v2415_v50  ;;  %v1084_v29 = vadd.f32 %v2573_v52, %v2466_v41  ;;  %v2388_v60 = vpack.c.bf16 %v1242_v54, %v1242_v54  ;;  %v1507_v61 = vmul.f32 %v3246_v46, %v1242_v54 }
 0x130   : > { %v3357_v62 = vmax.f32 %v1543_v55, 0.0  ;;  %v2387_v63 = vpack.c.bf16 %v1237_v56, %v1237_v56  ;;  %v2575_v0 = vpop.f32.mrf.mxu0  ;;  %v1249_v1 = vpop.f32.mrf.mxu1  ;;  %v1506_v6 = vmul.f32 %v3246_v46, %v1237_v56 }
 0x131   : > { %v1245_v5 = vadd.f32 %v2675_v33, %v1084_v29  ;;  %v2576_v7 = vadd.f32 %v2575_v0, %v2574_v57  ;;  %1467 = vst.msk [vmem:[%s3256_s13 + $0x28] sm:$0xf] %vm1456_vm2, %v2388_v60  ;;  %v1545_v9 = vadd.f32 %v3252_v51, %v1507_v61  ;;  %v1767_v57 = vadd.f32 %v1766_v53, %v1765_v37  ;;  %v3410_v61 = vld [vmem:[%s3227_s15 + $0x68] sm:$0xff]  }
 0x132   : > { %v2418_v10 = vpack.c.bf16 %v3357_v62, %v3357_v62  ;;  %1466 = vst.msk [vmem:[%s3256_s13 + $0x24] sm:$0xf] %vm1456_vm2, %v2387_v63  ;;  %v2577_v13 = vpop.f32.mrf.mxu0  ;;  %v3369_v14 = vpop.f32.mrf.mxu1  ;;  %v1544_v18 = vadd.f32 %v3252_v51, %v1506_v6  ;;  %v2474_v6 = vunpack.c.h.bf16 %v2513_v27  ;;  %v2501_v27 = vunpack.c.l.bf16 %v3418_v2  ;;  %v3446_v37 = vld [vmem:[%s3227_s15 + $0x48] sm:$0xff]  }
 0x133   : > { %v2389_v12 = vpack.c.bf16 %v1245_v5, %v1245_v5  ;;  %v1508_v15 = vmul.f32 %v3246_v46, %v1245_v5  ;;  %v3373_v20 = vmax.f32 %v1545_v9, 0.0  ;;  %v1089_v22 = vadd.f32 %v2576_v7, %v2469_v59  ;;  %v3425_v9 = vld [vmem:[%s3227_s15 + $0x40] sm:$0xff]  }
 0x134   : > { %1735 = vst.msk [vmem:[%s3273_s26 + $0x20] sm:$0xf] %vm1456_vm2, %v2418_v10  ;;  %v2578_v24 = vpop.f32.mrf.mxu0  ;;  %v1252_v25 = vpop.f32.mrf.mxu1  ;;  %v3383_v33 = vmax.f32 %v1544_v18, 0.0  ;;  %v1769_v18 = vadd.f32 %v1768_v17, %v1767_v57 }
 0x135   : > { %1468 = vst.msk [vmem:[%s3256_s13 + $0x2c] sm:$0xf] %vm1456_vm2, %v2389_v12  ;;  %v1546_v32 = vadd.f32 %v3252_v51, %v1508_v15  ;;  %v2579_v34 = vadd.f32 %v2578_v24, %v2577_v13  ;;  %v2420_v41 = vpack.c.bf16 %v3373_v20, %v3373_v20  ;;  %v1250_v35 = vadd.f32 %v1249_v1, %v1089_v22  ;;  %v3433_v15 = vld [vmem:[%s3227_s15 + $0x78] sm:$0xff]  }
 0x136   : > { %v2580_v42 = vpop.f32.mrf.mxu0  ;;  %v3387_v43 = vpop.f32.mrf.mxu1  ;;  %v2419_v39 = vpack.c.bf16 %v3383_v33, %v3383_v33  ;;  %v2497_v12 = vunpack.c.l.bf16 %v3410_v61 }
 0x137   : > { %v3389_v44 = vmax.f32 %v1546_v32, 0.0  ;;  %v1092_v45 = vadd.f32 %v2579_v34, %v2470_v19  ;;  %1737 = vst.msk [vmem:[%s3273_s26 + $0x28] sm:$0xf] %vm1456_vm2, %v2420_v41  ;;  %v2390_v48 = vpack.c.bf16 %v1250_v35, %v1250_v35  ;;  %v1509_v49 = vmul.f32 %v3246_v46, %v1250_v35 }
 0x138   : > { %v2581_v50 = vpop.f32.mrf.mxu0  ;;  %v3396_v52 = vpop.f32.mrf.mxu1  ;;  %1736 = vst.msk [vmem:[%s3273_s26 + $0x24] sm:$0xf] %vm1456_vm2, %v2419_v39  ;;  %v2477_v34 = vunpack.c.l.bf16 %v3425_v9  ;;  %v2505_v39 = vunpack.c.l.bf16 %v3433_v15 }
 0x139   : > { %v2421_v54 = vpack.c.bf16 %v3389_v44, %v3389_v44  ;;  %v1253_v55 = vadd.f32 %v1252_v25, %v1092_v45  ;;  %v2582_v56 = vadd.f32 %v2581_v50, %v2580_v42  ;;  %1469 = vst.msk [vmem:[%s3256_s13 + $0x30] sm:$0xf] %vm1456_vm2, %v2390_v48  ;;  %v1547_v29 = vadd.f32 %v3252_v51, %v1509_v49  ;;  %v3454_v45 = vld [vmem:[%s3227_s15 + $0x50] sm:$0xff]  }
 0x13a   : > { %v2583_v59 = vpop.f32.mrf.mxu0  ;;  %v3407_v60 = vpop.f32.mrf.mxu1  ;;  %v2498_v25 = vunpack.c.h.bf16 %v3410_v61  ;;  %v2502_v48 = vunpack.c.h.bf16 %v3418_v2  ;;  %v1770_v49 = vsel %vm957_vm0, %v3309_v4, 0.0  ;;  %v2481_v61 = vunpack.c.l.bf16 %v3446_v37 }
 0x13b   : > { %1738 = vst.msk [vmem:[%s3273_s26 + $0x2c] sm:$0xf] %vm1456_vm2, %v2421_v54  ;;  %v2391_v63 = vpack.c.bf16 %v1253_v55, %v1253_v55  ;;  %v1510_v0 = vmul.f32 %v3246_v46, %v1253_v55  ;;  %v1097_v1 = vadd.f32 %v2582_v56, %v2473_v47  ;;  %v3420_v5 = vmax.f32 %v1547_v29, 0.0 }
 0x13c   : > { %v2584_v7 = vpop.f32.mrf.mxu0  ;;  %v3422_v8 = vpop.f32.mrf.mxu1  ;;  %v2506_v47 = vunpack.c.h.bf16 %v3433_v15  ;;  %v1771_v55 = vadd.f32 %v1770_v49, %v1769_v18 }
 0x13d   : > { %1470 = vst.msk [vmem:[%s3256_s13 + $0x34] sm:$0xf] %vm1456_vm2, %v2391_v63  ;;  %v1548_v38 = vadd.f32 %v3252_v51, %v1510_v0  ;;  %v1258_v10 = vadd.f32 %v3352_v58, %v1097_v1  ;;  %v2585_v13 = vadd.f32 %v2584_v7, %v2583_v59  ;;  %v2422_v19 = vpack.c.bf16 %v3420_v5, %v3420_v5  ;;  %v3477_v1 = vld [vmem:[%s3227_s15 + $0x58] sm:$0xff]  }
 0x13e   : > { %v2586_v22 = vpop.f32.mrf.mxu0  ;;  %v3437_v24 = vpop.f32.mrf.mxu1  ;;  %v2478_v59 = vunpack.c.h.bf16 %v3425_v9  ;;  %v2482_v63 = vunpack.c.h.bf16 %v3446_v37  ;;  %v2485_v0 = vunpack.c.l.bf16 %v3454_v45  ;;  %v1780_v37 = vsel %vm957_vm0, %v3389_v44, 0.0 }
 0x13f   : > { %v3441_v30 = vmax.f32 %v1548_v38, 0.0  ;;  %v2392_v58 = vpack.c.bf16 %v1258_v10, %v1258_v10  ;;  %v1511_v32 = vmul.f32 %v3246_v46, %v1258_v10  ;;  %1739 = vst.msk [vmem:[%s3273_s26 + $0x30] sm:$0xf] %vm1456_vm2, %v2422_v19  ;;  %v1100_v41 = vadd.f32 %v2585_v13, %v2474_v6 }
 0x140   : > { %v2587_v35 = vpop.f32.mrf.mxu0  ;;  %v3450_v42 = vpop.f32.mrf.mxu1  ;;  %v1145_v38 = vadd.f32 %v3211_v11, %v2497_v12  ;;  %v2486_v10 = vunpack.c.h.bf16 %v3454_v45  ;;  %v1772_v13 = vsel %vm957_vm0, %v3325_v23, 0.0  ;;  %v1148_v11 = vadd.f32 %v3215_v16, %v2498_v25 }
 0x141   : > { %v2423_v50 = vpack.c.bf16 %v3441_v30, %v3441_v30  ;;  %1471 = vst.msk [vmem:[%s3256_s13 + $0x38] sm:$0xf] %vm1456_vm2, %v2392_v58  ;;  %v1549_v53 = vadd.f32 %v3252_v51, %v1511_v32  ;;  %v2588_v54 = vadd.f32 %v2587_v35, %v2586_v22  ;;  %v1261_v56 = vadd.f32 %v3369_v14, %v1100_v41 }
 0x142   : > { %v2589_v57 = vpop.f32.mrf.mxu0  ;;  %v3466_v29 = vpop.f32.mrf.mxu1  ;;  %v1773_v58 = vadd.f32 %v1772_v13, %v1771_v55  ;;  %v2489_v12 = vunpack.c.l.bf16 %v3477_v1 }
 0x143   : > { %1740 = vst.msk [vmem:[%s3273_s26 + $0x34] sm:$0xf] %vm1456_vm2, %v2423_v50  ;;  %v3472_v4 = vmax.f32 %v1549_v53, 0.0  ;;  %v1105_v17 = vadd.f32 %v2588_v54, %v2477_v34  ;;  %v2393_v14 = vpack.c.bf16 %v1261_v56, %v1261_v56  ;;  %v1512_v6 = vmul.f32 %v3246_v46, %v1261_v56 }
 0x144   : > { %v2590_v7 = vpop.f32.mrf.mxu0  ;;  %v3480_v9 = vpop.f32.mrf.mxu1  ;;  %v2630_v50 = vadd.f32 %v3232_v31, %v3229_v28  ;;  %v2633_v53 = vadd.f32 %v3240_v40, %v3235_v36  ;;  %v1774_v54 = vsel %vm957_vm0, %v3357_v62, 0.0 }
 0x145   : > { %v2424_v18 = vpack.c.bf16 %v3472_v4, %v3472_v4  ;;  %v1266_v19 = vadd.f32 %v3396_v52, %v1105_v17  ;;  %v2591_v22 = vadd.f32 %v2590_v7, %v2589_v57  ;;  %1472 = vst.msk [vmem:[%s3256_s13 + $0x3c] sm:$0xf] %vm1456_vm2, %v2393_v14  ;;  %v1550_v32 = vadd.f32 %v3252_v51, %v1512_v6 }
 0x146   : > { %v2592_v34 = vpop.f32.mrf.mxu0  ;;  %v2690_v41 = vpop.f32.mrf.mxu1  ;;  %v1775_v36 = vadd.f32 %v1774_v54, %v1773_v58  ;;  %v1153_v14 = vadd.f32 %v3217_v21, %v2501_v27  ;;  %v1776_v6 = vsel %vm957_vm0, %v3383_v33, 0.0  ;;  %v1161_v21 = vadd.f32 %v2630_v50, %v2505_v39 }
 0x147   : > { %1741 = vst.msk [vmem:[%s3273_s26 + $0x38] sm:$0xf] %vm1456_vm2, %v2424_v18  ;;  %v2394_v23 = vpack.c.bf16 %v1266_v19, %v1266_v19  ;;  %v1513_v35 = vmul.f32 %v3246_v46, %v1266_v19  ;;  %v1108_v49 = vadd.f32 %v2591_v22, %v2478_v59  ;;  %v1306_v52 = vadd.f32 %v2690_v41, %v1145_v38 }
 0x148   : > { %v3503_v55 = vmax.f32 %v1550_v32, 0.0  ;;  %v2593_v16 = vpop.f32.mrf.mxu0  ;;  %v3505_v25 = vpop.f32.mrf.mxu1  ;;  %v1778_v50 = vsel %vm957_vm0, %v3373_v20, 0.0 }
 0x149   : > { %1473 = vst.msk [vmem:[%s3256_s13 + $0x40] sm:$0xf] %vm1456_vm2, %v2394_v23  ;;  %v1551_v56 = vadd.f32 %v3252_v51, %v1513_v35  ;;  %v1269_v57 = vadd.f32 %v3422_v8, %v1108_v49  ;;  %v2404_v28 = vpack.c.bf16 %v1306_v52, %v1306_v52  ;;  %v1523_v31 = vmul.f32 %v3246_v46, %v1306_v52 }
 0x14a   : > { %v2425_v40 = vpack.c.bf16 %v3503_v55, %v3503_v55  ;;  %v2594_v62 = vadd.f32 %v2593_v16, %v2592_v34  ;;  %v2595_v59 = vpop.f32.mrf.mxu0  ;;  %v2691_v17 = vpop.f32.mrf.mxu1  ;;  %v1164_v34 = vadd.f32 %v2633_v53, %v2506_v47 }
 0x14b   : > { %v3519_v7 = vmax.f32 %v1551_v56, 0.0  ;;  %v2395_v8 = vpack.c.bf16 %v1269_v57, %v1269_v57  ;;  %v1514_v38 = vmul.f32 %v3246_v46, %v1269_v57  ;;  %1483 = vst.msk [vmem:[%s3256_s13 + $0x68] sm:$0xf] %vm1456_vm2, %v2404_v28  ;;  %v1561_v13 = vadd.f32 %v3252_v51, %v1523_v31 }
 0x14c   : > { %1742 = vst.msk [vmem:[%s3273_s26 + $0x3c] sm:$0xf] %vm1456_vm2, %v2425_v40  ;;  %v1113_v18 = vadd.f32 %v2594_v62, %v2481_v61  ;;  %v1309_v19 = vadd.f32 %v2691_v17, %v1148_v11  ;;  %v2596_v22 = vpop.f32.mrf.mxu0  ;;  %v3527_v58 = vpop.f32.mrf.mxu1  ;;  %v1777_v61 = vadd.f32 %v1776_v6, %v1775_v36 }
 0x14d   : > { %v2426_v33 = vpack.c.bf16 %v3519_v7, %v3519_v7  ;;  %1474 = vst.msk [vmem:[%s3256_s13 + $0x44] sm:$0xf] %vm1456_vm2, %v2395_v8  ;;  %v1552_v27 = vadd.f32 %v3252_v51, %v1514_v38  ;;  %v2597_v32 = vadd.f32 %v2596_v22, %v2595_v59  ;;  %v3538_v41 = vmax.f32 %v1561_v13, 0.0 }
 0x14e   : > { %v1274_v11 = vadd.f32 %v3387_v43, %v1113_v18  ;;  %v2405_v23 = vpack.c.bf16 %v1309_v19, %v1309_v19  ;;  %v2598_v35 = vpop.f32.mrf.mxu0  ;;  %v2694_v39 = vpop.f32.mrf.mxu1  ;;  %v1524_v52 = vmul.f32 %v3246_v46, %v1309_v19  ;;  %v1779_v28 = vadd.f32 %v1778_v50, %v1777_v61 }
 0x14f   : > { %1743 = vst.msk [vmem:[%s3273_s26 + $0x40] sm:$0xf] %vm1456_vm2, %v2426_v33  ;;  %v3543_v49 = vmax.f32 %v1552_v27, 0.0  ;;  %v1116_v15 = vadd.f32 %v2597_v32, %v2482_v63  ;;  %v1322_v47 = vadd.f32 %v2694_v39, %v1161_v21  ;;  %v2436_v43 = vpack.c.bf16 %v3538_v41, %v3538_v41 }
 0x150   : > { %v2396_v53 = vpack.c.bf16 %v1274_v11, %v1274_v11  ;;  %v1515_v54 = vmul.f32 %v3246_v46, %v1274_v11  ;;  %1484 = vst.msk [vmem:[%s3256_s13 + $0x6c] sm:$0xf] %vm1456_vm2, %v2405_v23  ;;  %v2599_v16 = vpop.f32.mrf.mxu0  ;;  %v1313_v56 = vpop.f32.mrf.mxu1  ;;  %v1562_v57 = vadd.f32 %v3252_v51, %v1524_v52  ;;  %v1782_v22 = vsel %vm957_vm0, %v3420_v5, 0.0 }
 0x151   : > { %v2427_v63 = vpack.c.bf16 %v3543_v49, %v3543_v49  ;;  %v1277_v20 = vadd.f32 %v3407_v60, %v1116_v15  ;;  %1753 = vst.msk [vmem:[%s3273_s26 + $0x68] sm:$0xf] %vm1456_vm2, %v2436_v43  ;;  %v2408_v36 = vpack.c.bf16 %v1322_v47, %v1322_v47  ;;  %v1527_v40 = vmul.f32 %v3246_v46, %v1322_v47 }
 0x152   : > { %1475 = vst.msk [vmem:[%s3256_s13 + $0x48] sm:$0xf] %vm1456_vm2, %v2396_v53  ;;  %v1553_v31 = vadd.f32 %v3252_v51, %v1515_v54  ;;  %v2601_v44 = vpop.f32.mrf.mxu0  ;;  %v2695_v62 = vpop.f32.mrf.mxu1  ;;  %v3569_v59 = vmax.f32 %v1562_v57, 0.0  ;;  %v2600_v6 = vadd.f32 %v2599_v16, %v2598_v35  ;;  %v1314_v13 = vadd.f32 %v1313_v56, %v1153_v14 }
 0x153   : > { %1744 = vst.msk [vmem:[%s3273_s26 + $0x44] sm:$0xf] %vm1456_vm2, %v2427_v63  ;;  %v2397_v17 = vpack.c.bf16 %v1277_v20, %v1277_v20  ;;  %v1516_v60 = vmul.f32 %v3246_v46, %v1277_v20  ;;  %1487 = vst.msk [vmem:[%s3256_s13 + $0x78] sm:$0xf] %vm1456_vm2, %v2408_v36  ;;  %v1565_v38 = vadd.f32 %v3252_v51, %v1527_v40  ;;  %v1784_v11 = vsel %vm957_vm0, %v3441_v30, 0.0 }
 0x154   : > { %v3572_v8 = vmax.f32 %v1553_v31, 0.0  ;;  %v1325_v18 = vadd.f32 %v2695_v62, %v1164_v34  ;;  %v2602_v19 = vpop.f32.mrf.mxu0  ;;  %v2437_v21 = vpack.c.bf16 %v3569_v59, %v3569_v59  ;;  %v1121_v27 = vadd.f32 %v2600_v6, %v2485_v0  ;;  %v1316_v47 = vpop.f32.mrf.mxu1 }
 0x155   : > { %1476 = vst.msk [vmem:[%s3256_s13 + $0x4c] sm:$0xf] %vm1456_vm2, %v2397_v17  ;;  %v1554_v33 = vadd.f32 %v3252_v51, %v1516_v60  ;;  %v1781_v32 = vadd.f32 %v1780_v37, %v1779_v28  ;;  %v3588_v34 = vmax.f32 %v1565_v38, 0.0  ;;  %v2406_v61 = vpack.c.bf16 %v1314_v13, %v1314_v13 }
 0x156   : > { %v2428_v14 = vpack.c.bf16 %v3572_v8, %v3572_v8  ;;  %v2604_v5 = vpop.f32.mrf.mxu0  ;;  %1754 = vst.msk [vmem:[%s3273_s26 + $0x6c] sm:$0xf] %vm1456_vm2, %v2437_v21  ;;  %v1282_v35 = vadd.f32 %v3450_v42, %v1121_v27  ;;  %v1525_v0 = vmul.f32 %v3246_v46, %v1314_v13  ;;  %v2409_v15 = vpack.c.bf16 %v1325_v18, %v1325_v18 }
 0x157   : > { %v3594_v23 = vmax.f32 %v1554_v33, 0.0  ;;  %v1783_v39 = vadd.f32 %v1782_v22, %v1781_v32  ;;  %v2440_v52 = vpack.c.bf16 %v3588_v34, %v3588_v34  ;;  %1485 = vst.msk [vmem:[%s3256_s13 + $0x70] sm:$0xf] %vm1456_vm2, %v2406_v61  ;;  %v1528_v30 = vmul.f32 %v3246_v46, %v1325_v18 }
 0x158   : > { %1745 = vst.msk [vmem:[%s3273_s26 + $0x48] sm:$0xf] %vm1456_vm2, %v2428_v14  ;;  %v2605_v50 = vpop.f32.mrf.mxu0  ;;  %v2398_v43 = vpack.c.bf16 %v1282_v35, %v1282_v35  ;;  %v1517_v53 = vmul.f32 %v3246_v46, %v1282_v35  ;;  %v1156_v54 = vadd.f32 %v3220_v26, %v2502_v48  ;;  %v1563_v56 = vadd.f32 %v3252_v51, %v1525_v0 }
 0x159   : > { %v2429_v42 = vpack.c.bf16 %v3594_v23, %v3594_v23  ;;  %v1785_v16 = vadd.f32 %v1784_v11, %v1783_v39  ;;  %1757 = vst.msk [vmem:[%s3273_s26 + $0x78] sm:$0xf] %vm1456_vm2, %v2440_v52  ;;  %1488 = vst.msk [vmem:[%s3256_s13 + $0x7c] sm:$0xf] %vm1456_vm2, %v2409_v15  ;;  %v1566_v37 = vadd.f32 %v3252_v51, %v1528_v30  ;;  %v1786_v20 = vsel %vm957_vm0, %v3472_v4, 0.0 }
 0x15a   : > { %v2603_v63 = vadd.f32 %v2602_v19, %v2601_v44  ;;  %v2607_v57 = vpop.f32.mrf.mxu0  ;;  %1477 = vst.msk [vmem:[%s3256_s13 + $0x50] sm:$0xf] %vm1456_vm2, %v2398_v43  ;;  %v1555_v26 = vadd.f32 %v3252_v51, %v1517_v53  ;;  %v1317_v2 = vadd.f32 %v1316_v47, %v1156_v54  ;;  %v2606_v48 = vadd.f32 %v2605_v50, %v2604_v5  ;;  %v3633_v44 = vld [vmem:[%s3227_s15 + $0x60] sm:$0xff]   ;;  %s3823_s15 = scalar_lea.vmem [#allocation4], %s3238_s22 }
 0x15b   : > { %1746 = vst.msk [vmem:[%s3273_s26 + $0x4c] sm:$0xf] %vm1456_vm2, %v2429_v42  ;;  %v1788_v28 = vsel %vm957_vm0, %v3503_v55, 0.0  ;;  %v3626_v31 = vmax.f32 %v1563_v56, 0.0  ;;  %v3628_v36 = vmax.f32 %v1566_v37, 0.0  ;;  %v1787_v6 = vadd.f32 %v1786_v20, %v1785_v16 }
 0x15c   : > { %v1124_v40 = vadd.f32 %v2603_v63, %v2486_v10  ;;  %v2608_v4 = vpop.f32.mrf.mxu0  ;;  %v1587_v62 = vmax.f32 %v1555_v26, 0.0  ;;  %v2407_v17 = vpack.c.bf16 %v1317_v2, %v1317_v2  ;;  %v1526_v60 = vmul.f32 %v3246_v46, %v1317_v2 }
 0x15d   : > { %v1129_v55 = vadd.f32 %v2606_v48, %v2489_v12  ;;  %v2438_v38 = vpack.c.bf16 %v3626_v31, %v3626_v31  ;;  %v2441_v45 = vpack.c.bf16 %v3628_v36, %v3628_v36  ;;  %v2490_v10 = vunpack.c.h.bf16 %v3477_v1 }
 0x15e   : > { %v2610_v13 = vpop.f32.mrf.mxu0  ;;  %v2430_v18 = vpack.c.bf16 %v1587_v62, %v1587_v62  ;;  %v1285_v19 = vadd.f32 %v3480_v9, %v1124_v40  ;;  %1486 = vst.msk [vmem:[%s3256_s13 + $0x74] sm:$0xf] %vm1456_vm2, %v2407_v17  ;;  %v1564_v22 = vadd.f32 %v3252_v51, %v1526_v60  ;;  %v2493_v12 = vunpack.c.l.bf16 %v3633_v44 }
 0x15f   : > { %v1789_v21 = vadd.f32 %v1788_v28, %v1787_v6  ;;  %v1790_v33 = vsel %vm957_vm0, %v3519_v7, 0.0  ;;  %1755 = vst.msk [vmem:[%s3273_s26 + $0x70] sm:$0xf] %vm1456_vm2, %v2438_v38  ;;  %1758 = vst.msk [vmem:[%s3273_s26 + $0x7c] sm:$0xf] %vm1456_vm2, %v2441_v45  ;;  %v1290_v1 = vadd.f32 %v3437_v24, %v1129_v55  ;;  %v2609_v27 = vadd.f32 %v2608_v4, %v2607_v57 }
 0x160   : > { %v2611_v32 = vpop.f32.mrf.mxu0  ;;  %1747 = vst.msk [vmem:[%s3273_s26 + $0x50] sm:$0xf] %vm1456_vm2, %v2430_v18  ;;  %v2399_v9 = vpack.c.bf16 %v1285_v19, %v1285_v19  ;;  %v1518_v14 = vmul.f32 %v3246_v46, %v1285_v19  ;;  %v3658_v61 = vmax.f32 %v1564_v22, 0.0  ;;  %v1792_v7 = vsel %vm957_vm0, %v3543_v49, 0.0 }
 0x161   : > { %v2612_v5 = vadd.f32 %v2611_v32, %v2610_v13  ;;  %v2400_v11 = vpack.c.bf16 %v1290_v1, %v1290_v1  ;;  %v1519_v35 = vmul.f32 %v3246_v46, %v1290_v1  ;;  %v1132_v0 = vadd.f32 %v2609_v27, %v2490_v10 }
 0x162   : > { %v2613_v24 = vpop.f32.mrf.mxu0  ;;  %v1791_v39 = vadd.f32 %v1790_v33, %v1789_v21  ;;  %1478 = vst.msk [vmem:[%s3256_s13 + $0x54] sm:$0xf] %vm1456_vm2, %v2399_v9  ;;  %v1556_v52 = vadd.f32 %v3252_v51, %v1518_v14  ;;  %v2439_v15 = vpack.c.bf16 %v3658_v61, %v3658_v61  ;;  %v1794_v47 = vsel %vm957_vm0, %v3572_v8, 0.0 }
 0x163   : > { %v1137_v30 = vadd.f32 %v2612_v5, %v2493_v12  ;;  %1479 = vst.msk [vmem:[%s3256_s13 + $0x58] sm:$0xf] %vm1456_vm2, %v2400_v11  ;;  %v1557_v49 = vadd.f32 %v3252_v51, %v1519_v35  ;;  %v1293_v50 = vadd.f32 %v3466_v29, %v1132_v0  ;;  %v2494_v42 = vunpack.c.h.bf16 %v3633_v44 }
 0x164   : > { %v2614_v43 = vpop.f32.mrf.mxu0  ;;  %v1793_v53 = vadd.f32 %v1792_v7, %v1791_v39  ;;  %v1588_v54 = vmax.f32 %v1556_v52, 0.0  ;;  %1756 = vst.msk [vmem:[%s3273_s26 + $0x74] sm:$0xf] %vm1456_vm2, %v2439_v15  ;;  %v1796_v8 = vsel %vm957_vm0, %v3594_v23, 0.0  ;;  %v1798_v48 = vsel %vm957_vm0, %v1587_v62, 0.0 }
 0x165   : > { %v1298_v16 = vadd.f32 %v3505_v25, %v1137_v30  ;;  %v2615_v56 = vadd.f32 %v2614_v43, %v2613_v24  ;;  %v1589_v37 = vmax.f32 %v1557_v49, 0.0  ;;  %v2401_v63 = vpack.c.bf16 %v1293_v50, %v1293_v50 }
 0x166   : > { %v1520_v29 = vmul.f32 %v3246_v46, %v1293_v50  ;;  %v1795_v57 = vadd.f32 %v1794_v47, %v1793_v53  ;;  %v2431_v20 = vpack.c.bf16 %v1588_v54, %v1588_v54  ;;  %v1800_v44 = vsel %vm957_vm0, %v1588_v54, 0.0 }
 0x167   : > { %v2402_v26 = vpack.c.bf16 %v1298_v16, %v1298_v16  ;;  %v1521_v2 = vmul.f32 %v3246_v46, %v1298_v16  ;;  %v2432_v28 = vpack.c.bf16 %v1589_v37, %v1589_v37  ;;  %1480 = vst.msk [vmem:[%s3256_s13 + $0x5c] sm:$0xf] %vm1456_vm2, %v2401_v63  ;;  %v1140_v4 = vadd.f32 %v2615_v56, %v2494_v42 }
 0x168   : > { %v1558_v25 = vadd.f32 %v3252_v51, %v1520_v29  ;;  %v1797_v40 = vadd.f32 %v1796_v8, %v1795_v57  ;;  %1748 = vst.msk [vmem:[%s3273_s26 + $0x54] sm:$0xf] %vm1456_vm2, %v2431_v20  ;;  %v1802_v6 = vsel %vm957_vm0, %v1589_v37, 0.0  ;;  %v1810_v14 = vsel %vm957_vm0, %v3538_v41, 0.0 }
 0x169   : > { %1481 = vst.msk [vmem:[%s3256_s13 + $0x60] sm:$0xf] %vm1456_vm2, %v2402_v26  ;;  %v1559_v23 = vadd.f32 %v3252_v51, %v1521_v2  ;;  %1749 = vst.msk [vmem:[%s3273_s26 + $0x58] sm:$0xf] %vm1456_vm2, %v2432_v28  ;;  %v1301_v55 = vadd.f32 %v3527_v58, %v1140_v4  ;;  %v1812_v5 = vsel %vm957_vm0, %v3569_v59, 0.0  ;;  %v1816_v35 = vsel %vm957_vm0, %v3658_v61, 0.0 }
 0x16a   : > { %v1590_v62 = vmax.f32 %v1558_v25, 0.0  ;;  %v1799_v17 = vadd.f32 %v1798_v48, %v1797_v40  ;;  %v1818_v24 = vsel %vm957_vm0, %v3588_v34, 0.0  ;;  %v1820_v41 = vsel %vm957_vm0, %v3628_v36, 0.0  ;;  %v1834_v34 = vld [vmem:[%s3818_s7] sm:$0x1] }
 0x16b   : > { %v1591_v60 = vmax.f32 %v1559_v23, 0.0  ;;  %v2403_v13 = vpack.c.bf16 %v1301_v55, %v1301_v55  ;;  %v1522_v19 = vmul.f32 %v3246_v46, %v1301_v55  ;;  %v1908_v53 = vlaneseq  ;;  %v1935_v2 = vld [vmem:[%s3817_s6 + $0x8] sm:$0x3]  ;;  %v1934_v48 = vld [vmem:[%s3817_s6] sm:$0xff] }
 0x16c   : > { %v2433_v38 = vpack.c.bf16 %v1590_v62, %v1590_v62  ;;  %v1801_v45 = vadd.f32 %v1800_v44, %v1799_v17  ;;  %v1804_v18 = vsel %vm957_vm0, %v1590_v62, 0.0 }
 0x16d   : > { %v2434_v10 = vpack.c.bf16 %v1591_v60, %v1591_v60  ;;  %1482 = vst.msk [vmem:[%s3256_s13 + $0x64] sm:$0xf] %vm1456_vm2, %v2403_v13  ;;  %v1806_v58 = vsel %vm957_vm0, %v1591_v60, 0.0  ;;  %v1560_v12 = vadd.f32 %v3252_v51, %v1522_v19  ;;  %v1814_v51 = vsel %vm957_vm0, %v3626_v31, 0.0 }
 0x16e   : > { %1750 = vst.msk [vmem:[%s3273_s26 + $0x5c] sm:$0xf] %vm1456_vm2, %v2433_v38  ;;  %v1803_v22 = vadd.f32 %v1802_v6, %v1801_v45  ;;  %v1909_v54 = vand.u32 127, %v1908_v53 }
 0x16f   : > { %1751 = vst.msk [vmem:[%s3273_s26 + $0x60] sm:$0xf] %vm1456_vm2, %v2434_v10  ;;  %v1592_v33 = vmax.f32 %v1560_v12, 0.0 }
 0x170   : > { %v1805_v21 = vadd.f32 %v1804_v18, %v1803_v22 }
 0x171   : > { %v2435_v27 = vpack.c.bf16 %v1592_v33, %v1592_v33  ;;  %v1808_v32 = vsel %vm957_vm0, %v1592_v33, 0.0 }
 0x172   : > { %v1807_v1 = vadd.f32 %v1806_v58, %v1805_v21 }
 0x173   : > { %1752 = vst.msk [vmem:[%s3273_s26 + $0x64] sm:$0xf] %vm1456_vm2, %v2435_v27 }
 0x174   : > { %v1809_v9 = vadd.f32 %v1808_v32, %v1807_v1 }
 0x176   : > { %v1811_v46 = vadd.f32 %v1810_v14, %v1809_v9 }
 0x178   : > { %v1813_v7 = vadd.f32 %v1812_v5, %v1811_v46 }
 0x17a   : > { %v1815_v11 = vadd.f32 %v1814_v51, %v1813_v7 }
 0x17c   : > { %v1817_v0 = vadd.f32 %v1816_v35, %v1815_v11 }
 0x17e   : > { %v1819_v39 = vadd.f32 %v1818_v24, %v1817_v0 }
 0x180   : > { %v1821_v52 = vadd.f32 %v1820_v41, %v1819_v39 }
 0x182   : > { %v1822_v15 = vrot.slane %v1821_v52, 4 }
 0x184   : > { %v1823_v59 = vadd.f32 %v1822_v15, %v1821_v52 }
 0x186   : > { %v1824_v30 = vrot.slane %v1823_v59, 2 }
 0x188   : > { %v1825_v47 = vadd.f32 %v1824_v30, %v1823_v59 }
 0x18a   : > { %v1826_v31 = vrot.slane %v1825_v47, 1 }
 0x18c   : > { %v1827_v49 = vadd.f32 %v1826_v31, %v1825_v47 }
 0x18e   : > { %v1829_v50 = vmul.f32 0.00390625, %v1827_v49 }
 0x190   : > { %2705 = vmatmul.mubr.msk.f32.vlgmr.msra.gmra.mxu1 %vm957_vm0, %v1829_v50 }
 0x191   : > { %2711 = vmatprep.mubr.msk.f32.mxu1 %vm2954_vm1, %v2953_v3  ;;  %2708 = vmatpush3.msk.msra.mxu1 %vm1940_vm6, %v1935_v2 }
 0x192   : > { %2709 = vmatprep.subr.mxu1 %v2953_v3 }
 0x193   : > { %2710 = vmatpush3.msra.mxu1 %v1934_v48 }
 0x250   : > { %v1904_v36 = vpop.f32.mrf.mxu1 }
 0x251   : > { %v1905_v61 = vadd.f32 %v1904_v36, %v1834_v34 }
 0x252   : > { %v2706_v42 = vpop.f32.mrf.mxu1 }
 0x253   : > { %v1911_v43 = vsel %vm1910_vm3, %v1905_v61, -inf  ;;  %2014 = vst.msk [vmem:[%s3823_s15] sm:$0x1] %vm1910_vm3, %v1905_v61  ;;  %s2865_s15 = sshll.u32 %s2955_s14, 4  ;;  %s2866_s15 = int_to_ptr.vmem [resolvable:$false] %s2865_s15 }
 0x254   : > { %1912 = vmax.xlane.f32.xlu0 %v1911_v43  ;;  %s2867_s0 = scalar_lea.vmem %s2866_s15, 4096  ;;  %p2868_p0 = scmp.lt.s32.totalorder %s3745_s16, %s2866_s15 }
 0x255   : > { %p2869_p1 = scmp.lt.s32.totalorder %s2867_s0, %s2861_s29 }
 0x257   : > { %p2870_p2 = por %p2869_p1, %p2868_p0 }
 0x259   : > { %p2871_p3 = pnand %p2870_p2, %p2864_p13 }
 0x2dd   : > { %v1913_v16 = vpop.xlane.xlu0 %1912 }
 0x2de   : > { %vm1914_vm4 = vcmp.ge.f32.partialorder %v1905_v61, %v1913_v16 }
 0x2df   : > { %v1915_v56 = vsel %vm1914_vm4, %v1909_v54, 10 }
 0x2e0   : > { %v1916_v8 = vsel %vm1910_vm3, %v1915_v56, 2147483647 }
 0x2e1   : > { %v1918_v37 = vshra.s32 %v1916_v8, 16  ;;  %v1917_v29 = vand.u32 65535, %v1916_v8 }
 0x2e3   : > { %v1920_v63 = vcvt.s32.f32 %v1918_v37  ;;  %v1919_v20 = vcvt.s32.f32 %v1917_v29 }
 0x2e5   : > { %1921 = vmin.xlane.f32.xlu0 %v1920_v63 }
 0x36e   : > { %v1922_v57 = vpop.xlane.xlu0 %1921 }
 0x36f   : > { %vm1923_vm5 = vcmp.eq.f32.partialorder %v1920_v63, %v1922_v57  ;;  %v1928_v28 = vcvt.f32.s32 %v1922_v57 }
 0x370   : > { %v1924_v26 = vsel %vm1923_vm5, %v1919_v20, inf }
 0x371   : > { %1925 = vmin.xlane.f32.xlu1 %v1924_v26  ;;  %v1929_v40 = vshll.u32 %v1928_v28, 16 }
 0x3fa   : > { %v1926_v25 = vpop.xlane.xlu1 %1925 }
 0x3fb   : > { %v1927_v23 = vcvt.f32.s32 %v1926_v25 }
 0x3fd   : > { %v1930_v4 = vadd.s32 %v1929_v40, %v1927_v23 }
 0x3ff   : > { %vm1931_vm8 = vcmp.eq.s32.totalorder %v1909_v54, %v1930_v4 }
 0x400   : > { %v2369_v44 = vsel %vm1931_vm8, 1.0, %v2953_v3 }
 0x401   : > { %2712 = vmatmul.mubr.msk.f32.vlgmr.msra.gmra.mxu1 %vm1936_vm7, %v2369_v44 }
 0x402   : > { %2874 = shalt.err (!%p2871_p3)
}
 0x403   : > { %s2875_s13 = scalar_lea.hbm %s3742_s30, 2048  ;;  %s2879_s12 = scalar_lea.hbm %s3819_s8, 4096 }
 0x404   : > { %p2876_p4 = scmp.ne.s32.totalorder %s3742_s30, %s2875_s13  ;;  %p2880_p9 = scmp.lt.s32.totalorder %s3742_s30, %s3819_s8 }
 0x405   : > { %p2881_p10 = scmp.lt.s32.totalorder %s2879_s12, %s2875_s13 }
 0x406   : > { %p2877_p7 = pnand %p2876_p4, %p3057_p5 }
 0x407   : > { %p2882_p11 = por %p2881_p10, %p2880_p9 }
 0x408   : > { %p2878_p8 = pneg %p2877_p7 }
 0x40a   : > { %p2883_p12 = pnand %p2882_p11, %p2878_p8 }
 0x40c   : > { %2886 = shalt.err (!%p2883_p12)
}
 0x40d   : > { %s2956_s0 = smov 64   ;;  %s2957_s15 = smov 4  }
 0x40e   : > { %s3839_s29 = scalar_lea.sflag [#allocation3], %s3238_s22  ;;  %s2375_s24 = sshll.u32 %s3040_s21, 4 }
 0x40f   : > { %2731 = dma.vmem_to_hbm [thread:$0]  (%p3057_p5), %s3745_s16, 2048, %s3742_s30, %s3839_s29, %s2956_s0, %s2956_s0, %s2957_s15  }
 0x410   : > { %s3840_s25 = scalar_lea.vmem [#allocation4], %s3238_s22  ;;  %s2061_s14 = scalar_lea.hbm %s3821_s10, %s2375_s24 }
 0x411   : > { %s2063_s26 = sshll.u32 %s3840_s25, 4  ;;  %s2028_s1 = scalar_lea.sflag [#allocation5], %s3238_s22  ;;  %s2064_s26 = int_to_ptr.vmem [resolvable:$true] %s2063_s26 }
 0x412   : > { %s2887_s2 = scalar_lea.vmem %s2064_s26, 16  ;;  %s2958_s3 = smov [#allocation4]  }
 0x413   : > { %p2888_p13 = scmp.ne.s32.totalorder %s2064_s26, %s2887_s2  ;;  %s2891_s4 = sshll.u32 %s2958_s3, 4  ;;  %s2892_s4 = int_to_ptr.vmem [resolvable:$false] %s2891_s4 }
 0x414   : > { %s2893_s5 = scalar_lea.vmem %s2892_s4, 32  ;;  %p2894_p2 = scmp.lt.s32.totalorder %s2064_s26, %s2892_s4 }
 0x415   : > { %p2889_p0 = pnand %p2888_p13, %p3057_p5  ;;  %p2895_p3 = scmp.lt.s32.totalorder %s2893_s5, %s2887_s2 }
 0x417   : > { %p2890_p1 = pneg %p2889_p0  ;;  %p2896_p4 = por %p2895_p3, %p2894_p2 }
 0x419   : > { %p2897_p7 = pnand %p2896_p4, %p2890_p1 }
 0x41b   : > { %2900 = shalt.err (!%p2897_p7)
}
 0x41c   : > { %s2901_s30 = scalar_lea.hbm %s2061_s14, 16  ;;  %s2905_s0 = scalar_lea.hbm %s3821_s10, 32 }
 0x41d   : > { %p2902_p8 = scmp.ne.s32.totalorder %s2061_s14, %s2901_s30  ;;  %p2906_p11 = scmp.lt.s32.totalorder %s2061_s14, %s3821_s10 }
 0x41e   : > { %p2907_p12 = scmp.lt.s32.totalorder %s2905_s0, %s2901_s30 }
 0x41f   : > { %p2903_p9 = pnand %p2902_p8, %p3057_p5 }
 0x420   : > { %p2908_p13 = por %p2907_p12, %p2906_p11 }
 0x421   : > { %p2904_p10 = pneg %p2903_p9 }
 0x423   : > { %p2909_p0 = pnand %p2908_p13, %p2904_p10 }
 0x425   : > { %2912 = shalt.err (!%p2909_p0)
}
 0x426   : > { %2732 = dma.vmem_to_hbm [thread:$0]  (%p3057_p5), %s2064_s26, 16, %s2061_s14, %s2028_s1   ;;  %vm2015_vm9 = vcmask 253952  }
 0x427   : > { %p441_p1 = scmp.lt.s32.totalorder %s3040_s21, 1 }
 0x429   : > { %s3849_s21 = smov (!%p441_p1, %s3040_s21), 1 }
 0x42a   : > { %s443_s4 = scalar_lea.vmem %s3822_s11, %s3849_s21 }
 0x4c1   : > { %v2010_v3 = vpop.f32.mrf.mxu1 }
 0x4c2   : > { %2016 = vst.msk [vmem:[%s443_s4] sm:$0x1] %vm2015_vm9, %v2010_v3 }
 0x4c3   : > { %v2713_v62 = vpop.f32.mrf.mxu1 }
 0x4c4 PF: > { %p2742_p2 = scmp.ge.s32.totalorder %s2951_s20, 2  ;;  %s2078_s5 = sand.u32 1, %s2939_s17  }
 0x4c5   : > { %s2079_s1 = scalar_lea.sflag [#allocation3], %s2078_s5 }
 0x4c6   : > { %p2736_p3 = pnand %p2742_p2, %p3061_p6 }
 0x4c8   : > { %p2737_p4 = pneg %p2736_p3 }
 0x4ca   : > { %2930 = dma.done.wait (%p2737_p4), %s2079_s1, 2048  }
 0x4cb   : > { %2932 = vsyncadd (%p2737_p4), %s2079_s1, 4294965248  ;;  %s2096_s27 = scalar_lea.sflag [#allocation5], %s2078_s5 }
 0x4cc   : > { %2934 = dma.done.wait (%p2737_p4), %s2096_s27, 16  }
 0x4cd   : > { %2936 = vsyncadd (%p2737_p4), %s2096_s27, 4294967280  ;;  %s3841_s21 = sld [smem:[#allocation8_spill]]  ;;  %p25_p5 = scmp.ge.s32.totalorder %s3044_s23, 4  }
 0x4ce   : > { %s3842_s17 = smov %s2943_s18  ;;  %s3843_s18 = smov %s2947_s19 }
 0x4cf   : > { %s3845_s20 = smov %s3044_s23  ;;  %27 = sbr.rel (!%p25_p5) target bundleno = 12 (0xc), region = 131 }
 0x4d3   : > { %s3844_s19 = smov %s3841_s21 }
 0x4d4   :  { %2106 = vsyncpa [#allocation3], 1 }
 0x4d5   :  { %2108 = vsyncpa [#allocation3 + $0x1], 1 }
 0x4d6   :  { %2109 = vsyncpa [#allocation5], 1 }
 0x4d7   :  { %2111 = vsyncpa [#allocation5 + $0x1], 1 }

// kernel: wideresnet_forward.12
= control target key start
LH: loop header
LB: loop body
LE: loop exit
PB: predicated region body
PF: predicated region fallthrough
CT: control target
= control target key end

     0   :  { %s1661_s24 = smov 0   ;;  %s1965_s0 = inlined_call_operand.vmem [shape: bf16[128,288], index: 0, kind: input, shape index: {}]   ;;  %s1966_s1 = inlined_call_operand.vmem [shape: bf16[2,1,288], index: 1, kind: input, shape index: {}]   ;;  %s1967_s2 = inlined_call_operand.vmem [shape: bf16[288,64], index: 2, kind: input, shape index: {}]   ;;  %s1968_s3 = inlined_call_operand.vmem [shape: bf16[288,64], index: 3, kind: input, shape index: {}]   ;;  %s1969_s4 = inlined_call_operand.vmem [shape: f32[1,64], index: 4, kind: input, shape index: {}]   ;;  %s1970_s5 = inlined_call_operand.vmem [shape: f32[1,64], index: 5, kind: input, shape index: {}]   ;;  %s1971_s6 = inlined_call_operand.vmem [shape: bf16[128,64], index: 6, kind: output, shape index: {0}]   ;;  %s1972_s7 = inlined_call_operand.vmem [shape: bf16[128,64], index: 7, kind: output, shape index: {1}]  }
   0x1 LB: > { %s1667_s25 = sadd.s32 4294967295, %s1618_s24   ;;  %p1323_p0 = scmp.ge.s32.totalorder %s1618_s24, 1  ;;  %s1618_s24 = sphi %s1661_s24, %s18_s24  }
   0x2   : > { %p251_p1 = scmp.lt.s32.totalorder %s1618_s24, 3 }
   0x4   : > { %p252_p2 = pnand %p1323_p0, %p251_p1 }
   0x5   : > { %p300_p3 = scmp.lt.s32.totalorder (!%p252_p2), %s1667_s25, 1  ;;  %s1324_s14 = sshll.u32 (!%p252_p2), %s1667_s25, 3 }
   0x6   : > { %255 = sbr.rel (%p252_p2) target bundleno = 295 (0x127), region = 44  ;;  %p294_p4 = scmp.lt.s32.totalorder (!%p252_p2), %s1324_s14, 15 }
   0xb   : > { %v1564_v0 = vld [vmem:[%s1967_s2 + $0x78] sm:$0xff]   ;;  %v1566_v2 = vld [vmem:[%s1967_s2 + $0x70] sm:$0xff]   ;;  %v1568_v4 = vld [vmem:[%s1967_s2 + $0x68] sm:$0xff]   ;;  %s301_s13 = scalar_select %p300_p3, %s1667_s25, 1  ;;  %v346_v8 = vlaneseq  ;;  %v1620_v14 = vmov 1966171168  }
   0xc   : > { %v1565_v1 = vld [vmem:[%s1967_s2 + $0x38] sm:$0xff]   ;;  %1437 = vmatprep.subr.bf16.mxu0 %v1564_v0  ;;  %v1567_v3 = vld [vmem:[%s1967_s2 + $0x30] sm:$0xff]   ;;  %v1570_v5 = vld [vmem:[%s1967_s2 + $0x88] sm:$0xff]   ;;  %s1974_s14 = smov (!%p294_p4, %s1324_s14), 15  ;;  %v344_v15 = vunpack.c.l.s4 %v1620_v14  ;;  %vm609_vm0 = vcmask 261120   ;;  %vm1168_vm1 = vcmask 519168  }
   0xd   : > { %1438 = vmatpush3.bf16.msra.mxu0 %v1565_v1  ;;  %s1554_s17 = smul.u32 3, %s301_s13  ;;  %v1569_v6 = vld [vmem:[%s1967_s2 + $0x28] sm:$0xff]   ;;  %1529 = vmatprep.subr.bf16.mxu1 %v1570_v5  ;;  %v1571_v7 = vld [vmem:[%s1967_s2 + $0x60] sm:$0xff]   ;;  %v1574_v11 = vld [vmem:[%s1967_s2 + $0x58] sm:$0xff]   ;;  %v347_v12 = vshrl.u32 %v346_v8, 7  ;;  %s1327_s28 = sshll.u32 %s1974_s14, 2 }
   0xe   : > { %1439 = vmatprep.subr.bf16.mxu0 %v1566_v2  ;;  %1530 = vmatpush3.bf16.msra.mxu1 %v1570_v5  ;;  %v1573_v9 = vld [vmem:[%s1967_s2 + $0x80] sm:$0xff]   ;;  %v1577_v16 = vld [vmem:[%s1968_s3 + $0x78] sm:$0xff]   ;;  %v345_v18 = vunpack.c.0.s8 %v344_v15  ;;  %v1578_v20 = vld [vmem:[%s1967_s2 + $0x50] sm:$0xff]   ;;  %s1553_s16 = smul.u32 12, %s1974_s14  ;;  %s1942_s10 = scalar_lea.vmem %s1972_s7, %s1327_s28 }
   0xf   : > { %s303_s27 = scalar_lea.vmem %s1966_s1, %s1554_s17  ;;  %v1572_v10 = vld [vmem:[%s1967_s2 + $0x20] sm:$0xff]   ;;  %1531 = vmatprep.subr.bf16.mxu1 %v1573_v9  ;;  %v1575_v17 = vld [vmem:[%s1967_s2 + $0x18] sm:$0xff]   ;;  %v1581_v23 = vld [vmem:[%s1967_s2 + $0x10] sm:$0xff]   ;;  %v363_v27 = vsub.s32 0, %v347_v12 }
  0x10   : > { %v1330_v13 = vld.sshfl [vmem:[%s303_s27] sm:$0x13 pattern:$0x75316420]  ;;  %v348_v21 = vsub.s32 %v345_v18, %v347_v12  ;;  %v1583_v25 = vld [vmem:[%s1967_s2 + $0x48] sm:$0xff]   ;;  %s1731_s23 = scalar_lea.vmem %s1965_s0, %s1553_s16  ;;  %v1580_v51 = vld [vmem:[%s1968_s3 + $0x38] sm:$0xff]  }
  0x11   : > { %1440 = vmatpush3.bf16.msra.mxu0 %v1567_v3  ;;  %v342_v19 = vcombine.high %v1330_v13, %v1330_v13  ;;  %v1585_v31 = vld [vmem:[%s1967_s2 + $0x8] sm:$0xff]   ;;  %v1740_v35 = vld [vmem:[%s1731_s23 + $0x14] sm:$0xf]  ;;  %v1587_v36 = vld [vmem:[%s1967_s2 + $0x40] sm:$0xff]  }
  0x12   : > { %1441 = vmatprep.subr.bf16.mxu0 %v1568_v4  ;;  %1532 = vmatpush3.bf16.msra.mxu1 %v1573_v9  ;;  %v349_v22 = vrot.slane %v1330_v13, %v348_v21  ;;  %v1737_v34 = vld [vmem:[%s1731_s23 + $0x8] sm:$0xf]  ;;  %v1746_v38 = vld [vmem:[%s1731_s23 + $0x20] sm:$0xf]  ;;  %v1751_v40 = vld [vmem:[%s1731_s23 + $0x2c] sm:$0xf] }
  0x13   : > { %1483 = vmatprep.subr.bf16.mxu1 %v1577_v16  ;;  %v356_v24 = vrot.slane %v342_v19, %v348_v21  ;;  %v1754_v41 = vld [vmem:[%s1731_s23] sm:$0xff]  ;;  %v1757_v42 = vld [vmem:[%s1731_s23 + $0xc] sm:$0xff]  ;;  %v1774_v54 = vld [vmem:[%s1731_s23 + $0x38] sm:$0xf] }
  0x14   : > { %v357_v26 = vcombine.high %v349_v22, %v349_v22  ;;  %v359_v28 = vpack.i.b16 %v349_v22, %v349_v22  ;;  %v1589_v44 = vld [vmem:[%s1967_s2] sm:$0xff]   ;;  %v1582_v58 = vld [vmem:[%s1968_s3 + $0x70] sm:$0xff]   ;;  %v1595_v61 = vld [vmem:[%s1968_s3 + $0x88] sm:$0xff]   ;;  %v1368_v18 = vcombine.high %v1754_v41, %v1757_v42 }
  0x15   : > { %1442 = vmatpush3.bf16.msra.mxu0 %v1569_v6  ;;  %v366_v29 = vpack.i.b16 %v356_v24, %v356_v24  ;;  %v1777_v55 = vld [vmem:[%s1731_s23 + $0x44] sm:$0xf]  ;;  %v1788_v62 = vld [vmem:[%s1731_s23 + $0x50] sm:$0xf]  ;;  %v1792_v0 = vld [vmem:[%s1731_s23 + $0x5c] sm:$0xf] }
  0x16   : > { %1443 = vmatprep.subr.bf16.mxu0 %v1571_v7  ;;  %v373_v30 = vpack.i.b16 %v357_v26, %v357_v26  ;;  %v364_v32 = vrot.slane %v359_v28, %v363_v27  ;;  %v1796_v2 = vld [vmem:[%s1731_s23 + $0x18] sm:$0xff]  ;;  %v1799_v3 = vld [vmem:[%s1731_s23 + $0x24] sm:$0xff]  ;;  %v1584_v7 = vld [vmem:[%s1968_s3 + $0x30] sm:$0xff]  }
  0x17   : > { %v371_v33 = vrot.slane %v366_v29, %v363_v27  ;;  %v1586_v8 = vld [vmem:[%s1968_s3 + $0x68] sm:$0xff]   ;;  %v1815_v12 = vld [vmem:[%s1731_s23 + $0x30] sm:$0xff]  ;;  %v1818_v13 = vld [vmem:[%s1731_s23 + $0x3c] sm:$0xff] }
  0x18   : > { %v378_v37 = vrot.slane %v373_v30, %v363_v27  ;;  %v1588_v14 = vld [vmem:[%s1968_s3 + $0x28] sm:$0xff]   ;;  %v331_v22 = vld [vmem:[%s1731_s23 + $0x54] sm:$0xff] }
  0x19   : > { %1444 = vmatpush3.bf16.msra.mxu0 %v1572_v10  ;;  %v1748_v39 = vcombine.low %v364_v32, %v371_v33  ;;  %v329_v21 = vld [vmem:[%s1731_s23 + $0x48] sm:$0xff]  ;;  %v1593_v26 = vld [vmem:[%s1968_s3 + $0x58] sm:$0xff]   ;;  %v1596_v30 = vld [vmem:[%s1968_s3 + $0x50] sm:$0xff]   ;;  %s1908_s23 = scalar_lea.vmem %s1971_s6, %s1327_s28 }
  0x1a   : > { %1445 = vmatprep.subr.bf16.mxu0 %v1574_v11  ;;  %v1332_v43 = vcombine.low %v378_v37, %v378_v37  ;;  %v1594_v28 = vld [vmem:[%s1968_s3 + $0x18] sm:$0xff]   ;;  %v1598_v32 = vld [vmem:[%s1968_s3 + $0x48] sm:$0xff]  }
  0x1b   : > { %v389_v45 = vmul.bf16 %v1748_v39, %v1754_v41  ;;  %v391_v46 = vmul.bf16 %v1748_v39, %v1757_v42  ;;  %v393_v5 = vmul.bf16 %v1748_v39, %v1796_v2  ;;  %v395_v6 = vmul.bf16 %v1748_v39, %v1799_v3  ;;  %v1599_v37 = vld [vmem:[%s1968_s3 + $0x8] sm:$0xff]  }
  0x1c   : > { %v390_v47 = vmul.bf16 %v1332_v43, %v1737_v34  ;;  %v392_v48 = vmul.bf16 %v1332_v43, %v1740_v35  ;;  %v394_v49 = vmul.bf16 %v1332_v43, %v1746_v38  ;;  %v396_v50 = vmul.bf16 %v1332_v43, %v1751_v40 }
  0x1d   : > { %1446 = vmatpush3.bf16.msra.mxu0 %v1575_v17  ;;  %v1334_v52 = vcombine.high %v389_v45, %v391_v46  ;;  %v1333_v53 = vcombine.low %v389_v45, %v391_v46  ;;  %v398_v59 = vmul.bf16 %v1332_v43, %v1774_v54  ;;  %v400_v60 = vmul.bf16 %v1332_v43, %v1777_v55  ;;  %v1591_v17 = vld [vmem:[%s1968_s3 + $0x60] sm:$0xff]  }
  0x1e   : > { %1447 = vmatprep.subr.bf16.mxu0 %v1578_v20  ;;  %v1335_v56 = vcombine.low %v390_v47, %v392_v48  ;;  %v1338_v57 = vcombine.low %v394_v49, %v396_v50  ;;  %v402_v1 = vmul.bf16 %v1332_v43, %v1788_v62  ;;  %v404_v4 = vmul.bf16 %v1332_v43, %v1792_v0  ;;  %v1603_v20 = vld [vmem:[%s1968_s3 + $0x80] sm:$0xff]  }
  0x1f   : > { %654 = vmatprep.mubr.bf16.mxu0 %v1334_v52  ;;  %v1341_v63 = vcombine.low %v398_v59, %v400_v60  ;;  %v1337_v9 = vcombine.high %v393_v5, %v395_v6  ;;  %v1336_v11 = vcombine.low %v393_v5, %v395_v6  ;;  %v397_v15 = vmul.bf16 %v1748_v39, %v1815_v12  ;;  %v1601_v43 = vld [vmem:[%s1968_s3] sm:$0xff]  }
  0x20   : > { %1533 = vmatprep.mubr.msk.bf16.mxu1 %vm609_vm0, %v1335_v56  ;;  %v1344_v10 = vcombine.low %v402_v1, %v404_v4  ;;  %v399_v16 = vmul.bf16 %v1748_v39, %v1818_v13  ;;  %v401_v24 = vmul.bf16 %v1748_v39, %v329_v21  ;;  %v1375_v45 = vcombine.low %v1774_v54, %v1777_v55  ;;  %v1892_v54 = vld [vmem:[%s1969_s4] ss:$0 sm:$0xff] }
  0x21   : > { %1448 = vmatpush3.bf16.msra.mxu0 %v1581_v23  ;;  %1534 = vmatmul.mubr.msk.bf16.vlgmr.msra.gmra.mxu1 %vm609_vm0, %v1338_v57  ;;  %v1592_v23 = vld [vmem:[%s1968_s3 + $0x20] sm:$0xff]   ;;  %v1370_v46 = vcombine.low %v1796_v2, %v1799_v3  ;;  %v1376_v47 = vcombine.low %v329_v21, %v331_v22 }
  0x22   : > { %1449 = vmatprep.subr.bf16.mxu0 %v1583_v25  ;;  %1484 = vmatpush3.bf16.msra.mxu1 %v1580_v51  ;;  %v1340_v19 = vcombine.high %v397_v15, %v399_v16  ;;  %v403_v25 = vmul.bf16 %v1748_v39, %v331_v22  ;;  %v1339_v27 = vcombine.low %v397_v15, %v399_v16  ;;  %v1600_v39 = vld [vmem:[%s1968_s3 + $0x40] sm:$0xff]  }
  0x23   : > { %1537 = vmatprep.mubr.msk.bf16.mxu1 %vm609_vm0, %v1341_v63  ;;  %1485 = vmatprep.subr.bf16.mxu1 %v1582_v58  ;;  %v1897_v57 = vld [vmem:[%s1970_s5] ss:$0 sm:$0xff] }
  0x24   : > { %v1343_v29 = vcombine.high %v401_v24, %v403_v25  ;;  %v1342_v33 = vcombine.low %v401_v24, %v403_v25 }
  0x25   : > { %1450 = vmatpush3.bf16.msra.mxu0 %v1585_v31  ;;  %v1597_v31 = vld [vmem:[%s1968_s3 + $0x10] sm:$0xff]  }
  0x26   : > { %1451 = vmatprep.subr.bf16.mxu0 %v1587_v36  ;;  %1486 = vmatpush3.bf16.msra.mxu1 %v1584_v7  ;;  %v1369_v36 = vcombine.low %v1737_v34, %v1740_v35  ;;  %v1372_v34 = vcombine.low %v1746_v38, %v1751_v40  ;;  %v1367_v35 = vcombine.low %v1754_v41, %v1757_v42 }
  0x27   : > { %1487 = vmatprep.subr.bf16.mxu1 %v1586_v8  ;;  %v1378_v38 = vcombine.low %v1788_v62, %v1792_v0  ;;  %v1374_v40 = vcombine.high %v1815_v12, %v1818_v13  ;;  %v1373_v41 = vcombine.low %v1815_v12, %v1818_v13  ;;  %v1377_v42 = vcombine.high %v329_v21, %v331_v22 }
  0x29   : > { %1452 = vmatpush3.bf16.msra.mxu0 %v1589_v44  ;;  %1538 = vmatmul.mubr.msk.bf16.gmra.mxu1 %vm609_vm0, %v1344_v10  ;;  %v1371_v44 = vcombine.high %v1796_v2, %v1799_v3 }
  0x2a   : > { %1541 = vmatprep.subr.bf16.mxu0 %v1595_v61  ;;  %1488 = vmatpush3.bf16.msra.mxu1 %v1588_v14 }
  0x2b   : > { %1489 = vmatprep.subr.bf16.mxu1 %v1591_v17  ;;  %1000 = vmatprep.mubr.bf16.mxu1 %v1368_v18 }
  0x2c   : > { %655 = vmatmul.mubr.bf16.vlgmr.msra.gmra.mxu0 %v1333_v53 }
  0x2d   : > { %1542 = vmatpush3.bf16.msra.mxu0 %v1595_v61  ;;  %662 = vmatprep.mubr.bf16.mxu0 %v1337_v9 }
  0x2e   : > { %1543 = vmatprep.subr.bf16.mxu0 %v1603_v20  ;;  %1490 = vmatpush3.bf16.msra.mxu1 %v1592_v23 }
  0x2f   : > { %1491 = vmatprep.subr.bf16.mxu1 %v1593_v26 }
  0x31   : > { %1544 = vmatpush3.bf16.msra.mxu0 %v1603_v20 }
  0x32   : > { %1492 = vmatpush3.bf16.msra.mxu1 %v1594_v28 }
  0x33   : > { %1493 = vmatprep.subr.bf16.mxu1 %v1596_v30 }
  0x34   : > { %663 = vmatmul.mubr.bf16.gmra.mxu0 %v1336_v11 }
  0x35   : > { %670 = vmatprep.mubr.bf16.mxu0 %v1340_v19 }
  0x36   : > { %1494 = vmatpush3.bf16.msra.mxu1 %v1597_v31 }
  0x37   : > { %1495 = vmatprep.subr.bf16.mxu1 %v1598_v32 }
  0x3a   : > { %1496 = vmatpush3.bf16.msra.mxu1 %v1599_v37 }
  0x3b   : > { %1497 = vmatprep.subr.bf16.mxu1 %v1600_v39 }
  0x3c   : > { %671 = vmatmul.mubr.bf16.gmra.mxu0 %v1339_v27 }
  0x3d   : > { %678 = vmatprep.mubr.bf16.mxu0 %v1343_v29 }
  0x3e   : > { %1498 = vmatpush3.bf16.msra.mxu1 %v1601_v43 }
  0x41   : > { %1001 = vmatmul.mubr.bf16.vlgmr.msra.gmra.mxu1 %v1367_v35 }
  0x42   : > { %1008 = vmatprep.mubr.bf16.mxu1 %v1371_v44 }
  0x44   : > { %679 = vmatmul.mubr.bf16.gmra.mxu0 %v1342_v33 }
  0x45   : > { %1545 = vmatprep.mubr.msk.bf16.mxu0 %vm609_vm0, %v1369_v36 }
  0x49   : > { %1009 = vmatmul.mubr.bf16.gmra.mxu1 %v1370_v46 }
  0x4a   : > { %1016 = vmatprep.mubr.bf16.mxu1 %v1374_v40 }
  0x4c   : > { %1546 = vmatmul.mubr.msk.bf16.vlgmr.msra.gmra.mxu0 %vm609_vm0, %v1372_v34 }
  0x4d   : > { %1549 = vmatprep.mubr.msk.bf16.mxu0 %vm609_vm0, %v1375_v45 }
  0x51   : > { %1017 = vmatmul.mubr.bf16.gmra.mxu1 %v1373_v41 }
  0x52   : > { %1024 = vmatprep.mubr.bf16.mxu1 %v1377_v42 }
  0x54   : > { %1550 = vmatmul.mubr.msk.bf16.gmra.mxu0 %vm609_vm0, %v1378_v38 }
  0x59   : > { %1025 = vmatmul.mubr.bf16.gmra.mxu1 %v1376_v47 }
  0xe1   : > { %v1535_v48 = vpop.f32.mrf.mxu1 }
  0xe3   : > { %v721_v50 = vpop.f32.mrf.mxu1 }
  0xe5   : > { %v1536_v53 = vpop.f32.mrf.mxu1 }
  0xe7   : > { %v724_v61 = vpop.f32.mrf.mxu1 }
  0xe9   : > { %v1539_v5 = vpop.f32.mrf.mxu1 }
  0xeb   : > { %v737_v14 = vpop.f32.mrf.mxu1 }
  0xec   : > { %v1453_v49 = vpop.f32.mrf.mxu0 }
  0xed   : > { %v1540_v23 = vpop.f32.mrf.mxu1 }
  0xee   : > { %v1454_v51 = vpop.f32.mrf.mxu0 }
  0xef   : > { %v1455_v52 = vadd.f32 %v1454_v51, %v1453_v49  ;;  %v740_v32 = vpop.f32.mrf.mxu1 }
  0xf0   : > { %v1456_v55 = vpop.f32.mrf.mxu0 }
  0xf1   : > { %v722_v56 = vadd.f32 %v1455_v52, %v721_v50 }
  0xf2   : > { %v1457_v58 = vpop.f32.mrf.mxu0 }
  0xf3   : > { %v1106_v59 = vmul.f32 %v1892_v54, %v722_v56  ;;  %v1458_v60 = vadd.f32 %v1457_v58, %v1456_v55 }
  0xf4   : > { %v1459_v62 = vpop.f32.mrf.mxu0 }
  0xf5   : > { %v1120_v63 = vadd.f32 %v1897_v57, %v1106_v59  ;;  %v725_v0 = vadd.f32 %v1458_v60, %v724_v61 }
  0xf6   : > { %v1460_v1 = vpop.f32.mrf.mxu0 }
  0xf7   : > { %v1128_v2 = vmax.f32 %v1120_v63, 0.0  ;;  %v1107_v3 = vmul.f32 %v1892_v54, %v725_v0  ;;  %v1461_v4 = vadd.f32 %v1460_v1, %v1459_v62 }
  0xf8   : > { %v1462_v6 = vpop.f32.mrf.mxu0 }
  0xf9   : > { %v1421_v7 = vpack.c.bf16 %v1128_v2, %v1128_v2  ;;  %v1121_v8 = vadd.f32 %v1897_v57, %v1107_v3  ;;  %v730_v9 = vadd.f32 %v1535_v48, %v1461_v4 }
  0xfa   : > { %v1463_v10 = vpop.f32.mrf.mxu0 }
  0xfb   : > { %1169 = vst.msk [vmem:[%s1908_s23] sm:$0xf] %vm1168_vm1, %v1421_v7  ;;  %v1129_v11 = vmax.f32 %v1121_v8, 0.0  ;;  %v1108_v12 = vmul.f32 %v1892_v54, %v730_v9  ;;  %v1464_v13 = vadd.f32 %v1463_v10, %v1462_v6 }
  0xfc   : > { %v1465_v15 = vpop.f32.mrf.mxu0 }
  0xfd   : > { %v1422_v16 = vpack.c.bf16 %v1129_v11, %v1129_v11  ;;  %v1122_v17 = vadd.f32 %v1897_v57, %v1108_v12  ;;  %v733_v18 = vadd.f32 %v1536_v53, %v1464_v13 }
  0xfe   : > { %v1466_v19 = vpop.f32.mrf.mxu0 }
  0xff   : > { %1170 = vst.msk [vmem:[%s1908_s23 + $0x4] sm:$0xf] %vm1168_vm1, %v1422_v16  ;;  %v1130_v20 = vmax.f32 %v1122_v17, 0.0  ;;  %v1109_v21 = vmul.f32 %v1892_v54, %v733_v18  ;;  %v1467_v22 = vadd.f32 %v1466_v19, %v1465_v15 }
 0x100   : > { %v1468_v24 = vpop.f32.mrf.mxu0 }
 0x101   : > { %v1423_v25 = vpack.c.bf16 %v1130_v20, %v1130_v20  ;;  %v1123_v26 = vadd.f32 %v1897_v57, %v1109_v21  ;;  %v738_v27 = vadd.f32 %v1467_v22, %v737_v14  ;;  %v1499_v49 = vpop.f32.mrf.mxu1 }
 0x102   : > { %v1469_v28 = vpop.f32.mrf.mxu0 }
 0x103   : > { %1171 = vst.msk [vmem:[%s1908_s23 + $0x8] sm:$0xf] %vm1168_vm1, %v1423_v25  ;;  %v1131_v29 = vmax.f32 %v1123_v26, 0.0  ;;  %v1110_v30 = vmul.f32 %v1892_v54, %v738_v27  ;;  %v1470_v31 = vadd.f32 %v1469_v28, %v1468_v24  ;;  %v1500_v55 = vpop.f32.mrf.mxu1 }
 0x104   : > { %v1471_v33 = vpop.f32.mrf.mxu0  ;;  %v1501_v58 = vadd.f32 %v1500_v55, %v1499_v49 }
 0x105   : > { %v1424_v36 = vpack.c.bf16 %v1131_v29, %v1131_v29  ;;  %v1124_v37 = vadd.f32 %v1897_v57, %v1110_v30  ;;  %v741_v39 = vadd.f32 %v1470_v31, %v740_v32  ;;  %v1502_v61 = vpop.f32.mrf.mxu1 }
 0x106   : > { %v1472_v43 = vpop.f32.mrf.mxu0 }
 0x107   : > { %1172 = vst.msk [vmem:[%s1908_s23 + $0xc] sm:$0xf] %vm1168_vm1, %v1424_v36  ;;  %v1132_v34 = vmax.f32 %v1124_v37, 0.0  ;;  %v1111_v35 = vmul.f32 %v1892_v54, %v741_v39  ;;  %v1473_v44 = vadd.f32 %v1472_v43, %v1471_v33  ;;  %v1503_v2 = vpop.f32.mrf.mxu1 }
 0x108   : > { %v1474_v45 = vpop.f32.mrf.mxu0  ;;  %v1504_v4 = vadd.f32 %v1503_v2, %v1502_v61 }
 0x109   : > { %v1425_v46 = vpack.c.bf16 %v1132_v34, %v1132_v34  ;;  %v1125_v38 = vadd.f32 %v1897_v57, %v1111_v35  ;;  %v746_v40 = vadd.f32 %v1539_v5, %v1473_v44  ;;  %v1505_v7 = vpop.f32.mrf.mxu1 }
 0x10a   : > { %v1475_v41 = vpop.f32.mrf.mxu0 }
 0x10b   : > { %1173 = vst.msk [vmem:[%s1908_s23 + $0x10] sm:$0xf] %vm1168_vm1, %v1425_v46  ;;  %v1133_v42 = vmax.f32 %v1125_v38, 0.0  ;;  %v1112_v47 = vmul.f32 %v1892_v54, %v746_v40  ;;  %v1476_v48 = vadd.f32 %v1475_v41, %v1474_v45  ;;  %v1506_v8 = vpop.f32.mrf.mxu1 }
 0x10c   : > { %v1547_v50 = vpop.f32.mrf.mxu0  ;;  %v1507_v10 = vadd.f32 %v1506_v8, %v1505_v7 }
 0x10d   : > { %v1426_v51 = vpack.c.bf16 %v1133_v42, %v1133_v42  ;;  %v1126_v52 = vadd.f32 %v1897_v57, %v1112_v47  ;;  %v749_v53 = vadd.f32 %v1540_v23, %v1476_v48  ;;  %v1508_v12 = vpop.f32.mrf.mxu1 }
 0x10e   : > { %v1067_v56 = vpop.f32.mrf.mxu0  ;;  %v1076_v13 = vadd.f32 %v1547_v50, %v1507_v10 }
 0x10f   : > { %1174 = vst.msk [vmem:[%s1908_s23 + $0x14] sm:$0xf] %vm1168_vm1, %v1426_v51  ;;  %v1134_v59 = vmax.f32 %v1126_v52, 0.0  ;;  %v1113_v60 = vmul.f32 %v1892_v54, %v749_v53  ;;  %v1068_v1 = vadd.f32 %v1501_v58, %v1067_v56  ;;  %v1509_v14 = vpop.f32.mrf.mxu1 }
 0x110   : > { %v1548_v62 = vpop.f32.mrf.mxu0  ;;  %v1431_v16 = vpack.c.bf16 %v1076_v13, %v1076_v13  ;;  %v1510_v17 = vadd.f32 %v1509_v14, %v1508_v12 }
 0x111   : > { %v1427_v63 = vpack.c.bf16 %v1134_v59, %v1134_v59  ;;  %v1127_v0 = vadd.f32 %v1897_v57, %v1113_v60  ;;  %v1429_v6 = vpack.c.bf16 %v1068_v1, %v1068_v1  ;;  %v1511_v18 = vpop.f32.mrf.mxu1 }
 0x112   : > { %v1070_v3 = vpop.f32.mrf.mxu0  ;;  %1211 = vst.msk [vmem:[%s1942_s10 + $0x8] sm:$0xf] %vm1168_vm1, %v1431_v16  ;;  %v1079_v19 = vadd.f32 %v1548_v62, %v1510_v17 }
 0x113   : > { %1175 = vst.msk [vmem:[%s1908_s23 + $0x18] sm:$0xf] %vm1168_vm1, %v1427_v63  ;;  %v1135_v5 = vmax.f32 %v1127_v0, 0.0  ;;  %1209 = vst.msk [vmem:[%s1942_s10] sm:$0xf] %vm1168_vm1, %v1429_v6  ;;  %v1071_v57 = vadd.f32 %v1504_v4, %v1070_v3  ;;  %v1512_v20 = vpop.f32.mrf.mxu1 }
 0x114   : > { %v1551_v9 = vpop.f32.mrf.mxu0  ;;  %v1432_v22 = vpack.c.bf16 %v1079_v19, %v1079_v19  ;;  %v1513_v23 = vadd.f32 %v1512_v20, %v1511_v18 }
 0x115   : > { %v1428_v54 = vpack.c.bf16 %v1135_v5, %v1135_v5  ;;  %v1430_v11 = vpack.c.bf16 %v1071_v57, %v1071_v57  ;;  %v1514_v24 = vpop.f32.mrf.mxu1 }
 0x116   : > { %v1083_v15 = vpop.f32.mrf.mxu0  ;;  %1212 = vst.msk [vmem:[%s1942_s10 + $0xc] sm:$0xf] %vm1168_vm1, %v1432_v22 }
 0x117   : > { %1176 = vst.msk [vmem:[%s1908_s23 + $0x1c] sm:$0xf] %vm1168_vm1, %v1428_v54  ;;  %1210 = vst.msk [vmem:[%s1942_s10 + $0x4] sm:$0xf] %vm1168_vm1, %v1430_v11  ;;  %v1084_v25 = vadd.f32 %v1513_v23, %v1083_v15  ;;  %v1515_v26 = vpop.f32.mrf.mxu1 }
 0x118   : > { %v1552_v21 = vpop.f32.mrf.mxu0  ;;  %v1516_v28 = vadd.f32 %v1515_v26, %v1514_v24 }
 0x119   : > { %v1433_v29 = vpack.c.bf16 %v1084_v25, %v1084_v25  ;;  %v1517_v30 = vpop.f32.mrf.mxu1 }
 0x11a   : > { %v1086_v27 = vpop.f32.mrf.mxu0 }
 0x11b   : > { %1213 = vst.msk [vmem:[%s1942_s10 + $0x10] sm:$0xf] %vm1168_vm1, %v1433_v29  ;;  %v1087_v31 = vadd.f32 %v1516_v28, %v1086_v27  ;;  %v1518_v32 = vpop.f32.mrf.mxu1 }
 0x11c   : > { %v1519_v33 = vadd.f32 %v1518_v32, %v1517_v30 }
 0x11d   : > { %v1434_v36 = vpack.c.bf16 %v1087_v31, %v1087_v31  ;;  %v1520_v37 = vpop.f32.mrf.mxu1 }
 0x11e   : > { %v1092_v39 = vadd.f32 %v1551_v9, %v1519_v33 }
 0x11f   : > { %1214 = vst.msk [vmem:[%s1942_s10 + $0x14] sm:$0xf] %vm1168_vm1, %v1434_v36  ;;  %v1521_v43 = vpop.f32.mrf.mxu1 }
 0x120   : > { %v1435_v34 = vpack.c.bf16 %v1092_v39, %v1092_v39  ;;  %v1522_v35 = vadd.f32 %v1521_v43, %v1520_v37 }
 0x122   : > { %1215 = vst.msk [vmem:[%s1942_s10 + $0x18] sm:$0xf] %vm1168_vm1, %v1435_v34  ;;  %v1095_v44 = vadd.f32 %v1552_v21, %v1522_v35 }
 0x124   : > { %v1436_v45 = vpack.c.bf16 %v1095_v44, %v1095_v44 }
 0x126   : > { %1216 = vst.msk [vmem:[%s1942_s10 + $0x1c] sm:$0xf] %vm1168_vm1, %v1436_v45 }
 0x127 PF: > { %s18_s24 = sadd.s32 1, %s1618_s24  }
 0x128   : > { %p15_p5 = scmp.ge.s32.totalorder %s18_s24, 4  }
 0x12a   :  { %17 = sbr.rel (!%p15_p5) target bundleno = 1 (0x1), region = 89 }

// kernel: wideresnet_forward.13
= control target key start
LH: loop header
LB: loop body
LE: loop exit
PB: predicated region body
PF: predicated region fallthrough
CT: control target
= control target key end

     0   :  { %s2423_s0 = inlined_call_operand.vmem [shape: bf16[128,576], index: 0, kind: input, shape index: {}]   ;;  %s2424_s1 = inlined_call_operand.vmem [shape: bf16[576,64], index: 1, kind: input, shape index: {}]   ;;  %s2425_s2 = inlined_call_operand.vmem [shape: bf16[128,64], index: 2, kind: input, shape index: {}]   ;;  %s2426_s3 = inlined_call_operand.vmem [shape: f32[1,64], index: 3, kind: input, shape index: {}]   ;;  %s2427_s4 = inlined_call_operand.vmem [shape: f32[1,64], index: 4, kind: input, shape index: {}]   ;;  %s2428_s5 = inlined_call_operand.vmem [shape: f32[64,10], index: 5, kind: input, shape index: {}]   ;;  %s2429_s6 = inlined_call_operand.vmem [shape: f32[10,64], index: 6, kind: input, shape index: {}]   ;;  %s2430_s7 = inlined_call_operand.vmem [shape: f32[1,10], index: 7, kind: input, shape index: {}, may-alias: {7,9}]   ;;  %s2431_s8 = inlined_call_operand.vmem [shape: f32[64,10], index: 8, kind: input, shape index: {}]   ;;  %s2432_s9 = inlined_call_operand.vmem [shape: f32[1,10], index: 9, kind: input, shape index: {}, may-alias: {7,9}]   ;;  %s2433_s10 = inlined_call_operand.hbm [shape: f32[2,1,10], index: 10, kind: output, shape index: {0}]   ;;  %s2434_s11 = inlined_call_operand.hbm [shape: f32[2,1,10], index: 11, kind: output, shape index: {1}]  }
   0x1   :  { %2437 = sst [smem:[#allocation10_spill]] %s2423_s0 }
   0x2   :  { %2438 = sst [smem:[#allocation11_spill]] %s2424_s1 }
   0x3   :  { %17 = vsyncpa [#allocation3], 0 }
   0x4   :  { %19 = vsyncpa [#allocation3 + $0x1], 0 }
   0x5   :  { %20 = vsyncpa [#allocation5], 0 }
   0x6   :  { %22 = vsyncpa [#allocation5 + $0x1], 0  ;;  %s2052_s17 = smov 0   ;;  %s2054_s18 = smov 0  }
   0x7   :  { %s2056_s19 = smov 0   ;;  %s2058_s20 = smov 0  }
   0x8 LB: > { %2439 = sst [smem:[#allocation8_spill]] %s1982_s19  ;;  %s2073_s21 = sadd.s32 4294967295, %s1986_s20   ;;  %s1986_s20 = sphi %s2058_s20, %s2450_s20   ;;  %s1982_s19 = sphi %s2056_s19, %s2447_s19   ;;  %s1978_s18 = sphi %s2054_s18, %s2449_s18   ;;  %s1974_s17 = sphi %s2052_s17, %s2448_s17  }
   0x9   : > { %s1517_s22 = sadd.s32 4294967294, %s1986_s20   ;;  %s2077_s23 = sadd.s32 1, %s1986_s20  }
   0xa   : > { %s255_s24 = sadd.s32 1, %s1982_s19  ;;  %s252_s25 = ssub.s32 %s1986_s20, %s2077_s23 }
   0xb   : > { %p265_p0 = scmp.ne.s32.totalorder %s1982_s19, %s1978_s18  ;;  %p253_p1 = scmp.eq.s32.totalorder %s252_s25, 0 }
   0xc   : > { %p266_p2 = scmp.eq.s32.totalorder %s2073_s21, 1  ;;  %p271_p3 = scmp.ne.s32.totalorder %s1978_s18, %s1974_s17 }
   0xd   : > { %p272_p4 = scmp.eq.s32.totalorder %s1517_s22, 1  ;;  %p1520_p7 = scmp.ge.s32.totalorder %s1986_s20, 1 }
   0xe   : > { %s2088_s26 = scalar_select %p253_p1, %s1982_s19, %s255_s24  }
   0xf   : > { %p2090_p5 = por %p266_p2, %p265_p0  ;;  %p2094_p6 = por %p272_p4, %p271_p3 }
  0x10   : > { %2440 = sst [smem:[#allocation9_spill]] %s2088_s26  ;;  %p359_p8 = scmp.lt.s32.totalorder %s1986_s20, 3 }
  0x12   : > { %p360_p9 = pnand %p1520_p7, %p359_p8 }
  0x13   : > { %s2443_s1 = sld [smem:[#allocation11_spill]] (!%p360_p9)  ;;  %s1521_s24 = sshll.u32 (!%p360_p9), %s2073_s21, 3 }
  0x14   : > { %363 = sbr.rel (%p360_p9) target bundleno = 1354 (0x54a), region = 60  ;;  %p409_p10 = scmp.lt.s32.totalorder (!%p360_p9), %s1521_s24, 15 }
  0x15   : > { %s2444_s0 = sld [smem:[#allocation10_spill]] (!%p360_p9)  ;;  %s1990_s19 = smov (!%p360_p9), [#allocation4]  }
  0x16   : > { %s1900_s25 = sshll.u32 (!%p360_p9), %s1990_s19, 4  ;;  %s1901_s25 = int_to_ptr.vmem [resolvable:$false] %s1900_s25 }
  0x17   : > { %s1902_s29 = scalar_lea.vmem (!%p360_p9), %s1901_s25, 32 }
  0x19   : > { %v1832_v0 = vld [vmem:[%s2443_s1 + $0x78] sm:$0xff]   ;;  %v1836_v4 = vld [vmem:[%s2443_s1 + $0x70] sm:$0xff]   ;;  %v1840_v8 = vld [vmem:[%s2443_s1 + $0x68] sm:$0xff]   ;;  %s2452_s24 = smov (!%p409_p10, %s1521_s24), 15  ;;  %vm850_vm0 = vcmask 523264   ;;  %v1988_v57 = vmov 0.0  }
  0x1a   : > { %v1833_v1 = vld [vmem:[%s2443_s1 + $0x38] sm:$0xff]   ;;  %1615 = vmatprep.subr.bf16.mxu0 %v1832_v0  ;;  %v1837_v5 = vld [vmem:[%s2443_s1 + $0x30] sm:$0xff]   ;;  %v1841_v9 = vld [vmem:[%s2443_s1 + $0x28] sm:$0xff]   ;;  %s1785_s13 = smul.u32 20, %s2452_s24  ;;  %vm1989_vm1 = vmmov 0   ;;  %s1524_s30 = sshll.u32 %s2452_s24, 2 }
  0x1b   : > { %v1834_v2 = vld [vmem:[%s2443_s1 + $0xf8] sm:$0xff]   ;;  %1616 = vmatpush3.bf16.msra.mxu0 %v1833_v1  ;;  %v1838_v6 = vld [vmem:[%s2443_s1 + $0xf0] sm:$0xff]   ;;  %v1842_v10 = vld [vmem:[%s2443_s1 + $0xe8] sm:$0xff]   ;;  %s419_s15 = scalar_lea.vmem %s2425_s2, %s1524_s30  ;;  %vm1203_vm2 = vcmask 73728   ;;  %vm1233_vm5 = vcmask 1041408   ;;  %vm1229_vm6 = vcmask 80896  }
  0x1c   : > { %v1835_v3 = vld [vmem:[%s2443_s1 + $0xb8] sm:$0xff]   ;;  %1655 = vmatprep.subr.bf16.mxu1 %v1834_v2  ;;  %1617 = vmatprep.subr.bf16.mxu0 %v1836_v4  ;;  %v1839_v7 = vld [vmem:[%s2443_s1 + $0xb0] sm:$0xff]   ;;  %v1843_v11 = vld [vmem:[%s2443_s1 + $0xa8] sm:$0xff]   ;;  %s2194_s26 = scalar_lea.vmem %s2444_s0, %s1785_s13  ;;  %s2304_s13 = sand.u32 1, %s1978_s18  }
  0x1d   : > { %1656 = vmatpush3.bf16.msra.mxu1 %v1835_v3  ;;  %v1844_v12 = vld [vmem:[%s2443_s1 + $0x60] sm:$0xff]   ;;  %v1848_v16 = vld [vmem:[%s2443_s1 + $0x58] sm:$0xff]   ;;  %v1852_v20 = vld [vmem:[%s2443_s1 + $0x50] sm:$0xff]   ;;  %s2436_s30 = sshll.u32 %s2073_s21, 4  ;;  %s1397_s16 = scalar_lea.sflag [#allocation5], %s2304_s13 }
  0x1e   : > { %1657 = vmatprep.subr.bf16.mxu1 %v1838_v6  ;;  %v1845_v13 = vld [vmem:[%s2443_s1 + $0x20] sm:$0xff]   ;;  %v1849_v17 = vld [vmem:[%s2443_s1 + $0x18] sm:$0xff]   ;;  %v1853_v21 = vld [vmem:[%s2443_s1 + $0x10] sm:$0xff]  }
  0x1f   : > { %1618 = vmatpush3.bf16.msra.mxu0 %v1837_v5  ;;  %v1846_v14 = vld [vmem:[%s2443_s1 + $0xe0] sm:$0xff]   ;;  %v1850_v18 = vld [vmem:[%s2443_s1 + $0xd8] sm:$0xff]   ;;  %v1854_v22 = vld [vmem:[%s2443_s1 + $0xd0] sm:$0xff]  }
  0x20   : > { %1619 = vmatprep.subr.bf16.mxu0 %v1840_v8  ;;  %v1847_v15 = vld [vmem:[%s2443_s1 + $0xa0] sm:$0xff]   ;;  %v1851_v19 = vld [vmem:[%s2443_s1 + $0x98] sm:$0xff]   ;;  %v1855_v23 = vld [vmem:[%s2443_s1 + $0x90] sm:$0xff]  }
  0x21   : > { %1658 = vmatpush3.bf16.msra.mxu1 %v1839_v7  ;;  %v1856_v24 = vld [vmem:[%s2443_s1 + $0x48] sm:$0xff]   ;;  %v1860_v28 = vld [vmem:[%s2443_s1 + $0x40] sm:$0xff]   ;;  %v1867_v34 = vld [vmem:[%s2443_s1 + $0x118] sm:$0xff]  }
  0x22   : > { %1659 = vmatprep.subr.bf16.mxu1 %v1842_v10  ;;  %v1857_v25 = vld [vmem:[%s2443_s1 + $0x8] sm:$0xff]   ;;  %v1861_v29 = vld [vmem:[%s2443_s1] sm:$0xff]   ;;  %v1874_v38 = vld [vmem:[%s2443_s1 + $0x110] sm:$0xff]  }
  0x23   : > { %1620 = vmatpush3.bf16.msra.mxu0 %v1841_v9  ;;  %v1858_v26 = vld [vmem:[%s2443_s1 + $0xc8] sm:$0xff]   ;;  %v1862_v30 = vld [vmem:[%s2443_s1 + $0xc0] sm:$0xff]   ;;  %v1882_v44 = vld [vmem:[%s2194_s26 + $0x5c] ss:$20 sps:$4 sm:$0xff]  }
  0x24   : > { %1621 = vmatprep.subr.bf16.mxu0 %v1844_v12  ;;  %v1859_v27 = vld [vmem:[%s2443_s1 + $0x88] sm:$0xff]   ;;  %v1863_v31 = vld [vmem:[%s2194_s26] ss:$20 sps:$4 sm:$0xff]   ;;  %v1865_v32 = vld [vmem:[%s2194_s26 + $0x4] ss:$20 sps:$4 sm:$0xff]  }
  0x25   : > { %1660 = vmatpush3.bf16.msra.mxu1 %v1843_v11  ;;  %v1866_v33 = vld [vmem:[%s2443_s1 + $0x80] sm:$0xff]   ;;  %895 = vmatprep.mubr.bf16.mxu0 %v1865_v32  ;;  %v1868_v35 = vld [vmem:[%s2194_s26 + $0x8] ss:$20 sps:$4 sm:$0xff]   ;;  %v1884_v48 = vld [vmem:[%s2194_s26 + $0x58] ss:$20 sps:$4 sm:$0xff]  }
  0x26   : > { %1661 = vmatprep.subr.bf16.mxu1 %v1846_v14  ;;  %v1870_v36 = vld [vmem:[%s2194_s26 + $0xc] ss:$20 sps:$4 sm:$0xff]   ;;  %v1875_v39 = vld [vmem:[%s2194_s26 + $0x34] ss:$20 sps:$4 sm:$0xff]   ;;  %v1877_v43 = vld [vmem:[%s2194_s26 + $0x30] ss:$20 sps:$4 sm:$0xff]  }
  0x27   : > { %1622 = vmatpush3.bf16.msra.mxu0 %v1845_v13  ;;  %v1871_v37 = vld [vmem:[%s2194_s26 + $0x2c] ss:$20 sps:$4 sm:$0xff]   ;;  %960 = vmatprep.mubr.bf16.mxu1 %v1870_v36  ;;  %v1873_v40 = vld [vmem:[%s2194_s26 + $0x28] ss:$20 sps:$4 sm:$0xff]   ;;  %v1880_v46 = vld [vmem:[%s2194_s26 + $0x50] ss:$20 sps:$4 sm:$0xff]  }
  0x28   : > { %1623 = vmatprep.subr.bf16.mxu0 %v1848_v16  ;;  %v1878_v41 = vld [vmem:[%s2194_s26 + $0x54] ss:$20 sps:$4 sm:$0xff]   ;;  %v1888_v45 = vld [vmem:[%s2443_s1 + $0x100] sm:$0xff]   ;;  %v1885_v47 = vld [vmem:[%s2194_s26 + $0x7c] ss:$20 sps:$4 sm:$0xff]  }
  0x29   : > { %1662 = vmatpush3.bf16.msra.mxu1 %v1847_v15  ;;  %v1881_v42 = vld [vmem:[%s2443_s1 + $0x108] sm:$0xff]   ;;  %v1889_v49 = vld [vmem:[%s2194_s26 + $0x84] ss:$20 sps:$4 sm:$0xff]   ;;  %v1891_v52 = vld [vmem:[%s2194_s26 + $0x80] ss:$20 sps:$4 sm:$0xff]  }
  0x2a   : > { %1663 = vmatprep.subr.bf16.mxu1 %v1850_v18  ;;  %v1887_v50 = vld [vmem:[%s2194_s26 + $0x78] ss:$20 sps:$4 sm:$0xff]   ;;  %v1892_v51 = vld [vmem:[%s2194_s26 + $0x10] ss:$20 sps:$4 sm:$0xff]   ;;  %v1894_v54 = vld [vmem:[%s2194_s26 + $0x60] ss:$20 sps:$4 sm:$0xff]  }
  0x2b   : > { %1624 = vmatpush3.bf16.msra.mxu0 %v1849_v17  ;;  %v1893_v53 = vld [vmem:[%s2194_s26 + $0x38] ss:$20 sps:$4 sm:$0xff]   ;;  %v1895_v55 = vld [vmem:[%s2194_s26 + $0x88] ss:$20 sps:$4 sm:$0xff]   ;;  %v1125_v58 = vld [vmem:[%s2428_s5 + $0x30] sm:$0xff]  ;;  %s407_s26 = scalar_lea.vmem [#allocation4], %s2304_s13 }
  0x2c   : > { %1625 = vmatprep.subr.bf16.mxu0 %v1852_v20  ;;  %v1126_v56 = vld [vmem:[%s2428_s5 + $0x38] sm:$0xff]  ;;  %v1124_v59 = vld [vmem:[%s2428_s5 + $0x28] sm:$0xff]  ;;  %v1123_v60 = vld [vmem:[%s2428_s5 + $0x20] sm:$0xff]  ;;  %s1422_s24 = sshll.u32 %s407_s26, 4  ;;  %s1423_s24 = int_to_ptr.vmem [resolvable:$true] %s1422_s24 }
  0x2d   : > { %1664 = vmatpush3.bf16.msra.mxu1 %v1851_v19  ;;  %v1122_v61 = vld [vmem:[%s2428_s5 + $0x18] sm:$0xff]  ;;  %v1121_v62 = vld [vmem:[%s2428_s5 + $0x10] sm:$0xff]  ;;  %v1120_v63 = vld [vmem:[%s2428_s5 + $0x8] sm:$0xff]  ;;  %s1896_s22 = scalar_lea.vmem %s1423_s24, 16  ;;  %p1903_p0 = scmp.lt.s32.totalorder %s1423_s24, %s1901_s25 }
  0x2e   : > { %1665 = vmatprep.subr.bf16.mxu1 %v1854_v22  ;;  %v1119_v0 = vld [vmem:[%s2428_s5] sm:$0xff]  ;;  %v1612_v20 = vld [vmem:[%s419_s15 + $0x8] sm:$0xff]   ;;  %p1897_p11 = scmp.ne.s32.totalorder %s1423_s24, %s1896_s22  ;;  %p1904_p1 = scmp.lt.s32.totalorder %s1902_s29, %s1896_s22 }
  0x2f   : > { %1626 = vmatpush3.bf16.msra.mxu0 %v1853_v21 }
  0x30   : > { %1627 = vmatprep.subr.bf16.mxu0 %v1856_v24  ;;  %p1898_p12 = pnand %p1897_p11, %p2090_p5  ;;  %p1905_p2 = por %p1904_p1, %p1903_p0 }
  0x31   : > { %1666 = vmatpush3.bf16.msra.mxu1 %v1855_v23  ;;  %v1597_v23 = vld [vmem:[%s419_s15] sm:$0xff]  }
  0x32   : > { %1667 = vmatprep.subr.bf16.mxu1 %v1858_v26  ;;  %v1599_v32 = vunpack.c.h.bf16 %v1597_v23  ;;  %p1899_p13 = pneg %p1898_p12 }
  0x33   : > { %1628 = vmatpush3.bf16.msra.mxu0 %v1857_v25  ;;  %v1602_v25 = vunpack.c.l.bf16 %v1612_v20 }
  0x34   : > { %1629 = vmatprep.subr.bf16.mxu0 %v1860_v28  ;;  %p1906_p3 = pnand %p1905_p2, %p1899_p13 }
  0x35   : > { %1668 = vmatpush3.bf16.msra.mxu1 %v1859_v27 }
  0x36   : > { %1669 = vmatprep.subr.bf16.mxu1 %v1862_v30 }
  0x37   : > { %1630 = vmatpush3.bf16.msra.mxu0 %v1861_v29  ;;  %v1598_v29 = vunpack.c.l.bf16 %v1597_v23 }
  0x38   : > { %1724 = vmatprep.subr.bf16.mxu0 %v1867_v34 }
  0x39   : > { %1670 = vmatpush3.bf16.msra.mxu1 %v1866_v33 }
  0x3a   : > { %896 = vmatmul.mubr.bf16.vlgmr.msra.gmra.mxu0 %v1863_v31  ;;  %1740 = vmatprep.subr.mxu1 %v1988_v57 }
  0x3b   : > { %1725 = vmatpush3.bf16.msra.mxu0 %v1867_v34  ;;  %903 = vmatprep.mubr.bf16.mxu0 %v1871_v37  ;;  %v1603_v37 = vunpack.c.h.bf16 %v1612_v20 }
  0x3c   : > { %961 = vmatmul.mubr.bf16.vlgmr.msra.gmra.mxu1 %v1868_v35  ;;  %1726 = vmatprep.subr.bf16.mxu0 %v1874_v38 }
  0x3d   : > { %968 = vmatprep.mubr.bf16.mxu1 %v1875_v39  ;;  %1741 = vmatpush3.msra.mxu1 %v1126_v56 }
  0x3e   : > { %1742 = vmatprep.subr.mxu1 %v1988_v57 }
  0x3f   : > { %1727 = vmatpush3.bf16.msra.mxu0 %v1874_v38  ;;  %1743 = vmatpush3.msra.mxu1 %v1125_v58 }
  0x40   : > { %1728 = vmatprep.subr.bf16.mxu0 %v1881_v42  ;;  %1744 = vmatprep.subr.mxu1 %v1988_v57 }
  0x41   : > { %1745 = vmatpush3.msra.mxu1 %v1124_v59 }
  0x42   : > { %904 = vmatmul.mubr.bf16.gmra.mxu0 %v1873_v40  ;;  %1746 = vmatprep.subr.mxu1 %v1988_v57 }
  0x43   : > { %911 = vmatprep.mubr.bf16.mxu0 %v1878_v41  ;;  %1729 = vmatpush3.bf16.msra.mxu0 %v1881_v42 }
  0x44   : > { %969 = vmatmul.mubr.bf16.gmra.mxu1 %v1877_v43  ;;  %1730 = vmatprep.subr.bf16.mxu0 %v1888_v45  ;;  %v1614_v43 = vld [vmem:[%s419_s15 + $0x18] sm:$0xff]  }
  0x45   : > { %976 = vmatprep.mubr.bf16.mxu1 %v1882_v44  ;;  %1747 = vmatpush3.msra.mxu1 %v1123_v60  ;;  %v1585_v60 = vld [vmem:[%s2426_s3] ss:$0 sm:$0xff] }
  0x46   : > { %1748 = vmatprep.subr.mxu1 %v1988_v57 }
  0x47   : > { %1731 = vmatpush3.bf16.msra.mxu0 %v1888_v45  ;;  %1749 = vmatpush3.msra.mxu1 %v1122_v61 }
  0x48   : > { %1766 = vmatprep.subr.mxu0 %v1988_v57  ;;  %1750 = vmatprep.subr.mxu1 %v1988_v57 }
  0x49   : > { %1751 = vmatpush3.msra.mxu1 %v1121_v62  ;;  %v1611_v62 = vunpack.c.h.bf16 %v1614_v43 }
  0x4a   : > { %912 = vmatmul.mubr.bf16.gmra.mxu0 %v1880_v46  ;;  %1752 = vmatprep.subr.mxu1 %v1988_v57  ;;  %v1613_v46 = vld [vmem:[%s419_s15 + $0x10] sm:$0xff]   ;;  %s1420_s15 = scalar_lea.hbm %s2434_s11, %s2436_s30 }
  0x4b   : > { %919 = vmatprep.mubr.bf16.mxu0 %v1885_v47  ;;  %1753 = vmatpush3.msra.mxu1 %v1120_v63  ;;  %v1606_v56 = vunpack.c.l.bf16 %v1613_v46 }
  0x4c   : > { %977 = vmatmul.mubr.bf16.gmra.mxu1 %v1884_v48  ;;  %1754 = vmatprep.subr.mxu1 %v1988_v57 }
  0x4d   : > { %984 = vmatprep.mubr.bf16.mxu1 %v1889_v49  ;;  %1755 = vmatpush3.msra.mxu1 %v1119_v0 }
  0x4e   : > { %1759 = vmatprep.subr.mxu1 %v1988_v57 }
  0x52   : > { %920 = vmatmul.mubr.bf16.gmra.mxu0 %v1887_v50 }
  0x53   : > { %1732 = vmatprep.mubr.msk.bf16.mxu0 %vm850_vm0, %v1892_v51 }
  0x54   : > { %985 = vmatmul.mubr.bf16.gmra.mxu1 %v1891_v52  ;;  %v1610_v52 = vunpack.c.l.bf16 %v1614_v43 }
  0x55   : > { %1756 = vmatprep.mubr.msk.f32.mxu1 %vm1989_vm1, %v1988_v57 }
  0x5a   : > { %1733 = vmatmul.mubr.msk.bf16.vlgmr.msra.gmra.mxu0 %vm850_vm0, %v1893_v53 }
  0x5b   : > { %1736 = vmatprep.mubr.msk.bf16.mxu0 %vm850_vm0, %v1894_v54 }
  0x62   : > { %1737 = vmatmul.mubr.msk.bf16.gmra.mxu0 %vm850_vm0, %v1895_v55 }
  0x63   : > { %1782 = vmatprep.mubr.msk.f32.mxu0 %vm1989_vm1, %v1988_v57 }
  0xfa   : > { %v1631_v1 = vpop.f32.mrf.mxu0 }
  0xfc   : > { %v1632_v2 = vpop.f32.mrf.mxu0  ;;  %v1671_v3 = vpop.f32.mrf.mxu1 }
  0xfd   : > { %v1633_v30 = vadd.f32 %v1632_v2, %v1631_v1  ;;  %v1607_v1 = vunpack.c.h.bf16 %v1613_v46 }
  0xfe   : > { %v1634_v4 = vpop.f32.mrf.mxu0  ;;  %v1672_v5 = vpop.f32.mrf.mxu1 }
  0xff   : > { %v898_v41 = vadd.f32 %v1633_v30, %v1598_v29  ;;  %v1673_v42 = vadd.f32 %v1672_v5, %v1671_v3 }
 0x100   : > { %v1635_v6 = vpop.f32.mrf.mxu0  ;;  %v1674_v7 = vpop.f32.mrf.mxu1 }
 0x101   : > { %v1636_v33 = vadd.f32 %v1635_v6, %v1634_v4  ;;  %v963_v61 = vadd.f32 %v1673_v42, %v898_v41 }
 0x102   : > { %v1637_v8 = vpop.f32.mrf.mxu0  ;;  %v1675_v9 = vpop.f32.mrf.mxu1 }
 0x103   : > { %v901_v45 = vadd.f32 %v1636_v33, %v1599_v32  ;;  %v1676_v48 = vadd.f32 %v1675_v9, %v1674_v7 }
 0x104   : > { %v1638_v10 = vpop.f32.mrf.mxu0  ;;  %v1677_v11 = vpop.f32.mrf.mxu1 }
 0x105   : > { %v1639_v26 = vadd.f32 %v1638_v10, %v1637_v8  ;;  %v966_v4 = vadd.f32 %v1676_v48, %v901_v45 }
 0x106   : > { %v1640_v12 = vpop.f32.mrf.mxu0  ;;  %v1678_v13 = vpop.f32.mrf.mxu1 }
 0x107   : > { %v906_v35 = vadd.f32 %v1639_v26, %v1602_v25  ;;  %v1679_v36 = vadd.f32 %v1678_v13, %v1677_v11  ;;  %v1586_v13 = vld [vmem:[%s2427_s4] ss:$0 sm:$0xff] }
 0x108   : > { %v1641_v14 = vpop.f32.mrf.mxu0  ;;  %v1680_v15 = vpop.f32.mrf.mxu1 }
 0x109   : > { %v1642_v38 = vadd.f32 %v1641_v14, %v1640_v12  ;;  %v971_v51 = vadd.f32 %v1679_v36, %v906_v35 }
 0x10a   : > { %v1643_v16 = vpop.f32.mrf.mxu0  ;;  %v1681_v17 = vpop.f32.mrf.mxu1 }
 0x10b   : > { %v909_v49 = vadd.f32 %v1642_v38, %v1603_v37  ;;  %v1682_v50 = vadd.f32 %v1681_v17, %v1680_v15 }
 0x10c   : > { %v1644_v18 = vpop.f32.mrf.mxu0  ;;  %v1683_v19 = vpop.f32.mrf.mxu1 }
 0x10d   : > { %v1645_v58 = vadd.f32 %v1644_v18, %v1643_v16  ;;  %v974_v3 = vadd.f32 %v1682_v50, %v909_v49 }
 0x10e   : > { %v1646_v21 = vpop.f32.mrf.mxu0  ;;  %v1684_v22 = vpop.f32.mrf.mxu1 }
 0x10f   : > { %v914_v11 = vadd.f32 %v1645_v58, %v1606_v56  ;;  %v1685_v12 = vadd.f32 %v1684_v22, %v1683_v19 }
 0x110   : > { %v1647_v24 = vpop.f32.mrf.mxu0  ;;  %v1686_v27 = vpop.f32.mrf.mxu1 }
 0x111   : > { %v1648_v5 = vadd.f32 %v1647_v24, %v1646_v21  ;;  %v979_v32 = vadd.f32 %v1685_v12, %v914_v11 }
 0x112   : > { %v1649_v28 = vpop.f32.mrf.mxu0  ;;  %v1687_v31 = vpop.f32.mrf.mxu1 }
 0x113   : > { %v917_v21 = vadd.f32 %v1648_v5, %v1607_v1  ;;  %v1688_v24 = vadd.f32 %v1687_v31, %v1686_v27 }
 0x114   : > { %v1650_v34 = vpop.f32.mrf.mxu0  ;;  %v1689_v39 = vpop.f32.mrf.mxu1 }
 0x115   : > { %v1651_v53 = vadd.f32 %v1650_v34, %v1649_v28 }
 0x116   : > { %v1652_v40 = vpop.f32.mrf.mxu0  ;;  %v1690_v44 = vpop.f32.mrf.mxu1 }
 0x117   : > { %v922_v6 = vadd.f32 %v1651_v53, %v1610_v52  ;;  %v1691_v7 = vadd.f32 %v1690_v44, %v1689_v39 }
 0x118   : > { %v1653_v47 = vpop.f32.mrf.mxu0  ;;  %v1692_v54 = vpop.f32.mrf.mxu1 }
 0x119   : > { %v1654_v63 = vadd.f32 %v1653_v47, %v1652_v40  ;;  %v987_v28 = vadd.f32 %v1691_v7, %v922_v6  ;;  %v982_v40 = vadd.f32 %v1688_v24, %v917_v21 }
 0x11a   : > { %v1734_v55 = vpop.f32.mrf.mxu0  ;;  %v1693_v8 = vpop.f32.mrf.mxu1 }
 0x11b   : > { %v1036_v59 = vadd.f32 %v1734_v55, %v971_v51  ;;  %v925_v16 = vadd.f32 %v1654_v63, %v1611_v62  ;;  %v1694_v18 = vadd.f32 %v1693_v8, %v1692_v54 }
 0x11c   : > { %v1027_v0 = vpop.f32.mrf.mxu0 }
 0x11d   : > { %v1028_v2 = vadd.f32 %v1027_v0, %v963_v61  ;;  %v1068_v9 = vmul.f32 %v1585_v60, %v1036_v59  ;;  %v990_v37 = vadd.f32 %v1694_v18, %v925_v16 }
 0x11e   : > { %v1735_v10 = vpop.f32.mrf.mxu0 }
 0x11f   : > { %v1066_v14 = vmul.f32 %v1585_v60, %v1028_v2  ;;  %v1039_v15 = vadd.f32 %v1735_v10, %v974_v3  ;;  %v1082_v26 = vadd.f32 %v1586_v13, %v1068_v9 }
 0x120   : > { %v1030_v17 = vpop.f32.mrf.mxu0 }
 0x121   : > { %v1080_v20 = vadd.f32 %v1586_v13, %v1066_v14  ;;  %v1069_v23 = vmul.f32 %v1585_v60, %v1039_v15  ;;  %v1031_v25 = vadd.f32 %v1030_v17, %v966_v4  ;;  %v1090_v38 = vmax.f32 %v1082_v26, 0.0  ;;  %v1127_v15 = vld [vmem:[%s2430_s7] sm:$0x1] }
 0x122   : > { %v1738_v29 = vpop.f32.mrf.mxu0 }
 0x123   : > { %v1067_v30 = vmul.f32 %v1585_v60, %v1031_v25  ;;  %v1088_v19 = vmax.f32 %v1080_v20, 0.0  ;;  %v1083_v22 = vadd.f32 %v1586_v13, %v1069_v23  ;;  %v1052_v33 = vadd.f32 %v1738_v29, %v987_v28 }
 0x124   : > { %v1043_v34 = vpop.f32.mrf.mxu0  ;;  %v1099_v51 = vsel %vm850_vm0, %v1090_v38, 0.0  ;;  %v1201_v23 = vlaneseq  ;;  %v1312_v38 = vld [vmem:[%s2431_s8 + $0x20] sm:$0xff] }
 0x125   : > { %v1081_v35 = vadd.f32 %v1586_v13, %v1067_v30  ;;  %v1044_v36 = vadd.f32 %v1043_v34, %v979_v32  ;;  %v1072_v42 = vmul.f32 %v1585_v60, %v1052_v33  ;;  %v1096_v27 = vsel %vm850_vm0, %v1088_v19, 0.0  ;;  %v1228_v33 = vld [vmem:[%s2429_s6 + $0x8] sm:$0x3]  ;;  %v1227_v34 = vld [vmem:[%s2429_s6] sm:$0xff] }
 0x126   : > { %v1739_v39 = vpop.f32.mrf.mxu0  ;;  %v1091_v31 = vmax.f32 %v1083_v22, 0.0  ;;  %v1202_v25 = vand.u32 127, %v1201_v23 }
 0x127   : > { %v1089_v41 = vmax.f32 %v1081_v35, 0.0  ;;  %v1070_v43 = vmul.f32 %v1585_v60, %v1044_v36  ;;  %v1055_v44 = vadd.f32 %v1739_v39, %v990_v37  ;;  %v1086_v52 = vadd.f32 %v1586_v13, %v1072_v42  ;;  %v1315_v35 = vld [vmem:[%s2431_s8 + $0x38] sm:$0xff]  ;;  %v1314_v36 = vld [vmem:[%s2431_s8 + $0x30] sm:$0xff]  ;;  %v1313_v37 = vld [vmem:[%s2431_s8 + $0x28] sm:$0xff] }
 0x128   : > { %v1046_v45 = vpop.f32.mrf.mxu0  ;;  %v1101_v56 = vsel %vm850_vm0, %v1091_v31, 0.0  ;;  %1767 = vmatpush3.msra.mxu0 %v1315_v35  ;;  %v1311_v39 = vld [vmem:[%s2431_s8 + $0x18] sm:$0xff] }
 0x129   : > { %v1097_v46 = vsel %vm850_vm0, %v1089_v41, 0.0  ;;  %v1084_v47 = vadd.f32 %v1586_v13, %v1070_v43  ;;  %v1073_v48 = vmul.f32 %v1585_v60, %v1055_v44  ;;  %v1047_v49 = vadd.f32 %v1046_v45, %v982_v40  ;;  %1768 = vmatprep.subr.mxu0 %v1988_v57  ;;  %v1310_v40 = vld [vmem:[%s2431_s8 + $0x10] sm:$0xff]  ;;  %v1309_v45 = vld [vmem:[%s2431_s8 + $0x8] sm:$0xff] }
 0x12a   : > { %v1098_v50 = vadd.f32 %v1097_v46, %v1096_v27  ;;  %v1094_v62 = vmax.f32 %v1086_v52, 0.0  ;;  %1769 = vmatpush3.msra.mxu0 %v1314_v36  ;;  %v1308_v46 = vld [vmem:[%s2431_s8] sm:$0xff] }
 0x12b   : > { %v1092_v53 = vmax.f32 %v1084_v47, 0.0  ;;  %v1071_v54 = vmul.f32 %v1585_v60, %v1047_v49  ;;  %v1087_v58 = vadd.f32 %v1586_v13, %v1073_v48  ;;  %1770 = vmatprep.subr.mxu0 %v1988_v57 }
 0x12c   : > { %v1100_v55 = vadd.f32 %v1099_v51, %v1098_v50  ;;  %v1107_v5 = vsel %vm850_vm0, %v1094_v62, 0.0  ;;  %1771 = vmatpush3.msra.mxu0 %v1313_v37 }
 0x12d   : > { %v1085_v59 = vadd.f32 %v1586_v13, %v1071_v54  ;;  %v1103_v63 = vsel %vm850_vm0, %v1092_v53, 0.0  ;;  %v1095_v2 = vmax.f32 %v1087_v58, 0.0  ;;  %1772 = vmatprep.subr.mxu0 %v1988_v57 }
 0x12e   : > { %v1102_v61 = vadd.f32 %v1101_v56, %v1100_v55  ;;  %1773 = vmatpush3.msra.mxu0 %v1312_v38 }
 0x12f   : > { %v1093_v0 = vmax.f32 %v1085_v59, 0.0  ;;  %v1109_v60 = vsel %vm850_vm0, %v1095_v2, 0.0  ;;  %1774 = vmatprep.subr.mxu0 %v1988_v57 }
 0x130   : > { %v1104_v1 = vadd.f32 %v1103_v63, %v1102_v61  ;;  %1775 = vmatpush3.msra.mxu0 %v1311_v39 }
 0x131   : > { %v1105_v3 = vsel %vm850_vm0, %v1093_v0, 0.0  ;;  %1776 = vmatprep.subr.mxu0 %v1988_v57 }
 0x132   : > { %v1106_v4 = vadd.f32 %v1105_v3, %v1104_v1  ;;  %1777 = vmatpush3.msra.mxu0 %v1310_v40 }
 0x133   : > { %1778 = vmatprep.subr.mxu0 %v1988_v57 }
 0x134   : > { %v1108_v6 = vadd.f32 %v1107_v5, %v1106_v4  ;;  %1779 = vmatpush3.msra.mxu0 %v1309_v45 }
 0x135   : > { %1780 = vmatprep.subr.mxu0 %v1988_v57 }
 0x136   : > { %v1110_v7 = vadd.f32 %v1109_v60, %v1108_v6  ;;  %1781 = vmatpush3.msra.mxu0 %v1308_v46 }
 0x138   : > { %v1111_v8 = vrot.slane %v1110_v7, 4 }
 0x13a   : > { %v1112_v9 = vadd.f32 %v1111_v8, %v1110_v7 }
 0x13c   : > { %v1113_v10 = vrot.slane %v1112_v9, 2 }
 0x13e   : > { %v1114_v11 = vadd.f32 %v1113_v10, %v1112_v9 }
 0x140   : > { %v1115_v12 = vrot.slane %v1114_v11, 1 }
 0x142   : > { %v1116_v13 = vadd.f32 %v1115_v12, %v1114_v11 }
 0x144   : > { %v2297_v14 = vmul.f32 0.015625, %v1116_v13 }
 0x146   : > { %1757 = vmatmul.mubr.msk.f32.vlgmr.msra.gmra.mxu1 %vm850_vm0, %v2297_v14 }
 0x147   : > { %1763 = vmatprep.mubr.msk.f32.mxu1 %vm1989_vm1, %v1988_v57  ;;  %1760 = vmatpush3.msk.msra.mxu1 %vm1233_vm5, %v1228_v33 }
 0x148   : > { %1761 = vmatprep.subr.mxu1 %v1988_v57 }
 0x149   : > { %1762 = vmatpush3.msra.mxu1 %v1227_v34 }
 0x206   : > { %v1197_v16 = vpop.f32.mrf.mxu1 }
 0x207   : > { %v1198_v17 = vadd.f32 %v1197_v16, %v1127_v15 }
 0x208   : > { %v1758_v18 = vpop.f32.mrf.mxu1 }
 0x209   : > { %v1204_v20 = vsel %vm1203_vm2, %v1198_v17, -inf  ;;  %1391 = vst.msk [vmem:[%s407_s26] sm:$0x1] %vm1203_vm2, %v1198_v17 }
 0x20a   : > { %1205 = vmax.xlane.f32.xlu0 %v1204_v20 }
 0x293   : > { %v1206_v21 = vpop.xlane.xlu0 %1205 }
 0x294   : > { %vm1207_vm3 = vcmp.ge.f32.partialorder %v1198_v17, %v1206_v21 }
 0x295   : > { %v1208_v24 = vsel %vm1207_vm3, %v1202_v25, 10 }
 0x296   : > { %v1209_v26 = vsel %vm1203_vm2, %v1208_v24, 2147483647 }
 0x297   : > { %v1211_v28 = vshra.s32 %v1209_v26, 16  ;;  %v1210_v30 = vand.u32 65535, %v1209_v26 }
 0x299   : > { %v1213_v29 = vcvt.s32.f32 %v1211_v28  ;;  %v1212_v19 = vcvt.s32.f32 %v1210_v30 }
 0x29b   : > { %1214 = vmin.xlane.f32.xlu0 %v1213_v29 }
 0x324   : > { %v1215_v32 = vpop.xlane.xlu0 %1214 }
 0x325   : > { %vm1216_vm4 = vcmp.eq.f32.partialorder %v1213_v29, %v1215_v32  ;;  %v1221_v41 = vcvt.f32.s32 %v1215_v32 }
 0x326   : > { %v1217_v22 = vsel %vm1216_vm4, %v1212_v19, inf }
 0x327   : > { %1218 = vmin.xlane.f32.xlu1 %v1217_v22  ;;  %v1222_v43 = vshll.u32 %v1221_v41, 16 }
 0x3b0   : > { %v1219_v42 = vpop.xlane.xlu1 %1218 }
 0x3b1   : > { %v1220_v44 = vcvt.f32.s32 %v1219_v42 }
 0x3b3   : > { %v1223_v27 = vadd.s32 %v1222_v43, %v1220_v44 }
 0x3b5   : > { %vm1224_vm7 = vcmp.eq.s32.totalorder %v1202_v25, %v1223_v27 }
 0x3b6   : > { %v1588_v31 = vsel %vm1224_vm7, 1.0, %v1988_v57 }
 0x3b7   : > { %1764 = vmatmul.mubr.msk.f32.vlgmr.msra.gmra.mxu1 %vm1229_vm6, %v1588_v31 }
 0x477   : > { %v1303_v47 = vpop.f32.mrf.mxu1 }
 0x478   : > { %v1307_v48 = vmul.f32 %v1303_v47, %v2297_v14 }
 0x479   : > { %v1765_v49 = vpop.f32.mrf.mxu1 }
 0x47a   : > { %1783 = vmatmul.mubr.msk.f32.vlgmr.msra.gmra.mxu0 %vm850_vm0, %v1307_v48 }
 0x47b   : > { %1909 = shalt.err (!%p1906_p3)
}
 0x47c   : > { %s1910_s12 = scalar_lea.hbm %s1420_s15, 16  ;;  %s1914_s30 = scalar_lea.hbm %s2434_s11, 32 }
 0x47d   : > { %p1911_p4 = scmp.ne.s32.totalorder %s1420_s15, %s1910_s12  ;;  %p1915_p9 = scmp.lt.s32.totalorder %s1420_s15, %s2434_s11 }
 0x47e   : > { %p1916_p10 = scmp.lt.s32.totalorder %s1914_s30, %s1910_s12 }
 0x47f   : > { %p1912_p7 = pnand %p1911_p4, %p2090_p5 }
 0x480   : > { %p1917_p11 = por %p1916_p10, %p1915_p9 }
 0x481   : > { %p1913_p8 = pneg %p1912_p7 }
 0x483   : > { %p1918_p12 = pnand %p1917_p11, %p1913_p8 }
 0x485   : > { %1921 = shalt.err (!%p1918_p12)
}
 0x486   : > { %1787 = dma.vmem_to_hbm [thread:$0]  (%p2090_p5), %s1423_s24, 16, %s1420_s15, %s1397_s16   ;;  %v1316_v57 = vld [vmem:[%s2432_s9] sm:$0x1] }
 0x487   : > { %s401_s25 = scalar_lea.vmem [#allocation2], %s2304_s13  ;;  %s2445_s0 = sshll.u32 %s2073_s21, 4 }
 0x488   : > { %s1409_s29 = sshll.u32 %s401_s25, 4  ;;  %s2386_s12 = scalar_lea.hbm %s2433_s10, %s2445_s0  ;;  %s1410_s29 = int_to_ptr.vmem [resolvable:$true] %s1409_s29 }
 0x489   : > { %s1393_s26 = scalar_lea.sflag [#allocation3], %s2304_s13  ;;  %s1922_s15 = scalar_lea.vmem %s1410_s29, 16 }
 0x48a   : > { %p1923_p13 = scmp.ne.s32.totalorder %s1410_s29, %s1922_s15  ;;  %s1991_s24 = smov [#allocation2]  }
 0x48b   : > { %s1926_s16 = sshll.u32 %s1991_s24, 4  ;;  %s1927_s16 = int_to_ptr.vmem [resolvable:$false] %s1926_s16 }
 0x48c   : > { %p1924_p0 = pnand %p1923_p13, %p2090_p5  ;;  %s1928_s14 = scalar_lea.vmem %s1927_s16, 32 }
 0x48d   : > { %p1929_p2 = scmp.lt.s32.totalorder %s1410_s29, %s1927_s16  ;;  %p1930_p3 = scmp.lt.s32.totalorder %s1928_s14, %s1922_s15 }
 0x48e   : > { %p1925_p1 = pneg %p1924_p0 }
 0x48f   : > { %p1931_p4 = por %p1930_p3, %p1929_p2 }
 0x491   : > { %p1932_p7 = pnand %p1931_p4, %p1925_p1 }
 0x53a   : > { %v1386_v50 = vpop.f32.mrf.mxu0 }
 0x53b   : > { %v1387_v51 = vadd.f32 %v1386_v50, %v1316_v57 }
 0x53c   : > { %v1784_v52 = vpop.f32.mrf.mxu0 }
 0x53d   : > { %1390 = vst.msk [vmem:[%s401_s25] sm:$0x1] %vm1203_vm2, %v1387_v51 }
 0x53e   : > { %1935 = shalt.err (!%p1932_p7)
}
 0x53f   : > { %s1936_s21 = scalar_lea.hbm %s2386_s12, 16  ;;  %s1940_s19 = scalar_lea.hbm %s2433_s10, 32 }
 0x540   : > { %p1937_p8 = scmp.ne.s32.totalorder %s2386_s12, %s1936_s21  ;;  %p1941_p11 = scmp.lt.s32.totalorder %s2386_s12, %s2433_s10 }
 0x541   : > { %p1942_p12 = scmp.lt.s32.totalorder %s1940_s19, %s1936_s21 }
 0x542   : > { %p1938_p9 = pnand %p1937_p8, %p2090_p5 }
 0x543   : > { %p1943_p13 = por %p1942_p12, %p1941_p11 }
 0x544   : > { %p1939_p10 = pneg %p1938_p9 }
 0x546   : > { %p1944_p0 = pnand %p1943_p13, %p1939_p10 }
 0x548   : > { %1947 = shalt.err (!%p1944_p0)
}
 0x549   : > { %1786 = dma.vmem_to_hbm [thread:$0]  (%p2090_p5), %s1410_s29, 16, %s2386_s12, %s1393_s26  }
 0x54a PF: > { %p1797_p1 = scmp.ge.s32.totalorder %s1986_s20, 2  ;;  %s1434_s1 = sand.u32 1, %s1974_s17  }
 0x54b   : > { %s1435_s30 = scalar_lea.sflag [#allocation3], %s1434_s1 }
 0x54c   : > { %p1791_p2 = pnand %p1797_p1, %p2094_p6 }
 0x54e   : > { %p1792_p3 = pneg %p1791_p2 }
 0x550   : > { %1965 = dma.done.wait (%p1792_p3), %s1435_s30, 16  }
 0x551   : > { %1967 = vsyncadd (%p1792_p3), %s1435_s30, 4294967280  ;;  %s1443_s15 = scalar_lea.sflag [#allocation5], %s1434_s1 }
 0x552   : > { %1969 = dma.done.wait (%p1792_p3), %s1443_s15, 16  }
 0x553   : > { %1971 = vsyncadd (%p1792_p3), %s1443_s15, 4294967280  ;;  %s2446_s27 = sld [smem:[#allocation8_spill]]  ;;  %p25_p5 = scmp.ge.s32.totalorder %s2077_s23, 4  }
 0x554   : > { %s2447_s19 = sld [smem:[#allocation9_spill]]  ;;  %s2448_s17 = smov %s1978_s18 }
 0x555   : > { %s2450_s20 = smov %s2077_s23  ;;  %27 = sbr.rel (!%p25_p5) target bundleno = 8 (0x8), region = 115 }
 0x559   : > { %s2449_s18 = smov %s2446_s27 }
 0x55a   :  { %1447 = vsyncpa [#allocation3], 1 }
 0x55b   :  { %1449 = vsyncpa [#allocation3 + $0x1], 1 }
 0x55c   :  { %1450 = vsyncpa [#allocation5], 1 }
 0x55d   :  { %1452 = vsyncpa [#allocation5 + $0x1], 1 }

</bundles_post_ra>
